<compile_context>
chip_gen: v7x
topology: tpu7x:2x2x1
jax: 0.10.0
libtpu: 0.0.40
codegen_flags: <defaults>
</compile_context>

<pallas_src>
import functools

import jax
import jax.numpy as jnp
from jax.experimental import pallas as pl
from jax.experimental.pallas import tpu as pltpu


_VMEM_LIMIT = 48 * 1024 * 1024   # <= v7x 64 MiB physical VMEM, > 32 MiB default


def _round_up(n, m):
    return ((n + m - 1) // m) * m


# ----------------------------------------------------------------------------
# Kernel 1: Conditional Position Encoding — depthwise 7x7 conv + bias + residual
# ----------------------------------------------------------------------------
def dwconv_cpe_kernel(xpad_ref, w_ref, b_ref, out_ref):
    # xpad_ref: (1, H+6, W+6, C), w_ref: (7, 7, C) (residual folded into w[3,3]),
    # b_ref: (1, C), out_ref: (1, H, W, C)
    H, W, C = out_ref.shape[1], out_ref.shape[2], out_ref.shape[3]
    xp = xpad_ref[0].astype(jnp.float32)            # (H+6, W+6, C)
    w = w_ref[...].astype(jnp.float32)              # (7, 7, C)
    b = b_ref[...].astype(jnp.float32)              # (1, C)

    acc = jnp.zeros((H, W, C), jnp.float32)
    # Hoist the sublane (W) shift out of the row loop: 7 column-shifted views,
    # then only cheap leading-dim (H) slices in the inner loop.
    for kw in range(7):
        cols = xp[:, kw:kw + W, :]                  # (H+6, W, C)
        for kh in range(7):
            acc = acc + cols[kh:kh + H] * w[kh, kw][None, None, :]
    out_ref[0] = (acc + b).astype(out_ref.dtype)    # pe(x) + x (+x is in w[3,3])


def cpe_forward(x, w, b):
    # x: (B, H, W, C) channel-last; w: (7, 7, C); b: (C,)
    B, H, W, C = x.shape
    xpad = jnp.pad(x, ((0, 0), (3, 3), (3, 3), (0, 0)))
    w_res = w.at[3, 3].add(1.0)       # fold "+ x" residual into the center tap
    # TODO(synk): for v7x at large H*W, tile over H with a 6-row halo.
    return pl.pallas_call(
        dwconv_cpe_kernel,
        out_shape=jax.ShapeDtypeStruct((B, H, W, C), x.dtype),
        grid=(B,),
        in_specs=[
            pl.BlockSpec((1, H + 6, W + 6, C), lambda i: (i, 0, 0, 0)),
            pl.BlockSpec((7, 7, C), lambda i: (0, 0, 0)),
            pl.BlockSpec((1, C), lambda i: (0, 0)),
        ],
        out_specs=pl.BlockSpec((1, H, W, C), lambda i: (i, 0, 0, 0)),
        compiler_params=pltpu.CompilerParams(
            dimension_semantics=("parallel",),
            vmem_limit_bytes=_VMEM_LIMIT),
    )(xpad, w_res, b.reshape(1, C))


# ----------------------------------------------------------------------------
# Kernel 2: 1x1 conv (matmul, bf16 MXU) + folded BatchNorm (+ residual)
#           BN scale is pre-folded into the weight columns; tiled over tokens.
# ----------------------------------------------------------------------------
def make_linear_kernel(has_res):
    def kernel(*refs):
        if has_res:
            x_ref, w_ref, t_ref, r_ref, o_ref = refs
        else:
            x_ref, w_ref, t_ref, o_ref = refs
        y = jnp.dot(x_ref[...].astype(jnp.bfloat16), w_ref[...],
                    preferred_element_type=jnp.float32)
        y = y + t_ref[...]                                    # f32 epilogue
        if has_res:
            y = y + r_ref[...].astype(jnp.float32)
        o_ref[...] = y.astype(o_ref.dtype)
    return kernel


def linear_bn(x, w, scale, shift, residual=None, tm=256):
    # x: (M, K) f32; w: (K, Nout) f32; scale/shift: (1, Nout) f32
    M, K = x.shape
    Nout = w.shape[1]
    w_f = (w * scale).astype(jnp.bfloat16)      # fold BN scale into weight cols

    TM = min(tm, _round_up(M, 8))
    Mp = _round_up(M, TM)
    if Mp != M:
        x = jnp.pad(x, ((0, Mp - M), (0, 0)))
        if residual is not None:
            residual = jnp.pad(residual, ((0, Mp - M), (0, 0)))

    inputs = [x, w_f, shift]
    in_specs = [
        pl.BlockSpec((TM, K), lambda i: (i, 0)),
        pl.BlockSpec((K, Nout), lambda i: (0, 0)),
        pl.BlockSpec((1, Nout), lambda i: (0, 0)),
    ]
    if residual is not None:
        inputs.append(residual)
        in_specs.append(pl.BlockSpec((TM, Nout), lambda i: (i, 0)))

    out = pl.pallas_call(
        make_linear_kernel(residual is not None),
        out_shape=jax.ShapeDtypeStruct((Mp, Nout), x.dtype),
        grid=(Mp // TM,),
        in_specs=in_specs,
        out_specs=pl.BlockSpec((TM, Nout), lambda i: (i, 0)),
        compiler_params=pltpu.CompilerParams(
            dimension_semantics=("parallel",),
            vmem_limit_bytes=_VMEM_LIMIT),
    )(*inputs)
    return out[:M]


# ----------------------------------------------------------------------------
# Kernel 3 (fused): within-cluster kNN + max-relative aggregation + MRConv
#                   linear (2C->Cout, BN scale folded) + shift + GELU.
#                   Tiled over query rows; keys stay resident per batch element.
# ----------------------------------------------------------------------------
def make_graph_gc_kernel(k):
    NEG = -1e30   # python literal -> jaxpr literal (NOT a captured tracer)

    def kernel(xk_ref, xq_ref, labk_ref, labq_ref, wt_ref, wb_ref, t_ref, o_ref):
        xk = xk_ref[0].astype(jnp.float32)           # (N, C)  all keys
        xq = xq_ref[0].astype(jnp.float32)           # (TQ, C) query tile
        N = xk.shape[0]
        TQ = xq.shape[0]

        # L2-normalize for edge construction (normalize_for_edges=True);
        # nearest-by-L2 on unit vectors == max cosine similarity.
        def l2n(v):
            ss = jnp.sum(v * v, axis=-1, keepdims=True)
            return v * jax.lax.rsqrt(jnp.maximum(ss, 1e-24))

        xkn = l2n(xk).astype(jnp.bfloat16)
        xqn = l2n(xq).astype(jnp.bfloat16)

        # cosine similarity on the MXU (bf16 operands, f32 accumulation)
        sim = jax.lax.dot_general(xqn, xkn, (((1,), (1,)), ((), ())),
                                  preferred_element_type=jnp.float32)   # (TQ, N)

        # restrict candidates to the same KMeans cluster (same graph via grid)
        same = labq_ref[0] == labk_ref[0]            # (TQ,1)==(1,N) -> (TQ,N)
        sim = jnp.where(same, sim, NEG)

        col = jax.lax.broadcasted_iota(jnp.int32, (TQ, N), 1)

        # iterative top-k selection; gather deferred to one stacked matmul
        onehots, bests = [], []
        for _ in range(k):
            best = jnp.max(sim, axis=-1, keepdims=True)                 # (TQ,1)
            # first-occurrence argmax without lax.argmax: min column at the max
            idx = jnp.min(jnp.where(sim >= best, col, N),
                          axis=-1, keepdims=True)                        # (TQ,1)
            oh = (col == idx).astype(jnp.float32)                        # (TQ,N)
            onehots.append(oh)
            bests.append(best)
            sim = jnp.where(oh > 0, NEG, sim)        # drop selected candidate

        oh_all = jnp.concatenate(onehots, axis=0)    # (k*TQ, N)
        best_all = jnp.concatenate(bests, axis=0)    # (k*TQ, 1)
        gathered = jnp.dot(oh_all, xk,
                           preferred_element_type=jnp.float32)           # (k*TQ,C)
        gathered = jnp.where(best_all > -1e29, gathered, NEG)  # cluster exhausted

        nbr_max = gathered[0:TQ]
        for i in range(1, k):
            nbr_max = jnp.maximum(nbr_max, gathered[i * TQ:(i + 1) * TQ])

        # fused MRConv: cat([x, max_j(x_j) - x_i]) @ W == x@W_top + rel@W_bot
        rel = (nbr_max - xq).astype(jnp.bfloat16)
        y = (jnp.dot(xq.astype(jnp.bfloat16), wt_ref[...],
                     preferred_element_type=jnp.float32)
             + jnp.dot(rel, wb_ref[...], preferred_element_type=jnp.float32))
        y = y + t_ref[...]                                    # folded BN shift
        # tanh-approx GELU (f32 epilogue)
        y = 0.5 * y * (1.0 + jnp.tanh(0.7978845608028654 *
                                      (y + 0.044715 * y * y * y)))
        o_ref[0] = y.astype(o_ref.dtype)

    return kernel


def graph_gc(feats, labels, w_top, w_bot, shift, k, tq=128):
    # feats: (B, N, C) f32; labels: (B, N) int32
    # w_top/w_bot: (C, Cout) bf16 (BN scale pre-folded); shift: (1, Cout) f32
    B, N, C = feats.shape
    Cout = w_top.shape[1]
    TQ = min(tq, _round_up(N, 8))
    Np = _round_up(N, TQ)
    if Np != N:
        feats = jnp.pad(feats, ((0, 0), (0, Np - N), (0, 0)))
        labels = jnp.pad(labels, ((0, 0), (0, Np - N)), constant_values=-1)
    labk = labels.reshape(B, 1, Np).astype(jnp.int32)
    labq = labels.reshape(B, Np, 1).astype(jnp.int32)

    out = pl.pallas_call(
        make_graph_gc_kernel(k),
        out_shape=jax.ShapeDtypeStruct((B, Np, Cout), feats.dtype),
        grid=(B, Np // TQ),
        in_specs=[
            pl.BlockSpec((1, Np, C), lambda b, q: (b, 0, 0)),   # keys (resident)
            pl.BlockSpec((1, TQ, C), lambda b, q: (b, q, 0)),   # query tile
            pl.BlockSpec((1, 1, Np), lambda b, q: (b, 0, 0)),   # key labels
            pl.BlockSpec((1, TQ, 1), lambda b, q: (b, q, 0)),   # query labels
            pl.BlockSpec((C, Cout), lambda b, q: (0, 0)),       # W_top (bf16)
            pl.BlockSpec((C, Cout), lambda b, q: (0, 0)),       # W_bot (bf16)
            pl.BlockSpec((1, Cout), lambda b, q: (0, 0)),       # BN shift
        ],
        out_specs=pl.BlockSpec((1, TQ, Cout), lambda b, q: (b, q, 0)),
        compiler_params=pltpu.CompilerParams(
            dimension_semantics=("parallel", "parallel"),
            vmem_limit_bytes=_VMEM_LIMIT),
    )(feats, feats, labk, labq, w_top, w_bot, shift)
    return out[:, :N, :]


# ----------------------------------------------------------------------------
# Glue: deterministic KMeans label assignment (Lloyd, matmul-form distances)
# ----------------------------------------------------------------------------
def kmeans_labels(x, n_clusters, iters=10):
    # x: (B, N, C) -> labels (B, N) int32
    def one(xb):
        xn = xb / jnp.maximum(jnp.linalg.norm(xb, axis=-1, keepdims=True), 1e-12)
        centers0 = xn[:n_clusters]

        def assign(c):
            # ||x - c||^2 = ||x||^2 + ||c||^2 - 2 x.c ; ||x||^2 is per-row const
            d = jnp.sum(c * c, axis=-1)[None, :] - 2.0 * (xn @ c.T)   # (N, K)
            return jnp.argmin(d, axis=-1)

        def step(c, _):
            lab = assign(c)
            onehot = jax.nn.one_hot(lab, n_clusters, dtype=xn.dtype)  # (N, K)
            counts = onehot.sum(0)
            sums = onehot.T @ xn
            newc = jnp.where(counts[:, None] > 0,
                             sums / jnp.maximum(counts[:, None], 1.0), c)
            return newc, None

        centers, _ = jax.lax.scan(step, centers0, None, length=iters)
        return assign(centers).astype(jnp.int32)

    return jax.vmap(one)(x)


def fold_bn(bias, gamma, beta, mean, var, eps=1e-5):
    s = gamma / jnp.sqrt(var + eps)
    t = (bias - mean) * s + beta
    return s.reshape(1, -1), t.reshape(1, -1)


# ----------------------------------------------------------------------------
# Grapher forward (eval mode)
# ----------------------------------------------------------------------------
def grapher_forward(x_nchw, params, *, clusters, neighbors):
    B, C, H, W = x_nchw.shape
    x = jnp.transpose(x_nchw, (0, 2, 3, 1))              # (B, H, W, C)
    tmp = x                                               # residual (original x)

    # cpe: depthwise 7x7 conv + bias + residual (residual folded into weights)
    x = cpe_forward(x, params["cpe_w"], params["cpe_b"])

    # fc1: 1x1 conv + BatchNorm (scale folded into W, bf16 matmul)
    tokens = x.reshape(B * H * W, C)
    s1, t1 = fold_bn(params["fc1_b"], params["fc1_g"], params["fc1_be"],
                     params["fc1_m"], params["fc1_v"])
    h = linear_bn(tokens, params["fc1_w"], s1, t1)                    # (B*N, C)

    # graphconv: KMeans clusters -> within-cluster kNN -> MRConv, fused with the
    # 2C->Cout linear + BN + GELU (no materialized concat / agg round trip).
    feats = h.reshape(B, H * W, C)
    labels = kmeans_labels(feats, clusters)
    sg, tg = fold_bn(params["gc_b"], params["gc_g"], params["gc_be"],
                     params["gc_m"], params["gc_v"])
    gc_wf = (params["gc_w"] * sg).astype(jnp.bfloat16)                # (2C, Cout)
    w_top, w_bot = gc_wf[:C], gc_wf[C:]
    g = graph_gc(feats, labels, w_top, w_bot, tg, neighbors)          # (B, N, Cout)
    Cout = g.shape[-1]

    # fc2: 1x1 conv + BatchNorm, drop_path=Identity, + residual (fused)
    s2, t2 = fold_bn(params["fc2_b"], params["fc2_g"], params["fc2_be"],
                     params["fc2_m"], params["fc2_v"])
    out = linear_bn(g.reshape(B * H * W, Cout), params["fc2_w"], s2, t2,
                    residual=tmp.reshape(B * H * W, C))               # (B*N, C)

    out = out.reshape(B, H, W, C)
    return jnp.transpose(out, (0, 3, 1, 2))                           # NCHW


# ----------------------------------------------------------------------------
# Deterministic parameter init (synthetic — shapes follow Grapher.__init__)
# ----------------------------------------------------------------------------
def init_params(key, c_in, c_out):
    ks = jax.random.split(key, 20)
    nrm = lambda k, s, sc=0.1: sc * jax.random.normal(k, s, jnp.float32)
    uni = lambda k, s: jax.random.uniform(k, s, jnp.float32, 0.5, 1.5)
    p = {
        # ConditionalPositionEncoding: depthwise Conv2d(C, C, 7, groups=C) + bias
        "cpe_w": nrm(ks[0], (7, 7, c_in)),
        "cpe_b": nrm(ks[1], (c_in,), 0.05),
        # fc1: Conv2d(C, C, 1) + BatchNorm2d(C)
        "fc1_w": nrm(ks[2], (c_in, c_in)), "fc1_b": nrm(ks[3], (c_in,), 0.05),
        "fc1_g": uni(ks[4], (c_in,)), "fc1_be": nrm(ks[5], (c_in,), 0.05),
        "fc1_m": nrm(ks[6], (c_in,), 0.05), "fc1_v": uni(ks[7], (c_in,)),
        # vertex graph conv (MRConv): Linear(2C -> C_out) + BatchNorm + GELU
        "gc_w": nrm(ks[8], (2 * c_in, c_out)), "gc_b": nrm(ks[9], (c_out,), 0.05),
        "gc_g": uni(ks[10], (c_out,)), "gc_be": nrm(ks[11], (c_out,), 0.05),
        "gc_m": nrm(ks[12], (c_out,), 0.05), "gc_v": uni(ks[13], (c_out,)),
        # fc2: Conv2d(C_out, C, 1) + BatchNorm2d(C)
        "fc2_w": nrm(ks[14], (c_out, c_in)), "fc2_b": nrm(ks[15], (c_in,), 0.05),
        "fc2_g": uni(ks[16], (c_in,)), "fc2_be": nrm(ks[17], (c_in,), 0.05),
        "fc2_m": nrm(ks[18], (c_in,), 0.05), "fc2_v": uni(ks[19], (c_in,)),
    }
    return p


if __name__ == "__main__":
    B, C_in, H, W = 2, 16, 8, 8
    C_out = 32
    clusters = 4
    neighbors = 4

    key = jax.random.PRNGKey(0)
    kx, kp = jax.random.split(key)
    x = jax.random.normal(kx, (B, C_in, H, W), jnp.float32)
    params = init_params(kp, C_in, C_out)

    fwd = jax.jit(functools.partial(grapher_forward, clusters=clusters,
                                    neighbors=neighbors))
    y = fwd(x, params)
    jax.block_until_ready(y)
    assert y.shape == (B, C_in, H, W), y.shape
    assert bool(jnp.all(jnp.isfinite(y)))
    print("KERNEL_OK")
</pallas_src>

<mosaic_0001>
module attributes {stable_mosaic.version = 11 : i64} {
  func.func @dwconv_cpe_kernel(%arg0: i32, %arg1: memref<1x14x14x16xf32, #tpu.memory_space<vmem>>, %arg2: memref<7x7x16xf32, #tpu.memory_space<vmem>>, %arg3: memref<1x16xf32, #tpu.memory_space<vmem>>, %arg4: memref<1x8x8x16xf32, #tpu.memory_space<vmem>>) attributes {dimension_semantics = [#tpu.dimension_semantics<parallel>], iteration_bounds = array<i64: 2>, scalar_prefetch = 0 : i64, scratch_operands = 0 : i64, tpu.core_type = #tpu.core_type<tc>, window_params = [{transform_indices = @transform_0, window_bounds = array<i64: 1, 14, 14, 16>}, {pipeline_mode = #tpu.pipeline_mode<synchronous>, transform_indices = @transform_1, window_bounds = array<i64: 7, 7, 16>}, {pipeline_mode = #tpu.pipeline_mode<synchronous>, transform_indices = @transform_2, window_bounds = array<i64: 1, 16>}, {transform_indices = @transform_3, window_bounds = array<i64: 1, 8, 8, 16>}]} {
    %c0 = arith.constant 0 : index
    %c0_0 = arith.constant 0 : index
    %c0_1 = arith.constant 0 : index
    %c0_2 = arith.constant 0 : index
    %0 = vector.load %arg1[%c0, %c0_0, %c0_1, %c0_2] : memref<1x14x14x16xf32, #tpu.memory_space<vmem>>, vector<1x14x14x16xf32>
    %1 = vector.shape_cast %0 : vector<1x14x14x16xf32> to vector<14x14x16xf32>
    %c0_3 = arith.constant 0 : index
    %c0_4 = arith.constant 0 : index
    %c0_5 = arith.constant 0 : index
    %2 = vector.load %arg2[%c0_3, %c0_4, %c0_5] : memref<7x7x16xf32, #tpu.memory_space<vmem>>, vector<7x7x16xf32>
    %c0_6 = arith.constant 0 : index
    %c0_7 = arith.constant 0 : index
    %3 = vector.load %arg3[%c0_6, %c0_7] : memref<1x16xf32, #tpu.memory_space<vmem>>, vector<1x16xf32>
    %cst = arith.constant 0.000000e+00 : f32
    %4 = vector.broadcast %cst : f32 to vector<8x8x16xf32>
    %5 = vector.extract_strided_slice %1 {offsets = [0, 0, 0], sizes = [14, 8, 16], strides = [1, 1, 1]} : vector<14x14x16xf32> to vector<14x8x16xf32>
    %6 = vector.extract_strided_slice %5 {offsets = [0, 0, 0], sizes = [8, 8, 16], strides = [1, 1, 1]} : vector<14x8x16xf32> to vector<8x8x16xf32>
    %7 = vector.extract_strided_slice %2 {offsets = [0, 0, 0], sizes = [1, 1, 16], strides = [1, 1, 1]} : vector<7x7x16xf32> to vector<1x1x16xf32>
    %8 = vector.shape_cast %7 : vector<1x1x16xf32> to vector<16xf32>
    %9 = vector.shape_cast %8 : vector<16xf32> to vector<1x1x16xf32>
    %10 = vector.broadcast %9 : vector<1x1x16xf32> to vector<8x8x16xf32>
    %11 = arith.mulf %6, %10 : vector<8x8x16xf32>
    %12 = arith.addf %4, %11 : vector<8x8x16xf32>
    %13 = vector.extract_strided_slice %5 {offsets = [1, 0, 0], sizes = [8, 8, 16], strides = [1, 1, 1]} : vector<14x8x16xf32> to vector<8x8x16xf32>
    %14 = vector.extract_strided_slice %2 {offsets = [1, 0, 0], sizes = [1, 1, 16], strides = [1, 1, 1]} : vector<7x7x16xf32> to vector<1x1x16xf32>
    %15 = vector.shape_cast %14 : vector<1x1x16xf32> to vector<16xf32>
    %16 = vector.shape_cast %15 : vector<16xf32> to vector<1x1x16xf32>
    %17 = vector.broadcast %16 : vector<1x1x16xf32> to vector<8x8x16xf32>
    %18 = arith.mulf %13, %17 : vector<8x8x16xf32>
    %19 = arith.addf %12, %18 : vector<8x8x16xf32>
    %20 = vector.extract_strided_slice %5 {offsets = [2, 0, 0], sizes = [8, 8, 16], strides = [1, 1, 1]} : vector<14x8x16xf32> to vector<8x8x16xf32>
    %21 = vector.extract_strided_slice %2 {offsets = [2, 0, 0], sizes = [1, 1, 16], strides = [1, 1, 1]} : vector<7x7x16xf32> to vector<1x1x16xf32>
    %22 = vector.shape_cast %21 : vector<1x1x16xf32> to vector<16xf32>
    %23 = vector.shape_cast %22 : vector<16xf32> to vector<1x1x16xf32>
    %24 = vector.broadcast %23 : vector<1x1x16xf32> to vector<8x8x16xf32>
    %25 = arith.mulf %20, %24 : vector<8x8x16xf32>
    %26 = arith.addf %19, %25 : vector<8x8x16xf32>
    %27 = vector.extract_strided_slice %5 {offsets = [3, 0, 0], sizes = [8, 8, 16], strides = [1, 1, 1]} : vector<14x8x16xf32> to vector<8x8x16xf32>
    %28 = vector.extract_strided_slice %2 {offsets = [3, 0, 0], sizes = [1, 1, 16], strides = [1, 1, 1]} : vector<7x7x16xf32> to vector<1x1x16xf32>
    %29 = vector.shape_cast %28 : vector<1x1x16xf32> to vector<16xf32>
    %30 = vector.shape_cast %29 : vector<16xf32> to vector<1x1x16xf32>
    %31 = vector.broadcast %30 : vector<1x1x16xf32> to vector<8x8x16xf32>
    %32 = arith.mulf %27, %31 : vector<8x8x16xf32>
    %33 = arith.addf %26, %32 : vector<8x8x16xf32>
    %34 = vector.extract_strided_slice %5 {offsets = [4, 0, 0], sizes = [8, 8, 16], strides = [1, 1, 1]} : vector<14x8x16xf32> to vector<8x8x16xf32>
    %35 = vector.extract_strided_slice %2 {offsets = [4, 0, 0], sizes = [1, 1, 16], strides = [1, 1, 1]} : vector<7x7x16xf32> to vector<1x1x16xf32>
    %36 = vector.shape_cast %35 : vector<1x1x16xf32> to vector<16xf32>
    %37 = vector.shape_cast %36 : vector<16xf32> to vector<1x1x16xf32>
    %38 = vector.broadcast %37 : vector<1x1x16xf32> to vector<8x8x16xf32>
    %39 = arith.mulf %34, %38 : vector<8x8x16xf32>
    %40 = arith.addf %33, %39 : vector<8x8x16xf32>
    %41 = vector.extract_strided_slice %5 {offsets = [5, 0, 0], sizes = [8, 8, 16], strides = [1, 1, 1]} : vector<14x8x16xf32> to vector<8x8x16xf32>
    %42 = vector.extract_strided_slice %2 {offsets = [5, 0, 0], sizes = [1, 1, 16], strides = [1, 1, 1]} : vector<7x7x16xf32> to vector<1x1x16xf32>
    %43 = vector.shape_cast %42 : vector<1x1x16xf32> to vector<16xf32>
    %44 = vector.shape_cast %43 : vector<16xf32> to vector<1x1x16xf32>
    %45 = vector.broadcast %44 : vector<1x1x16xf32> to vector<8x8x16xf32>
    %46 = arith.mulf %41, %45 : vector<8x8x16xf32>
    %47 = arith.addf %40, %46 : vector<8x8x16xf32>
    %48 = vector.extract_strided_slice %5 {offsets = [6, 0, 0], sizes = [8, 8, 16], strides = [1, 1, 1]} : vector<14x8x16xf32> to vector<8x8x16xf32>
    %49 = vector.extract_strided_slice %2 {offsets = [6, 0, 0], sizes = [1, 1, 16], strides = [1, 1, 1]} : vector<7x7x16xf32> to vector<1x1x16xf32>
    %50 = vector.shape_cast %49 : vector<1x1x16xf32> to vector<16xf32>
    %51 = vector.shape_cast %50 : vector<16xf32> to vector<1x1x16xf32>
    %52 = vector.broadcast %51 : vector<1x1x16xf32> to vector<8x8x16xf32>
    %53 = arith.mulf %48, %52 : vector<8x8x16xf32>
    %54 = arith.addf %47, %53 : vector<8x8x16xf32>
    %55 = vector.extract_strided_slice %1 {offsets = [0, 1, 0], sizes = [14, 8, 16], strides = [1, 1, 1]} : vector<14x14x16xf32> to vector<14x8x16xf32>
    %56 = vector.extract_strided_slice %55 {offsets = [0, 0, 0], sizes = [8, 8, 16], strides = [1, 1, 1]} : vector<14x8x16xf32> to vector<8x8x16xf32>
    %57 = vector.extract_strided_slice %2 {offsets = [0, 1, 0], sizes = [1, 1, 16], strides = [1, 1, 1]} : vector<7x7x16xf32> to vector<1x1x16xf32>
    %58 = vector.shape_cast %57 : vector<1x1x16xf32> to vector<16xf32>
    %59 = vector.shape_cast %58 : vector<16xf32> to vector<1x1x16xf32>
    %60 = vector.broadcast %59 : vector<1x1x16xf32> to vector<8x8x16xf32>
    %61 = arith.mulf %56, %60 : vector<8x8x16xf32>
    %62 = arith.addf %54, %61 : vector<8x8x16xf32>
    %63 = vector.extract_strided_slice %55 {offsets = [1, 0, 0], sizes = [8, 8, 16], strides = [1, 1, 1]} : vector<14x8x16xf32> to vector<8x8x16xf32>
    %64 = vector.extract_strided_slice %2 {offsets = [1, 1, 0], sizes = [1, 1, 16], strides = [1, 1, 1]} : vector<7x7x16xf32> to vector<1x1x16xf32>
    %65 = vector.shape_cast %64 : vector<1x1x16xf32> to vector<16xf32>
    %66 = vector.shape_cast %65 : vector<16xf32> to vector<1x1x16xf32>
    %67 = vector.broadcast %66 : vector<1x1x16xf32> to vector<8x8x16xf32>
    %68 = arith.mulf %63, %67 : vector<8x8x16xf32>
    %69 = arith.addf %62, %68 : vector<8x8x16xf32>
    %70 = vector.extract_strided_slice %55 {offsets = [2, 0, 0], sizes = [8, 8, 16], strides = [1, 1, 1]} : vector<14x8x16xf32> to vector<8x8x16xf32>
    %71 = vector.extract_strided_slice %2 {offsets = [2, 1, 0], sizes = [1, 1, 16], strides = [1, 1, 1]} : vector<7x7x16xf32> to vector<1x1x16xf32>
    %72 = vector.shape_cast %71 : vector<1x1x16xf32> to vector<16xf32>
    %73 = vector.shape_cast %72 : vector<16xf32> to vector<1x1x16xf32>
    %74 = vector.broadcast %73 : vector<1x1x16xf32> to vector<8x8x16xf32>
    %75 = arith.mulf %70, %74 : vector<8x8x16xf32>
    %76 = arith.addf %69, %75 : vector<8x8x16xf32>
    %77 = vector.extract_strided_slice %55 {offsets = [3, 0, 0], sizes = [8, 8, 16], strides = [1, 1, 1]} : vector<14x8x16xf32> to vector<8x8x16xf32>
    %78 = vector.extract_strided_slice %2 {offsets = [3, 1, 0], sizes = [1, 1, 16], strides = [1, 1, 1]} : vector<7x7x16xf32> to vector<1x1x16xf32>
    %79 = vector.shape_cast %78 : vector<1x1x16xf32> to vector<16xf32>
    %80 = vector.shape_cast %79 : vector<16xf32> to vector<1x1x16xf32>
    %81 = vector.broadcast %80 : vector<1x1x16xf32> to vector<8x8x16xf32>
    %82 = arith.mulf %77, %81 : vector<8x8x16xf32>
    %83 = arith.addf %76, %82 : vector<8x8x16xf32>
    %84 = vector.extract_strided_slice %55 {offsets = [4, 0, 0], sizes = [8, 8, 16], strides = [1, 1, 1]} : vector<14x8x16xf32> to vector<8x8x16xf32>
    %85 = vector.extract_strided_slice %2 {offsets = [4, 1, 0], sizes = [1, 1, 16], strides = [1, 1, 1]} : vector<7x7x16xf32> to vector<1x1x16xf32>
    %86 = vector.shape_cast %85 : vector<1x1x16xf32> to vector<16xf32>
    %87 = vector.shape_cast %86 : vector<16xf32> to vector<1x1x16xf32>
    %88 = vector.broadcast %87 : vector<1x1x16xf32> to vector<8x8x16xf32>
    %89 = arith.mulf %84, %88 : vector<8x8x16xf32>
    %90 = arith.addf %83, %89 : vector<8x8x16xf32>
    %91 = vector.extract_strided_slice %55 {offsets = [5, 0, 0], sizes = [8, 8, 16], strides = [1, 1, 1]} : vector<14x8x16xf32> to vector<8x8x16xf32>
    %92 = vector.extract_strided_slice %2 {offsets = [5, 1, 0], sizes = [1, 1, 16], strides = [1, 1, 1]} : vector<7x7x16xf32> to vector<1x1x16xf32>
    %93 = vector.shape_cast %92 : vector<1x1x16xf32> to vector<16xf32>
    %94 = vector.shape_cast %93 : vector<16xf32> to vector<1x1x16xf32>
    %95 = vector.broadcast %94 : vector<1x1x16xf32> to vector<8x8x16xf32>
    %96 = arith.mulf %91, %95 : vector<8x8x16xf32>
    %97 = arith.addf %90, %96 : vector<8x8x16xf32>
    %98 = vector.extract_strided_slice %55 {offsets = [6, 0, 0], sizes = [8, 8, 16], strides = [1, 1, 1]} : vector<14x8x16xf32> to vector<8x8x16xf32>
    %99 = vector.extract_strided_slice %2 {offsets = [6, 1, 0], sizes = [1, 1, 16], strides = [1, 1, 1]} : vector<7x7x16xf32> to vector<1x1x16xf32>
    %100 = vector.shape_cast %99 : vector<1x1x16xf32> to vector<16xf32>
    %101 = vector.shape_cast %100 : vector<16xf32> to vector<1x1x16xf32>
    %102 = vector.broadcast %101 : vector<1x1x16xf32> to vector<8x8x16xf32>
    %103 = arith.mulf %98, %102 : vector<8x8x16xf32>
    %104 = arith.addf %97, %103 : vector<8x8x16xf32>
    %105 = vector.extract_strided_slice %1 {offsets = [0, 2, 0], sizes = [14, 8, 16], strides = [1, 1, 1]} : vector<14x14x16xf32> to vector<14x8x16xf32>
    %106 = vector.extract_strided_slice %105 {offsets = [0, 0, 0], sizes = [8, 8, 16], strides = [1, 1, 1]} : vector<14x8x16xf32> to vector<8x8x16xf32>
    %107 = vector.extract_strided_slice %2 {offsets = [0, 2, 0], sizes = [1, 1, 16], strides = [1, 1, 1]} : vector<7x7x16xf32> to vector<1x1x16xf32>
    %108 = vector.shape_cast %107 : vector<1x1x16xf32> to vector<16xf32>
    %109 = vector.shape_cast %108 : vector<16xf32> to vector<1x1x16xf32>
    %110 = vector.broadcast %109 : vector<1x1x16xf32> to vector<8x8x16xf32>
    %111 = arith.mulf %106, %110 : vector<8x8x16xf32>
    %112 = arith.addf %104, %111 : vector<8x8x16xf32>
    %113 = vector.extract_strided_slice %105 {offsets = [1, 0, 0], sizes = [8, 8, 16], strides = [1, 1, 1]} : vector<14x8x16xf32> to vector<8x8x16xf32>
    %114 = vector.extract_strided_slice %2 {offsets = [1, 2, 0], sizes = [1, 1, 16], strides = [1, 1, 1]} : vector<7x7x16xf32> to vector<1x1x16xf32>
    %115 = vector.shape_cast %114 : vector<1x1x16xf32> to vector<16xf32>
    %116 = vector.shape_cast %115 : vector<16xf32> to vector<1x1x16xf32>
    %117 = vector.broadcast %116 : vector<1x1x16xf32> to vector<8x8x16xf32>
    %118 = arith.mulf %113, %117 : vector<8x8x16xf32>
    %119 = arith.addf %112, %118 : vector<8x8x16xf32>
    %120 = vector.extract_strided_slice %105 {offsets = [2, 0, 0], sizes = [8, 8, 16], strides = [1, 1, 1]} : vector<14x8x16xf32> to vector<8x8x16xf32>
    %121 = vector.extract_strided_slice %2 {offsets = [2, 2, 0], sizes = [1, 1, 16], strides = [1, 1, 1]} : vector<7x7x16xf32> to vector<1x1x16xf32>
    %122 = vector.shape_cast %121 : vector<1x1x16xf32> to vector<16xf32>
    %123 = vector.shape_cast %122 : vector<16xf32> to vector<1x1x16xf32>
    %124 = vector.broadcast %123 : vector<1x1x16xf32> to vector<8x8x16xf32>
    %125 = arith.mulf %120, %124 : vector<8x8x16xf32>
    %126 = arith.addf %119, %125 : vector<8x8x16xf32>
    %127 = vector.extract_strided_slice %105 {offsets = [3, 0, 0], sizes = [8, 8, 16], strides = [1, 1, 1]} : vector<14x8x16xf32> to vector<8x8x16xf32>
    %128 = vector.extract_strided_slice %2 {offsets = [3, 2, 0], sizes = [1, 1, 16], strides = [1, 1, 1]} : vector<7x7x16xf32> to vector<1x1x16xf32>
    %129 = vector.shape_cast %128 : vector<1x1x16xf32> to vector<16xf32>
    %130 = vector.shape_cast %129 : vector<16xf32> to vector<1x1x16xf32>
    %131 = vector.broadcast %130 : vector<1x1x16xf32> to vector<8x8x16xf32>
    %132 = arith.mulf %127, %131 : vector<8x8x16xf32>
    %133 = arith.addf %126, %132 : vector<8x8x16xf32>
    %134 = vector.extract_strided_slice %105 {offsets = [4, 0, 0], sizes = [8, 8, 16], strides = [1, 1, 1]} : vector<14x8x16xf32> to vector<8x8x16xf32>
    %135 = vector.extract_strided_slice %2 {offsets = [4, 2, 0], sizes = [1, 1, 16], strides = [1, 1, 1]} : vector<7x7x16xf32> to vector<1x1x16xf32>
    %136 = vector.shape_cast %135 : vector<1x1x16xf32> to vector<16xf32>
    %137 = vector.shape_cast %136 : vector<16xf32> to vector<1x1x16xf32>
    %138 = vector.broadcast %137 : vector<1x1x16xf32> to vector<8x8x16xf32>
    %139 = arith.mulf %134, %138 : vector<8x8x16xf32>
    %140 = arith.addf %133, %139 : vector<8x8x16xf32>
    %141 = vector.extract_strided_slice %105 {offsets = [5, 0, 0], sizes = [8, 8, 16], strides = [1, 1, 1]} : vector<14x8x16xf32> to vector<8x8x16xf32>
    %142 = vector.extract_strided_slice %2 {offsets = [5, 2, 0], sizes = [1, 1, 16], strides = [1, 1, 1]} : vector<7x7x16xf32> to vector<1x1x16xf32>
    %143 = vector.shape_cast %142 : vector<1x1x16xf32> to vector<16xf32>
    %144 = vector.shape_cast %143 : vector<16xf32> to vector<1x1x16xf32>
    %145 = vector.broadcast %144 : vector<1x1x16xf32> to vector<8x8x16xf32>
    %146 = arith.mulf %141, %145 : vector<8x8x16xf32>
    %147 = arith.addf %140, %146 : vector<8x8x16xf32>
    %148 = vector.extract_strided_slice %105 {offsets = [6, 0, 0], sizes = [8, 8, 16], strides = [1, 1, 1]} : vector<14x8x16xf32> to vector<8x8x16xf32>
    %149 = vector.extract_strided_slice %2 {offsets = [6, 2, 0], sizes = [1, 1, 16], strides = [1, 1, 1]} : vector<7x7x16xf32> to vector<1x1x16xf32>
    %150 = vector.shape_cast %149 : vector<1x1x16xf32> to vector<16xf32>
    %151 = vector.shape_cast %150 : vector<16xf32> to vector<1x1x16xf32>
    %152 = vector.broadcast %151 : vector<1x1x16xf32> to vector<8x8x16xf32>
    %153 = arith.mulf %148, %152 : vector<8x8x16xf32>
    %154 = arith.addf %147, %153 : vector<8x8x16xf32>
    %155 = vector.extract_strided_slice %1 {offsets = [0, 3, 0], sizes = [14, 8, 16], strides = [1, 1, 1]} : vector<14x14x16xf32> to vector<14x8x16xf32>
    %156 = vector.extract_strided_slice %155 {offsets = [0, 0, 0], sizes = [8, 8, 16], strides = [1, 1, 1]} : vector<14x8x16xf32> to vector<8x8x16xf32>
    %157 = vector.extract_strided_slice %2 {offsets = [0, 3, 0], sizes = [1, 1, 16], strides = [1, 1, 1]} : vector<7x7x16xf32> to vector<1x1x16xf32>
    %158 = vector.shape_cast %157 : vector<1x1x16xf32> to vector<16xf32>
    %159 = vector.shape_cast %158 : vector<16xf32> to vector<1x1x16xf32>
    %160 = vector.broadcast %159 : vector<1x1x16xf32> to vector<8x8x16xf32>
    %161 = arith.mulf %156, %160 : vector<8x8x16xf32>
    %162 = arith.addf %154, %161 : vector<8x8x16xf32>
    %163 = vector.extract_strided_slice %155 {offsets = [1, 0, 0], sizes = [8, 8, 16], strides = [1, 1, 1]} : vector<14x8x16xf32> to vector<8x8x16xf32>
    %164 = vector.extract_strided_slice %2 {offsets = [1, 3, 0], sizes = [1, 1, 16], strides = [1, 1, 1]} : vector<7x7x16xf32> to vector<1x1x16xf32>
    %165 = vector.shape_cast %164 : vector<1x1x16xf32> to vector<16xf32>
    %166 = vector.shape_cast %165 : vector<16xf32> to vector<1x1x16xf32>
    %167 = vector.broadcast %166 : vector<1x1x16xf32> to vector<8x8x16xf32>
    %168 = arith.mulf %163, %167 : vector<8x8x16xf32>
    %169 = arith.addf %162, %168 : vector<8x8x16xf32>
    %170 = vector.extract_strided_slice %155 {offsets = [2, 0, 0], sizes = [8, 8, 16], strides = [1, 1, 1]} : vector<14x8x16xf32> to vector<8x8x16xf32>
    %171 = vector.extract_strided_slice %2 {offsets = [2, 3, 0], sizes = [1, 1, 16], strides = [1, 1, 1]} : vector<7x7x16xf32> to vector<1x1x16xf32>
    %172 = vector.shape_cast %171 : vector<1x1x16xf32> to vector<16xf32>
    %173 = vector.shape_cast %172 : vector<16xf32> to vector<1x1x16xf32>
    %174 = vector.broadcast %173 : vector<1x1x16xf32> to vector<8x8x16xf32>
    %175 = arith.mulf %170, %174 : vector<8x8x16xf32>
    %176 = arith.addf %169, %175 : vector<8x8x16xf32>
    %177 = vector.extract_strided_slice %155 {offsets = [3, 0, 0], sizes = [8, 8, 16], strides = [1, 1, 1]} : vector<14x8x16xf32> to vector<8x8x16xf32>
    %178 = vector.extract_strided_slice %2 {offsets = [3, 3, 0], sizes = [1, 1, 16], strides = [1, 1, 1]} : vector<7x7x16xf32> to vector<1x1x16xf32>
    %179 = vector.shape_cast %178 : vector<1x1x16xf32> to vector<16xf32>
    %180 = vector.shape_cast %179 : vector<16xf32> to vector<1x1x16xf32>
    %181 = vector.broadcast %180 : vector<1x1x16xf32> to vector<8x8x16xf32>
    %182 = arith.mulf %177, %181 : vector<8x8x16xf32>
    %183 = arith.addf %176, %182 : vector<8x8x16xf32>
    %184 = vector.extract_strided_slice %155 {offsets = [4, 0, 0], sizes = [8, 8, 16], strides = [1, 1, 1]} : vector<14x8x16xf32> to vector<8x8x16xf32>
    %185 = vector.extract_strided_slice %2 {offsets = [4, 3, 0], sizes = [1, 1, 16], strides = [1, 1, 1]} : vector<7x7x16xf32> to vector<1x1x16xf32>
    %186 = vector.shape_cast %185 : vector<1x1x16xf32> to vector<16xf32>
    %187 = vector.shape_cast %186 : vector<16xf32> to vector<1x1x16xf32>
    %188 = vector.broadcast %187 : vector<1x1x16xf32> to vector<8x8x16xf32>
    %189 = arith.mulf %184, %188 : vector<8x8x16xf32>
    %190 = arith.addf %183, %189 : vector<8x8x16xf32>
    %191 = vector.extract_strided_slice %155 {offsets = [5, 0, 0], sizes = [8, 8, 16], strides = [1, 1, 1]} : vector<14x8x16xf32> to vector<8x8x16xf32>
    %192 = vector.extract_strided_slice %2 {offsets = [5, 3, 0], sizes = [1, 1, 16], strides = [1, 1, 1]} : vector<7x7x16xf32> to vector<1x1x16xf32>
    %193 = vector.shape_cast %192 : vector<1x1x16xf32> to vector<16xf32>
    %194 = vector.shape_cast %193 : vector<16xf32> to vector<1x1x16xf32>
    %195 = vector.broadcast %194 : vector<1x1x16xf32> to vector<8x8x16xf32>
    %196 = arith.mulf %191, %195 : vector<8x8x16xf32>
    %197 = arith.addf %190, %196 : vector<8x8x16xf32>
    %198 = vector.extract_strided_slice %155 {offsets = [6, 0, 0], sizes = [8, 8, 16], strides = [1, 1, 1]} : vector<14x8x16xf32> to vector<8x8x16xf32>
    %199 = vector.extract_strided_slice %2 {offsets = [6, 3, 0], sizes = [1, 1, 16], strides = [1, 1, 1]} : vector<7x7x16xf32> to vector<1x1x16xf32>
    %200 = vector.shape_cast %199 : vector<1x1x16xf32> to vector<16xf32>
    %201 = vector.shape_cast %200 : vector<16xf32> to vector<1x1x16xf32>
    %202 = vector.broadcast %201 : vector<1x1x16xf32> to vector<8x8x16xf32>
    %203 = arith.mulf %198, %202 : vector<8x8x16xf32>
    %204 = arith.addf %197, %203 : vector<8x8x16xf32>
    %205 = vector.extract_strided_slice %1 {offsets = [0, 4, 0], sizes = [14, 8, 16], strides = [1, 1, 1]} : vector<14x14x16xf32> to vector<14x8x16xf32>
    %206 = vector.extract_strided_slice %205 {offsets = [0, 0, 0], sizes = [8, 8, 16], strides = [1, 1, 1]} : vector<14x8x16xf32> to vector<8x8x16xf32>
    %207 = vector.extract_strided_slice %2 {offsets = [0, 4, 0], sizes = [1, 1, 16], strides = [1, 1, 1]} : vector<7x7x16xf32> to vector<1x1x16xf32>
    %208 = vector.shape_cast %207 : vector<1x1x16xf32> to vector<16xf32>
    %209 = vector.shape_cast %208 : vector<16xf32> to vector<1x1x16xf32>
    %210 = vector.broadcast %209 : vector<1x1x16xf32> to vector<8x8x16xf32>
    %211 = arith.mulf %206, %210 : vector<8x8x16xf32>
    %212 = arith.addf %204, %211 : vector<8x8x16xf32>
    %213 = vector.extract_strided_slice %205 {offsets = [1, 0, 0], sizes = [8, 8, 16], strides = [1, 1, 1]} : vector<14x8x16xf32> to vector<8x8x16xf32>
    %214 = vector.extract_strided_slice %2 {offsets = [1, 4, 0], sizes = [1, 1, 16], strides = [1, 1, 1]} : vector<7x7x16xf32> to vector<1x1x16xf32>
    %215 = vector.shape_cast %214 : vector<1x1x16xf32> to vector<16xf32>
    %216 = vector.shape_cast %215 : vector<16xf32> to vector<1x1x16xf32>
    %217 = vector.broadcast %216 : vector<1x1x16xf32> to vector<8x8x16xf32>
    %218 = arith.mulf %213, %217 : vector<8x8x16xf32>
    %219 = arith.addf %212, %218 : vector<8x8x16xf32>
    %220 = vector.extract_strided_slice %205 {offsets = [2, 0, 0], sizes = [8, 8, 16], strides = [1, 1, 1]} : vector<14x8x16xf32> to vector<8x8x16xf32>
    %221 = vector.extract_strided_slice %2 {offsets = [2, 4, 0], sizes = [1, 1, 16], strides = [1, 1, 1]} : vector<7x7x16xf32> to vector<1x1x16xf32>
    %222 = vector.shape_cast %221 : vector<1x1x16xf32> to vector<16xf32>
    %223 = vector.shape_cast %222 : vector<16xf32> to vector<1x1x16xf32>
    %224 = vector.broadcast %223 : vector<1x1x16xf32> to vector<8x8x16xf32>
    %225 = arith.mulf %220, %224 : vector<8x8x16xf32>
    %226 = arith.addf %219, %225 : vector<8x8x16xf32>
    %227 = vector.extract_strided_slice %205 {offsets = [3, 0, 0], sizes = [8, 8, 16], strides = [1, 1, 1]} : vector<14x8x16xf32> to vector<8x8x16xf32>
    %228 = vector.extract_strided_slice %2 {offsets = [3, 4, 0], sizes = [1, 1, 16], strides = [1, 1, 1]} : vector<7x7x16xf32> to vector<1x1x16xf32>
    %229 = vector.shape_cast %228 : vector<1x1x16xf32> to vector<16xf32>
    %230 = vector.shape_cast %229 : vector<16xf32> to vector<1x1x16xf32>
    %231 = vector.broadcast %230 : vector<1x1x16xf32> to vector<8x8x16xf32>
    %232 = arith.mulf %227, %231 : vector<8x8x16xf32>
    %233 = arith.addf %226, %232 : vector<8x8x16xf32>
    %234 = vector.extract_strided_slice %205 {offsets = [4, 0, 0], sizes = [8, 8, 16], strides = [1, 1, 1]} : vector<14x8x16xf32> to vector<8x8x16xf32>
    %235 = vector.extract_strided_slice %2 {offsets = [4, 4, 0], sizes = [1, 1, 16], strides = [1, 1, 1]} : vector<7x7x16xf32> to vector<1x1x16xf32>
    %236 = vector.shape_cast %235 : vector<1x1x16xf32> to vector<16xf32>
    %237 = vector.shape_cast %236 : vector<16xf32> to vector<1x1x16xf32>
    %238 = vector.broadcast %237 : vector<1x1x16xf32> to vector<8x8x16xf32>
    %239 = arith.mulf %234, %238 : vector<8x8x16xf32>
    %240 = arith.addf %233, %239 : vector<8x8x16xf32>
    %241 = vector.extract_strided_slice %205 {offsets = [5, 0, 0], sizes = [8, 8, 16], strides = [1, 1, 1]} : vector<14x8x16xf32> to vector<8x8x16xf32>
    %242 = vector.extract_strided_slice %2 {offsets = [5, 4, 0], sizes = [1, 1, 16], strides = [1, 1, 1]} : vector<7x7x16xf32> to vector<1x1x16xf32>
    %243 = vector.shape_cast %242 : vector<1x1x16xf32> to vector<16xf32>
    %244 = vector.shape_cast %243 : vector<16xf32> to vector<1x1x16xf32>
    %245 = vector.broadcast %244 : vector<1x1x16xf32> to vector<8x8x16xf32>
    %246 = arith.mulf %241, %245 : vector<8x8x16xf32>
    %247 = arith.addf %240, %246 : vector<8x8x16xf32>
    %248 = vector.extract_strided_slice %205 {offsets = [6, 0, 0], sizes = [8, 8, 16], strides = [1, 1, 1]} : vector<14x8x16xf32> to vector<8x8x16xf32>
    %249 = vector.extract_strided_slice %2 {offsets = [6, 4, 0], sizes = [1, 1, 16], strides = [1, 1, 1]} : vector<7x7x16xf32> to vector<1x1x16xf32>
    %250 = vector.shape_cast %249 : vector<1x1x16xf32> to vector<16xf32>
    %251 = vector.shape_cast %250 : vector<16xf32> to vector<1x1x16xf32>
    %252 = vector.broadcast %251 : vector<1x1x16xf32> to vector<8x8x16xf32>
    %253 = arith.mulf %248, %252 : vector<8x8x16xf32>
    %254 = arith.addf %247, %253 : vector<8x8x16xf32>
    %255 = vector.extract_strided_slice %1 {offsets = [0, 5, 0], sizes = [14, 8, 16], strides = [1, 1, 1]} : vector<14x14x16xf32> to vector<14x8x16xf32>
    %256 = vector.extract_strided_slice %255 {offsets = [0, 0, 0], sizes = [8, 8, 16], strides = [1, 1, 1]} : vector<14x8x16xf32> to vector<8x8x16xf32>
    %257 = vector.extract_strided_slice %2 {offsets = [0, 5, 0], sizes = [1, 1, 16], strides = [1, 1, 1]} : vector<7x7x16xf32> to vector<1x1x16xf32>
    %258 = vector.shape_cast %257 : vector<1x1x16xf32> to vector<16xf32>
    %259 = vector.shape_cast %258 : vector<16xf32> to vector<1x1x16xf32>
    %260 = vector.broadcast %259 : vector<1x1x16xf32> to vector<8x8x16xf32>
    %261 = arith.mulf %256, %260 : vector<8x8x16xf32>
    %262 = arith.addf %254, %261 : vector<8x8x16xf32>
    %263 = vector.extract_strided_slice %255 {offsets = [1, 0, 0], sizes = [8, 8, 16], strides = [1, 1, 1]} : vector<14x8x16xf32> to vector<8x8x16xf32>
    %264 = vector.extract_strided_slice %2 {offsets = [1, 5, 0], sizes = [1, 1, 16], strides = [1, 1, 1]} : vector<7x7x16xf32> to vector<1x1x16xf32>
    %265 = vector.shape_cast %264 : vector<1x1x16xf32> to vector<16xf32>
    %266 = vector.shape_cast %265 : vector<16xf32> to vector<1x1x16xf32>
    %267 = vector.broadcast %266 : vector<1x1x16xf32> to vector<8x8x16xf32>
    %268 = arith.mulf %263, %267 : vector<8x8x16xf32>
    %269 = arith.addf %262, %268 : vector<8x8x16xf32>
    %270 = vector.extract_strided_slice %255 {offsets = [2, 0, 0], sizes = [8, 8, 16], strides = [1, 1, 1]} : vector<14x8x16xf32> to vector<8x8x16xf32>
    %271 = vector.extract_strided_slice %2 {offsets = [2, 5, 0], sizes = [1, 1, 16], strides = [1, 1, 1]} : vector<7x7x16xf32> to vector<1x1x16xf32>
    %272 = vector.shape_cast %271 : vector<1x1x16xf32> to vector<16xf32>
    %273 = vector.shape_cast %272 : vector<16xf32> to vector<1x1x16xf32>
    %274 = vector.broadcast %273 : vector<1x1x16xf32> to vector<8x8x16xf32>
    %275 = arith.mulf %270, %274 : vector<8x8x16xf32>
    %276 = arith.addf %269, %275 : vector<8x8x16xf32>
    %277 = vector.extract_strided_slice %255 {offsets = [3, 0, 0], sizes = [8, 8, 16], strides = [1, 1, 1]} : vector<14x8x16xf32> to vector<8x8x16xf32>
    %278 = vector.extract_strided_slice %2 {offsets = [3, 5, 0], sizes = [1, 1, 16], strides = [1, 1, 1]} : vector<7x7x16xf32> to vector<1x1x16xf32>
    %279 = vector.shape_cast %278 : vector<1x1x16xf32> to vector<16xf32>
    %280 = vector.shape_cast %279 : vector<16xf32> to vector<1x1x16xf32>
    %281 = vector.broadcast %280 : vector<1x1x16xf32> to vector<8x8x16xf32>
    %282 = arith.mulf %277, %281 : vector<8x8x16xf32>
    %283 = arith.addf %276, %282 : vector<8x8x16xf32>
    %284 = vector.extract_strided_slice %255 {offsets = [4, 0, 0], sizes = [8, 8, 16], strides = [1, 1, 1]} : vector<14x8x16xf32> to vector<8x8x16xf32>
    %285 = vector.extract_strided_slice %2 {offsets = [4, 5, 0], sizes = [1, 1, 16], strides = [1, 1, 1]} : vector<7x7x16xf32> to vector<1x1x16xf32>
    %286 = vector.shape_cast %285 : vector<1x1x16xf32> to vector<16xf32>
    %287 = vector.shape_cast %286 : vector<16xf32> to vector<1x1x16xf32>
    %288 = vector.broadcast %287 : vector<1x1x16xf32> to vector<8x8x16xf32>
    %289 = arith.mulf %284, %288 : vector<8x8x16xf32>
    %290 = arith.addf %283, %289 : vector<8x8x16xf32>
    %291 = vector.extract_strided_slice %255 {offsets = [5, 0, 0], sizes = [8, 8, 16], strides = [1, 1, 1]} : vector<14x8x16xf32> to vector<8x8x16xf32>
    %292 = vector.extract_strided_slice %2 {offsets = [5, 5, 0], sizes = [1, 1, 16], strides = [1, 1, 1]} : vector<7x7x16xf32> to vector<1x1x16xf32>
    %293 = vector.shape_cast %292 : vector<1x1x16xf32> to vector<16xf32>
    %294 = vector.shape_cast %293 : vector<16xf32> to vector<1x1x16xf32>
    %295 = vector.broadcast %294 : vector<1x1x16xf32> to vector<8x8x16xf32>
    %296 = arith.mulf %291, %295 : vector<8x8x16xf32>
    %297 = arith.addf %290, %296 : vector<8x8x16xf32>
    %298 = vector.extract_strided_slice %255 {offsets = [6, 0, 0], sizes = [8, 8, 16], strides = [1, 1, 1]} : vector<14x8x16xf32> to vector<8x8x16xf32>
    %299 = vector.extract_strided_slice %2 {offsets = [6, 5, 0], sizes = [1, 1, 16], strides = [1, 1, 1]} : vector<7x7x16xf32> to vector<1x1x16xf32>
    %300 = vector.shape_cast %299 : vector<1x1x16xf32> to vector<16xf32>
    %301 = vector.shape_cast %300 : vector<16xf32> to vector<1x1x16xf32>
    %302 = vector.broadcast %301 : vector<1x1x16xf32> to vector<8x8x16xf32>
    %303 = arith.mulf %298, %302 : vector<8x8x16xf32>
    %304 = arith.addf %297, %303 : vector<8x8x16xf32>
    %305 = vector.extract_strided_slice %1 {offsets = [0, 6, 0], sizes = [14, 8, 16], strides = [1, 1, 1]} : vector<14x14x16xf32> to vector<14x8x16xf32>
    %306 = vector.extract_strided_slice %305 {offsets = [0, 0, 0], sizes = [8, 8, 16], strides = [1, 1, 1]} : vector<14x8x16xf32> to vector<8x8x16xf32>
    %307 = vector.extract_strided_slice %2 {offsets = [0, 6, 0], sizes = [1, 1, 16], strides = [1, 1, 1]} : vector<7x7x16xf32> to vector<1x1x16xf32>
    %308 = vector.shape_cast %307 : vector<1x1x16xf32> to vector<16xf32>
    %309 = vector.shape_cast %308 : vector<16xf32> to vector<1x1x16xf32>
    %310 = vector.broadcast %309 : vector<1x1x16xf32> to vector<8x8x16xf32>
    %311 = arith.mulf %306, %310 : vector<8x8x16xf32>
    %312 = arith.addf %304, %311 : vector<8x8x16xf32>
    %313 = vector.extract_strided_slice %305 {offsets = [1, 0, 0], sizes = [8, 8, 16], strides = [1, 1, 1]} : vector<14x8x16xf32> to vector<8x8x16xf32>
    %314 = vector.extract_strided_slice %2 {offsets = [1, 6, 0], sizes = [1, 1, 16], strides = [1, 1, 1]} : vector<7x7x16xf32> to vector<1x1x16xf32>
    %315 = vector.shape_cast %314 : vector<1x1x16xf32> to vector<16xf32>
    %316 = vector.shape_cast %315 : vector<16xf32> to vector<1x1x16xf32>
    %317 = vector.broadcast %316 : vector<1x1x16xf32> to vector<8x8x16xf32>
    %318 = arith.mulf %313, %317 : vector<8x8x16xf32>
    %319 = arith.addf %312, %318 : vector<8x8x16xf32>
    %320 = vector.extract_strided_slice %305 {offsets = [2, 0, 0], sizes = [8, 8, 16], strides = [1, 1, 1]} : vector<14x8x16xf32> to vector<8x8x16xf32>
    %321 = vector.extract_strided_slice %2 {offsets = [2, 6, 0], sizes = [1, 1, 16], strides = [1, 1, 1]} : vector<7x7x16xf32> to vector<1x1x16xf32>
    %322 = vector.shape_cast %321 : vector<1x1x16xf32> to vector<16xf32>
    %323 = vector.shape_cast %322 : vector<16xf32> to vector<1x1x16xf32>
    %324 = vector.broadcast %323 : vector<1x1x16xf32> to vector<8x8x16xf32>
    %325 = arith.mulf %320, %324 : vector<8x8x16xf32>
    %326 = arith.addf %319, %325 : vector<8x8x16xf32>
    %327 = vector.extract_strided_slice %305 {offsets = [3, 0, 0], sizes = [8, 8, 16], strides = [1, 1, 1]} : vector<14x8x16xf32> to vector<8x8x16xf32>
    %328 = vector.extract_strided_slice %2 {offsets = [3, 6, 0], sizes = [1, 1, 16], strides = [1, 1, 1]} : vector<7x7x16xf32> to vector<1x1x16xf32>
    %329 = vector.shape_cast %328 : vector<1x1x16xf32> to vector<16xf32>
    %330 = vector.shape_cast %329 : vector<16xf32> to vector<1x1x16xf32>
    %331 = vector.broadcast %330 : vector<1x1x16xf32> to vector<8x8x16xf32>
    %332 = arith.mulf %327, %331 : vector<8x8x16xf32>
    %333 = arith.addf %326, %332 : vector<8x8x16xf32>
    %334 = vector.extract_strided_slice %305 {offsets = [4, 0, 0], sizes = [8, 8, 16], strides = [1, 1, 1]} : vector<14x8x16xf32> to vector<8x8x16xf32>
    %335 = vector.extract_strided_slice %2 {offsets = [4, 6, 0], sizes = [1, 1, 16], strides = [1, 1, 1]} : vector<7x7x16xf32> to vector<1x1x16xf32>
    %336 = vector.shape_cast %335 : vector<1x1x16xf32> to vector<16xf32>
    %337 = vector.shape_cast %336 : vector<16xf32> to vector<1x1x16xf32>
    %338 = vector.broadcast %337 : vector<1x1x16xf32> to vector<8x8x16xf32>
    %339 = arith.mulf %334, %338 : vector<8x8x16xf32>
    %340 = arith.addf %333, %339 : vector<8x8x16xf32>
    %341 = vector.extract_strided_slice %305 {offsets = [5, 0, 0], sizes = [8, 8, 16], strides = [1, 1, 1]} : vector<14x8x16xf32> to vector<8x8x16xf32>
    %342 = vector.extract_strided_slice %2 {offsets = [5, 6, 0], sizes = [1, 1, 16], strides = [1, 1, 1]} : vector<7x7x16xf32> to vector<1x1x16xf32>
    %343 = vector.shape_cast %342 : vector<1x1x16xf32> to vector<16xf32>
    %344 = vector.shape_cast %343 : vector<16xf32> to vector<1x1x16xf32>
    %345 = vector.broadcast %344 : vector<1x1x16xf32> to vector<8x8x16xf32>
    %346 = arith.mulf %341, %345 : vector<8x8x16xf32>
    %347 = arith.addf %340, %346 : vector<8x8x16xf32>
    %348 = vector.extract_strided_slice %305 {offsets = [6, 0, 0], sizes = [8, 8, 16], strides = [1, 1, 1]} : vector<14x8x16xf32> to vector<8x8x16xf32>
    %349 = vector.extract_strided_slice %2 {offsets = [6, 6, 0], sizes = [1, 1, 16], strides = [1, 1, 1]} : vector<7x7x16xf32> to vector<1x1x16xf32>
    %350 = vector.shape_cast %349 : vector<1x1x16xf32> to vector<16xf32>
    %351 = vector.shape_cast %350 : vector<16xf32> to vector<1x1x16xf32>
    %352 = vector.broadcast %351 : vector<1x1x16xf32> to vector<8x8x16xf32>
    %353 = arith.mulf %348, %352 : vector<8x8x16xf32>
    %354 = arith.addf %347, %353 : vector<8x8x16xf32>
    %355 = vector.shape_cast %3 : vector<1x16xf32> to vector<1x1x16xf32>
    %356 = vector.broadcast %355 : vector<1x1x16xf32> to vector<8x8x16xf32>
    %357 = arith.addf %354, %356 : vector<8x8x16xf32>
    %c0_8 = arith.constant 0 : index
    %c0_9 = arith.constant 0 : index
    %c0_10 = arith.constant 0 : index
    %c0_11 = arith.constant 0 : index
    %358 = vector.load %arg4[%c0_8, %c0_9, %c0_10, %c0_11] : memref<1x8x8x16xf32, #tpu.memory_space<vmem>>, vector<1x8x8x16xf32>
    %359 = vector.shape_cast %358 : vector<1x8x8x16xf32> to vector<8x8x16xf32>
    %360 = vector.shape_cast %357 : vector<8x8x16xf32> to vector<1x8x8x16xf32>
    tpu.vector_store %arg4[%c0_8, %c0_9, %c0_10, %c0_11], %360 {strides = array<i32>} : memref<1x8x8x16xf32, #tpu.memory_space<vmem>>, vector<1x8x8x16xf32>,
    return
  }
  func.func @transform_0(%arg0: i32) -> (i32, i32, i32, i32) {
    %c0_i32 = arith.constant 0 : i32
    %c0_i32_0 = arith.constant 0 : i32
    %c0_i32_1 = arith.constant 0 : i32
    %c0_i32_2 = arith.constant 0 : i32
    return %arg0, %c0_i32, %c0_i32_0, %c0_i32_1 : i32, i32, i32, i32
  }
  func.func @transform_1(%arg0: i32) -> (i32, i32, i32) {
    %c0_i32 = arith.constant 0 : i32
    %c0_i32_0 = arith.constant 0 : i32
    %c0_i32_1 = arith.constant 0 : i32
    %c0_i32_2 = arith.constant 0 : i32
    return %c0_i32, %c0_i32_0, %c0_i32_1 : i32, i32, i32
  }
  func.func @transform_2(%arg0: i32) -> (i32, i32) {
    %c0_i32 = arith.constant 0 : i32
    %c0_i32_0 = arith.constant 0 : i32
    %c0_i32_1 = arith.constant 0 : i32
    return %c0_i32, %c0_i32_0 : i32, i32
  }
  func.func @transform_3(%arg0: i32) -> (i32, i32, i32, i32) {
    %c0_i32 = arith.constant 0 : i32
    %c0_i32_0 = arith.constant 0 : i32
    %c0_i32_1 = arith.constant 0 : i32
    %c0_i32_2 = arith.constant 0 : i32
    return %arg0, %c0_i32, %c0_i32_0, %c0_i32_1 : i32, i32, i32, i32
  }
}

module attributes {stable_mosaic.version = 11 : i64} {
  func.func @kernel(%arg0: i32, %arg1: memref<128x16xf32, #tpu.memory_space<vmem>>, %arg2: memref<16x16xbf16, #tpu.memory_space<vmem>>, %arg3: memref<1x16xf32, #tpu.memory_space<vmem>>, %arg4: memref<128x16xf32, #tpu.memory_space<vmem>>) attributes {dimension_semantics = [#tpu.dimension_semantics<parallel>], iteration_bounds = array<i64: 1>, scalar_prefetch = 0 : i64, scratch_operands = 0 : i64, tpu.core_type = #tpu.core_type<tc>, window_params = [{transform_indices = @transform_0, window_bounds = array<i64: 128, 16>}, {pipeline_mode = #tpu.pipeline_mode<synchronous>, transform_indices = @transform_1, window_bounds = array<i64: 16, 16>}, {pipeline_mode = #tpu.pipeline_mode<synchronous>, transform_indices = @transform_2, window_bounds = array<i64: 1, 16>}, {transform_indices = @transform_3, window_bounds = array<i64: 128, 16>}]} {
    %c0 = arith.constant 0 : index
    %c0_0 = arith.constant 0 : index
    %0 = vector.load %arg1[%c0, %c0_0] : memref<128x16xf32, #tpu.memory_space<vmem>>, vector<128x16xf32>
    %1 = arith.truncf %0 : vector<128x16xf32> to vector<128x16xbf16>
    %c0_1 = arith.constant 0 : index
    %c0_2 = arith.constant 0 : index
    %2 = vector.load %arg2[%c0_1, %c0_2] : memref<16x16xbf16, #tpu.memory_space<vmem>>, vector<16x16xbf16>
    %cst = arith.constant dense<0.000000e+00> : vector<128x16xf32>
    %3 = tpu.matmul %1, %2, %cst {dimension_numbers = #tpu.dot_dimension_numbers<[1], [0], [0], [1], [0, 0, 1, 1], [], []>} : vector<128x16xbf16>, vector<16x16xbf16>, vector<128x16xf32> -> vector<128x16xf32>
    %c0_3 = arith.constant 0 : index
    %c0_4 = arith.constant 0 : index
    %4 = vector.load %arg3[%c0_3, %c0_4] : memref<1x16xf32, #tpu.memory_space<vmem>>, vector<1x16xf32>
    %5 = vector.broadcast %4 : vector<1x16xf32> to vector<128x16xf32>
    %6 = arith.addf %3, %5 : vector<128x16xf32>
    %c0_5 = arith.constant 0 : index
    %c0_6 = arith.constant 0 : index
    %7 = vector.load %arg4[%c0_5, %c0_6] : memref<128x16xf32, #tpu.memory_space<vmem>>, vector<128x16xf32>
    tpu.vector_store %arg4[%c0_5, %c0_6], %6 {strides = array<i32>} : memref<128x16xf32, #tpu.memory_space<vmem>>, vector<128x16xf32>,
    return
  }
  func.func @transform_0(%arg0: i32) -> (i32, i32) {
    %c0_i32 = arith.constant 0 : i32
    %c0_i32_0 = arith.constant 0 : i32
    return %arg0, %c0_i32 : i32, i32
  }
  func.func @transform_1(%arg0: i32) -> (i32, i32) {
    %c0_i32 = arith.constant 0 : i32
    %c0_i32_0 = arith.constant 0 : i32
    %c0_i32_1 = arith.constant 0 : i32
    return %c0_i32, %c0_i32_0 : i32, i32
  }
  func.func @transform_2(%arg0: i32) -> (i32, i32) {
    %c0_i32 = arith.constant 0 : i32
    %c0_i32_0 = arith.constant 0 : i32
    %c0_i32_1 = arith.constant 0 : i32
    return %c0_i32, %c0_i32_0 : i32, i32
  }
  func.func @transform_3(%arg0: i32) -> (i32, i32) {
    %c0_i32 = arith.constant 0 : i32
    %c0_i32_0 = arith.constant 0 : i32
    return %arg0, %c0_i32 : i32, i32
  }
}

module attributes {stable_mosaic.version = 11 : i64} {
  func.func @kernel(%arg0: i32, %arg1: memref<128x32xf32, #tpu.memory_space<vmem>>, %arg2: memref<32x16xbf16, #tpu.memory_space<vmem>>, %arg3: memref<1x16xf32, #tpu.memory_space<vmem>>, %arg4: memref<128x16xf32, #tpu.memory_space<vmem>>, %arg5: memref<128x16xf32, #tpu.memory_space<vmem>>) attributes {dimension_semantics = [#tpu.dimension_semantics<parallel>], iteration_bounds = array<i64: 1>, scalar_prefetch = 0 : i64, scratch_operands = 0 : i64, tpu.core_type = #tpu.core_type<tc>, window_params = [{transform_indices = @transform_0, window_bounds = array<i64: 128, 32>}, {pipeline_mode = #tpu.pipeline_mode<synchronous>, transform_indices = @transform_1, window_bounds = array<i64: 32, 16>}, {pipeline_mode = #tpu.pipeline_mode<synchronous>, transform_indices = @transform_2, window_bounds = array<i64: 1, 16>}, {transform_indices = @transform_3, window_bounds = array<i64: 128, 16>}, {transform_indices = @transform_4, window_bounds = array<i64: 128, 16>}]} {
    %c0 = arith.constant 0 : index
    %c0_0 = arith.constant 0 : index
    %0 = vector.load %arg1[%c0, %c0_0] : memref<128x32xf32, #tpu.memory_space<vmem>>, vector<128x32xf32>
    %1 = arith.truncf %0 : vector<128x32xf32> to vector<128x32xbf16>
    %c0_1 = arith.constant 0 : index
    %c0_2 = arith.constant 0 : index
    %2 = vector.load %arg2[%c0_1, %c0_2] : memref<32x16xbf16, #tpu.memory_space<vmem>>, vector<32x16xbf16>
    %cst = arith.constant dense<0.000000e+00> : vector<128x16xf32>
    %3 = tpu.matmul %1, %2, %cst {dimension_numbers = #tpu.dot_dimension_numbers<[1], [0], [0], [1], [0, 0, 1, 1], [], []>} : vector<128x32xbf16>, vector<32x16xbf16>, vector<128x16xf32> -> vector<128x16xf32>
    %c0_3 = arith.constant 0 : index
    %c0_4 = arith.constant 0 : index
    %4 = vector.load %arg3[%c0_3, %c0_4] : memref<1x16xf32, #tpu.memory_space<vmem>>, vector<1x16xf32>
    %5 = vector.broadcast %4 : vector<1x16xf32> to vector<128x16xf32>
    %6 = arith.addf %3, %5 : vector<128x16xf32>
    %c0_5 = arith.constant 0 : index
    %c0_6 = arith.constant 0 : index
    %7 = vector.load %arg4[%c0_5, %c0_6] : memref<128x16xf32, #tpu.memory_space<vmem>>, vector<128x16xf32>
    %8 = arith.addf %6, %7 : vector<128x16xf32>
    %c0_7 = arith.constant 0 : index
    %c0_8 = arith.constant 0 : index
    %9 = vector.load %arg5[%c0_7, %c0_8] : memref<128x16xf32, #tpu.memory_space<vmem>>, vector<128x16xf32>
    tpu.vector_store %arg5[%c0_7, %c0_8], %8 {strides = array<i32>} : memref<128x16xf32, #tpu.memory_space<vmem>>, vector<128x16xf32>,
    return
  }
  func.func @transform_0(%arg0: i32) -> (i32, i32) {
    %c0_i32 = arith.constant 0 : i32
    %c0_i32_0 = arith.constant 0 : i32
    return %arg0, %c0_i32 : i32, i32
  }
  func.func @transform_1(%arg0: i32) -> (i32, i32) {
    %c0_i32 = arith.constant 0 : i32
    %c0_i32_0 = arith.constant 0 : i32
    %c0_i32_1 = arith.constant 0 : i32
    return %c0_i32, %c0_i32_0 : i32, i32
  }
  func.func @transform_2(%arg0: i32) -> (i32, i32) {
    %c0_i32 = arith.constant 0 : i32
    %c0_i32_0 = arith.constant 0 : i32
    %c0_i32_1 = arith.constant 0 : i32
    return %c0_i32, %c0_i32_0 : i32, i32
  }
  func.func @transform_3(%arg0: i32) -> (i32, i32) {
    %c0_i32 = arith.constant 0 : i32
    %c0_i32_0 = arith.constant 0 : i32
    return %arg0, %c0_i32 : i32, i32
  }
  func.func @transform_4(%arg0: i32) -> (i32, i32) {
    %c0_i32 = arith.constant 0 : i32
    %c0_i32_0 = arith.constant 0 : i32
    return %arg0, %c0_i32 : i32, i32
  }
}

module attributes {stable_mosaic.version = 11 : i64} {
  func.func @kernel(%arg0: i32, %arg1: i32, %arg2: memref<1x64x16xf32, #tpu.memory_space<vmem>>, %arg3: memref<1x64x16xf32, #tpu.memory_space<vmem>>, %arg4: memref<1x1x64xi32, #tpu.memory_space<vmem>>, %arg5: memref<1x64x1xi32, #tpu.memory_space<vmem>>, %arg6: memref<16x32xbf16, #tpu.memory_space<vmem>>, %arg7: memref<16x32xbf16, #tpu.memory_space<vmem>>, %arg8: memref<1x32xf32, #tpu.memory_space<vmem>>, %arg9: memref<1x64x32xf32, #tpu.memory_space<vmem>>) attributes {dimension_semantics = [#tpu.dimension_semantics<parallel>, #tpu.dimension_semantics<parallel>], iteration_bounds = array<i64: 2, 1>, scalar_prefetch = 0 : i64, scratch_operands = 0 : i64, tpu.core_type = #tpu.core_type<tc>, window_params = [{transform_indices = @transform_0, window_bounds = array<i64: 1, 64, 16>}, {transform_indices = @transform_1, window_bounds = array<i64: 1, 64, 16>}, {transform_indices = @transform_2, window_bounds = array<i64: 1, 1, 64>}, {transform_indices = @transform_3, window_bounds = array<i64: 1, 64, 1>}, {pipeline_mode = #tpu.pipeline_mode<synchronous>, transform_indices = @transform_4, window_bounds = array<i64: 16, 32>}, {pipeline_mode = #tpu.pipeline_mode<synchronous>, transform_indices = @transform_5, window_bounds = array<i64: 16, 32>}, {pipeline_mode = #tpu.pipeline_mode<synchronous>, transform_indices = @transform_6, window_bounds = array<i64: 1, 32>}, {transform_indices = @transform_7, window_bounds = array<i64: 1, 64, 32>}]} {
    %c0 = arith.constant 0 : index
    %c0_0 = arith.constant 0 : index
    %c0_1 = arith.constant 0 : index
    %0 = vector.load %arg2[%c0, %c0_0, %c0_1] : memref<1x64x16xf32, #tpu.memory_space<vmem>>, vector<1x64x16xf32>
    %1 = vector.shape_cast %0 : vector<1x64x16xf32> to vector<64x16xf32>
    %c0_2 = arith.constant 0 : index
    %c0_3 = arith.constant 0 : index
    %c0_4 = arith.constant 0 : index
    %2 = vector.load %arg3[%c0_2, %c0_3, %c0_4] : memref<1x64x16xf32, #tpu.memory_space<vmem>>, vector<1x64x16xf32>
    %3 = vector.shape_cast %2 : vector<1x64x16xf32> to vector<64x16xf32>
    %4 = arith.mulf %1, %1 : vector<64x16xf32>
    %cst = arith.constant dense<0.000000e+00> : vector<64xf32>
    %5 = vector.multi_reduction <add>, %4, %cst [1] : vector<64x16xf32> to vector<64xf32>
    %6 = vector.shape_cast %5 : vector<64xf32> to vector<64x1xf32>
    %cst_5 = arith.constant 1.000000e-24 : f32
    %7 = vector.broadcast %cst_5 : f32 to vector<64x1xf32>
    %8 = arith.maximumf %6, %7 : vector<64x1xf32>
    %9 = math.rsqrt %8 : vector<64x1xf32>
    %10 = vector.broadcast %9 : vector<64x1xf32> to vector<64x16xf32>
    %11 = arith.mulf %1, %10 : vector<64x16xf32>
    %12 = arith.truncf %11 : vector<64x16xf32> to vector<64x16xbf16>
    %13 = arith.mulf %3, %3 : vector<64x16xf32>
    %cst_6 = arith.constant dense<0.000000e+00> : vector<64xf32>
    %14 = vector.multi_reduction <add>, %13, %cst_6 [1] : vector<64x16xf32> to vector<64xf32>
    %15 = vector.shape_cast %14 : vector<64xf32> to vector<64x1xf32>
    %cst_7 = arith.constant 1.000000e-24 : f32
    %16 = vector.broadcast %cst_7 : f32 to vector<64x1xf32>
    %17 = arith.maximumf %15, %16 : vector<64x1xf32>
    %18 = math.rsqrt %17 : vector<64x1xf32>
    %19 = vector.broadcast %18 : vector<64x1xf32> to vector<64x16xf32>
    %20 = arith.mulf %3, %19 : vector<64x16xf32>
    %21 = arith.truncf %20 : vector<64x16xf32> to vector<64x16xbf16>
    %cst_8 = arith.constant dense<0.000000e+00> : vector<64x64xf32>
    %22 = tpu.matmul %21, %12, %cst_8 {dimension_numbers = #tpu.dot_dimension_numbers<[1], [1], [0], [0], [0, 0, 1, 0], [], []>} : vector<64x16xbf16>, vector<64x16xbf16>, vector<64x64xf32> -> vector<64x64xf32>
    %c0_9 = arith.constant 0 : index
    %c0_10 = arith.constant 0 : index
    %c0_11 = arith.constant 0 : index
    %23 = vector.load %arg5[%c0_9, %c0_10, %c0_11] : memref<1x64x1xi32, #tpu.memory_space<vmem>>, vector<1x64x1xi32>
    %24 = vector.shape_cast %23 : vector<1x64x1xi32> to vector<64x1xi32>
    %c0_12 = arith.constant 0 : index
    %c0_13 = arith.constant 0 : index
    %c0_14 = arith.constant 0 : index
    %25 = vector.load %arg4[%c0_12, %c0_13, %c0_14] : memref<1x1x64xi32, #tpu.memory_space<vmem>>, vector<1x1x64xi32>
    %26 = vector.shape_cast %25 : vector<1x1x64xi32> to vector<1x64xi32>
    %27 = vector.broadcast %24 : vector<64x1xi32> to vector<64x64xi32>
    %28 = vector.broadcast %26 : vector<1x64xi32> to vector<64x64xi32>
    %29 = arith.cmpi eq, %27, %28 : vector<64x64xi32>
    %cst_15 = arith.constant -1.000000e+30 : f32
    %30 = vector.broadcast %cst_15 : f32 to vector<64x64xf32>
    %31 = arith.select %29, %22, %30 : vector<64x64xi1>, vector<64x64xf32>
    %32 = tpu.iota {dimensions = array<i32: 1>} : vector<64x64xi32>
    %cst_16 = arith.constant dense<0xFF800000> : vector<64xf32>
    %33 = vector.multi_reduction <maximumf>, %31, %cst_16 [1] : vector<64x64xf32> to vector<64xf32>
    %34 = vector.shape_cast %33 : vector<64xf32> to vector<64x1xf32>
    %35 = vector.broadcast %34 : vector<64x1xf32> to vector<64x64xf32>
    %36 = arith.cmpf oge, %31, %35 : vector<64x64xf32>
    %c64_i32 = arith.constant 64 : i32
    %37 = vector.broadcast %c64_i32 : i32 to vector<64x64xi32>
    %38 = arith.select %36, %32, %37 : vector<64x64xi1>, vector<64x64xi32>
    %cst_17 = arith.constant dense<2147483647> : vector<64xi32>
    %39 = vector.multi_reduction <minsi>, %38, %cst_17 [1] : vector<64x64xi32> to vector<64xi32>
    %40 = vector.shape_cast %39 : vector<64xi32> to vector<64x1xi32>
    %41 = vector.broadcast %40 : vector<64x1xi32> to vector<64x64xi32>
    %42 = arith.cmpi eq, %32, %41 : vector<64x64xi32>
    %43 = arith.extui %42 : vector<64x64xi1> to vector<64x64xi32>
    %44 = arith.sitofp %43 : vector<64x64xi32> to vector<64x64xf32>
    %cst_18 = arith.constant 0.000000e+00 : f32
    %45 = vector.broadcast %cst_18 : f32 to vector<64x64xf32>
    %46 = arith.cmpf ogt, %44, %45 : vector<64x64xf32>
    %cst_19 = arith.constant -1.000000e+30 : f32
    %47 = vector.broadcast %cst_19 : f32 to vector<64x64xf32>
    %48 = arith.select %46, %47, %31 : vector<64x64xi1>, vector<64x64xf32>
    %cst_20 = arith.constant dense<0xFF800000> : vector<64xf32>
    %49 = vector.multi_reduction <maximumf>, %48, %cst_20 [1] : vector<64x64xf32> to vector<64xf32>
    %50 = vector.shape_cast %49 : vector<64xf32> to vector<64x1xf32>
    %51 = vector.broadcast %50 : vector<64x1xf32> to vector<64x64xf32>
    %52 = arith.cmpf oge, %48, %51 : vector<64x64xf32>
    %c64_i32_21 = arith.constant 64 : i32
    %53 = vector.broadcast %c64_i32_21 : i32 to vector<64x64xi32>
    %54 = arith.select %52, %32, %53 : vector<64x64xi1>, vector<64x64xi32>
    %cst_22 = arith.constant dense<2147483647> : vector<64xi32>
    %55 = vector.multi_reduction <minsi>, %54, %cst_22 [1] : vector<64x64xi32> to vector<64xi32>
    %56 = vector.shape_cast %55 : vector<64xi32> to vector<64x1xi32>
    %57 = vector.broadcast %56 : vector<64x1xi32> to vector<64x64xi32>
    %58 = arith.cmpi eq, %32, %57 : vector<64x64xi32>
    %59 = arith.extui %58 : vector<64x64xi1> to vector<64x64xi32>
    %60 = arith.sitofp %59 : vector<64x64xi32> to vector<64x64xf32>
    %cst_23 = arith.constant 0.000000e+00 : f32
    %61 = vector.broadcast %cst_23 : f32 to vector<64x64xf32>
    %62 = arith.cmpf ogt, %60, %61 : vector<64x64xf32>
    %cst_24 = arith.constant -1.000000e+30 : f32
    %63 = vector.broadcast %cst_24 : f32 to vector<64x64xf32>
    %64 = arith.select %62, %63, %48 : vector<64x64xi1>, vector<64x64xf32>
    %cst_25 = arith.constant dense<0xFF800000> : vector<64xf32>
    %65 = vector.multi_reduction <maximumf>, %64, %cst_25 [1] : vector<64x64xf32> to vector<64xf32>
    %66 = vector.shape_cast %65 : vector<64xf32> to vector<64x1xf32>
    %67 = vector.broadcast %66 : vector<64x1xf32> to vector<64x64xf32>
    %68 = arith.cmpf oge, %64, %67 : vector<64x64xf32>
    %c64_i32_26 = arith.constant 64 : i32
    %69 = vector.broadcast %c64_i32_26 : i32 to vector<64x64xi32>
    %70 = arith.select %68, %32, %69 : vector<64x64xi1>, vector<64x64xi32>
    %cst_27 = arith.constant dense<2147483647> : vector<64xi32>
    %71 = vector.multi_reduction <minsi>, %70, %cst_27 [1] : vector<64x64xi32> to vector<64xi32>
    %72 = vector.shape_cast %71 : vector<64xi32> to vector<64x1xi32>
    %73 = vector.broadcast %72 : vector<64x1xi32> to vector<64x64xi32>
    %74 = arith.cmpi eq, %32, %73 : vector<64x64xi32>
    %75 = arith.extui %74 : vector<64x64xi1> to vector<64x64xi32>
    %76 = arith.sitofp %75 : vector<64x64xi32> to vector<64x64xf32>
    %cst_28 = arith.constant 0.000000e+00 : f32
    %77 = vector.broadcast %cst_28 : f32 to vector<64x64xf32>
    %78 = arith.cmpf ogt, %76, %77 : vector<64x64xf32>
    %cst_29 = arith.constant -1.000000e+30 : f32
    %79 = vector.broadcast %cst_29 : f32 to vector<64x64xf32>
    %80 = arith.select %78, %79, %64 : vector<64x64xi1>, vector<64x64xf32>
    %cst_30 = arith.constant dense<0xFF800000> : vector<64xf32>
    %81 = vector.multi_reduction <maximumf>, %80, %cst_30 [1] : vector<64x64xf32> to vector<64xf32>
    %82 = vector.shape_cast %81 : vector<64xf32> to vector<64x1xf32>
    %83 = vector.broadcast %82 : vector<64x1xf32> to vector<64x64xf32>
    %84 = arith.cmpf oge, %80, %83 : vector<64x64xf32>
    %c64_i32_31 = arith.constant 64 : i32
    %85 = vector.broadcast %c64_i32_31 : i32 to vector<64x64xi32>
    %86 = arith.select %84, %32, %85 : vector<64x64xi1>, vector<64x64xi32>
    %cst_32 = arith.constant dense<2147483647> : vector<64xi32>
    %87 = vector.multi_reduction <minsi>, %86, %cst_32 [1] : vector<64x64xi32> to vector<64xi32>
    %88 = vector.shape_cast %87 : vector<64xi32> to vector<64x1xi32>
    %89 = vector.broadcast %88 : vector<64x1xi32> to vector<64x64xi32>
    %90 = arith.cmpi eq, %32, %89 : vector<64x64xi32>
    %91 = arith.extui %90 : vector<64x64xi1> to vector<64x64xi32>
    %92 = arith.sitofp %91 : vector<64x64xi32> to vector<64x64xf32>
    %93 = tpu.concatenate %44, %60, %76, %92 in 0 : vector<64x64xf32>, vector<64x64xf32>, vector<64x64xf32>, vector<64x64xf32> -> vector<256x64xf32>
    %94 = tpu.concatenate %34, %50, %66, %82 in 0 : vector<64x1xf32>, vector<64x1xf32>, vector<64x1xf32>, vector<64x1xf32> -> vector<256x1xf32>
    %cst_33 = arith.constant dense<0.000000e+00> : vector<256x16xf32>
    %95 = tpu.matmul %93, %1, %cst_33 {dimension_numbers = #tpu.dot_dimension_numbers<[1], [0], [0], [1], [0, 0, 1, 1], [], []>} : vector<256x64xf32>, vector<64x16xf32>, vector<256x16xf32> -> vector<256x16xf32>
    %cst_34 = arith.constant -1.000000e+29 : f32
    %96 = vector.broadcast %cst_34 : f32 to vector<256x1xf32>
    %97 = arith.cmpf ogt, %94, %96 : vector<256x1xf32>
    %cst_35 = arith.constant -1.000000e+30 : f32
    %98 = vector.shape_cast %97 : vector<256x1xi1> to vector<256x1xi1>
    %99 = vector.broadcast %98 : vector<256x1xi1> to vector<256x16xi1>
    %100 = vector.broadcast %cst_35 : f32 to vector<256x16xf32>
    %101 = arith.select %99, %95, %100 : vector<256x16xi1>, vector<256x16xf32>
    %102 = vector.extract_strided_slice %101 {offsets = [0, 0], sizes = [64, 16], strides = [1, 1]} : vector<256x16xf32> to vector<64x16xf32>
    %103 = vector.extract_strided_slice %101 {offsets = [64, 0], sizes = [64, 16], strides = [1, 1]} : vector<256x16xf32> to vector<64x16xf32>
    %104 = arith.maximumf %102, %103 : vector<64x16xf32>
    %105 = vector.extract_strided_slice %101 {offsets = [128, 0], sizes = [64, 16], strides = [1, 1]} : vector<256x16xf32> to vector<64x16xf32>
    %106 = arith.maximumf %104, %105 : vector<64x16xf32>
    %107 = vector.extract_strided_slice %101 {offsets = [192, 0], sizes = [64, 16], strides = [1, 1]} : vector<256x16xf32> to vector<64x16xf32>
    %108 = arith.maximumf %106, %107 : vector<64x16xf32>
    %109 = arith.subf %108, %3 : vector<64x16xf32>
    %110 = arith.truncf %109 : vector<64x16xf32> to vector<64x16xbf16>
    %111 = arith.truncf %3 : vector<64x16xf32> to vector<64x16xbf16>
    %c0_36 = arith.constant 0 : index
    %c0_37 = arith.constant 0 : index
    %112 = vector.load %arg6[%c0_36, %c0_37] : memref<16x32xbf16, #tpu.memory_space<vmem>>, vector<16x32xbf16>
    %cst_38 = arith.constant dense<0.000000e+00> : vector<64x32xf32>
    %113 = tpu.matmul %111, %112, %cst_38 {dimension_numbers = #tpu.dot_dimension_numbers<[1], [0], [0], [1], [0, 0, 1, 1], [], []>} : vector<64x16xbf16>, vector<16x32xbf16>, vector<64x32xf32> -> vector<64x32xf32>
    %c0_39 = arith.constant 0 : index
    %c0_40 = arith.constant 0 : index
    %114 = vector.load %arg7[%c0_39, %c0_40] : memref<16x32xbf16, #tpu.memory_space<vmem>>, vector<16x32xbf16>
    %cst_41 = arith.constant dense<0.000000e+00> : vector<64x32xf32>
    %115 = tpu.matmul %110, %114, %cst_41 {dimension_numbers = #tpu.dot_dimension_numbers<[1], [0], [0], [1], [0, 0, 1, 1], [], []>} : vector<64x16xbf16>, vector<16x32xbf16>, vector<64x32xf32> -> vector<64x32xf32>
    %116 = arith.addf %113, %115 : vector<64x32xf32>
    %c0_42 = arith.constant 0 : index
    %c0_43 = arith.constant 0 : index
    %117 = vector.load %arg8[%c0_42, %c0_43] : memref<1x32xf32, #tpu.memory_space<vmem>>, vector<1x32xf32>
    %118 = vector.broadcast %117 : vector<1x32xf32> to vector<64x32xf32>
    %119 = arith.addf %116, %118 : vector<64x32xf32>
    %cst_44 = arith.constant 5.000000e-01 : f32
    %120 = vector.broadcast %cst_44 : f32 to vector<64x32xf32>
    %121 = arith.mulf %120, %119 : vector<64x32xf32>
    %cst_45 = arith.constant 4.471500e-02 : f32
    %122 = vector.broadcast %cst_45 : f32 to vector<64x32xf32>
    %123 = arith.mulf %122, %119 : vector<64x32xf32>
    %124 = arith.mulf %123, %119 : vector<64x32xf32>
    %125 = arith.mulf %124, %119 : vector<64x32xf32>
    %126 = arith.addf %119, %125 : vector<64x32xf32>
    %cst_46 = arith.constant 0.797884583 : f32
    %127 = vector.broadcast %cst_46 : f32 to vector<64x32xf32>
    %128 = arith.mulf %127, %126 : vector<64x32xf32>
    %129 = math.tanh %128 : vector<64x32xf32>
    %cst_47 = arith.constant 1.000000e+00 : f32
    %130 = vector.broadcast %cst_47 : f32 to vector<64x32xf32>
    %131 = arith.addf %130, %129 : vector<64x32xf32>
    %132 = arith.mulf %121, %131 : vector<64x32xf32>
    %c0_48 = arith.constant 0 : index
    %c0_49 = arith.constant 0 : index
    %c0_50 = arith.constant 0 : index
    %133 = vector.load %arg9[%c0_48, %c0_49, %c0_50] : memref<1x64x32xf32, #tpu.memory_space<vmem>>, vector<1x64x32xf32>
    %134 = vector.shape_cast %133 : vector<1x64x32xf32> to vector<64x32xf32>
    %135 = vector.shape_cast %132 : vector<64x32xf32> to vector<1x64x32xf32>
    tpu.vector_store %arg9[%c0_48, %c0_49, %c0_50], %135 {strides = array<i32>} : memref<1x64x32xf32, #tpu.memory_space<vmem>>, vector<1x64x32xf32>,
    return
  }
  func.func @transform_0(%arg0: i32, %arg1: i32) -> (i32, i32, i32) {
    %c0_i32 = arith.constant 0 : i32
    %c0_i32_0 = arith.constant 0 : i32
    %c0_i32_1 = arith.constant 0 : i32
    return %arg0, %c0_i32, %c0_i32_0 : i32, i32, i32
  }
  func.func @transform_1(%arg0: i32, %arg1: i32) -> (i32, i32, i32) {
    %c0_i32 = arith.constant 0 : i32
    %c0_i32_0 = arith.constant 0 : i32
    return %arg0, %arg1, %c0_i32 : i32, i32, i32
  }
  func.func @transform_2(%arg0: i32, %arg1: i32) -> (i32, i32, i32) {
    %c0_i32 = arith.constant 0 : i32
    %c0_i32_0 = arith.constant 0 : i32
    %c0_i32_1 = arith.constant 0 : i32
    return %arg0, %c0_i32, %c0_i32_0 : i32, i32, i32
  }
  func.func @transform_3(%arg0: i32, %arg1: i32) -> (i32, i32, i32) {
    %c0_i32 = arith.constant 0 : i32
    %c0_i32_0 = arith.constant 0 : i32
    return %arg0, %arg1, %c0_i32 : i32, i32, i32
  }
  func.func @transform_4(%arg0: i32, %arg1: i32) -> (i32, i32) {
    %c0_i32 = arith.constant 0 : i32
    %c0_i32_0 = arith.constant 0 : i32
    %c0_i32_1 = arith.constant 0 : i32
    return %c0_i32, %c0_i32_0 : i32, i32
  }
  func.func @transform_5(%arg0: i32, %arg1: i32) -> (i32, i32) {
    %c0_i32 = arith.constant 0 : i32
    %c0_i32_0 = arith.constant 0 : i32
    %c0_i32_1 = arith.constant 0 : i32
    return %c0_i32, %c0_i32_0 : i32, i32
  }
  func.func @transform_6(%arg0: i32, %arg1: i32) -> (i32, i32) {
    %c0_i32 = arith.constant 0 : i32
    %c0_i32_0 = arith.constant 0 : i32
    %c0_i32_1 = arith.constant 0 : i32
    return %c0_i32, %c0_i32_0 : i32, i32
  }
  func.func @transform_7(%arg0: i32, %arg1: i32) -> (i32, i32, i32) {
    %c0_i32 = arith.constant 0 : i32
    %c0_i32_0 = arith.constant 0 : i32
    return %arg0, %arg1, %c0_i32 : i32, i32, i32
  }
}

</mosaic_0001>

<bundles_post_ra>
// kernel: grapher_forward.5
= control target key start
LH: loop header
LB: loop body
LE: loop exit
PB: predicated region body
PF: predicated region fallthrough
CT: control target
= control target key end

     0   :  { %vm54_vm0 = vcmask 130048   ;;  %s382_s1 = inlined_call_operand.vmem [shape: bf16[16,16], index: 1, kind: input, shape index: {}]   ;;  %s383_s0 = inlined_call_operand.vmem [shape: f32[128,16], index: 0, kind: input, shape index: {}]   ;;  %s384_s2 = inlined_call_operand.vmem [shape: f32[1,16], index: 2, kind: input, shape index: {}]   ;;  %s385_s3 = inlined_call_operand.vmem [shape: f32[128,16], index: 3, kind: output, shape index: {}]  }
   0x1   :  { %v235_v0 = vld [vmem:[%s382_s1] sm:$0xff]   ;;  %v16_v2 = vld [vmem:[%s383_s0 + $0x8] sm:$0xff]  ;;  %v17_v6 = vld [vmem:[%s383_s0 + $0x10] sm:$0xff] }
   0x2   :  { %v15_v1 = vld [vmem:[%s383_s0] sm:$0xff]  ;;  %215 = vmatprep.subr.bf16.mxu0 %v235_v0  ;;  %233 = vmatprep.subr.bf16.mxu1 %v235_v0  ;;  %v24_v5 = vld [vmem:[%s383_s0 + $0x48] sm:$0xff]  ;;  %v18_v7 = vld [vmem:[%s383_s0 + $0x18] sm:$0xff] }
   0x3   :  { %v23_v3 = vld [vmem:[%s383_s0 + $0x40] sm:$0xff]  ;;  %v31_v4 = vpack.c.bf16 %v16_v2, %v15_v1  ;;  %216 = vmatpush3.bf16.msra.mxu0 %v235_v0  ;;  %234 = vmatpush3.bf16.msra.mxu1 %v235_v0  ;;  %v32_v9 = vpack.c.bf16 %v18_v7, %v17_v6  ;;  %v25_v10 = vld [vmem:[%s383_s0 + $0x50] sm:$0xff]  ;;  %v26_v11 = vld [vmem:[%s383_s0 + $0x58] sm:$0xff] }
   0x4   :  { %v35_v8 = vpack.c.bf16 %v24_v5, %v23_v3  ;;  %v19_v12 = vld [vmem:[%s383_s0 + $0x20] sm:$0xff]  ;;  %v36_v13 = vpack.c.bf16 %v26_v11, %v25_v10  ;;  %v20_v14 = vld [vmem:[%s383_s0 + $0x28] sm:$0xff]  ;;  %v21_v19 = vld [vmem:[%s383_s0 + $0x30] sm:$0xff] }
   0x5   :  { %217 = vmatprep.mubr.msk.bf16.mxu0 %vm54_vm0, %v31_v4  ;;  %v27_v15 = vld [vmem:[%s383_s0 + $0x60] sm:$0xff]  ;;  %v28_v16 = vld [vmem:[%s383_s0 + $0x68] sm:$0xff]  ;;  %v33_v17 = vpack.c.bf16 %v20_v14, %v19_v12  ;;  %v22_v20 = vld [vmem:[%s383_s0 + $0x38] sm:$0xff] }
   0x6   :  { %225 = vmatprep.mubr.msk.bf16.mxu1 %vm54_vm0, %v35_v8  ;;  %v37_v18 = vpack.c.bf16 %v28_v16, %v27_v15  ;;  %218 = vmatmul.mubr.msk.bf16.vlgmr.msra.gmra.mrb[0].mxu0 %vm54_vm0, %v32_v9  ;;  %v29_v21 = vld [vmem:[%s383_s0 + $0x70] sm:$0xff]  ;;  %v30_v22 = vld [vmem:[%s383_s0 + $0x78] sm:$0xff]  ;;  %v34_v23 = vpack.c.bf16 %v22_v20, %v21_v19  ;;  %v196_v25 = vld [vmem:[%s384_s2] ss:$0 sm:$0xff] }
   0x7   :  { %226 = vmatmul.mubr.msk.bf16.vlgmr.msra.gmra.mrb[0].mxu1 %vm54_vm0, %v36_v13  ;;  %221 = vmatprep.mubr.msk.bf16.mxu0 %vm54_vm0, %v33_v17  ;;  %v38_v24 = vpack.c.bf16 %v30_v22, %v29_v21 }
   0x8   :  { %229 = vmatprep.mubr.msk.bf16.mxu1 %vm54_vm0, %v37_v18 }
   0xe   :  { %222 = vmatmul.mubr.msk.bf16.gmra.mrb[4].mxu0 %vm54_vm0, %v34_v23 }
   0xf   :  { %230 = vmatmul.mubr.msk.bf16.gmra.mrb[4].mxu1 %vm54_vm0, %v38_v24 }
  0xd9   :  { %v219_v26 = vpop.f32.mrb[0].mxu0 }
  0xda   :  { %v227_v27 = vpop.f32.mrb[0].mxu1  ;;  %v122_v28 = vadd.f32 %v219_v26, %v196_v25  ;;  %v113_v30 = vpop.f32.mrb[1].mxu0 }
  0xdb   :  { %v154_v29 = vadd.f32 %v227_v27, %v196_v25  ;;  %v145_v31 = vpop.f32.mrb[1].mxu1  ;;  %v114_v32 = vadd.f32 %v196_v25, %v113_v30  ;;  %v220_v34 = vpop.f32.mrb[2].mxu0 }
  0xdc   :  { %v146_v33 = vadd.f32 %v196_v25, %v145_v31  ;;  %v228_v35 = vpop.f32.mrb[2].mxu1  ;;  %178 = vst.msk [vmem:[%s385_s3 + $0x10] sm:$0xff] %vm54_vm0, %v122_v28  ;;  %v125_v36 = vadd.f32 %v220_v34, %v196_v25  ;;  %v116_v38 = vpop.f32.mrb[3].mxu0 }
  0xdd   :  { %186 = vst.msk [vmem:[%s385_s3 + $0x50] sm:$0xff] %vm54_vm0, %v154_v29  ;;  %v157_v37 = vadd.f32 %v228_v35, %v196_v25  ;;  %v148_v39 = vpop.f32.mrb[3].mxu1  ;;  %176 = vst.msk [vmem:[%s385_s3] sm:$0xff] %vm54_vm0, %v114_v32  ;;  %v117_v40 = vadd.f32 %v196_v25, %v116_v38 }
  0xde   :  { %184 = vst.msk [vmem:[%s385_s3 + $0x40] sm:$0xff] %vm54_vm0, %v146_v33  ;;  %v149_v41 = vadd.f32 %v196_v25, %v148_v39  ;;  %179 = vst.msk [vmem:[%s385_s3 + $0x18] sm:$0xff] %vm54_vm0, %v125_v36 }
  0xdf   :  { %187 = vst.msk [vmem:[%s385_s3 + $0x58] sm:$0xff] %vm54_vm0, %v157_v37  ;;  %177 = vst.msk [vmem:[%s385_s3 + $0x8] sm:$0xff] %vm54_vm0, %v117_v40 }
  0xe0   :  { %185 = vst.msk [vmem:[%s385_s3 + $0x48] sm:$0xff] %vm54_vm0, %v149_v41 }
  0xe1   :  { %v223_v42 = vpop.f32.mrb[4].mxu0 }
  0xe2   :  { %v231_v43 = vpop.f32.mrb[4].mxu1  ;;  %v138_v44 = vadd.f32 %v223_v42, %v196_v25  ;;  %v129_v46 = vpop.f32.mrb[5].mxu0 }
  0xe3   :  { %v170_v45 = vadd.f32 %v231_v43, %v196_v25  ;;  %v161_v47 = vpop.f32.mrb[5].mxu1  ;;  %v130_v48 = vadd.f32 %v196_v25, %v129_v46  ;;  %v224_v50 = vpop.f32.mrb[6].mxu0 }
  0xe4   :  { %v162_v49 = vadd.f32 %v196_v25, %v161_v47  ;;  %v232_v51 = vpop.f32.mrb[6].mxu1  ;;  %182 = vst.msk [vmem:[%s385_s3 + $0x30] sm:$0xff] %vm54_vm0, %v138_v44  ;;  %v141_v52 = vadd.f32 %v224_v50, %v196_v25  ;;  %v132_v54 = vpop.f32.mrb[7].mxu0 }
  0xe5   :  { %190 = vst.msk [vmem:[%s385_s3 + $0x70] sm:$0xff] %vm54_vm0, %v170_v45  ;;  %v173_v53 = vadd.f32 %v232_v51, %v196_v25  ;;  %v164_v55 = vpop.f32.mrb[7].mxu1  ;;  %180 = vst.msk [vmem:[%s385_s3 + $0x20] sm:$0xff] %vm54_vm0, %v130_v48  ;;  %v133_v56 = vadd.f32 %v196_v25, %v132_v54 }
  0xe6   :  { %188 = vst.msk [vmem:[%s385_s3 + $0x60] sm:$0xff] %vm54_vm0, %v162_v49  ;;  %v165_v57 = vadd.f32 %v196_v25, %v164_v55  ;;  %183 = vst.msk [vmem:[%s385_s3 + $0x38] sm:$0xff] %vm54_vm0, %v141_v52 }
  0xe7   :  { %191 = vst.msk [vmem:[%s385_s3 + $0x78] sm:$0xff] %vm54_vm0, %v173_v53  ;;  %181 = vst.msk [vmem:[%s385_s3 + $0x28] sm:$0xff] %vm54_vm0, %v133_v56 }
  0xe8   :  { %189 = vst.msk [vmem:[%s385_s3 + $0x68] sm:$0xff] %vm54_vm0, %v165_v57 }

// kernel: grapher_forward.7
= control target key start
LH: loop header
LB: loop body
LE: loop exit
PB: predicated region body
PF: predicated region fallthrough
CT: control target
= control target key end

     0   :  { %vm66_vm0 = vcmask 261120   ;;  %s514_s0 = inlined_call_operand.vmem [shape: f32[128,32], index: 0, kind: input, shape index: {}]   ;;  %s515_s1 = inlined_call_operand.vmem [shape: bf16[32,16], index: 1, kind: input, shape index: {}]   ;;  %s516_s2 = inlined_call_operand.vmem [shape: f32[1,16], index: 2, kind: input, shape index: {}]   ;;  %s517_s3 = inlined_call_operand.vmem [shape: f32[128,16], index: 3, kind: input, shape index: {}]   ;;  %s518_s4 = inlined_call_operand.hbm [shape: f32[128,16], index: 4, kind: output, shape index: {}]  }
   0x1   :  { %v301_v0 = vld [vmem:[%s515_s1] sm:$0xff]   ;;  %v302_v1 = vld [vmem:[%s515_s1 + $0x8] sm:$0xff]   ;;  %v21_v7 = vld [vmem:[%s514_s0 + $0x10] sm:$0xff] }
   0x2   :  { %274 = vmatprep.subr.bf16.mxu0 %v301_v0  ;;  %294 = vmatprep.subr.bf16.mxu1 %v301_v0  ;;  %v19_v2 = vld [vmem:[%s514_s0] sm:$0xff]  ;;  %v20_v3 = vld [vmem:[%s514_s0 + $0x8] sm:$0xff]  ;;  %v22_v8 = vld [vmem:[%s514_s0 + $0x18] sm:$0xff] }
   0x3   :  { %v27_v4 = vld [vmem:[%s514_s0 + $0x40] sm:$0xff]  ;;  %275 = vmatpush3.bf16.msra.mxu0 %v301_v0  ;;  %296 = vmatpush3.bf16.msra.mxu1 %v301_v0  ;;  %v35_v5 = vpack.c.bf16 %v20_v3, %v19_v2  ;;  %v28_v6 = vld [vmem:[%s514_s0 + $0x48] sm:$0xff]  ;;  %v29_v10 = vld [vmem:[%s514_s0 + $0x50] sm:$0xff]  ;;  %v36_v16 = vpack.c.bf16 %v22_v8, %v21_v7 }
   0x4   :  { %276 = vmatprep.subr.bf16.mxu0 %v302_v1  ;;  %295 = vmatprep.subr.bf16.mxu1 %v302_v1  ;;  %v39_v9 = vpack.c.bf16 %v28_v6, %v27_v4  ;;  %v30_v11 = vld [vmem:[%s514_s0 + $0x58] sm:$0xff]  ;;  %v23_v12 = vld [vmem:[%s514_s0 + $0x20] sm:$0xff]  ;;  %v24_v13 = vld [vmem:[%s514_s0 + $0x28] sm:$0xff] }
   0x5   :  { %278 = vmatprep.mubr.msk.bf16.mxu0 %vm66_vm0, %v35_v5  ;;  %v31_v14 = vld [vmem:[%s514_s0 + $0x60] sm:$0xff]  ;;  %v32_v15 = vld [vmem:[%s514_s0 + $0x68] sm:$0xff]  ;;  %v40_v17 = vpack.c.bf16 %v30_v11, %v29_v10  ;;  %v37_v18 = vpack.c.bf16 %v24_v13, %v23_v12 }
   0x6   :  { %286 = vmatprep.mubr.msk.bf16.mxu1 %vm66_vm0, %v39_v9  ;;  %v41_v19 = vpack.c.bf16 %v32_v15, %v31_v14 }
   0x7   :  { %277 = vmatpush3.bf16.msra.mxu0 %v302_v1  ;;  %297 = vmatpush3.bf16.msra.mxu1 %v302_v1 }
   0x8   :  { %9 = vsyncpa [#allocation3], 0  ;;  %v25_v20 = vld [vmem:[%s514_s0 + $0x30] sm:$0xff]  ;;  %v26_v21 = vld [vmem:[%s514_s0 + $0x38] sm:$0xff]  ;;  %vm220_vm1 = vcmask 130048   ;;  %s327_s25 = smov [#allocation2]  }
   0x9   :  { %v33_v22 = vld [vmem:[%s514_s0 + $0x70] sm:$0xff]  ;;  %v34_v23 = vld [vmem:[%s514_s0 + $0x78] sm:$0xff]  ;;  %v38_v24 = vpack.c.bf16 %v26_v21, %v25_v20  ;;  %v420_v26 = vld [vmem:[%s516_s2] ss:$0 sm:$0xff]  ;;  %s242_s1 = sshll.u32 %s327_s25, 4  ;;  %s243_s1 = int_to_ptr.vmem [resolvable:$true] %s242_s1 }
   0xa   :  { %279 = vmatmul.mubr.msk.bf16.vlgmr.msra.gmra.mrb[0].mxu0 %vm66_vm0, %v36_v16  ;;  %287 = vmatmul.mubr.msk.bf16.vlgmr.msra.gmra.mrb[0].mxu1 %vm66_vm0, %v40_v17  ;;  %v42_v25 = vpack.c.bf16 %v34_v23, %v33_v22  ;;  %v190_v28 = vld [vmem:[%s517_s3 + $0x10] sm:$0xff]  ;;  %v188_v34 = vld [vmem:[%s517_s3] sm:$0xff]  ;;  %v191_v40 = vld [vmem:[%s517_s3 + $0x18] sm:$0xff]  ;;  %p308_p1 = scmp.lt.s32.totalorder %s243_s1, %s243_s1 }
   0xb   :  { %282 = vmatprep.mubr.msk.bf16.mxu0 %vm66_vm0, %v37_v18  ;;  %290 = vmatprep.mubr.msk.bf16.mxu1 %vm66_vm0, %v41_v19  ;;  %v198_v30 = vld [vmem:[%s517_s3 + $0x50] sm:$0xff]  ;;  %v196_v36 = vld [vmem:[%s517_s3 + $0x40] sm:$0xff]  ;;  %v199_v42 = vld [vmem:[%s517_s3 + $0x58] sm:$0xff] }
   0xc   :  { %v189_v48 = vld [vmem:[%s517_s3 + $0x8] sm:$0xff]  ;;  %v194_v60 = vld [vmem:[%s517_s3 + $0x30] sm:$0xff]  ;;  %v192_v2 = vld [vmem:[%s517_s3 + $0x20] sm:$0xff] }
   0xd   :  { %v197_v50 = vld [vmem:[%s517_s3 + $0x48] sm:$0xff]  ;;  %v202_v62 = vld [vmem:[%s517_s3 + $0x70] sm:$0xff]  ;;  %v200_v4 = vld [vmem:[%s517_s3 + $0x60] sm:$0xff] }
   0xe   :  { %v195_v8 = vld [vmem:[%s517_s3 + $0x38] sm:$0xff]  ;;  %v193_v16 = vld [vmem:[%s517_s3 + $0x28] sm:$0xff] }
   0xf   :  { %v203_v10 = vld [vmem:[%s517_s3 + $0x78] sm:$0xff]  ;;  %v201_v18 = vld [vmem:[%s517_s3 + $0x68] sm:$0xff]  ;;  %s303_s3 = scalar_lea.vmem %s243_s1, 2048 }
  0x10   :  { %p304_p0 = scmp.ne.s32.totalorder %s243_s1, %s303_s3  ;;  %p309_p2 = scmp.lt.s32.totalorder %s303_s3, %s303_s3 }
  0x12   :  { %283 = vmatmul.mubr.msk.bf16.gmra.mrb[4].mxu0 %vm66_vm0, %v38_v24  ;;  %291 = vmatmul.mubr.msk.bf16.gmra.mrb[4].mxu1 %vm66_vm0, %v42_v25  ;;  %p310_p3 = por %p309_p2, %p308_p1 }
  0x14   :  { %p311_p4 = pnand %p310_p3, %p304_p0 }
  0xdd   :  { %v280_v27 = vpop.f32.mrb[0].mxu0  ;;  %v288_v29 = vpop.f32.mrb[0].mxu1 }
  0xde   :  { %v134_v31 = vadd.f32 %v280_v27, %v420_v26  ;;  %v166_v32 = vadd.f32 %v288_v29, %v420_v26  ;;  %v125_v33 = vpop.f32.mrb[1].mxu0  ;;  %v157_v35 = vpop.f32.mrb[1].mxu1 }
  0xdf   :  { %v126_v37 = vadd.f32 %v420_v26, %v125_v33  ;;  %v158_v38 = vadd.f32 %v420_v26, %v157_v35  ;;  %v281_v39 = vpop.f32.mrb[2].mxu0  ;;  %v289_v41 = vpop.f32.mrb[2].mxu1 }
  0xe0   :  { %v206_v43 = vadd.f32 %v190_v28, %v134_v31  ;;  %v214_v44 = vadd.f32 %v198_v30, %v166_v32  ;;  %v137_v45 = vadd.f32 %v281_v39, %v420_v26  ;;  %v169_v46 = vadd.f32 %v289_v41, %v420_v26  ;;  %v128_v47 = vpop.f32.mrb[3].mxu0  ;;  %v160_v49 = vpop.f32.mrb[3].mxu1 }
  0xe1   :  { %v204_v51 = vadd.f32 %v188_v34, %v126_v37  ;;  %v212_v52 = vadd.f32 %v196_v36, %v158_v38  ;;  %v129_v53 = vadd.f32 %v420_v26, %v128_v47  ;;  %v161_v54 = vadd.f32 %v420_v26, %v160_v49 }
  0xe2   :  { %223 = vst.msk [vmem:[#allocation2 + $0x10] sm:$0xff] %vm220_vm1, %v206_v43  ;;  %231 = vst.msk [vmem:[#allocation2 + $0x50] sm:$0xff] %vm220_vm1, %v214_v44  ;;  %v207_v55 = vadd.f32 %v191_v40, %v137_v45  ;;  %v215_v56 = vadd.f32 %v199_v42, %v169_v46 }
  0xe3   :  { %221 = vst.msk [vmem:[#allocation2] sm:$0xff] %vm220_vm1, %v204_v51  ;;  %229 = vst.msk [vmem:[#allocation2 + $0x40] sm:$0xff] %vm220_vm1, %v212_v52  ;;  %v205_v57 = vadd.f32 %v189_v48, %v129_v53  ;;  %v213_v58 = vadd.f32 %v197_v50, %v161_v54 }
  0xe4   :  { %224 = vst.msk [vmem:[#allocation2 + $0x18] sm:$0xff] %vm220_vm1, %v207_v55  ;;  %232 = vst.msk [vmem:[#allocation2 + $0x58] sm:$0xff] %vm220_vm1, %v215_v56 }
  0xe5   :  { %222 = vst.msk [vmem:[#allocation2 + $0x8] sm:$0xff] %vm220_vm1, %v205_v57  ;;  %230 = vst.msk [vmem:[#allocation2 + $0x48] sm:$0xff] %vm220_vm1, %v213_v58  ;;  %v284_v59 = vpop.f32.mrb[4].mxu0  ;;  %v292_v61 = vpop.f32.mrb[4].mxu1 }
  0xe6   :  { %v150_v63 = vadd.f32 %v284_v59, %v420_v26  ;;  %v182_v0 = vadd.f32 %v292_v61, %v420_v26  ;;  %v141_v1 = vpop.f32.mrb[5].mxu0  ;;  %v173_v3 = vpop.f32.mrb[5].mxu1 }
  0xe7   :  { %v142_v5 = vadd.f32 %v420_v26, %v141_v1  ;;  %v174_v6 = vadd.f32 %v420_v26, %v173_v3  ;;  %v285_v7 = vpop.f32.mrb[6].mxu0  ;;  %v293_v9 = vpop.f32.mrb[6].mxu1 }
  0xe8   :  { %v210_v11 = vadd.f32 %v194_v60, %v150_v63  ;;  %v218_v12 = vadd.f32 %v202_v62, %v182_v0  ;;  %v153_v13 = vadd.f32 %v285_v7, %v420_v26  ;;  %v185_v14 = vadd.f32 %v293_v9, %v420_v26  ;;  %v144_v15 = vpop.f32.mrb[7].mxu0  ;;  %v176_v17 = vpop.f32.mrb[7].mxu1 }
  0xe9   :  { %v208_v19 = vadd.f32 %v192_v2, %v142_v5  ;;  %v216_v20 = vadd.f32 %v200_v4, %v174_v6  ;;  %v145_v21 = vadd.f32 %v420_v26, %v144_v15  ;;  %v177_v22 = vadd.f32 %v420_v26, %v176_v17 }
  0xea   :  { %227 = vst.msk [vmem:[#allocation2 + $0x30] sm:$0xff] %vm220_vm1, %v210_v11  ;;  %235 = vst.msk [vmem:[#allocation2 + $0x70] sm:$0xff] %vm220_vm1, %v218_v12  ;;  %v211_v23 = vadd.f32 %v195_v8, %v153_v13  ;;  %v219_v24 = vadd.f32 %v203_v10, %v185_v14 }
  0xeb   :  { %225 = vst.msk [vmem:[#allocation2 + $0x20] sm:$0xff] %vm220_vm1, %v208_v19  ;;  %233 = vst.msk [vmem:[#allocation2 + $0x60] sm:$0xff] %vm220_vm1, %v216_v20  ;;  %v209_v25 = vadd.f32 %v193_v16, %v145_v21  ;;  %v217_v27 = vadd.f32 %v201_v18, %v177_v22 }
  0xec   :  { %228 = vst.msk [vmem:[#allocation2 + $0x38] sm:$0xff] %vm220_vm1, %v211_v23  ;;  %236 = vst.msk [vmem:[#allocation2 + $0x78] sm:$0xff] %vm220_vm1, %v219_v24 }
  0xed   :  { %226 = vst.msk [vmem:[#allocation2 + $0x28] sm:$0xff] %vm220_vm1, %v209_v25  ;;  %234 = vst.msk [vmem:[#allocation2 + $0x68] sm:$0xff] %vm220_vm1, %v217_v27 }
  0xee   :  { %314 = shalt.err (!%p311_p4)
}
  0xef   :  { %s315_s30 = scalar_lea.hbm %s518_s4, 2048 }
  0xf0   :  { %p316_p5 = scmp.ne.s32.totalorder %s518_s4, %s315_s30  ;;  %p319_p6 = scmp.lt.u32.totalorder %s315_s30, %s518_s4 }
  0xf2   :  { %p321_p7 = pnand %p319_p6, %p316_p5 }
  0xf4   :  { %324 = shalt.err (!%p321_p7)
}
  0xf5   :  { %s328_s9 = smov 128   ;;  %s329_s10 = smov 8  }
  0xf6   :  { %248 = dma.vmem_to_hbm [thread:$0]  %s243_s1, 2048, %s518_s4, [#allocation3], %s328_s9, %s328_s9, %s329_s10  }
  0xf7   :  { %325 = dma.done.wait [#allocation3], 2048  }
  0xf8   :  { %326 = vsyncadd [#allocation3], 4294965248 }
  0xf9   :  { %252 = vsyncpa [#allocation3], 1 }

// kernel: grapher_forward.4
= control target key start
LH: loop header
LB: loop body
LE: loop exit
PB: predicated region body
PF: predicated region fallthrough
CT: control target
= control target key end

     0   :  { %s3768_s12 = smov 0   ;;  %s6062_s0 = inlined_call_operand.vmem [shape: f32[2,14,14,16], index: 0, kind: input, shape index: {}]   ;;  %s6063_s1 = inlined_call_operand.vmem [shape: f32[7,7,16], index: 1, kind: input, shape index: {}]   ;;  %s6064_s2 = inlined_call_operand.vmem [shape: f32[1,16], index: 2, kind: input, shape index: {}]   ;;  %s6065_s3 = inlined_call_operand.vmem [shape: f32[2,8,8,16], index: 3, kind: output, shape index: {}]  }
   0x1 LB: > { %s3623_s13 = sadd.s32 4294967295, %s3746_s12   ;;  %p3627_p0 = scmp.ge.s32.totalorder %s3746_s12, 1  ;;  %s3746_s12 = sphi %s3768_s12, %s13_s12  }
   0x2   : > { %p137_p1 = scmp.lt.s32.totalorder %s3746_s12, 3 }
   0x4   : > { %p138_p2 = pnand %p3627_p0, %p137_p1 }
   0x6   : > { %141 = sbr.rel (%p138_p2) target bundleno = 570 (0x23a), region = 32 }
   0xd   : > { %p161_p3 = scmp.lt.s32.totalorder %s3623_s13, 1  ;;  %v207_v0 = vlaneseq  ;;  %v3779_v1 = vld [vmem:[%s6063_s1] sm:$0x7f]  ;;  %v3786_v2 = vld [vmem:[%s6063_s1 + $0x8] sm:$0x7f]  ;;  %vm383_vm0 = vcmask 1046528  }
   0xe   : > { %6121 = vst [vmem:[#allocation2_spill] sm:$0xff] %v3786_v2  ;;  %v3791_v3 = vld [vmem:[%s6063_s1 + $0x10] sm:$0x7f]  ;;  %v3798_v5 = vld [vmem:[%s6063_s1 + $0x18] sm:$0x7f]  ;;  %vm916_vm1 = vcmask 1045504  }
   0xf   : > { %s6204_s13 = smov (!%p161_p3, %s3623_s13), 1  ;;  %v3793_v4 = vshrl.u32 %v207_v0, 7  ;;  %v3803_v6 = vld [vmem:[%s6063_s1 + $0x20] sm:$0x7f]  ;;  %v3808_v7 = vld [vmem:[%s6063_s1 + $0x28] sm:$0x7f] }
  0x10   : > { %s3635_s26 = smul.u32 224, %s6204_s13  ;;  %v3814_v8 = vld [vmem:[%s6063_s1 + $0x30] sm:$0x7f]  ;;  %vm1449_vm2 = vcmask 1044480   ;;  %vm1982_vm3 = vcmask 1043456   ;;  %vm2515_vm4 = vcmask 1042432  }
  0x11   : > { %6122 = vst [vmem:[#allocation3_spill] sm:$0xff] %v3793_v4  ;;  %v209_v9 = vsub.s32 0, %v3793_v4  ;;  %v3818_v10 = vsub.s32 1, %v3793_v4  ;;  %v3821_v11 = vsub.s32 2, %v3793_v4  ;;  %vm3048_vm5 = vcmask 1041408  }
  0x12   : > { %s3826_s4 = scalar_lea.vmem %s6062_s0, %s3635_s26  ;;  %vm3559_vm6 = vcmask 130048  }
  0x13   : > { %6123 = vst [vmem:[#allocation4_spill] sm:$0xff] %v3821_v11  ;;  %v210_v12 = vrot.slane %v3779_v1, %v209_v9  ;;  %v230_v13 = vrot.slane %v3786_v2, %v209_v9  ;;  %v250_v14 = vrot.slane %v3791_v3, %v209_v9  ;;  %v3832_v15 = vrot.slane %v3798_v5, %v209_v9  ;;  %v3835_v16 = vld [vmem:[%s3826_s4] sm:$0xff]  ;;  %v3838_v17 = vld [vmem:[%s3826_s4 + $0x10] sm:$0xff] }
  0x14   : > { %6124 = vst [vmem:[#allocation5_spill] sm:$0xff] %v3835_v16  ;;  %v3841_v18 = vrot.slane %v3803_v6, %v209_v9  ;;  %v3844_v19 = vrot.slane %v3808_v7, %v209_v9  ;;  %v3847_v20 = vrot.slane %v3814_v8, %v209_v9  ;;  %v3851_v21 = vrot.slane %v3779_v1, %v3818_v10  ;;  %v3854_v22 = vld [vmem:[%s3826_s4 + $0x20] sm:$0xff]  ;;  %v3864_v27 = vld [vmem:[%s3826_s4 + $0x30] sm:$0xff] }
  0x15   : > { %v211_v23 = vmul.f32 %v210_v12, %v3835_v16  ;;  %v212_v24 = vmul.f32 %v210_v12, %v3838_v17  ;;  %v231_v25 = vmul.f32 %v230_v13, %v3838_v17  ;;  %v3861_v26 = vrot.slane %v3786_v2, %v3818_v10  ;;  %v3867_v28 = vld [vmem:[%s3826_s4 + $0x40] sm:$0xff]  ;;  %v3877_v33 = vld [vmem:[%s3826_s4 + $0x50] sm:$0xff] }
  0x16   : > { %v213_v29 = vmul.f32 %v210_v12, %v3854_v22  ;;  %v232_v30 = vmul.f32 %v230_v13, %v3854_v22  ;;  %v251_v31 = vmul.f32 %v250_v14, %v3854_v22  ;;  %v3874_v32 = vmul.f32 %v3851_v21, %v3835_v16  ;;  %v3884_v38 = vld [vmem:[%s3826_s4 + $0x60] sm:$0xff]  ;;  %v3887_v39 = vld [vmem:[%s3826_s4 + $0x70] sm:$0xff] }
  0x17   : > { %v214_v34 = vmul.f32 %v210_v12, %v3864_v27  ;;  %v215_v35 = vmul.f32 %v210_v12, %v3867_v28  ;;  %v233_v36 = vmul.f32 %v230_v13, %v3864_v27  ;;  %v234_v37 = vmul.f32 %v230_v13, %v3867_v28  ;;  %v3892_v44 = vld [vmem:[%s3826_s4 + $0x80] sm:$0xff]  ;;  %v3899_v49 = vld [vmem:[%s3826_s4 + $0x90] sm:$0xff] }
  0x18   : > { %v216_v40 = vmul.f32 %v210_v12, %v3877_v33  ;;  %v235_v41 = vmul.f32 %v230_v13, %v3877_v33  ;;  %v239_v42 = vadd.f32 %v231_v25, %v211_v23  ;;  %v240_v43 = vadd.f32 %v232_v30, %v212_v24  ;;  %6125 = vst [vmem:[#allocation6_spill] sm:$0xff] %v3899_v49 }
  0x19   : > { %v217_v45 = vmul.f32 %v210_v12, %v3884_v38  ;;  %v218_v46 = vmul.f32 %v210_v12, %v3887_v39  ;;  %v236_v47 = vmul.f32 %v230_v13, %v3884_v38  ;;  %v237_v48 = vmul.f32 %v230_v13, %v3887_v39  ;;  %v3910_v12 = vld [vmem:[%s3826_s4 + $0xa0] sm:$0xff] }
  0x1a   : > { %v238_v50 = vmul.f32 %v230_v13, %v3892_v44  ;;  %v241_v51 = vadd.f32 %v233_v36, %v213_v29  ;;  %v242_v52 = vadd.f32 %v234_v37, %v214_v34  ;;  %v243_v53 = vadd.f32 %v235_v41, %v215_v35  ;;  %6126 = vst [vmem:[#allocation7_spill] sm:$0xff] %v3910_v12 }
  0x1b   : > { %v244_v54 = vadd.f32 %v236_v47, %v216_v40  ;;  %v245_v55 = vadd.f32 %v237_v48, %v217_v45  ;;  %v252_v56 = vmul.f32 %v250_v14, %v3864_v27  ;;  %v253_v57 = vmul.f32 %v250_v14, %v3867_v28  ;;  %v3929_v45 = vld [vmem:[%s3826_s4 + $0xb0] sm:$0xff] }
  0x1c   : > { %v246_v58 = vadd.f32 %v238_v50, %v218_v46  ;;  %v254_v59 = vmul.f32 %v250_v14, %v3877_v33  ;;  %v255_v60 = vmul.f32 %v250_v14, %v3884_v38  ;;  %v256_v61 = vmul.f32 %v250_v14, %v3887_v39  ;;  %6127 = vst [vmem:[#allocation8_spill] sm:$0xff] %v3929_v45 }
  0x1d   : > { %v257_v62 = vmul.f32 %v250_v14, %v3892_v44  ;;  %v258_v63 = vmul.f32 %v250_v14, %v3899_v49  ;;  %v259_v0 = vadd.f32 %v251_v31, %v239_v42  ;;  %v260_v9 = vadd.f32 %v252_v56, %v240_v43 }
  0x1e   : > { %v261_v13 = vadd.f32 %v253_v57, %v241_v51  ;;  %v262_v23 = vadd.f32 %v254_v59, %v242_v52  ;;  %v263_v24 = vadd.f32 %v255_v60, %v243_v53  ;;  %v264_v25 = vadd.f32 %v256_v61, %v244_v54 }
  0x1f   : > { %v265_v29 = vadd.f32 %v257_v62, %v245_v55  ;;  %v266_v30 = vadd.f32 %v258_v63, %v246_v58  ;;  %v271_v34 = vmul.f32 %v3832_v15, %v3864_v27  ;;  %v272_v35 = vmul.f32 %v3832_v15, %v3867_v28  ;;  %v3948_v62 = vld [vmem:[%s3826_s4 + $0xc0] sm:$0xff] }
  0x20   : > { %v273_v14 = vmul.f32 %v3832_v15, %v3877_v33  ;;  %v274_v31 = vmul.f32 %v3832_v15, %v3884_v38  ;;  %v275_v36 = vmul.f32 %v3832_v15, %v3887_v39  ;;  %v276_v37 = vmul.f32 %v3832_v15, %v3892_v44  ;;  %6128 = vst [vmem:[#allocation9_spill] sm:$0xff] %v3948_v62 }
  0x21   : > { %v277_v40 = vmul.f32 %v3832_v15, %v3899_v49  ;;  %v278_v41 = vmul.f32 %v3832_v15, %v3910_v12  ;;  %v279_v42 = vadd.f32 %v271_v34, %v259_v0  ;;  %v280_v43 = vadd.f32 %v272_v35, %v260_v9 }
  0x22   : > { %v281_v46 = vadd.f32 %v273_v14, %v261_v13  ;;  %v282_v47 = vadd.f32 %v274_v31, %v262_v23  ;;  %v283_v48 = vadd.f32 %v275_v36, %v263_v24  ;;  %v284_v50 = vadd.f32 %v276_v37, %v264_v25 }
  0x23   : > { %v285_v51 = vadd.f32 %v277_v40, %v265_v29  ;;  %v286_v52 = vadd.f32 %v278_v41, %v266_v30  ;;  %v291_v53 = vmul.f32 %v3841_v18, %v3867_v28  ;;  %v292_v54 = vmul.f32 %v3841_v18, %v3877_v33  ;;  %v3967_v40 = vld [vmem:[%s3826_s4 + $0xd0] sm:$0xff] }
  0x24   : > { %v293_v15 = vmul.f32 %v3841_v18, %v3884_v38  ;;  %v294_v55 = vmul.f32 %v3841_v18, %v3887_v39  ;;  %v295_v56 = vmul.f32 %v3841_v18, %v3892_v44  ;;  %v296_v57 = vmul.f32 %v3841_v18, %v3899_v49  ;;  %6129 = vst [vmem:[#allocation10_spill] sm:$0xff] %v3967_v40 }
  0x25   : > { %v297_v58 = vmul.f32 %v3841_v18, %v3910_v12  ;;  %v298_v59 = vmul.f32 %v3841_v18, %v3929_v45  ;;  %v299_v60 = vadd.f32 %v291_v53, %v279_v42  ;;  %v300_v61 = vadd.f32 %v292_v54, %v280_v43 }
  0x26   : > { %v301_v63 = vadd.f32 %v293_v15, %v281_v46  ;;  %v302_v0 = vadd.f32 %v294_v55, %v282_v47  ;;  %v303_v9 = vadd.f32 %v295_v56, %v283_v48  ;;  %v304_v13 = vadd.f32 %v296_v57, %v284_v50  ;;  %v3985_v55 = vld [vmem:[%s3826_s4 + $0x18] sm:$0x3f]  ;;  %v3988_v56 = vld [vmem:[%s3826_s4 + $0x28] sm:$0x3f] }
  0x27   : > { %v305_v23 = vadd.f32 %v297_v58, %v285_v51  ;;  %v306_v24 = vadd.f32 %v298_v59, %v286_v52  ;;  %v311_v25 = vmul.f32 %v3844_v19, %v3877_v33  ;;  %v312_v29 = vmul.f32 %v3844_v19, %v3884_v38  ;;  %v3974_v51 = vld [vmem:[%s3826_s4 + $0x8] sm:$0x3f] }
  0x28   : > { %v313_v18 = vmul.f32 %v3844_v19, %v3887_v39  ;;  %v314_v30 = vmul.f32 %v3844_v19, %v3892_v44  ;;  %v315_v34 = vmul.f32 %v3844_v19, %v3899_v49  ;;  %v316_v35 = vmul.f32 %v3844_v19, %v3910_v12  ;;  %6130 = vst [vmem:[#allocation11_spill] sm:$0xff] %v3974_v51 }
  0x29   : > { %v317_v14 = vmul.f32 %v3844_v19, %v3929_v45  ;;  %v318_v31 = vmul.f32 %v3844_v19, %v3948_v62  ;;  %v319_v36 = vadd.f32 %v311_v25, %v299_v60  ;;  %v320_v37 = vadd.f32 %v312_v29, %v300_v61  ;;  %v3995_v61 = vld [vmem:[%s3826_s4 + $0x38] sm:$0x3f]  ;;  %v4004_v25 = vld [vmem:[%s3826_s4 + $0x68] sm:$0x3f] }
  0x2a   : > { %v321_v41 = vadd.f32 %v313_v18, %v301_v63  ;;  %v322_v42 = vadd.f32 %v314_v30, %v302_v0  ;;  %v323_v43 = vadd.f32 %v315_v34, %v303_v9  ;;  %v324_v46 = vadd.f32 %v316_v35, %v304_v13  ;;  %v3998_v63 = vld [vmem:[%s3826_s4 + $0x48] sm:$0x3f]  ;;  %v4011_v34 = vld [vmem:[%s3826_s4 + $0x78] sm:$0x3f] }
  0x2b   : > { %v325_v47 = vadd.f32 %v317_v14, %v305_v23  ;;  %v326_v48 = vadd.f32 %v318_v31, %v306_v24  ;;  %v331_v50 = vmul.f32 %v3847_v20, %v3884_v38  ;;  %v332_v19 = vmul.f32 %v3847_v20, %v3887_v39  ;;  %6131 = vst [vmem:[#allocation12_spill] sm:$0xff] %v3998_v63  ;;  %v4001_v24 = vld [vmem:[%s3826_s4 + $0x58] sm:$0x3f] }
  0x2c   : > { %v333_v52 = vmul.f32 %v3847_v20, %v3892_v44  ;;  %v334_v53 = vmul.f32 %v3847_v20, %v3899_v49  ;;  %v335_v54 = vmul.f32 %v3847_v20, %v3910_v12  ;;  %v336_v15 = vmul.f32 %v3847_v20, %v3929_v45  ;;  %6132 = vst [vmem:[#allocation13_spill] sm:$0xff] %v4001_v24 }
  0x2d   : > { %v337_v57 = vmul.f32 %v3847_v20, %v3948_v62  ;;  %v338_v58 = vmul.f32 %v3847_v20, %v3967_v40  ;;  %v339_v59 = vadd.f32 %v331_v50, %v319_v36  ;;  %v340_v60 = vadd.f32 %v332_v19, %v320_v37 }
  0x2e   : > { %v341_v0 = vadd.f32 %v333_v52, %v321_v41  ;;  %v342_v9 = vadd.f32 %v334_v53, %v322_v42  ;;  %v343_v13 = vadd.f32 %v335_v54, %v323_v43  ;;  %v344_v23 = vadd.f32 %v336_v15, %v324_v46 }
  0x2f   : > { %v345_v29 = vadd.f32 %v337_v57, %v325_v47  ;;  %v346_v18 = vadd.f32 %v338_v58, %v326_v48  ;;  %v352_v30 = vmul.f32 %v3851_v21, %v3974_v51  ;;  %v353_v20 = vmul.f32 %v3851_v21, %v3838_v17 }
  0x30   : > { %v354_v35 = vmul.f32 %v3851_v21, %v3985_v55  ;;  %v355_v14 = vmul.f32 %v3851_v21, %v3854_v22  ;;  %v356_v31 = vmul.f32 %v3851_v21, %v3988_v56  ;;  %v357_v36 = vmul.f32 %v3851_v21, %v3864_v27 }
  0x31   : > { %v358_v37 = vmul.f32 %v3851_v21, %v3995_v61  ;;  %v359_v41 = vmul.f32 %v3851_v21, %v3867_v28  ;;  %v360_v42 = vmul.f32 %v3851_v21, %v3998_v63  ;;  %v361_v43 = vmul.f32 %v3851_v21, %v3877_v33 }
  0x32   : > { %v362_v46 = vmul.f32 %v3851_v21, %v4001_v24  ;;  %v363_v47 = vmul.f32 %v3851_v21, %v3884_v38  ;;  %v364_v48 = vmul.f32 %v3851_v21, %v4004_v25  ;;  %v365_v50 = vmul.f32 %v3851_v21, %v3887_v39 }
  0x33   : > { %v366_v19 = vmul.f32 %v3851_v21, %v4011_v34  ;;  %v384_v52 = vrot.slane %v3874_v32, 1  ;;  %v385_v53 = vrot.slane %v352_v30, 1  ;;  %v387_v54 = vrot.slane %v353_v20, 1 }
  0x34   : > { %v388_v15 = vrot.slane %v354_v35, 1  ;;  %v390_v57 = vrot.slane %v355_v14, 1  ;;  %v391_v58 = vrot.slane %v356_v31, 1  ;;  %v393_v4 = vrot.slane %v357_v36, 1 }
  0x35   : > { %v386_v51 = vsel %vm383_vm0, %v384_v52, %v385_v53  ;;  %v394_v16 = vrot.slane %v358_v37, 1  ;;  %v396_v40 = vrot.slane %v359_v41, 1  ;;  %v397_v62 = vrot.slane %v360_v42, 1 }
  0x36   : > { %v389_v45 = vsel %vm383_vm0, %v387_v54, %v388_v15  ;;  %v392_v12 = vsel %vm383_vm0, %v390_v57, %v391_v58  ;;  %v399_v49 = vrot.slane %v361_v43, 1  ;;  %v400_v2 = vrot.slane %v362_v46, 1 }
  0x37   : > { %v395_v21 = vsel %vm383_vm0, %v393_v4, %v394_v16  ;;  %v398_v32 = vsel %vm383_vm0, %v396_v40, %v397_v62  ;;  %v402_v30 = vrot.slane %v363_v47, 1  ;;  %v403_v20 = vrot.slane %v364_v48, 1  ;;  %v4055_v40 = vld [vmem:[%s3826_s4 + $0x88] sm:$0x3f] }
  0x38   : > { %v401_v35 = vsel %vm383_vm0, %v399_v49, %v400_v2  ;;  %v405_v14 = vrot.slane %v365_v50, 1  ;;  %v406_v31 = vrot.slane %v366_v19, 1  ;;  %v416_v36 = vadd.f32 %v386_v51, %v339_v59 }
  0x39   : > { %v404_v37 = vsel %vm383_vm0, %v402_v30, %v403_v20  ;;  %v417_v41 = vadd.f32 %v389_v45, %v340_v60  ;;  %v418_v42 = vadd.f32 %v392_v12, %v341_v0  ;;  %v419_v52 = vadd.f32 %v395_v21, %v342_v9 }
  0x3a   : > { %v407_v43 = vsel %vm383_vm0, %v405_v14, %v406_v31  ;;  %v420_v46 = vadd.f32 %v398_v32, %v343_v13  ;;  %v421_v53 = vadd.f32 %v401_v35, %v344_v23  ;;  %v422_v4 = vadd.f32 %v404_v37, %v345_v29 }
  0x3b   : > { %v423_v16 = vadd.f32 %v407_v43, %v346_v18  ;;  %v428_v62 = vmul.f32 %v3861_v26, %v3838_v17  ;;  %v429_v2 = vmul.f32 %v3861_v26, %v3985_v55  ;;  %v430_v49 = vmul.f32 %v3861_v26, %v3854_v22 }
  0x3c   : > { %v431_v12 = vmul.f32 %v3861_v26, %v3988_v56  ;;  %v432_v45 = vmul.f32 %v3861_v26, %v3864_v27  ;;  %v433_v51 = vmul.f32 %v3861_v26, %v3995_v61  ;;  %v434_v59 = vmul.f32 %v3861_v26, %v3867_v28 }
  0x3d   : > { %v435_v60 = vmul.f32 %v3861_v26, %v3998_v63  ;;  %v436_v0 = vmul.f32 %v3861_v26, %v3877_v33  ;;  %v437_v9 = vmul.f32 %v3861_v26, %v4001_v24  ;;  %v438_v13 = vmul.f32 %v3861_v26, %v3884_v38 }
  0x3e   : > { %v439_v23 = vmul.f32 %v3861_v26, %v4004_v25  ;;  %v440_v29 = vmul.f32 %v3861_v26, %v3887_v39  ;;  %v441_v18 = vmul.f32 %v3861_v26, %v4011_v34  ;;  %v442_v47 = vmul.f32 %v3861_v26, %v3892_v44 }
  0x3f   : > { %v443_v48 = vmul.f32 %v3861_v26, %v4055_v40  ;;  %v460_v50 = vrot.slane %v428_v62, 1  ;;  %v461_v19 = vrot.slane %v429_v2, 1  ;;  %v463_v54 = vrot.slane %v430_v49, 1 }
  0x40   : > { %v464_v15 = vrot.slane %v431_v12, 1  ;;  %v466_v57 = vrot.slane %v432_v45, 1  ;;  %v467_v58 = vrot.slane %v433_v51, 1  ;;  %v469_v21 = vrot.slane %v434_v59, 1 }
  0x41   : > { %v462_v32 = vsel %vm383_vm0, %v460_v50, %v461_v19  ;;  %v470_v30 = vrot.slane %v435_v60, 1  ;;  %v472_v20 = vrot.slane %v436_v0, 1  ;;  %v473_v35 = vrot.slane %v437_v9, 1 }
  0x42   : > { %v465_v14 = vsel %vm383_vm0, %v463_v54, %v464_v15  ;;  %v468_v31 = vsel %vm383_vm0, %v466_v57, %v467_v58  ;;  %v475_v37 = vrot.slane %v438_v13, 1  ;;  %v476_v43 = vrot.slane %v439_v23, 1 }
  0x43   : > { %v471_v26 = vsel %vm383_vm0, %v469_v21, %v470_v30  ;;  %v474_v62 = vsel %vm383_vm0, %v472_v20, %v473_v35  ;;  %v478_v2 = vrot.slane %v440_v29, 1  ;;  %v479_v49 = vrot.slane %v441_v18, 1  ;;  %v6135_v30 = vld [vmem:[#allocation6_spill] sm:$0xff] }
  0x44   : > { %v477_v12 = vsel %vm383_vm0, %v475_v37, %v476_v43  ;;  %v481_v45 = vrot.slane %v442_v47, 1  ;;  %v482_v51 = vrot.slane %v443_v48, 1  ;;  %v492_v59 = vadd.f32 %v462_v32, %v416_v36 }
  0x45   : > { %v480_v60 = vsel %vm383_vm0, %v478_v2, %v479_v49  ;;  %v493_v0 = vadd.f32 %v465_v14, %v417_v41  ;;  %v494_v9 = vadd.f32 %v468_v31, %v418_v42  ;;  %v495_v50 = vadd.f32 %v471_v26, %v419_v52 }
  0x46   : > { %v483_v13 = vsel %vm383_vm0, %v481_v45, %v482_v51  ;;  %v496_v23 = vadd.f32 %v474_v62, %v420_v46  ;;  %v497_v19 = vadd.f32 %v477_v12, %v421_v53  ;;  %v498_v54 = vadd.f32 %v480_v60, %v422_v4  ;;  %v4118_v46 = vld [vmem:[%s3826_s4 + $0x98] sm:$0x3f] }
  0x47   : > { %v499_v15 = vadd.f32 %v483_v13, %v423_v16  ;;  %v503_v29 = vrot.slane %v3791_v3, %v3818_v10  ;;  %v4095_v18 = vrot.slane %v3798_v5, %v3818_v10  ;;  %v4099_v36 = vrot.slane %v3803_v6, %v3818_v10  ;;  %v6133_v3 = vld [vmem:[#allocation2_spill] sm:$0xff] }
  0x48   : > { %v4103_v41 = vrot.slane %v3808_v7, %v3818_v10  ;;  %v4107_v42 = vrot.slane %v3814_v8, %v3818_v10  ;;  %v4111_v52 = vrot.slane %v3779_v1, %v3821_v11  ;;  %v4115_v5 = vrot.slane %v6133_v3, %v3821_v11 }
  0x49   : > { %v504_v6 = vmul.f32 %v503_v29, %v3854_v22  ;;  %v505_v53 = vmul.f32 %v503_v29, %v3988_v56  ;;  %v506_v7 = vmul.f32 %v503_v29, %v3864_v27  ;;  %v507_v4 = vmul.f32 %v503_v29, %v3995_v61 }
  0x4a   : > { %6134 = vst [vmem:[#allocation2_spill] sm:$0xff] %v4115_v5  ;;  %v508_v8 = vmul.f32 %v503_v29, %v3867_v28  ;;  %v509_v10 = vmul.f32 %v503_v29, %v3998_v63  ;;  %v510_v1 = vmul.f32 %v503_v29, %v3877_v33  ;;  %v511_v16 = vmul.f32 %v503_v29, %v4001_v24 }
  0x4b   : > { %v512_v47 = vmul.f32 %v503_v29, %v3884_v38  ;;  %v513_v48 = vmul.f32 %v503_v29, %v4004_v25  ;;  %v514_v57 = vmul.f32 %v503_v29, %v3887_v39  ;;  %v515_v58 = vmul.f32 %v503_v29, %v4011_v34 }
  0x4c   : > { %v516_v21 = vmul.f32 %v503_v29, %v3892_v44  ;;  %v517_v32 = vmul.f32 %v503_v29, %v4055_v40  ;;  %v518_v20 = vmul.f32 %v503_v29, %v6135_v30  ;;  %v519_v35 = vmul.f32 %v503_v29, %v4118_v46 }
  0x4d   : > { %v536_v14 = vrot.slane %v504_v6, 1  ;;  %v537_v31 = vrot.slane %v505_v53, 1  ;;  %v539_v37 = vrot.slane %v506_v7, 1  ;;  %v540_v43 = vrot.slane %v507_v4, 1 }
  0x4e   : > { %v542_v26 = vrot.slane %v508_v8, 1  ;;  %v543_v62 = vrot.slane %v509_v10, 1  ;;  %v545_v2 = vrot.slane %v510_v1, 1  ;;  %v546_v49 = vrot.slane %v511_v16, 1 }
  0x4f   : > { %v538_v12 = vsel %vm383_vm0, %v536_v14, %v537_v31  ;;  %v541_v45 = vsel %vm383_vm0, %v539_v37, %v540_v43  ;;  %v548_v51 = vrot.slane %v512_v47, 1  ;;  %v549_v60 = vrot.slane %v513_v48, 1 }
  0x50   : > { %v544_v13 = vsel %vm383_vm0, %v542_v26, %v543_v62  ;;  %v547_v3 = vsel %vm383_vm0, %v545_v2, %v546_v49  ;;  %v551_v11 = vrot.slane %v514_v57, 1  ;;  %v552_v29 = vrot.slane %v515_v58, 1  ;;  %v6136_v2 = vld [vmem:[#allocation7_spill] sm:$0xff] }
  0x51   : > { %v550_v6 = vsel %vm383_vm0, %v548_v51, %v549_v60  ;;  %v554_v53 = vrot.slane %v516_v21, 1  ;;  %v555_v7 = vrot.slane %v517_v32, 1  ;;  %v557_v4 = vrot.slane %v518_v20, 1  ;;  %v4147_v21 = vld [vmem:[%s3826_s4 + $0xa8] sm:$0x3f] }
  0x52   : > { %v553_v8 = vsel %vm383_vm0, %v551_v11, %v552_v29  ;;  %v558_v10 = vrot.slane %v519_v35, 1  ;;  %v568_v1 = vadd.f32 %v538_v12, %v492_v59  ;;  %v569_v16 = vadd.f32 %v541_v45, %v493_v0 }
  0x53   : > { %v556_v47 = vsel %vm383_vm0, %v554_v53, %v555_v7  ;;  %v570_v48 = vadd.f32 %v544_v13, %v494_v9  ;;  %v571_v14 = vadd.f32 %v547_v3, %v495_v50  ;;  %v572_v31 = vadd.f32 %v550_v6, %v496_v23 }
  0x54   : > { %v559_v37 = vsel %vm383_vm0, %v557_v4, %v558_v10  ;;  %v573_v57 = vadd.f32 %v553_v8, %v497_v19  ;;  %v574_v58 = vadd.f32 %v556_v47, %v498_v54  ;;  %v580_v43 = vmul.f32 %v4095_v18, %v3864_v27 }
  0x55   : > { %v575_v32 = vadd.f32 %v559_v37, %v499_v15  ;;  %v581_v11 = vmul.f32 %v4095_v18, %v3995_v61  ;;  %v582_v59 = vmul.f32 %v4095_v18, %v3867_v28  ;;  %v583_v0 = vmul.f32 %v4095_v18, %v3998_v63 }
  0x56   : > { %v584_v9 = vmul.f32 %v4095_v18, %v3877_v33  ;;  %v585_v50 = vmul.f32 %v4095_v18, %v4001_v24  ;;  %v586_v23 = vmul.f32 %v4095_v18, %v3884_v38  ;;  %v587_v19 = vmul.f32 %v4095_v18, %v4004_v25 }
  0x57   : > { %v588_v54 = vmul.f32 %v4095_v18, %v3887_v39  ;;  %v589_v15 = vmul.f32 %v4095_v18, %v4011_v34  ;;  %v590_v20 = vmul.f32 %v4095_v18, %v3892_v44  ;;  %v591_v35 = vmul.f32 %v4095_v18, %v4055_v40 }
  0x58   : > { %v592_v26 = vmul.f32 %v4095_v18, %v6135_v30  ;;  %v593_v62 = vmul.f32 %v4095_v18, %v4118_v46  ;;  %v594_v49 = vmul.f32 %v4095_v18, %v6136_v2  ;;  %v595_v12 = vmul.f32 %v4095_v18, %v4147_v21 }
  0x59   : > { %v612_v45 = vrot.slane %v580_v43, 1  ;;  %v613_v51 = vrot.slane %v581_v11, 1  ;;  %v615_v60 = vrot.slane %v582_v59, 1  ;;  %v616_v13 = vrot.slane %v583_v0, 1 }
  0x5a   : > { %v618_v3 = vrot.slane %v584_v9, 1  ;;  %v619_v29 = vrot.slane %v585_v50, 1  ;;  %v621_v6 = vrot.slane %v586_v23, 1  ;;  %v622_v53 = vrot.slane %v587_v19, 1 }
  0x5b   : > { %v614_v7 = vsel %vm383_vm0, %v612_v45, %v613_v51  ;;  %v617_v4 = vsel %vm383_vm0, %v615_v60, %v616_v13  ;;  %v624_v8 = vrot.slane %v588_v54, 1  ;;  %v625_v10 = vrot.slane %v589_v15, 1 }
  0x5c   : > { %v620_v47 = vsel %vm383_vm0, %v618_v3, %v619_v29  ;;  %v623_v37 = vsel %vm383_vm0, %v621_v6, %v622_v53  ;;  %v627_v5 = vrot.slane %v590_v20, 1  ;;  %v628_v18 = vrot.slane %v591_v35, 1  ;;  %v6137_v6 = vld [vmem:[#allocation8_spill] sm:$0xff] }
  0x5d   : > { %v626_v43 = vsel %vm383_vm0, %v624_v8, %v625_v10  ;;  %v630_v11 = vrot.slane %v592_v26, 1  ;;  %v631_v59 = vrot.slane %v593_v62, 1  ;;  %v633_v0 = vrot.slane %v594_v49, 1  ;;  %v4190_v26 = vld [vmem:[%s3826_s4 + $0xb8] sm:$0x3f] }
  0x5e   : > { %v629_v9 = vsel %vm383_vm0, %v627_v5, %v628_v18  ;;  %v634_v50 = vrot.slane %v595_v12, 1  ;;  %v644_v23 = vadd.f32 %v614_v7, %v568_v1  ;;  %v645_v19 = vadd.f32 %v617_v4, %v569_v16 }
  0x5f   : > { %v632_v54 = vsel %vm383_vm0, %v630_v11, %v631_v59  ;;  %v646_v15 = vadd.f32 %v620_v47, %v570_v48  ;;  %v647_v45 = vadd.f32 %v623_v37, %v571_v14  ;;  %v648_v51 = vadd.f32 %v626_v43, %v572_v31 }
  0x60   : > { %v635_v60 = vsel %vm383_vm0, %v633_v0, %v634_v50  ;;  %v649_v20 = vadd.f32 %v629_v9, %v573_v57  ;;  %v650_v35 = vadd.f32 %v632_v54, %v574_v58  ;;  %v656_v13 = vmul.f32 %v4099_v36, %v3867_v28 }
  0x61   : > { %v651_v62 = vadd.f32 %v635_v60, %v575_v32  ;;  %v657_v5 = vmul.f32 %v4099_v36, %v3998_v63  ;;  %v658_v1 = vmul.f32 %v4099_v36, %v3877_v33  ;;  %v659_v16 = vmul.f32 %v4099_v36, %v4001_v24 }
  0x62   : > { %v660_v48 = vmul.f32 %v4099_v36, %v3884_v38  ;;  %v661_v14 = vmul.f32 %v4099_v36, %v4004_v25  ;;  %v662_v31 = vmul.f32 %v4099_v36, %v3887_v39  ;;  %v663_v57 = vmul.f32 %v4099_v36, %v4011_v34 }
  0x63   : > { %v664_v58 = vmul.f32 %v4099_v36, %v3892_v44  ;;  %v665_v32 = vmul.f32 %v4099_v36, %v4055_v40  ;;  %v666_v49 = vmul.f32 %v4099_v36, %v6135_v30  ;;  %v667_v12 = vmul.f32 %v4099_v36, %v4118_v46 }
  0x64   : > { %v668_v3 = vmul.f32 %v4099_v36, %v6136_v2  ;;  %v669_v29 = vmul.f32 %v4099_v36, %v4147_v21  ;;  %v670_v53 = vmul.f32 %v4099_v36, %v6137_v6  ;;  %v671_v7 = vmul.f32 %v4099_v36, %v4190_v26 }
  0x65   : > { %v688_v4 = vrot.slane %v656_v13, 1  ;;  %v689_v8 = vrot.slane %v657_v5, 1  ;;  %v691_v10 = vrot.slane %v658_v1, 1  ;;  %v692_v47 = vrot.slane %v659_v16, 1 }
  0x66   : > { %v694_v37 = vrot.slane %v660_v48, 1  ;;  %v695_v18 = vrot.slane %v661_v14, 1  ;;  %v697_v43 = vrot.slane %v662_v31, 1  ;;  %v698_v11 = vrot.slane %v663_v57, 1 }
  0x67   : > { %v690_v59 = vsel %vm383_vm0, %v688_v4, %v689_v8  ;;  %v693_v0 = vsel %vm383_vm0, %v691_v10, %v692_v47  ;;  %v700_v9 = vrot.slane %v664_v58, 1  ;;  %v701_v50 = vrot.slane %v665_v32, 1 }
  0x68   : > { %v696_v54 = vsel %vm383_vm0, %v694_v37, %v695_v18  ;;  %v699_v60 = vsel %vm383_vm0, %v697_v43, %v698_v11  ;;  %v703_v63 = vrot.slane %v666_v49, 1  ;;  %v704_v36 = vrot.slane %v667_v12, 1  ;;  %v6138_v43 = vld [vmem:[#allocation9_spill] sm:$0xff] }
  0x69   : > { %v702_v13 = vsel %vm383_vm0, %v700_v9, %v701_v50  ;;  %v706_v5 = vrot.slane %v668_v3, 1  ;;  %v707_v1 = vrot.slane %v669_v29, 1  ;;  %v709_v16 = vrot.slane %v670_v53, 1  ;;  %v4233_v3 = vld [vmem:[%s3826_s4 + $0xc8] sm:$0x3f] }
  0x6a   : > { %v705_v48 = vsel %vm383_vm0, %v703_v63, %v704_v36  ;;  %v710_v14 = vrot.slane %v671_v7, 1  ;;  %v720_v31 = vadd.f32 %v690_v59, %v644_v23  ;;  %v721_v57 = vadd.f32 %v693_v0, %v645_v19 }
  0x6b   : > { %v708_v58 = vsel %vm383_vm0, %v706_v5, %v707_v1  ;;  %v722_v32 = vadd.f32 %v696_v54, %v646_v15  ;;  %v723_v4 = vadd.f32 %v699_v60, %v647_v45  ;;  %v724_v8 = vadd.f32 %v702_v13, %v648_v51 }
  0x6c   : > { %v711_v10 = vsel %vm383_vm0, %v709_v16, %v710_v14  ;;  %v725_v49 = vadd.f32 %v705_v48, %v649_v20  ;;  %v726_v12 = vadd.f32 %v708_v58, %v650_v35  ;;  %v732_v47 = vmul.f32 %v4103_v41, %v3877_v33 }
  0x6d   : > { %v727_v29 = vadd.f32 %v711_v10, %v651_v62  ;;  %v733_v63 = vmul.f32 %v4103_v41, %v4001_v24  ;;  %v734_v23 = vmul.f32 %v4103_v41, %v3884_v38  ;;  %v735_v19 = vmul.f32 %v4103_v41, %v4004_v25 }
  0x6e   : > { %v736_v15 = vmul.f32 %v4103_v41, %v3887_v39  ;;  %v737_v45 = vmul.f32 %v4103_v41, %v4011_v34  ;;  %v738_v51 = vmul.f32 %v4103_v41, %v3892_v44  ;;  %v739_v20 = vmul.f32 %v4103_v41, %v4055_v40 }
  0x6f   : > { %v740_v35 = vmul.f32 %v4103_v41, %v6135_v30  ;;  %v741_v62 = vmul.f32 %v4103_v41, %v4118_v46  ;;  %v742_v53 = vmul.f32 %v4103_v41, %v6136_v2  ;;  %v743_v7 = vmul.f32 %v4103_v41, %v4147_v21 }
  0x70   : > { %v744_v37 = vmul.f32 %v4103_v41, %v6137_v6  ;;  %v745_v18 = vmul.f32 %v4103_v41, %v4190_v26  ;;  %v746_v11 = vmul.f32 %v4103_v41, %v6138_v43  ;;  %v747_v59 = vmul.f32 %v4103_v41, %v4233_v3 }
  0x71   : > { %v764_v0 = vrot.slane %v732_v47, 1  ;;  %v765_v9 = vrot.slane %v733_v63, 1  ;;  %v767_v50 = vrot.slane %v734_v23, 1  ;;  %v768_v54 = vrot.slane %v735_v19, 1 }
  0x72   : > { %v770_v60 = vrot.slane %v736_v15, 1  ;;  %v771_v36 = vrot.slane %v737_v45, 1  ;;  %v773_v13 = vrot.slane %v738_v51, 1  ;;  %v774_v5 = vrot.slane %v739_v20, 1 }
  0x73   : > { %v766_v1 = vsel %vm383_vm0, %v764_v0, %v765_v9  ;;  %v769_v16 = vsel %vm383_vm0, %v767_v50, %v768_v54  ;;  %v776_v48 = vrot.slane %v740_v35, 1  ;;  %v777_v14 = vrot.slane %v741_v62, 1 }
  0x74   : > { %v772_v58 = vsel %vm383_vm0, %v770_v60, %v771_v36  ;;  %v775_v10 = vsel %vm383_vm0, %v773_v13, %v774_v5  ;;  %v779_v24 = vrot.slane %v742_v53, 1  ;;  %v780_v41 = vrot.slane %v743_v7, 1  ;;  %v6139_v60 = vld [vmem:[#allocation10_spill] sm:$0xff] }
  0x75   : > { %v778_v47 = vsel %vm383_vm0, %v776_v48, %v777_v14  ;;  %v782_v63 = vrot.slane %v744_v37, 1  ;;  %v783_v23 = vrot.slane %v745_v18, 1  ;;  %v785_v19 = vrot.slane %v746_v11, 1  ;;  %v4276_v37 = vld [vmem:[%s3826_s4 + $0xd8] sm:$0x3f] }
  0x76   : > { %v781_v15 = vsel %vm383_vm0, %v779_v24, %v780_v41  ;;  %v786_v45 = vrot.slane %v747_v59, 1  ;;  %v796_v51 = vadd.f32 %v766_v1, %v720_v31  ;;  %v797_v20 = vadd.f32 %v769_v16, %v721_v57 }
  0x77   : > { %v784_v35 = vsel %vm383_vm0, %v782_v63, %v783_v23  ;;  %v798_v62 = vadd.f32 %v772_v58, %v722_v32  ;;  %v799_v0 = vadd.f32 %v775_v10, %v723_v4  ;;  %v800_v9 = vadd.f32 %v778_v47, %v724_v8 }
  0x78   : > { %v787_v50 = vsel %vm383_vm0, %v785_v19, %v786_v45  ;;  %v801_v53 = vadd.f32 %v781_v15, %v725_v49  ;;  %v802_v7 = vadd.f32 %v784_v35, %v726_v12  ;;  %v808_v54 = vmul.f32 %v4107_v42, %v3884_v38 }
  0x79   : > { %v803_v18 = vadd.f32 %v787_v50, %v727_v29  ;;  %v809_v24 = vmul.f32 %v4107_v42, %v4004_v25  ;;  %v810_v31 = vmul.f32 %v4107_v42, %v3887_v39  ;;  %v811_v57 = vmul.f32 %v4107_v42, %v4011_v34 }
  0x7a   : > { %v812_v32 = vmul.f32 %v4107_v42, %v3892_v44  ;;  %v813_v4 = vmul.f32 %v4107_v42, %v4055_v40  ;;  %v814_v8 = vmul.f32 %v4107_v42, %v6135_v30  ;;  %v815_v49 = vmul.f32 %v4107_v42, %v4118_v46 }
  0x7b   : > { %v816_v12 = vmul.f32 %v4107_v42, %v6136_v2  ;;  %v817_v29 = vmul.f32 %v4107_v42, %v4147_v21  ;;  %v818_v11 = vmul.f32 %v4107_v42, %v6137_v6  ;;  %v819_v44 = vmul.f32 %v4107_v42, %v4190_v26 }
  0x7c   : > { %v820_v59 = vmul.f32 %v4107_v42, %v6138_v43  ;;  %v821_v30 = vmul.f32 %v4107_v42, %v4233_v3  ;;  %v822_v36 = vmul.f32 %v4107_v42, %v6139_v60  ;;  %v823_v2 = vmul.f32 %v4107_v42, %v4276_v37 }
  0x7d   : > { %v840_v13 = vrot.slane %v808_v54, 1  ;;  %v841_v5 = vrot.slane %v809_v24, 1  ;;  %v843_v1 = vrot.slane %v810_v31, 1  ;;  %v844_v16 = vrot.slane %v811_v57, 1 }
  0x7e   : > { %v846_v6 = vrot.slane %v812_v32, 1  ;;  %v847_v48 = vrot.slane %v813_v4, 1  ;;  %v849_v14 = vrot.slane %v814_v8, 1  ;;  %v850_v58 = vrot.slane %v815_v49, 1 }
  0x7f   : > { %v842_v10 = vsel %vm383_vm0, %v840_v13, %v841_v5  ;;  %v845_v43 = vsel %vm383_vm0, %v843_v1, %v844_v16  ;;  %v852_v41 = vrot.slane %v816_v12, 1  ;;  %v853_v47 = vrot.slane %v817_v29, 1  ;;  %v6143_v13 = vld [vmem:[#allocation13_spill] sm:$0xff] }
  0x80   : > { %v848_v63 = vsel %vm383_vm0, %v846_v6, %v847_v48  ;;  %v851_v23 = vsel %vm383_vm0, %v849_v14, %v850_v58  ;;  %v855_v19 = vrot.slane %v818_v11, 1  ;;  %v856_v42 = vrot.slane %v819_v44, 1  ;;  %v6140_v44 = vld [vmem:[#allocation5_spill] sm:$0xff] }
  0x81   : > { %v854_v15 = vsel %vm383_vm0, %v852_v41, %v853_v47  ;;  %v858_v45 = vrot.slane %v820_v59, 1  ;;  %v859_v35 = vrot.slane %v821_v30, 1  ;;  %v861_v50 = vrot.slane %v822_v36, 1  ;;  %v6141_v30 = vld [vmem:[#allocation11_spill] sm:$0xff] }
  0x82   : > { %v857_v54 = vsel %vm383_vm0, %v855_v19, %v856_v42  ;;  %v862_v24 = vrot.slane %v823_v2, 1  ;;  %v872_v31 = vadd.f32 %v842_v10, %v796_v51  ;;  %v873_v57 = vadd.f32 %v845_v43, %v797_v20 }
  0x83   : > { %v860_v32 = vsel %vm383_vm0, %v858_v45, %v859_v35  ;;  %v874_v4 = vadd.f32 %v848_v63, %v798_v62  ;;  %v875_v8 = vadd.f32 %v851_v23, %v799_v0  ;;  %v876_v49 = vadd.f32 %v854_v15, %v800_v9 }
  0x84   : > { %v863_v12 = vsel %vm383_vm0, %v861_v50, %v862_v24  ;;  %v877_v29 = vadd.f32 %v857_v54, %v801_v53  ;;  %v878_v11 = vadd.f32 %v860_v32, %v802_v7  ;;  %v884_v60 = vmul.f32 %v4111_v52, %v6140_v44 }
  0x85   : > { %v879_v59 = vadd.f32 %v863_v12, %v803_v18  ;;  %v885_v36 = vmul.f32 %v4111_v52, %v6141_v30  ;;  %v886_v51 = vmul.f32 %v4111_v52, %v3838_v17  ;;  %v887_v20 = vmul.f32 %v4111_v52, %v3985_v55  ;;  %v6142_v18 = vld [vmem:[#allocation12_spill] sm:$0xff] }
  0x86   : > { %v888_v62 = vmul.f32 %v4111_v52, %v3854_v22  ;;  %v889_v0 = vmul.f32 %v4111_v52, %v3988_v56  ;;  %v890_v9 = vmul.f32 %v4111_v52, %v3864_v27  ;;  %v891_v53 = vmul.f32 %v4111_v52, %v3995_v61 }
  0x87   : > { %v892_v7 = vmul.f32 %v4111_v52, %v3867_v28  ;;  %v893_v17 = vmul.f32 %v4111_v52, %v6142_v18  ;;  %v894_v2 = vmul.f32 %v4111_v52, %v3877_v33  ;;  %v895_v22 = vmul.f32 %v4111_v52, %v6143_v13 }
  0x88   : > { %v896_v5 = vmul.f32 %v4111_v52, %v3884_v38  ;;  %v897_v27 = vmul.f32 %v4111_v52, %v4004_v25  ;;  %v898_v1 = vmul.f32 %v4111_v52, %v3887_v39  ;;  %v899_v28 = vmul.f32 %v4111_v52, %v4011_v34 }
  0x89   : > { %v917_v16 = vrot.slane %v884_v60, 2  ;;  %v918_v6 = vrot.slane %v885_v36, 2  ;;  %v920_v48 = vrot.slane %v886_v51, 2  ;;  %v921_v14 = vrot.slane %v887_v20, 2 }
  0x8a   : > { %v923_v33 = vrot.slane %v888_v62, 2  ;;  %v924_v58 = vrot.slane %v889_v0, 2  ;;  %v926_v10 = vrot.slane %v890_v9, 2  ;;  %v927_v43 = vrot.slane %v891_v53, 2  ;;  %v4357_v62 = vld [vmem:[%s3826_s4 + $0x10] sm:$0xff]  ;;  %v6145_v0 = vld [vmem:[#allocation2_spill] sm:$0xff] }
  0x8b   : > { %v919_v41 = vsel %vm916_vm1, %v917_v16, %v918_v6  ;;  %v922_v38 = vsel %vm916_vm1, %v920_v48, %v921_v14  ;;  %v929_v47 = vrot.slane %v892_v7, 2  ;;  %v930_v63 = vrot.slane %v893_v17, 2  ;;  %6144 = vst [vmem:[#allocation6_spill] sm:$0xff] %v4357_v62  ;;  %v4378_v53 = vld [vmem:[%s3826_s4 + $0x40] sm:$0xff]  ;;  %v4385_v17 = vld [vmem:[%s3826_s4 + $0x50] sm:$0xff] }
  0x8c   : > { %v925_v23 = vsel %vm916_vm1, %v923_v33, %v924_v58  ;;  %v928_v39 = vsel %vm916_vm1, %v926_v10, %v927_v43  ;;  %v932_v19 = vrot.slane %v894_v2, 2  ;;  %v933_v52 = vrot.slane %v895_v22, 2  ;;  %v4406_v48 = vld [vmem:[%s3826_s4 + $0x80] sm:$0xff] }
  0x8d   : > { %v931_v42 = vsel %vm916_vm1, %v929_v47, %v930_v63  ;;  %v935_v15 = vrot.slane %v896_v5, 2  ;;  %v936_v45 = vrot.slane %v897_v27, 2  ;;  %v938_v35 = vrot.slane %v898_v1, 2  ;;  %v4392_v5 = vld [vmem:[%s3826_s4 + $0x60] sm:$0xff] }
  0x8e   : > { %v934_v50 = vsel %vm916_vm1, %v932_v19, %v933_v52  ;;  %v939_v54 = vrot.slane %v899_v28, 2  ;;  %v949_v24 = vadd.f32 %v919_v41, %v872_v31  ;;  %v950_v32 = vadd.f32 %v922_v38, %v873_v57  ;;  %v4399_v28 = vld [vmem:[%s3826_s4 + $0x70] sm:$0xff] }
  0x8f   : > { %v937_v12 = vsel %vm916_vm1, %v935_v15, %v936_v45  ;;  %v951_v44 = vadd.f32 %v925_v23, %v874_v4  ;;  %v952_v60 = vadd.f32 %v928_v39, %v875_v8  ;;  %v953_v30 = vadd.f32 %v931_v42, %v876_v49  ;;  %v4364_v4 = vld [vmem:[%s3826_s4 + $0x20] sm:$0xff] }
  0x90   : > { %v940_v36 = vsel %vm916_vm1, %v938_v35, %v939_v54  ;;  %v954_v51 = vadd.f32 %v934_v50, %v877_v29  ;;  %v955_v20 = vadd.f32 %v937_v12, %v878_v11  ;;  %v961_v9 = vmul.f32 %v4357_v62, %v6145_v0  ;;  %6146 = vst [vmem:[#allocation7_spill] sm:$0xff] %v4364_v4  ;;  %v4371_v29 = vld [vmem:[%s3826_s4 + $0x30] sm:$0xff] }
  0x91   : > { %v956_v31 = vadd.f32 %v940_v36, %v879_v59  ;;  %v962_v57 = vmul.f32 %v6145_v0, %v3985_v55  ;;  %v963_v8 = vmul.f32 %v4364_v4, %v6145_v0  ;;  %v964_v49 = vmul.f32 %v6145_v0, %v3988_v56 }
  0x92   : > { %v965_v11 = vmul.f32 %v4371_v29, %v6145_v0  ;;  %v966_v59 = vmul.f32 %v6145_v0, %v3995_v61  ;;  %v967_v55 = vmul.f32 %v4378_v53, %v6145_v0  ;;  %v968_v7 = vmul.f32 %v6145_v0, %v6142_v18 }
  0x93   : > { %v969_v2 = vmul.f32 %v4385_v17, %v6145_v0  ;;  %v970_v22 = vmul.f32 %v6145_v0, %v6143_v13  ;;  %v971_v27 = vmul.f32 %v4392_v5, %v6145_v0  ;;  %v972_v1 = vmul.f32 %v6145_v0, %v4004_v25 }
  0x94   : > { %v973_v16 = vmul.f32 %v4399_v28, %v6145_v0  ;;  %v974_v6 = vmul.f32 %v6145_v0, %v4011_v34  ;;  %v975_v14 = vmul.f32 %v4406_v48, %v6145_v0  ;;  %v976_v33 = vmul.f32 %v6145_v0, %v4055_v40 }
  0x95   : > { %v993_v58 = vrot.slane %v961_v9, 2  ;;  %v994_v10 = vrot.slane %v962_v57, 2  ;;  %v996_v43 = vrot.slane %v963_v8, 2  ;;  %v997_v41 = vrot.slane %v964_v49, 2 }
  0x96   : > { %v999_v38 = vrot.slane %v965_v11, 2  ;;  %v1000_v47 = vrot.slane %v966_v59, 2  ;;  %v1002_v63 = vrot.slane %v967_v55, 2  ;;  %v1003_v23 = vrot.slane %v968_v7, 2 }
  0x97   : > { %v995_v39 = vsel %vm916_vm1, %v993_v58, %v994_v10  ;;  %v998_v19 = vsel %vm916_vm1, %v996_v43, %v997_v41  ;;  %v1005_v52 = vrot.slane %v969_v2, 2  ;;  %v1006_v42 = vrot.slane %v970_v22, 2 }
  0x98   : > { %v1001_v15 = vsel %vm916_vm1, %v999_v38, %v1000_v47  ;;  %v1004_v45 = vsel %vm916_vm1, %v1002_v63, %v1003_v23  ;;  %v1008_v35 = vrot.slane %v971_v27, 2  ;;  %v1009_v50 = vrot.slane %v972_v1, 2  ;;  %v4423_v1 = vld [vmem:[%s6063_s1 + $0x10] sm:$0x7f] }
  0x99   : > { %v1007_v54 = vsel %vm916_vm1, %v1005_v52, %v1006_v42  ;;  %v1011_v12 = vrot.slane %v973_v16, 2  ;;  %v1012_v36 = vrot.slane %v974_v6, 2  ;;  %v1014_v0 = vrot.slane %v975_v14, 2  ;;  %v6147_v16 = vld [vmem:[#allocation4_spill] sm:$0xff] }
  0x9a   : > { %v1010_v9 = vsel %vm916_vm1, %v1008_v35, %v1009_v50  ;;  %v1015_v57 = vrot.slane %v976_v33, 2  ;;  %v1025_v8 = vadd.f32 %v995_v39, %v949_v24  ;;  %v1026_v49 = vadd.f32 %v998_v19, %v950_v32  ;;  %v4430_v24 = vld [vmem:[%s6063_s1 + $0x18] sm:$0x7f]  ;;  %v4469_v52 = vld [vmem:[%s3826_s4 + $0x90] sm:$0xff] }
  0x9b   : > { %v1013_v11 = vsel %vm916_vm1, %v1011_v12, %v1012_v36  ;;  %v1027_v59 = vadd.f32 %v1001_v15, %v951_v44  ;;  %v1028_v55 = vadd.f32 %v1004_v45, %v952_v60  ;;  %v1029_v7 = vadd.f32 %v1007_v54, %v953_v30  ;;  %v4439_v44 = vld [vmem:[%s6063_s1 + $0x20] sm:$0x7f]  ;;  %v4448_v30 = vld [vmem:[%s6063_s1 + $0x28] sm:$0x7f] }
  0x9c   : > { %v1016_v2 = vsel %vm916_vm1, %v1014_v0, %v1015_v57  ;;  %v1030_v22 = vadd.f32 %v1010_v9, %v954_v51  ;;  %v1031_v27 = vadd.f32 %v1013_v11, %v955_v20  ;;  %v1036_v6 = vrot.slane %v4423_v1, %v6147_v16  ;;  %6148 = vst [vmem:[#allocation8_spill] sm:$0xff] %v4439_v44 }
  0x9d   : > { %v1032_v14 = vadd.f32 %v1016_v2, %v956_v31  ;;  %v4434_v32 = vrot.slane %v4430_v24, %v6147_v16  ;;  %v4443_v60 = vrot.slane %v4439_v44, %v6147_v16  ;;  %6149 = vst [vmem:[#allocation9_spill] sm:$0xff] %v4448_v30  ;;  %v4452_v51 = vrot.slane %v4448_v30, %v6147_v16 }
  0x9e   : > { %v1037_v20 = vmul.f32 %v4364_v4, %v1036_v6  ;;  %v1038_v31 = vmul.f32 %v1036_v6, %v3988_v56  ;;  %v1039_v33 = vmul.f32 %v4371_v29, %v1036_v6  ;;  %v1040_v58 = vmul.f32 %v1036_v6, %v3995_v61 }
  0x9f   : > { %v1041_v10 = vmul.f32 %v4378_v53, %v1036_v6  ;;  %v1042_v43 = vmul.f32 %v1036_v6, %v6142_v18  ;;  %v1043_v41 = vmul.f32 %v4385_v17, %v1036_v6  ;;  %v1044_v38 = vmul.f32 %v1036_v6, %v6143_v13 }
  0xa0   : > { %v1045_v47 = vmul.f32 %v4392_v5, %v1036_v6  ;;  %v1046_v63 = vmul.f32 %v1036_v6, %v4004_v25  ;;  %v1047_v23 = vmul.f32 %v4399_v28, %v1036_v6  ;;  %v1048_v56 = vmul.f32 %v1036_v6, %v4011_v34 }
  0xa1   : > { %v1049_v39 = vmul.f32 %v4406_v48, %v1036_v6  ;;  %v1050_v19 = vmul.f32 %v1036_v6, %v4055_v40  ;;  %v1051_v42 = vmul.f32 %v4469_v52, %v1036_v6  ;;  %v1052_v15 = vmul.f32 %v1036_v6, %v4118_v46 }
  0xa2   : > { %v1069_v45 = vrot.slane %v1037_v20, 2  ;;  %v1070_v35 = vrot.slane %v1038_v31, 2  ;;  %v1072_v50 = vrot.slane %v1039_v33, 2  ;;  %v1073_v54 = vrot.slane %v1040_v58, 2 }
  0xa3   : > { %v1075_v12 = vrot.slane %v1041_v10, 2  ;;  %v1076_v36 = vrot.slane %v1042_v43, 2  ;;  %v1078_v0 = vrot.slane %v1043_v41, 2  ;;  %v1079_v9 = vrot.slane %v1044_v38, 2 }
  0xa4   : > { %v1071_v57 = vsel %vm916_vm1, %v1069_v45, %v1070_v35  ;;  %v1074_v11 = vsel %vm916_vm1, %v1072_v50, %v1073_v54  ;;  %v1081_v2 = vrot.slane %v1045_v47, 2  ;;  %v1082_v30 = vrot.slane %v1046_v63, 2 }
  0xa5   : > { %v1077_v44 = vsel %vm916_vm1, %v1075_v12, %v1076_v36  ;;  %v1080_v4 = vsel %vm916_vm1, %v1078_v0, %v1079_v9  ;;  %v1084_v62 = vrot.slane %v1047_v23, 2  ;;  %v1085_v6 = vrot.slane %v1048_v56, 2 }
  0xa6   : > { %v1083_v20 = vsel %vm916_vm1, %v1081_v2, %v1082_v30  ;;  %v1087_v31 = vrot.slane %v1049_v39, 2  ;;  %v1088_v33 = vrot.slane %v1050_v19, 2  ;;  %v1090_v58 = vrot.slane %v1051_v42, 2 }
  0xa7   : > { %v1086_v10 = vsel %vm916_vm1, %v1084_v62, %v1085_v6  ;;  %v1091_v43 = vrot.slane %v1052_v15, 2  ;;  %v1101_v41 = vadd.f32 %v1071_v57, %v1025_v8  ;;  %v1102_v38 = vadd.f32 %v1074_v11, %v1026_v49 }
  0xa8   : > { %v1089_v45 = vsel %vm916_vm1, %v1087_v31, %v1088_v33  ;;  %v1103_v47 = vadd.f32 %v1077_v44, %v1027_v59  ;;  %v1104_v63 = vadd.f32 %v1080_v4, %v1028_v55  ;;  %v1105_v35 = vadd.f32 %v1083_v20, %v1029_v7  ;;  %v4510_v44 = vld [vmem:[%s3826_s4 + $0xa0] sm:$0xff] }
  0xa9   : > { %v1092_v50 = vsel %vm916_vm1, %v1090_v58, %v1091_v43  ;;  %v1106_v54 = vadd.f32 %v1086_v10, %v1030_v22  ;;  %v1107_v23 = vadd.f32 %v1089_v45, %v1031_v27  ;;  %v1113_v30 = vmul.f32 %v4371_v29, %v4434_v32 }
  0xaa   : > { %v1108_v56 = vadd.f32 %v1092_v50, %v1032_v14  ;;  %v1114_v62 = vmul.f32 %v4434_v32, %v3995_v61  ;;  %v1115_v8 = vmul.f32 %v4378_v53, %v4434_v32  ;;  %v1116_v49 = vmul.f32 %v4434_v32, %v6142_v18 }
  0xab   : > { %v1117_v4 = vmul.f32 %v4385_v17, %v4434_v32  ;;  %v1118_v59 = vmul.f32 %v4434_v32, %v6143_v13  ;;  %v1119_v55 = vmul.f32 %v4392_v5, %v4434_v32  ;;  %v1120_v7 = vmul.f32 %v4434_v32, %v4004_v25 }
  0xac   : > { %v1121_v61 = vmul.f32 %v4399_v28, %v4434_v32  ;;  %v1122_v22 = vmul.f32 %v4434_v32, %v4011_v34  ;;  %v1123_v18 = vmul.f32 %v4406_v48, %v4434_v32  ;;  %v1124_v27 = vmul.f32 %v4434_v32, %v4055_v40 }
  0xad   : > { %v1125_v13 = vmul.f32 %v4469_v52, %v4434_v32  ;;  %v1126_v14 = vmul.f32 %v4434_v32, %v4118_v46  ;;  %v1127_v25 = vmul.f32 %v4510_v44, %v4434_v32  ;;  %v1128_v34 = vmul.f32 %v4434_v32, %v4147_v21 }
  0xae   : > { %v1145_v39 = vrot.slane %v1113_v30, 2  ;;  %v1146_v19 = vrot.slane %v1114_v62, 2  ;;  %v1148_v42 = vrot.slane %v1115_v8, 2  ;;  %v1149_v15 = vrot.slane %v1116_v49, 2 }
  0xaf   : > { %v1151_v12 = vrot.slane %v1117_v4, 2  ;;  %v1152_v36 = vrot.slane %v1118_v59, 2  ;;  %v1154_v0 = vrot.slane %v1119_v55, 2  ;;  %v1155_v9 = vrot.slane %v1120_v7, 2 }
  0xb0   : > { %v1147_v57 = vsel %vm916_vm1, %v1145_v39, %v1146_v19  ;;  %v1150_v11 = vsel %vm916_vm1, %v1148_v42, %v1149_v15  ;;  %v1157_v2 = vrot.slane %v1121_v61, 2  ;;  %v1158_v6 = vrot.slane %v1122_v22, 2 }
  0xb1   : > { %v1153_v20 = vsel %vm916_vm1, %v1151_v12, %v1152_v36  ;;  %v1156_v31 = vsel %vm916_vm1, %v1154_v0, %v1155_v9  ;;  %v1160_v33 = vrot.slane %v1123_v18, 2  ;;  %v1161_v32 = vrot.slane %v1124_v27, 2  ;;  %v4565_v36 = vld [vmem:[%s3826_s4 + $0xb0] sm:$0xff] }
  0xb2   : > { %v1159_v58 = vsel %vm916_vm1, %v1157_v2, %v1158_v6  ;;  %v1163_v10 = vrot.slane %v1125_v13, 2  ;;  %v1164_v43 = vrot.slane %v1126_v14, 2  ;;  %v1166_v45 = vrot.slane %v1127_v25, 2  ;;  %v4527_v13 = vld [vmem:[%s3826_s4 + $0x48] sm:$0x3f]  ;;  %6150 = vst [vmem:[#allocation10_spill] sm:$0xff] %v4565_v36 }
  0xb3   : > { %v1162_v50 = vsel %vm916_vm1, %v1160_v33, %v1161_v32  ;;  %v1167_v30 = vrot.slane %v1128_v34, 2  ;;  %v1177_v62 = vadd.f32 %v1147_v57, %v1101_v41  ;;  %v1178_v8 = vadd.f32 %v1150_v11, %v1102_v38  ;;  %v4548_v14 = vld [vmem:[%s3826_s4 + $0x78] sm:$0x3f] }
  0xb4   : > { %v1165_v49 = vsel %vm916_vm1, %v1163_v10, %v1164_v43  ;;  %v1179_v4 = vadd.f32 %v1153_v20, %v1103_v47  ;;  %v1180_v59 = vadd.f32 %v1156_v31, %v1104_v63  ;;  %v1181_v55 = vadd.f32 %v1159_v58, %v1105_v35  ;;  %v4534_v47 = vld [vmem:[%s3826_s4 + $0x58] sm:$0x3f] }
  0xb5   : > { %v1168_v7 = vsel %vm916_vm1, %v1166_v45, %v1167_v30  ;;  %v1182_v61 = vadd.f32 %v1162_v50, %v1106_v54  ;;  %v1183_v22 = vadd.f32 %v1165_v49, %v1107_v23  ;;  %v1189_v18 = vmul.f32 %v4378_v53, %v4443_v60  ;;  %v4541_v54 = vld [vmem:[%s3826_s4 + $0x68] sm:$0x3f] }
  0xb6   : > { %v1184_v27 = vadd.f32 %v1168_v7, %v1108_v56  ;;  %v1190_v41 = vmul.f32 %v4527_v13, %v4443_v60  ;;  %v1191_v38 = vmul.f32 %v4385_v17, %v4443_v60  ;;  %v1192_v63 = vmul.f32 %v4534_v47, %v4443_v60 }
  0xb7   : > { %v1193_v35 = vmul.f32 %v4392_v5, %v4443_v60  ;;  %v1194_v23 = vmul.f32 %v4541_v54, %v4443_v60  ;;  %v1195_v56 = vmul.f32 %v4399_v28, %v4443_v60  ;;  %v1196_v25 = vmul.f32 %v4548_v14, %v4443_v60 }
  0xb8   : > { %v1197_v34 = vmul.f32 %v4406_v48, %v4443_v60  ;;  %v1198_v39 = vmul.f32 %v4443_v60, %v4055_v40  ;;  %v1199_v19 = vmul.f32 %v4469_v52, %v4443_v60  ;;  %v1200_v42 = vmul.f32 %v4443_v60, %v4118_v46 }
  0xb9   : > { %v1201_v15 = vmul.f32 %v4510_v44, %v4443_v60  ;;  %v1202_v12 = vmul.f32 %v4443_v60, %v4147_v21  ;;  %v1203_v0 = vmul.f32 %v4565_v36, %v4443_v60  ;;  %v1204_v40 = vmul.f32 %v4443_v60, %v4190_v26 }
  0xba   : > { %v1221_v9 = vrot.slane %v1189_v18, 2  ;;  %v1222_v57 = vrot.slane %v1190_v41, 2  ;;  %v1224_v11 = vrot.slane %v1191_v38, 2  ;;  %v1225_v2 = vrot.slane %v1192_v63, 2 }
  0xbb   : > { %v1227_v6 = vrot.slane %v1193_v35, 2  ;;  %v1228_v20 = vrot.slane %v1194_v23, 2  ;;  %v1230_v31 = vrot.slane %v1195_v56, 2  ;;  %v1231_v33 = vrot.slane %v1196_v25, 2 }
  0xbc   : > { %v1223_v32 = vsel %vm916_vm1, %v1221_v9, %v1222_v57  ;;  %v1226_v58 = vsel %vm916_vm1, %v1224_v11, %v1225_v2  ;;  %v1233_v10 = vrot.slane %v1197_v34, 2  ;;  %v1234_v43 = vrot.slane %v1198_v39, 2 }
  0xbd   : > { %v1229_v45 = vsel %vm916_vm1, %v1227_v6, %v1228_v20  ;;  %v1232_v50 = vsel %vm916_vm1, %v1230_v31, %v1231_v33  ;;  %v1236_v30 = vrot.slane %v1199_v19, 2  ;;  %v1237_v60 = vrot.slane %v1200_v42, 2  ;;  %v4611_v20 = vld [vmem:[%s3826_s4 + $0xc0] sm:$0xff] }
  0xbe   : > { %v1235_v49 = vsel %vm916_vm1, %v1233_v10, %v1234_v43  ;;  %v1239_v7 = vrot.slane %v1201_v15, 2  ;;  %v1240_v18 = vrot.slane %v1202_v12, 2  ;;  %v1242_v41 = vrot.slane %v1203_v0, 2  ;;  %6151 = vst [vmem:[#allocation5_spill] sm:$0xff] %v4611_v20 }
  0xbf   : > { %v1238_v38 = vsel %vm916_vm1, %v1236_v30, %v1237_v60  ;;  %v1243_v63 = vrot.slane %v1204_v40, 2  ;;  %v1253_v35 = vadd.f32 %v1223_v32, %v1177_v62  ;;  %v1254_v23 = vadd.f32 %v1226_v58, %v1178_v8 }
  0xc0   : > { %v1241_v56 = vsel %vm916_vm1, %v1239_v7, %v1240_v18  ;;  %v1255_v25 = vadd.f32 %v1229_v45, %v1179_v4  ;;  %v1256_v34 = vadd.f32 %v1232_v50, %v1180_v59  ;;  %v1257_v39 = vadd.f32 %v1235_v49, %v1181_v55 }
  0xc1   : > { %v1244_v9 = vsel %vm916_vm1, %v1242_v41, %v1243_v63  ;;  %v1258_v19 = vadd.f32 %v1238_v38, %v1182_v61  ;;  %v1259_v42 = vadd.f32 %v1241_v56, %v1183_v22  ;;  %v1265_v15 = vmul.f32 %v4385_v17, %v4452_v51  ;;  %v4594_v61 = vld [vmem:[%s3826_s4 + $0x88] sm:$0x3f] }
  0xc2   : > { %v1260_v12 = vadd.f32 %v1244_v9, %v1184_v27  ;;  %v1266_v0 = vmul.f32 %v4534_v47, %v4452_v51  ;;  %v1267_v62 = vmul.f32 %v4392_v5, %v4452_v51  ;;  %v1268_v8 = vmul.f32 %v4541_v54, %v4452_v51 }
  0xc3   : > { %v1269_v4 = vmul.f32 %v4399_v28, %v4452_v51  ;;  %v1270_v59 = vmul.f32 %v4548_v14, %v4452_v51  ;;  %v1271_v55 = vmul.f32 %v4406_v48, %v4452_v51  ;;  %v1272_v22 = vmul.f32 %v4594_v61, %v4452_v51 }
  0xc4   : > { %v1273_v27 = vmul.f32 %v4469_v52, %v4452_v51  ;;  %v1274_v40 = vmul.f32 %v4452_v51, %v4118_v46  ;;  %v1275_v57 = vmul.f32 %v4510_v44, %v4452_v51  ;;  %v1276_v11 = vmul.f32 %v4452_v51, %v4147_v21 }
  0xc5   : > { %v1277_v2 = vmul.f32 %v4565_v36, %v4452_v51  ;;  %v1278_v6 = vmul.f32 %v4452_v51, %v4190_v26  ;;  %v1279_v31 = vmul.f32 %v4611_v20, %v4452_v51  ;;  %v1280_v46 = vmul.f32 %v4452_v51, %v4233_v3 }
  0xc6   : > { %v1297_v33 = vrot.slane %v1265_v15, 2  ;;  %v1298_v32 = vrot.slane %v1266_v0, 2  ;;  %v1300_v58 = vrot.slane %v1267_v62, 2  ;;  %v1301_v10 = vrot.slane %v1268_v8, 2 }
  0xc7   : > { %v1303_v43 = vrot.slane %v1269_v4, 2  ;;  %v1304_v45 = vrot.slane %v1270_v59, 2  ;;  %v1306_v50 = vrot.slane %v1271_v55, 2  ;;  %v1307_v30 = vrot.slane %v1272_v22, 2 }
  0xc8   : > { %v1299_v60 = vsel %vm916_vm1, %v1297_v33, %v1298_v32  ;;  %v1302_v49 = vsel %vm916_vm1, %v1300_v58, %v1301_v10  ;;  %v1309_v7 = vrot.slane %v1273_v27, 2  ;;  %v1310_v18 = vrot.slane %v1274_v40, 2 }
  0xc9   : > { %v1305_v41 = vsel %vm916_vm1, %v1303_v43, %v1304_v45  ;;  %v1308_v38 = vsel %vm916_vm1, %v1306_v50, %v1307_v30  ;;  %v1312_v63 = vrot.slane %v1275_v57, 2  ;;  %v1313_v51 = vrot.slane %v1276_v11, 2  ;;  %v4628_v11 = vld [vmem:[%s6063_s1 + $0x30] sm:$0x7f] }
  0xca   : > { %v1311_v56 = vsel %vm916_vm1, %v1309_v7, %v1310_v18  ;;  %v1315_v9 = vrot.slane %v1277_v2, 2  ;;  %v1316_v15 = vrot.slane %v1278_v6, 2  ;;  %v1318_v0 = vrot.slane %v1279_v31, 2  ;;  %v6152_v31 = vld [vmem:[#allocation3_spill] sm:$0xff] }
  0xcb   : > { %v1314_v62 = vsel %vm916_vm1, %v1312_v63, %v1313_v51  ;;  %v1319_v8 = vrot.slane %v1280_v46, 2  ;;  %v1329_v4 = vadd.f32 %v1299_v60, %v1253_v35  ;;  %v1330_v55 = vadd.f32 %v1302_v49, %v1254_v23  ;;  %v4656_v49 = vld [vmem:[%s3826_s4 + $0xd0] sm:$0xff] }
  0xcc   : > { %v1317_v59 = vsel %vm916_vm1, %v1315_v9, %v1316_v15  ;;  %v1331_v22 = vadd.f32 %v1305_v41, %v1255_v25  ;;  %v1332_v27 = vadd.f32 %v1308_v38, %v1256_v34  ;;  %v1333_v33 = vadd.f32 %v1311_v56, %v1257_v39  ;;  %6154 = vst [vmem:[#allocation12_spill] sm:$0xff] %v4656_v49 }
  0xcd   : > { %v1320_v40 = vsel %vm916_vm1, %v1318_v0, %v1319_v8  ;;  %v1334_v57 = vadd.f32 %v1314_v62, %v1258_v19  ;;  %v1340_v2 = vrot.slane %v4628_v11, %v6147_v16  ;;  %v1335_v6 = vadd.f32 %v1317_v59, %v1259_v42 }
  0xce   : > { %v1336_v35 = vadd.f32 %v1320_v40, %v1260_v12  ;;  %v4633_v46 = vsub.s32 3, %v6152_v31  ;;  %v4636_v23 = vsub.s32 4, %v6152_v31  ;;  %v4646_v12 = vld [vmem:[%s3826_s4 + $0x98] sm:$0x3f] }
  0xcf   : > { %v1341_v25 = vmul.f32 %v4392_v5, %v1340_v2  ;;  %v1342_v34 = vmul.f32 %v4541_v54, %v1340_v2  ;;  %v1343_v39 = vmul.f32 %v4399_v28, %v1340_v2  ;;  %v1344_v19 = vmul.f32 %v4548_v14, %v1340_v2 }
  0xd0   : > { %6153 = vst [vmem:[#allocation11_spill] sm:$0xff] %v4636_v23  ;;  %v1345_v32 = vmul.f32 %v4406_v48, %v1340_v2  ;;  %v1346_v16 = vmul.f32 %v4594_v61, %v1340_v2  ;;  %v1347_v42 = vmul.f32 %v4469_v52, %v1340_v2  ;;  %v1348_v58 = vmul.f32 %v4646_v12, %v1340_v2 }
  0xd1   : > { %v1349_v10 = vmul.f32 %v4510_v44, %v1340_v2  ;;  %v1350_v43 = vmul.f32 %v1340_v2, %v4147_v21  ;;  %v1351_v45 = vmul.f32 %v4565_v36, %v1340_v2  ;;  %v1352_v50 = vmul.f32 %v1340_v2, %v4190_v26 }
  0xd2   : > { %v1353_v30 = vmul.f32 %v4611_v20, %v1340_v2  ;;  %v1354_v60 = vmul.f32 %v1340_v2, %v4233_v3  ;;  %v1355_v7 = vmul.f32 %v4656_v49, %v1340_v2  ;;  %v1356_v18 = vmul.f32 %v1340_v2, %v4276_v37 }
  0xd3   : > { %v1373_v41 = vrot.slane %v1341_v25, 2  ;;  %v1374_v38 = vrot.slane %v1342_v34, 2  ;;  %v1376_v63 = vrot.slane %v1343_v39, 2  ;;  %v1377_v51 = vrot.slane %v1344_v19, 2 }
  0xd4   : > { %v1379_v56 = vrot.slane %v1345_v32, 2  ;;  %v1380_v21 = vrot.slane %v1346_v16, 2  ;;  %v1382_v9 = vrot.slane %v1347_v42, 2  ;;  %v1383_v15 = vrot.slane %v1348_v58, 2 }
  0xd5   : > { %v1375_v26 = vsel %vm916_vm1, %v1373_v41, %v1374_v38  ;;  %v1378_v0 = vsel %vm916_vm1, %v1376_v63, %v1377_v51  ;;  %v1385_v62 = vrot.slane %v1349_v10, 2  ;;  %v1386_v3 = vrot.slane %v1350_v43, 2  ;;  %v6159_v38 = vld [vmem:[#allocation6_spill] sm:$0xff]  ;;  %v4702_v51 = vld [vmem:[%s3826_s4 + $0x18] sm:$0x3f] }
  0xd6   : > { %v1381_v8 = vsel %vm916_vm1, %v1379_v56, %v1380_v21  ;;  %v1384_v59 = vsel %vm916_vm1, %v1382_v9, %v1383_v15  ;;  %v1388_v40 = vrot.slane %v1351_v45, 2  ;;  %v1389_v37 = vrot.slane %v1352_v50, 2  ;;  %v4707_v9 = vld [vmem:[%s3826_s4 + $0x28] sm:$0x3f] }
  0xd7   : > { %v1387_v2 = vsel %vm916_vm1, %v1385_v62, %v1386_v3  ;;  %v1391_v25 = vrot.slane %v1353_v30, 2  ;;  %v1392_v34 = vrot.slane %v1354_v60, 2  ;;  %v1394_v39 = vrot.slane %v1355_v7, 2  ;;  %v4671_v60 = vld [vmem:[%s6063_s1] sm:$0x7f] }
  0xd8   : > { %v1390_v19 = vsel %vm916_vm1, %v1388_v40, %v1389_v37  ;;  %v1395_v32 = vrot.slane %v1356_v18, 2  ;;  %v1405_v16 = vadd.f32 %v1375_v26, %v1329_v4  ;;  %v1406_v42 = vadd.f32 %v1378_v0, %v1330_v55  ;;  %6155 = vst [vmem:[#allocation13_spill] sm:$0xff] %v4671_v60  ;;  %v4697_v7 = vld [vmem:[%s3826_s4 + $0x8] sm:$0x3f]  ;;  %v4712_v26 = vld [vmem:[%s3826_s4 + $0x38] sm:$0x3f] }
  0xd9   : > { %v1393_v58 = vsel %vm916_vm1, %v1391_v25, %v1392_v34  ;;  %v1407_v10 = vadd.f32 %v1381_v8, %v1331_v22  ;;  %v1408_v43 = vadd.f32 %v1384_v59, %v1332_v27  ;;  %v1409_v41 = vadd.f32 %v1387_v2, %v1333_v33  ;;  %v4678_v22 = vld [vmem:[%s6063_s1 + $0x8] sm:$0x7f]  ;;  %6158 = vst [vmem:[#allocation14_spill] sm:$0xff] %v4697_v7 }
  0xda   : > { %v1396_v45 = vsel %vm916_vm1, %v1394_v39, %v1395_v32  ;;  %v1410_v50 = vadd.f32 %v1390_v19, %v1334_v57  ;;  %v1411_v30 = vadd.f32 %v1393_v58, %v1335_v6  ;;  %v1416_v4 = vrot.slane %v4671_v60, %v4633_v46  ;;  %6156 = vst [vmem:[#allocation2_spill] sm:$0xff] %v4678_v22  ;;  %v4693_v6 = vld [vmem:[%s3826_s4] sm:$0xff] }
  0xdb   : > { %v1412_v55 = vadd.f32 %v1396_v45, %v1336_v35  ;;  %v4682_v27 = vrot.slane %v4678_v22, %v4633_v46  ;;  %v4686_v33 = vrot.slane %v4423_v1, %v4633_v46  ;;  %v4690_v57 = vrot.slane %v4430_v24, %v4633_v46  ;;  %6157 = vst [vmem:[#allocation4_spill] sm:$0xff] %v4693_v6  ;;  %v6160_v1 = vld [vmem:[#allocation7_spill] sm:$0xff] }
  0xdc   : > { %v1417_v35 = vmul.f32 %v4693_v6, %v1416_v4  ;;  %v1418_v18 = vmul.f32 %v4697_v7, %v1416_v4  ;;  %v1419_v63 = vmul.f32 %v6159_v38, %v1416_v4  ;;  %v1420_v56 = vmul.f32 %v4702_v51, %v1416_v4 }
  0xdd   : > { %v1421_v21 = vmul.f32 %v6160_v1, %v1416_v4  ;;  %v1422_v24 = vmul.f32 %v4707_v9, %v1416_v4  ;;  %v1423_v15 = vmul.f32 %v4371_v29, %v1416_v4  ;;  %v1424_v0 = vmul.f32 %v4712_v26, %v1416_v4 }
  0xde   : > { %v1425_v62 = vmul.f32 %v4378_v53, %v1416_v4  ;;  %v1426_v3 = vmul.f32 %v4527_v13, %v1416_v4  ;;  %v1427_v8 = vmul.f32 %v4385_v17, %v1416_v4  ;;  %v1428_v59 = vmul.f32 %v4534_v47, %v1416_v4 }
  0xdf   : > { %v1429_v40 = vmul.f32 %v4392_v5, %v1416_v4  ;;  %v1430_v37 = vmul.f32 %v4541_v54, %v1416_v4  ;;  %v1431_v2 = vmul.f32 %v4399_v28, %v1416_v4  ;;  %v1432_v25 = vmul.f32 %v4548_v14, %v1416_v4 }
  0xe0   : > { %v1450_v34 = vrot.slane %v1417_v35, 3  ;;  %v1451_v39 = vrot.slane %v1418_v18, 3  ;;  %v1453_v19 = vrot.slane %v1419_v63, 3  ;;  %v1454_v32 = vrot.slane %v1420_v56, 3 }
  0xe1   : > { %v1456_v58 = vrot.slane %v1421_v21, 3  ;;  %v1457_v45 = vrot.slane %v1422_v24, 3  ;;  %v1459_v31 = vrot.slane %v1423_v15, 3  ;;  %v1460_v22 = vrot.slane %v1424_v0, 3 }
  0xe2   : > { %v1452_v7 = vsel %vm1449_vm2, %v1450_v34, %v1451_v39  ;;  %v1455_v6 = vsel %vm1449_vm2, %v1453_v19, %v1454_v32  ;;  %v1462_v49 = vrot.slane %v1425_v62, 3  ;;  %v1463_v20 = vrot.slane %v1426_v3, 3 }
  0xe3   : > { %v1458_v36 = vsel %vm1449_vm2, %v1456_v58, %v1457_v45  ;;  %v1461_v60 = vsel %vm1449_vm2, %v1459_v31, %v1460_v22  ;;  %v1465_v23 = vrot.slane %v1427_v8, 3  ;;  %v1466_v4 = vrot.slane %v1428_v59, 3 }
  0xe4   : > { %v1464_v35 = vsel %vm1449_vm2, %v1462_v49, %v1463_v20  ;;  %v1468_v18 = vrot.slane %v1429_v40, 3  ;;  %v1469_v63 = vrot.slane %v1430_v37, 3  ;;  %v1471_v56 = vrot.slane %v1431_v2, 3 }
  0xe5   : > { %v1467_v21 = vsel %vm1449_vm2, %v1465_v23, %v1466_v4  ;;  %v1472_v24 = vrot.slane %v1432_v25, 3  ;;  %v1482_v15 = vadd.f32 %v1452_v7, %v1405_v16  ;;  %v1483_v0 = vadd.f32 %v1455_v6, %v1406_v42 }
  0xe6   : > { %v1470_v34 = vsel %vm1449_vm2, %v1468_v18, %v1469_v63  ;;  %v1484_v62 = vadd.f32 %v1458_v36, %v1407_v10  ;;  %v1485_v3 = vadd.f32 %v1461_v60, %v1408_v43  ;;  %v1486_v39 = vadd.f32 %v1464_v35, %v1409_v41 }
  0xe7   : > { %v1473_v19 = vsel %vm1449_vm2, %v1471_v56, %v1472_v24  ;;  %v1487_v31 = vadd.f32 %v1467_v21, %v1410_v50  ;;  %v1488_v22 = vadd.f32 %v1470_v34, %v1411_v30  ;;  %v1494_v20 = vmul.f32 %v6159_v38, %v4682_v27 }
  0xe8   : > { %v1489_v49 = vadd.f32 %v1473_v19, %v1412_v55  ;;  %v1495_v8 = vmul.f32 %v4702_v51, %v4682_v27  ;;  %v1496_v23 = vmul.f32 %v6160_v1, %v4682_v27  ;;  %v1497_v16 = vmul.f32 %v4707_v9, %v4682_v27 }
  0xe9   : > { %v1498_v36 = vmul.f32 %v4371_v29, %v4682_v27  ;;  %v1499_v42 = vmul.f32 %v4712_v26, %v4682_v27  ;;  %v1500_v10 = vmul.f32 %v4378_v53, %v4682_v27  ;;  %v1501_v43 = vmul.f32 %v4527_v13, %v4682_v27 }
  0xea   : > { %v1502_v41 = vmul.f32 %v4385_v17, %v4682_v27  ;;  %v1503_v50 = vmul.f32 %v4534_v47, %v4682_v27  ;;  %v1504_v30 = vmul.f32 %v4392_v5, %v4682_v27  ;;  %v1505_v60 = vmul.f32 %v4541_v54, %v4682_v27 }
  0xeb   : > { %v1506_v55 = vmul.f32 %v4399_v28, %v4682_v27  ;;  %v1507_v6 = vmul.f32 %v4548_v14, %v4682_v27  ;;  %v1508_v7 = vmul.f32 %v4406_v48, %v4682_v27  ;;  %v1509_v38 = vmul.f32 %v4594_v61, %v4682_v27 }
  0xec   : > { %v1526_v59 = vrot.slane %v1494_v20, 3  ;;  %v1527_v40 = vrot.slane %v1495_v8, 3  ;;  %v1529_v37 = vrot.slane %v1496_v23, 3  ;;  %v1530_v2 = vrot.slane %v1497_v16, 3 }
  0xed   : > { %v1532_v25 = vrot.slane %v1498_v36, 3  ;;  %v1533_v32 = vrot.slane %v1499_v42, 3  ;;  %v1535_v58 = vrot.slane %v1500_v10, 3  ;;  %v1536_v45 = vrot.slane %v1501_v43, 3 }
  0xee   : > { %v1528_v4 = vsel %vm1449_vm2, %v1526_v59, %v1527_v40  ;;  %v1531_v35 = vsel %vm1449_vm2, %v1529_v37, %v1530_v2  ;;  %v1538_v18 = vrot.slane %v1502_v41, 3  ;;  %v1539_v63 = vrot.slane %v1503_v50, 3 }
  0xef   : > { %v1534_v56 = vsel %vm1449_vm2, %v1532_v25, %v1533_v32  ;;  %v1537_v21 = vsel %vm1449_vm2, %v1535_v58, %v1536_v45  ;;  %v1541_v24 = vrot.slane %v1504_v30, 3  ;;  %v1542_v27 = vrot.slane %v1505_v60, 3 }
  0xf0   : > { %v1540_v34 = vsel %vm1449_vm2, %v1538_v18, %v1539_v63  ;;  %v1544_v19 = vrot.slane %v1506_v55, 3  ;;  %v1545_v20 = vrot.slane %v1507_v6, 3  ;;  %v1547_v8 = vrot.slane %v1508_v7, 3 }
  0xf1   : > { %v1543_v23 = vsel %vm1449_vm2, %v1541_v24, %v1542_v27  ;;  %v1548_v16 = vrot.slane %v1509_v38, 3  ;;  %v1558_v36 = vadd.f32 %v1528_v4, %v1482_v15  ;;  %v1559_v42 = vadd.f32 %v1531_v35, %v1483_v0 }
  0xf2   : > { %v1546_v10 = vsel %vm1449_vm2, %v1544_v19, %v1545_v20  ;;  %v1560_v43 = vadd.f32 %v1534_v56, %v1484_v62  ;;  %v1561_v41 = vadd.f32 %v1537_v21, %v1485_v3  ;;  %v1562_v50 = vadd.f32 %v1540_v34, %v1486_v39 }
  0xf3   : > { %v1549_v59 = vsel %vm1449_vm2, %v1547_v8, %v1548_v16  ;;  %v1563_v40 = vadd.f32 %v1543_v23, %v1487_v31  ;;  %v1564_v30 = vadd.f32 %v1546_v10, %v1488_v22  ;;  %v1570_v60 = vmul.f32 %v6160_v1, %v4686_v33 }
  0xf4   : > { %v1565_v55 = vadd.f32 %v1549_v59, %v1489_v49  ;;  %v1571_v6 = vmul.f32 %v4707_v9, %v4686_v33  ;;  %v1572_v15 = vmul.f32 %v4371_v29, %v4686_v33  ;;  %v1573_v0 = vmul.f32 %v4712_v26, %v4686_v33 }
  0xf5   : > { %v1574_v62 = vmul.f32 %v4378_v53, %v4686_v33  ;;  %v1575_v3 = vmul.f32 %v4527_v13, %v4686_v33  ;;  %v1576_v39 = vmul.f32 %v4385_v17, %v4686_v33  ;;  %v1577_v1 = vmul.f32 %v4534_v47, %v4686_v33 }
  0xf6   : > { %v1578_v31 = vmul.f32 %v4392_v5, %v4686_v33  ;;  %v1579_v22 = vmul.f32 %v4541_v54, %v4686_v33  ;;  %v1580_v49 = vmul.f32 %v4399_v28, %v4686_v33  ;;  %v1581_v7 = vmul.f32 %v4548_v14, %v4686_v33 }
  0xf7   : > { %v1582_v38 = vmul.f32 %v4406_v48, %v4686_v33  ;;  %v1583_v37 = vmul.f32 %v4594_v61, %v4686_v33  ;;  %v1584_v2 = vmul.f32 %v4469_v52, %v4686_v33  ;;  %v1585_v25 = vmul.f32 %v4646_v12, %v4686_v33 }
  0xf8   : > { %v1602_v32 = vrot.slane %v1570_v60, 3  ;;  %v1603_v58 = vrot.slane %v1571_v6, 3  ;;  %v1605_v45 = vrot.slane %v1572_v15, 3  ;;  %v1606_v4 = vrot.slane %v1573_v0, 3 }
  0xf9   : > { %v1608_v35 = vrot.slane %v1574_v62, 3  ;;  %v1609_v18 = vrot.slane %v1575_v3, 3  ;;  %v1611_v63 = vrot.slane %v1576_v39, 3  ;;  %v1612_v56 = vrot.slane %v1577_v1, 3 }
  0xfa   : > { %v1604_v21 = vsel %vm1449_vm2, %v1602_v32, %v1603_v58  ;;  %v1607_v24 = vsel %vm1449_vm2, %v1605_v45, %v1606_v4  ;;  %v1614_v27 = vrot.slane %v1578_v31, 3  ;;  %v1615_v34 = vrot.slane %v1579_v22, 3  ;;  %v4842_v45 = vld [vmem:[%s3826_s4 + $0xa8] sm:$0x3f] }
  0xfb   : > { %v1610_v19 = vsel %vm1449_vm2, %v1608_v35, %v1609_v18  ;;  %v1613_v20 = vsel %vm1449_vm2, %v1611_v63, %v1612_v56  ;;  %v1617_v8 = vrot.slane %v1580_v49, 3  ;;  %v1618_v33 = vrot.slane %v1581_v7, 3 }
  0xfc   : > { %v1616_v23 = vsel %vm1449_vm2, %v1614_v27, %v1615_v34  ;;  %v1620_v16 = vrot.slane %v1582_v38, 3  ;;  %v1621_v10 = vrot.slane %v1583_v37, 3  ;;  %v1623_v59 = vrot.slane %v1584_v2, 3 }
  0xfd   : > { %v1619_v60 = vsel %vm1449_vm2, %v1617_v8, %v1618_v33  ;;  %v1624_v6 = vrot.slane %v1585_v25, 3  ;;  %v1634_v15 = vadd.f32 %v1604_v21, %v1558_v36  ;;  %v1635_v0 = vadd.f32 %v1607_v24, %v1559_v42 }
  0xfe   : > { %v1622_v62 = vsel %vm1449_vm2, %v1620_v16, %v1621_v10  ;;  %v1636_v3 = vadd.f32 %v1610_v19, %v1560_v43  ;;  %v1637_v39 = vadd.f32 %v1613_v20, %v1561_v41  ;;  %v1638_v1 = vadd.f32 %v1616_v23, %v1562_v50 }
  0xff   : > { %v1625_v31 = vsel %vm1449_vm2, %v1623_v59, %v1624_v6  ;;  %v1639_v22 = vadd.f32 %v1619_v60, %v1563_v40  ;;  %v1640_v49 = vadd.f32 %v1622_v62, %v1564_v30  ;;  %v1646_v7 = vmul.f32 %v4371_v29, %v4690_v57 }
 0x100   : > { %v1641_v38 = vadd.f32 %v1625_v31, %v1565_v55  ;;  %v1647_v37 = vmul.f32 %v4712_v26, %v4690_v57  ;;  %v1648_v36 = vmul.f32 %v4378_v53, %v4690_v57  ;;  %v1649_v42 = vmul.f32 %v4527_v13, %v4690_v57 }
 0x101   : > { %v1650_v43 = vmul.f32 %v4385_v17, %v4690_v57  ;;  %v1651_v41 = vmul.f32 %v4534_v47, %v4690_v57  ;;  %v1652_v29 = vmul.f32 %v4392_v5, %v4690_v57  ;;  %v1653_v50 = vmul.f32 %v4541_v54, %v4690_v57 }
 0x102   : > { %v1654_v40 = vmul.f32 %v4399_v28, %v4690_v57  ;;  %v1655_v30 = vmul.f32 %v4548_v14, %v4690_v57  ;;  %v1656_v55 = vmul.f32 %v4406_v48, %v4690_v57  ;;  %v1657_v2 = vmul.f32 %v4594_v61, %v4690_v57 }
 0x103   : > { %v1658_v25 = vmul.f32 %v4469_v52, %v4690_v57  ;;  %v1659_v32 = vmul.f32 %v4646_v12, %v4690_v57  ;;  %v1660_v58 = vmul.f32 %v4510_v44, %v4690_v57  ;;  %v1661_v4 = vmul.f32 %v4842_v45, %v4690_v57 }
 0x104   : > { %v1678_v35 = vrot.slane %v1646_v7, 3  ;;  %v1679_v18 = vrot.slane %v1647_v37, 3  ;;  %v1681_v63 = vrot.slane %v1648_v36, 3  ;;  %v1682_v56 = vrot.slane %v1649_v42, 3 }
 0x105   : > { %v1684_v21 = vrot.slane %v1650_v43, 3  ;;  %v1685_v24 = vrot.slane %v1651_v41, 3  ;;  %v1687_v27 = vrot.slane %v1652_v29, 3  ;;  %v1688_v34 = vrot.slane %v1653_v50, 3 }
 0x106   : > { %v1680_v19 = vsel %vm1449_vm2, %v1678_v35, %v1679_v18  ;;  %v1683_v20 = vsel %vm1449_vm2, %v1681_v63, %v1682_v56  ;;  %v1690_v8 = vrot.slane %v1654_v40, 3  ;;  %v1691_v33 = vrot.slane %v1655_v30, 3 }
 0x107   : > { %v1686_v23 = vsel %vm1449_vm2, %v1684_v21, %v1685_v24  ;;  %v1689_v16 = vsel %vm1449_vm2, %v1687_v27, %v1688_v34  ;;  %v1693_v10 = vrot.slane %v1656_v55, 3  ;;  %v1694_v57 = vrot.slane %v1657_v2, 3  ;;  %v6161_v55 = vld [vmem:[#allocation8_spill] sm:$0xff]  ;;  %v6165_v27 = vld [vmem:[#allocation10_spill] sm:$0xff]  ;;  %v4884_v34 = vld [vmem:[%s3826_s4 + $0xb8] sm:$0x3f] }
 0x108   : > { %v1692_v59 = vsel %vm1449_vm2, %v1690_v8, %v1691_v33  ;;  %v1696_v60 = vrot.slane %v1658_v25, 3  ;;  %v1697_v6 = vrot.slane %v1659_v32, 3  ;;  %v1699_v62 = vrot.slane %v1660_v58, 3  ;;  %v6162_v32 = vld [vmem:[#allocation9_spill] sm:$0xff] }
 0x109   : > { %v1695_v31 = vsel %vm1449_vm2, %v1693_v10, %v1694_v57  ;;  %v1700_v7 = vrot.slane %v1661_v4, 3  ;;  %v1710_v37 = vadd.f32 %v1680_v19, %v1634_v15  ;;  %v1711_v36 = vadd.f32 %v1683_v20, %v1635_v0  ;;  %v6163_v0 = vld [vmem:[#allocation11_spill] sm:$0xff] }
 0x10a   : > { %v1698_v42 = vsel %vm1449_vm2, %v1696_v60, %v1697_v6  ;;  %v1712_v43 = vadd.f32 %v1686_v23, %v1636_v3  ;;  %v1713_v41 = vadd.f32 %v1689_v16, %v1637_v39  ;;  %v1714_v29 = vadd.f32 %v1692_v59, %v1638_v1  ;;  %v6164_v3 = vld [vmem:[#allocation13_spill] sm:$0xff] }
 0x10b   : > { %v1701_v50 = vsel %vm1449_vm2, %v1699_v62, %v1700_v7  ;;  %v1715_v40 = vadd.f32 %v1695_v31, %v1639_v22  ;;  %v1716_v30 = vadd.f32 %v1698_v42, %v1640_v49  ;;  %v1721_v2 = vrot.slane %v6161_v55, %v4633_v46 }
 0x10c   : > { %v1717_v25 = vadd.f32 %v1701_v50, %v1641_v38  ;;  %v4858_v58 = vrot.slane %v6162_v32, %v4633_v46  ;;  %v4862_v15 = vrot.slane %v4628_v11, %v4633_v46  ;;  %v4866_v39 = vrot.slane %v6164_v3, %v6163_v0 }
 0x10d   : > { %v1722_v1 = vmul.f32 %v4378_v53, %v1721_v2  ;;  %v1723_v22 = vmul.f32 %v4527_v13, %v1721_v2  ;;  %v1724_v49 = vmul.f32 %v4385_v17, %v1721_v2  ;;  %v1725_v38 = vmul.f32 %v4534_v47, %v1721_v2 }
 0x10e   : > { %v1726_v4 = vmul.f32 %v4392_v5, %v1721_v2  ;;  %v1727_v35 = vmul.f32 %v4541_v54, %v1721_v2  ;;  %v1728_v46 = vmul.f32 %v4399_v28, %v1721_v2  ;;  %v1729_v18 = vmul.f32 %v4548_v14, %v1721_v2 }
 0x10f   : > { %v1730_v63 = vmul.f32 %v4406_v48, %v1721_v2  ;;  %v1731_v56 = vmul.f32 %v4594_v61, %v1721_v2  ;;  %v1732_v53 = vmul.f32 %v4469_v52, %v1721_v2  ;;  %v1733_v21 = vmul.f32 %v4646_v12, %v1721_v2 }
 0x110   : > { %v1734_v17 = vmul.f32 %v4510_v44, %v1721_v2  ;;  %v1735_v24 = vmul.f32 %v4842_v45, %v1721_v2  ;;  %v1736_v5 = vmul.f32 %v6165_v27, %v1721_v2  ;;  %v1737_v28 = vmul.f32 %v4884_v34, %v1721_v2 }
 0x111   : > { %v1754_v19 = vrot.slane %v1722_v1, 3  ;;  %v1755_v20 = vrot.slane %v1723_v22, 3  ;;  %v1757_v8 = vrot.slane %v1724_v49, 3  ;;  %v1758_v48 = vrot.slane %v1725_v38, 3 }
 0x112   : > { %v1760_v33 = vrot.slane %v1726_v4, 3  ;;  %v1761_v23 = vrot.slane %v1727_v35, 3  ;;  %v1763_v16 = vrot.slane %v1728_v46, 3  ;;  %v1764_v10 = vrot.slane %v1729_v18, 3 }
 0x113   : > { %v1756_v57 = vsel %vm1449_vm2, %v1754_v19, %v1755_v20  ;;  %v1759_v59 = vsel %vm1449_vm2, %v1757_v8, %v1758_v48  ;;  %v1766_v60 = vrot.slane %v1730_v63, 3  ;;  %v1767_v6 = vrot.slane %v1731_v56, 3 }
 0x114   : > { %v1762_v62 = vsel %vm1449_vm2, %v1760_v33, %v1761_v23  ;;  %v1765_v31 = vsel %vm1449_vm2, %v1763_v16, %v1764_v10  ;;  %v1769_v7 = vrot.slane %v1732_v53, 3  ;;  %v1770_v42 = vrot.slane %v1733_v21, 3  ;;  %v4896_v53 = vld [vmem:[%s3826_s4 + $0x50] sm:$0xff]  ;;  %v6166_v23 = vld [vmem:[#allocation5_spill] sm:$0xff]  ;;  %v4938_v10 = vld [vmem:[%s3826_s4 + $0xc8] sm:$0x3f] }
 0x115   : > { %v1768_v50 = vsel %vm1449_vm2, %v1766_v60, %v1767_v6  ;;  %v1772_v55 = vrot.slane %v1734_v17, 3  ;;  %v1773_v2 = vrot.slane %v1735_v24, 3  ;;  %v1775_v32 = vrot.slane %v1736_v5, 3 }
 0x116   : > { %v1771_v3 = vsel %vm1449_vm2, %v1769_v7, %v1770_v42  ;;  %v1776_v1 = vrot.slane %v1737_v28, 3  ;;  %v1786_v22 = vadd.f32 %v1756_v57, %v1710_v37  ;;  %v1787_v49 = vadd.f32 %v1759_v59, %v1711_v36  ;;  %v4903_v36 = vld [vmem:[%s3826_s4 + $0x60] sm:$0xff] }
 0x117   : > { %v1774_v38 = vsel %vm1449_vm2, %v1772_v55, %v1773_v2  ;;  %v1788_v4 = vadd.f32 %v1762_v62, %v1712_v43  ;;  %v1789_v35 = vadd.f32 %v1765_v31, %v1713_v41  ;;  %v1790_v46 = vadd.f32 %v1768_v50, %v1714_v29  ;;  %v4910_v29 = vld [vmem:[%s3826_s4 + $0x70] sm:$0xff] }
 0x118   : > { %v1777_v18 = vsel %vm1449_vm2, %v1775_v32, %v1776_v1  ;;  %v1791_v63 = vadd.f32 %v1771_v3, %v1715_v40  ;;  %v1792_v56 = vadd.f32 %v1774_v38, %v1716_v30  ;;  %v1798_v21 = vmul.f32 %v4896_v53, %v4858_v58 }
 0x119   : > { %v1793_v17 = vadd.f32 %v1777_v18, %v1717_v25  ;;  %v1799_v37 = vmul.f32 %v4534_v47, %v4858_v58  ;;  %v1800_v43 = vmul.f32 %v4903_v36, %v4858_v58  ;;  %v1801_v41 = vmul.f32 %v4541_v54, %v4858_v58  ;;  %v4917_v25 = vld [vmem:[%s3826_s4 + $0x80] sm:$0xff] }
 0x11a   : > { %v1802_v40 = vmul.f32 %v4910_v29, %v4858_v58  ;;  %v1803_v30 = vmul.f32 %v4548_v14, %v4858_v58  ;;  %v1804_v24 = vmul.f32 %v4917_v25, %v4858_v58  ;;  %v1805_v5 = vmul.f32 %v4594_v61, %v4858_v58 }
 0x11b   : > { %v1806_v28 = vmul.f32 %v4469_v52, %v4858_v58  ;;  %v1807_v19 = vmul.f32 %v4646_v12, %v4858_v58  ;;  %v1808_v20 = vmul.f32 %v4510_v44, %v4858_v58  ;;  %v1809_v8 = vmul.f32 %v4842_v45, %v4858_v58 }
 0x11c   : > { %v1810_v48 = vmul.f32 %v6165_v27, %v4858_v58  ;;  %v1811_v33 = vmul.f32 %v4884_v34, %v4858_v58  ;;  %v1812_v16 = vmul.f32 %v6166_v23, %v4858_v58  ;;  %v1813_v52 = vmul.f32 %v4938_v10, %v4858_v58 }
 0x11d   : > { %v1830_v57 = vrot.slane %v1798_v21, 3  ;;  %v1831_v59 = vrot.slane %v1799_v37, 3  ;;  %v1833_v60 = vrot.slane %v1800_v43, 3  ;;  %v1834_v6 = vrot.slane %v1801_v41, 3 }
 0x11e   : > { %v1836_v62 = vrot.slane %v1802_v40, 3  ;;  %v1837_v31 = vrot.slane %v1803_v30, 3  ;;  %v1839_v7 = vrot.slane %v1804_v24, 3  ;;  %v1840_v42 = vrot.slane %v1805_v5, 3 }
 0x11f   : > { %v1832_v50 = vsel %vm1449_vm2, %v1830_v57, %v1831_v59  ;;  %v1835_v55 = vsel %vm1449_vm2, %v1833_v60, %v1834_v6  ;;  %v1842_v2 = vrot.slane %v1806_v28, 3  ;;  %v1843_v32 = vrot.slane %v1807_v19, 3 }
 0x120   : > { %v1838_v3 = vsel %vm1449_vm2, %v1836_v62, %v1837_v31  ;;  %v1841_v1 = vsel %vm1449_vm2, %v1839_v7, %v1840_v42  ;;  %v1845_v38 = vrot.slane %v1808_v20, 3  ;;  %v1846_v58 = vrot.slane %v1809_v8, 3  ;;  %v6167_v7 = vld [vmem:[#allocation12_spill] sm:$0xff] }
 0x121   : > { %v1844_v18 = vsel %vm1449_vm2, %v1842_v2, %v1843_v32  ;;  %v1848_v21 = vrot.slane %v1810_v48, 3  ;;  %v1849_v37 = vrot.slane %v1811_v33, 3  ;;  %v1851_v43 = vrot.slane %v1812_v16, 3 }
 0x122   : > { %v1847_v41 = vsel %vm1449_vm2, %v1845_v38, %v1846_v58  ;;  %v1852_v40 = vrot.slane %v1813_v52, 3  ;;  %v1862_v30 = vadd.f32 %v1832_v50, %v1786_v22  ;;  %v1863_v24 = vadd.f32 %v1835_v55, %v1787_v49  ;;  %v4984_v50 = vld [vmem:[%s3826_s4 + $0xd8] sm:$0x3f] }
 0x123   : > { %v1850_v5 = vsel %vm1449_vm2, %v1848_v21, %v1849_v37  ;;  %v1864_v28 = vadd.f32 %v1838_v3, %v1788_v4  ;;  %v1865_v19 = vadd.f32 %v1841_v1, %v1789_v35  ;;  %v1866_v57 = vadd.f32 %v1844_v18, %v1790_v46  ;;  %v4963_v46 = vld [vmem:[%s3826_s4 + $0x90] sm:$0xff]  ;;  %6168 = vst [vmem:[#allocation6_spill] sm:$0xff] %v4984_v50 }
 0x124   : > { %v1853_v59 = vsel %vm1449_vm2, %v1851_v43, %v1852_v40  ;;  %v1867_v20 = vadd.f32 %v1847_v41, %v1791_v63  ;;  %v1868_v8 = vadd.f32 %v1850_v5, %v1792_v56  ;;  %v1874_v48 = vmul.f32 %v4903_v36, %v4862_v15 }
 0x125   : > { %v1869_v33 = vadd.f32 %v1853_v59, %v1793_v17  ;;  %v1875_v16 = vmul.f32 %v4541_v54, %v4862_v15  ;;  %v1876_v22 = vmul.f32 %v4910_v29, %v4862_v15  ;;  %v1877_v49 = vmul.f32 %v4548_v14, %v4862_v15 }
 0x126   : > { %v1878_v4 = vmul.f32 %v4917_v25, %v4862_v15  ;;  %v1879_v35 = vmul.f32 %v4594_v61, %v4862_v15  ;;  %v1880_v63 = vmul.f32 %v4963_v46, %v4862_v15  ;;  %v1881_v56 = vmul.f32 %v4646_v12, %v4862_v15 }
 0x127   : > { %v1882_v17 = vmul.f32 %v4510_v44, %v4862_v15  ;;  %v1883_v52 = vmul.f32 %v4842_v45, %v4862_v15  ;;  %v1884_v60 = vmul.f32 %v6165_v27, %v4862_v15  ;;  %v1885_v6 = vmul.f32 %v4884_v34, %v4862_v15 }
 0x128   : > { %v1886_v62 = vmul.f32 %v6166_v23, %v4862_v15  ;;  %v1887_v31 = vmul.f32 %v4938_v10, %v4862_v15  ;;  %v1888_v42 = vmul.f32 %v6167_v7, %v4862_v15  ;;  %v1889_v44 = vmul.f32 %v4984_v50, %v4862_v15 }
 0x129   : > { %v1906_v55 = vrot.slane %v1874_v48, 3  ;;  %v1907_v2 = vrot.slane %v1875_v16, 3  ;;  %v1909_v27 = vrot.slane %v1876_v22, 3  ;;  %v1910_v32 = vrot.slane %v1877_v49, 3 }
 0x12a   : > { %v1912_v3 = vrot.slane %v1878_v4, 3  ;;  %v1913_v1 = vrot.slane %v1879_v35, 3  ;;  %v1915_v38 = vrot.slane %v1880_v63, 3  ;;  %v1916_v58 = vrot.slane %v1881_v56, 3 }
 0x12b   : > { %v1908_v23 = vsel %vm1449_vm2, %v1906_v55, %v1907_v2  ;;  %v1911_v18 = vsel %vm1449_vm2, %v1909_v27, %v1910_v32  ;;  %v1918_v21 = vrot.slane %v1882_v17, 3  ;;  %v1919_v37 = vrot.slane %v1883_v52, 3  ;;  %v5022_v27 = vld [vmem:[%s3826_s4 + $0x40] sm:$0xff] }
 0x12c   : > { %v1914_v43 = vsel %vm1449_vm2, %v1912_v3, %v1913_v1  ;;  %v1917_v41 = vsel %vm1449_vm2, %v1915_v38, %v1916_v58  ;;  %v1921_v40 = vrot.slane %v1884_v60, 3  ;;  %v1922_v15 = vrot.slane %v1885_v6, 3 }
 0x12d   : > { %v1920_v5 = vsel %vm1449_vm2, %v1918_v21, %v1919_v37  ;;  %v1924_v59 = vrot.slane %v1886_v62, 3  ;;  %v1925_v48 = vrot.slane %v1887_v31, 3  ;;  %v1927_v16 = vrot.slane %v1888_v42, 3  ;;  %v6169_v31 = vld [vmem:[#allocation4_spill] sm:$0xff] }
 0x12e   : > { %v1923_v22 = vsel %vm1449_vm2, %v1921_v40, %v1922_v15  ;;  %v1928_v49 = vrot.slane %v1889_v44, 3  ;;  %v1938_v4 = vadd.f32 %v1908_v23, %v1862_v30  ;;  %v1939_v35 = vadd.f32 %v1911_v18, %v1863_v24  ;;  %v6170_v44 = vld [vmem:[#allocation14_spill] sm:$0xff]  ;;  %v5001_v30 = vld [vmem:[%s3826_s4 + $0x10] sm:$0xff] }
 0x12f   : > { %v1926_v63 = vsel %vm1449_vm2, %v1924_v59, %v1925_v48  ;;  %v1940_v56 = vadd.f32 %v1914_v43, %v1864_v28  ;;  %v1941_v17 = vadd.f32 %v1917_v41, %v1865_v19  ;;  %v1942_v52 = vadd.f32 %v1920_v5, %v1866_v57  ;;  %6171 = vst [vmem:[#allocation7_spill] sm:$0xff] %v5001_v30  ;;  %v5008_v19 = vld [vmem:[%s3826_s4 + $0x20] sm:$0xff] }
 0x130   : > { %v1929_v60 = vsel %vm1449_vm2, %v1927_v16, %v1928_v49  ;;  %v1943_v6 = vadd.f32 %v1923_v22, %v1867_v20  ;;  %v1944_v62 = vadd.f32 %v1926_v63, %v1868_v8  ;;  %v1950_v7 = vmul.f32 %v6169_v31, %v4866_v39  ;;  %v5015_v8 = vld [vmem:[%s3826_s4 + $0x30] sm:$0xff] }
 0x131   : > { %v1945_v42 = vadd.f32 %v1929_v60, %v1869_v33  ;;  %v1951_v55 = vmul.f32 %v6170_v44, %v4866_v39  ;;  %v1952_v24 = vmul.f32 %v5001_v30, %v4866_v39  ;;  %v1953_v28 = vmul.f32 %v4702_v51, %v4866_v39 }
 0x132   : > { %v1954_v57 = vmul.f32 %v5008_v19, %v4866_v39  ;;  %v1955_v20 = vmul.f32 %v4707_v9, %v4866_v39  ;;  %v1956_v33 = vmul.f32 %v5015_v8, %v4866_v39  ;;  %v1957_v2 = vmul.f32 %v4712_v26, %v4866_v39 }
 0x133   : > { %v1958_v32 = vmul.f32 %v5022_v27, %v4866_v39  ;;  %v1959_v3 = vmul.f32 %v4527_v13, %v4866_v39  ;;  %v1960_v1 = vmul.f32 %v4896_v53, %v4866_v39  ;;  %v1961_v38 = vmul.f32 %v4534_v47, %v4866_v39 }
 0x134   : > { %v1962_v58 = vmul.f32 %v4903_v36, %v4866_v39  ;;  %v1963_v23 = vmul.f32 %v4541_v54, %v4866_v39  ;;  %v1964_v18 = vmul.f32 %v4910_v29, %v4866_v39  ;;  %v1965_v21 = vmul.f32 %v4548_v14, %v4866_v39 }
 0x135   : > { %v1983_v13 = vrot.slane %v1950_v7, 4  ;;  %v1984_v37 = vrot.slane %v1951_v55, 4  ;;  %v1986_v43 = vrot.slane %v1952_v24, 4  ;;  %v1987_v41 = vrot.slane %v1953_v28, 4 }
 0x136   : > { %v1989_v40 = vrot.slane %v1954_v57, 4  ;;  %v1990_v15 = vrot.slane %v1955_v20, 4  ;;  %v1992_v47 = vrot.slane %v1956_v33, 4  ;;  %v1993_v59 = vrot.slane %v1957_v2, 4 }
 0x137   : > { %v1985_v5 = vsel %vm1982_vm3, %v1983_v13, %v1984_v37  ;;  %v1995_v48 = vrot.slane %v1958_v32, 4  ;;  %v1996_v16 = vrot.slane %v1959_v3, 4  ;;  %v1988_v54 = vsel %vm1982_vm3, %v1986_v43, %v1987_v41 }
 0x138   : > { %v1991_v22 = vsel %vm1982_vm3, %v1989_v40, %v1990_v15  ;;  %v1998_v49 = vrot.slane %v1960_v1, 4  ;;  %v1999_v63 = vrot.slane %v1961_v38, 4  ;;  %v1994_v14 = vsel %vm1982_vm3, %v1992_v47, %v1993_v59 }
 0x139   : > { %v1997_v39 = vsel %vm1982_vm3, %v1995_v48, %v1996_v16  ;;  %v2001_v60 = vrot.slane %v1962_v58, 4  ;;  %v2002_v31 = vrot.slane %v1963_v23, 4  ;;  %v2004_v44 = vrot.slane %v1964_v18, 4  ;;  %v6172_v58 = vld [vmem:[#allocation2_spill] sm:$0xff]  ;;  %v5118_v48 = vld [vmem:[%s3826_s4 + $0x58] sm:$0x3f] }
 0x13a   : > { %v2000_v7 = vsel %vm1982_vm3, %v1998_v49, %v1999_v63  ;;  %v2005_v55 = vrot.slane %v1965_v21, 4  ;;  %v5046_v24 = vadd.f32 %v1985_v5, %v1938_v4  ;;  %v2016_v57 = vadd.f32 %v1988_v54, %v1939_v35  ;;  %v5065_v35 = vld [vmem:[%s6063_s1 + $0x10] sm:$0x7f]  ;;  %v6177_v21 = vld [vmem:[#allocation3_spill] sm:$0xff]  ;;  %v5128_v63 = vld [vmem:[%s3826_s4 + $0x78] sm:$0x3f] }
 0x13b   : > { %v2003_v28 = vsel %vm1982_vm3, %v2001_v60, %v2002_v31  ;;  %v5049_v20 = vadd.f32 %v1991_v22, %v1940_v56  ;;  %v5051_v33 = vadd.f32 %v1994_v14, %v1941_v17  ;;  %v2019_v32 = vadd.f32 %v1997_v39, %v1942_v52  ;;  %6173 = vst [vmem:[#allocation8_spill] sm:$0xff] %v5065_v35  ;;  %v5074_v17 = vld [vmem:[%s6063_s1 + $0x18] sm:$0x7f]  ;;  %v5123_v54 = vld [vmem:[%s3826_s4 + $0x68] sm:$0x3f] }
 0x13c   : > { %v2006_v2 = vsel %vm1982_vm3, %v2004_v44, %v2005_v55  ;;  %v5054_v3 = vadd.f32 %v2000_v7, %v1943_v6  ;;  %v5056_v1 = vadd.f32 %v2003_v28, %v1944_v62  ;;  %v2026_v4 = vrot.slane %v6172_v58, %v6163_v0  ;;  %6174 = vst [vmem:[#allocation9_spill] sm:$0xff] %v5074_v17  ;;  %v5083_v6 = vld [vmem:[%s6063_s1 + $0x20] sm:$0x7f] }
 0x13d   : > { %v5058_v38 = vadd.f32 %v2006_v2, %v1945_v42  ;;  %v5069_v56 = vrot.slane %v5065_v35, %v6163_v0  ;;  %v5078_v52 = vrot.slane %v5074_v17, %v6163_v0  ;;  %6175 = vst [vmem:[#allocation11_spill] sm:$0xff] %v5083_v6  ;;  %v5087_v62 = vrot.slane %v5083_v6, %v6163_v0  ;;  %v5092_v42 = vld [vmem:[%s6063_s1 + $0x28] sm:$0x7f] }
 0x13e   : > { %6176 = vst [vmem:[#allocation13_spill] sm:$0xff] %v5092_v42  ;;  %v5096_v23 = vrot.slane %v5092_v42, %v6163_v0  ;;  %v5100_v18 = vrot.slane %v4628_v11, %v6163_v0  ;;  %v5103_v13 = vsub.s32 5, %v6177_v21  ;;  %v2027_v37 = vmul.f32 %v5001_v30, %v2026_v4  ;;  %v5113_v11 = vld [vmem:[%s3826_s4 + $0x48] sm:$0x3f] }
 0x13f   : > { %v2028_v43 = vmul.f32 %v4702_v51, %v2026_v4  ;;  %v2029_v41 = vmul.f32 %v5008_v19, %v2026_v4  ;;  %v2030_v40 = vmul.f32 %v4707_v9, %v2026_v4  ;;  %v2031_v15 = vmul.f32 %v5015_v8, %v2026_v4 }
 0x140   : > { %6178 = vst [vmem:[#allocation10_spill] sm:$0xff] %v5103_v13  ;;  %v2032_v47 = vmul.f32 %v4712_v26, %v2026_v4  ;;  %v2033_v5 = vmul.f32 %v5022_v27, %v2026_v4  ;;  %v2034_v0 = vmul.f32 %v5113_v11, %v2026_v4  ;;  %v2035_v59 = vmul.f32 %v4896_v53, %v2026_v4 }
 0x141   : > { %v2036_v51 = vmul.f32 %v5118_v48, %v2026_v4  ;;  %v2037_v16 = vmul.f32 %v4903_v36, %v2026_v4  ;;  %v2038_v22 = vmul.f32 %v5123_v54, %v2026_v4  ;;  %v2039_v49 = vmul.f32 %v4910_v29, %v2026_v4 }
 0x142   : > { %v2040_v14 = vmul.f32 %v5128_v63, %v2026_v4  ;;  %v2041_v39 = vmul.f32 %v4917_v25, %v2026_v4  ;;  %v2042_v60 = vmul.f32 %v4594_v61, %v2026_v4  ;;  %v2059_v31 = vrot.slane %v2027_v37, 4 }
 0x143   : > { %v2060_v7 = vrot.slane %v2028_v43, 4  ;;  %v2062_v44 = vrot.slane %v2029_v41, 4  ;;  %v2063_v55 = vrot.slane %v2030_v40, 4  ;;  %v2065_v28 = vrot.slane %v2031_v15, 4 }
 0x144   : > { %v2066_v2 = vrot.slane %v2032_v47, 4  ;;  %v2068_v58 = vrot.slane %v2033_v5, 4  ;;  %v2069_v21 = vrot.slane %v2034_v0, 4  ;;  %v2071_v17 = vrot.slane %v2035_v59, 4 }
 0x145   : > { %v2061_v42 = vsel %vm1982_vm3, %v2059_v31, %v2060_v7  ;;  %v2064_v6 = vsel %vm1982_vm3, %v2062_v44, %v2063_v55  ;;  %v2072_v30 = vrot.slane %v2036_v51, 4  ;;  %v2074_v50 = vrot.slane %v2037_v16, 4 }
 0x146   : > { %v2067_v35 = vsel %vm1982_vm3, %v2065_v28, %v2066_v2  ;;  %v2070_v13 = vsel %vm1982_vm3, %v2068_v58, %v2069_v21  ;;  %v2075_v61 = vrot.slane %v2038_v22, 4  ;;  %v2077_v37 = vrot.slane %v2039_v49, 4  ;;  %v5174_v22 = vld [vmem:[%s3826_s4 + $0x88] sm:$0x3f] }
 0x147   : > { %v2073_v4 = vsel %vm1982_vm3, %v2071_v17, %v2072_v30  ;;  %v2078_v43 = vrot.slane %v2040_v14, 4  ;;  %v2080_v41 = vrot.slane %v2041_v39, 4  ;;  %v2081_v15 = vrot.slane %v2042_v60, 4 }
 0x148   : > { %v2076_v40 = vsel %vm1982_vm3, %v2074_v50, %v2075_v61  ;;  %v2091_v47 = vadd.f32 %v2061_v42, %v5046_v24  ;;  %v2092_v5 = vadd.f32 %v2064_v6, %v2016_v57  ;;  %v2093_v59 = vadd.f32 %v2067_v35, %v5049_v20 }
 0x149   : > { %v2079_v0 = vsel %vm1982_vm3, %v2077_v37, %v2078_v43  ;;  %v2094_v51 = vadd.f32 %v2070_v13, %v5051_v33  ;;  %v2095_v21 = vadd.f32 %v2073_v4, %v2019_v32  ;;  %v2082_v16 = vsel %vm1982_vm3, %v2080_v41, %v2081_v15 }
 0x14a   : > { %v2096_v30 = vadd.f32 %v2076_v40, %v5054_v3  ;;  %v2097_v17 = vadd.f32 %v2079_v0, %v5056_v1  ;;  %v2103_v50 = vmul.f32 %v5008_v19, %v5069_v56  ;;  %v2098_v24 = vadd.f32 %v2082_v16, %v5058_v38 }
 0x14b   : > { %v2104_v57 = vmul.f32 %v4707_v9, %v5069_v56  ;;  %v2105_v20 = vmul.f32 %v5015_v8, %v5069_v56  ;;  %v2106_v33 = vmul.f32 %v4712_v26, %v5069_v56  ;;  %v2107_v32 = vmul.f32 %v5022_v27, %v5069_v56 }
 0x14c   : > { %v2108_v3 = vmul.f32 %v5113_v11, %v5069_v56  ;;  %v2109_v1 = vmul.f32 %v4896_v53, %v5069_v56  ;;  %v2110_v38 = vmul.f32 %v5118_v48, %v5069_v56  ;;  %v2111_v9 = vmul.f32 %v4903_v36, %v5069_v56 }
 0x14d   : > { %v2112_v35 = vmul.f32 %v5123_v54, %v5069_v56  ;;  %v2113_v6 = vmul.f32 %v4910_v29, %v5069_v56  ;;  %v2114_v42 = vmul.f32 %v5128_v63, %v5069_v56  ;;  %v2115_v13 = vmul.f32 %v4917_v25, %v5069_v56 }
 0x14e   : > { %v2116_v49 = vmul.f32 %v5174_v22, %v5069_v56  ;;  %v2117_v14 = vmul.f32 %v4963_v46, %v5069_v56  ;;  %v2118_v39 = vmul.f32 %v4646_v12, %v5069_v56  ;;  %v2135_v60 = vrot.slane %v2103_v50, 4 }
 0x14f   : > { %v2136_v31 = vrot.slane %v2104_v57, 4  ;;  %v2138_v7 = vrot.slane %v2105_v20, 4  ;;  %v2139_v44 = vrot.slane %v2106_v33, 4  ;;  %v2141_v55 = vrot.slane %v2107_v32, 4 }
 0x150   : > { %v2142_v28 = vrot.slane %v2108_v3, 4  ;;  %v2144_v2 = vrot.slane %v2109_v1, 4  ;;  %v2145_v58 = vrot.slane %v2110_v38, 4  ;;  %v2147_v37 = vrot.slane %v2111_v9, 4 }
 0x151   : > { %v2137_v61 = vsel %vm1982_vm3, %v2135_v60, %v2136_v31  ;;  %v2140_v4 = vsel %vm1982_vm3, %v2138_v7, %v2139_v44  ;;  %v2148_v43 = vrot.slane %v2112_v35, 4  ;;  %v2150_v15 = vrot.slane %v2113_v6, 4  ;;  %v5217_v31 = vld [vmem:[%s3826_s4 + $0x98] sm:$0x3f]  ;;  %v5222_v44 = vld [vmem:[%s3826_s4 + $0xa0] sm:$0xff] }
 0x152   : > { %v2143_v41 = vsel %vm1982_vm3, %v2141_v55, %v2142_v28  ;;  %v2146_v40 = vsel %vm1982_vm3, %v2144_v2, %v2145_v58  ;;  %v2151_v12 = vrot.slane %v2114_v42, 4  ;;  %v2153_v0 = vrot.slane %v2115_v13, 4 }
 0x153   : > { %v2149_v56 = vsel %vm1982_vm3, %v2147_v37, %v2148_v43  ;;  %v2154_v16 = vrot.slane %v2116_v49, 4  ;;  %v2156_v50 = vrot.slane %v2117_v14, 4  ;;  %v2157_v20 = vrot.slane %v2118_v39, 4 }
 0x154   : > { %v2152_v57 = vsel %vm1982_vm3, %v2150_v15, %v2151_v12  ;;  %v2167_v33 = vadd.f32 %v2137_v61, %v2091_v47  ;;  %v2168_v32 = vadd.f32 %v2140_v4, %v2092_v5  ;;  %v2169_v1 = vadd.f32 %v2143_v41, %v2093_v59 }
 0x155   : > { %v2155_v3 = vsel %vm1982_vm3, %v2153_v0, %v2154_v16  ;;  %v2170_v38 = vadd.f32 %v2146_v40, %v2094_v51  ;;  %v2171_v9 = vadd.f32 %v2149_v56, %v2095_v21  ;;  %v2158_v35 = vsel %vm1982_vm3, %v2156_v50, %v2157_v20 }
 0x156   : > { %v2172_v60 = vadd.f32 %v2152_v57, %v2096_v30  ;;  %v2173_v6 = vadd.f32 %v2155_v3, %v2097_v17  ;;  %v2179_v42 = vmul.f32 %v5015_v8, %v5078_v52  ;;  %v2174_v13 = vadd.f32 %v2158_v35, %v2098_v24 }
 0x157   : > { %v2180_v49 = vmul.f32 %v4712_v26, %v5078_v52  ;;  %v2181_v47 = vmul.f32 %v5022_v27, %v5078_v52  ;;  %v2182_v5 = vmul.f32 %v5113_v11, %v5078_v52  ;;  %v2183_v59 = vmul.f32 %v4896_v53, %v5078_v52 }
 0x158   : > { %v2184_v51 = vmul.f32 %v5118_v48, %v5078_v52  ;;  %v2185_v21 = vmul.f32 %v4903_v36, %v5078_v52  ;;  %v2186_v30 = vmul.f32 %v5123_v54, %v5078_v52  ;;  %v2187_v26 = vmul.f32 %v4910_v29, %v5078_v52 }
 0x159   : > { %v2188_v17 = vmul.f32 %v5128_v63, %v5078_v52  ;;  %v2189_v24 = vmul.f32 %v4917_v25, %v5078_v52  ;;  %v2190_v14 = vmul.f32 %v5174_v22, %v5078_v52  ;;  %v2191_v39 = vmul.f32 %v4963_v46, %v5078_v52 }
 0x15a   : > { %v2192_v7 = vmul.f32 %v5217_v31, %v5078_v52  ;;  %v2193_v55 = vmul.f32 %v5222_v44, %v5078_v52  ;;  %v2194_v28 = vmul.f32 %v4842_v45, %v5078_v52  ;;  %v2211_v2 = vrot.slane %v2179_v42, 4 }
 0x15b   : > { %v2212_v58 = vrot.slane %v2180_v49, 4  ;;  %v2214_v61 = vrot.slane %v2181_v47, 4  ;;  %v2215_v4 = vrot.slane %v2182_v5, 4  ;;  %v2217_v37 = vrot.slane %v2183_v59, 4 }
 0x15c   : > { %v2218_v43 = vrot.slane %v2184_v51, 4  ;;  %v2220_v41 = vrot.slane %v2185_v21, 4  ;;  %v2221_v40 = vrot.slane %v2186_v30, 4  ;;  %v2223_v56 = vrot.slane %v2187_v26, 4 }
 0x15d   : > { %v2213_v15 = vsel %vm1982_vm3, %v2211_v2, %v2212_v58  ;;  %v2216_v12 = vsel %vm1982_vm3, %v2214_v61, %v2215_v4  ;;  %v2224_v0 = vrot.slane %v2188_v17, 4  ;;  %v2226_v57 = vrot.slane %v2189_v24, 4  ;;  %v5265_v4 = vld [vmem:[%s3826_s4 + $0xb0] sm:$0xff] }
 0x15e   : > { %v2219_v16 = vsel %vm1982_vm3, %v2217_v37, %v2218_v43  ;;  %v2222_v50 = vsel %vm1982_vm3, %v2220_v41, %v2221_v40  ;;  %v2227_v52 = vrot.slane %v2190_v14, 4  ;;  %v2229_v3 = vrot.slane %v2191_v39, 4 }
 0x15f   : > { %v2225_v20 = vsel %vm1982_vm3, %v2223_v56, %v2224_v0  ;;  %v2230_v35 = vrot.slane %v2192_v7, 4  ;;  %v2232_v42 = vrot.slane %v2193_v55, 4  ;;  %v2233_v47 = vrot.slane %v2194_v28, 4 }
 0x160   : > { %v2228_v49 = vsel %vm1982_vm3, %v2226_v57, %v2227_v52  ;;  %v2243_v5 = vadd.f32 %v2213_v15, %v2167_v33  ;;  %v2244_v59 = vadd.f32 %v2216_v12, %v2168_v32  ;;  %v2245_v21 = vadd.f32 %v2219_v16, %v2169_v1 }
 0x161   : > { %v2231_v51 = vsel %vm1982_vm3, %v2229_v3, %v2230_v35  ;;  %v2246_v30 = vadd.f32 %v2222_v50, %v2170_v38  ;;  %v2247_v26 = vadd.f32 %v2225_v20, %v2171_v9  ;;  %v2234_v17 = vsel %vm1982_vm3, %v2232_v42, %v2233_v47 }
 0x162   : > { %v2248_v2 = vadd.f32 %v2228_v49, %v2172_v60  ;;  %v2249_v24 = vadd.f32 %v2231_v51, %v2173_v6  ;;  %v2255_v14 = vmul.f32 %v5022_v27, %v5087_v62  ;;  %v2250_v39 = vadd.f32 %v2234_v17, %v2174_v13 }
 0x163   : > { %v2256_v7 = vmul.f32 %v5113_v11, %v5087_v62  ;;  %v2257_v33 = vmul.f32 %v4896_v53, %v5087_v62  ;;  %v2258_v32 = vmul.f32 %v5118_v48, %v5087_v62  ;;  %v2259_v1 = vmul.f32 %v4903_v36, %v5087_v62 }
 0x164   : > { %v2260_v38 = vmul.f32 %v5123_v54, %v5087_v62  ;;  %v2261_v9 = vmul.f32 %v4910_v29, %v5087_v62  ;;  %v2262_v60 = vmul.f32 %v5128_v63, %v5087_v62  ;;  %v2263_v6 = vmul.f32 %v4917_v25, %v5087_v62 }
 0x165   : > { %v2264_v13 = vmul.f32 %v5174_v22, %v5087_v62  ;;  %v2265_v55 = vmul.f32 %v4963_v46, %v5087_v62  ;;  %v2266_v28 = vmul.f32 %v5217_v31, %v5087_v62  ;;  %v2267_v58 = vmul.f32 %v5222_v44, %v5087_v62 }
 0x166   : > { %v2268_v61 = vmul.f32 %v4842_v45, %v5087_v62  ;;  %v2269_v37 = vmul.f32 %v5265_v4, %v5087_v62  ;;  %v2270_v43 = vmul.f32 %v4884_v34, %v5087_v62  ;;  %v2287_v41 = vrot.slane %v2255_v14, 4 }
 0x167   : > { %v2288_v40 = vrot.slane %v2256_v7, 4  ;;  %v2290_v15 = vrot.slane %v2257_v33, 4  ;;  %v2291_v12 = vrot.slane %v2258_v32, 4  ;;  %v2293_v56 = vrot.slane %v2259_v1, 4 }
 0x168   : > { %v2294_v0 = vrot.slane %v2260_v38, 4  ;;  %v2296_v16 = vrot.slane %v2261_v9, 4  ;;  %v2297_v50 = vrot.slane %v2262_v60, 4  ;;  %v2299_v20 = vrot.slane %v2263_v6, 4 }
 0x169   : > { %v2289_v57 = vsel %vm1982_vm3, %v2287_v41, %v2288_v40  ;;  %v2292_v52 = vsel %vm1982_vm3, %v2290_v15, %v2291_v12  ;;  %v2300_v3 = vrot.slane %v2264_v13, 4  ;;  %v2302_v49 = vrot.slane %v2265_v55, 4  ;;  %v5308_v12 = vld [vmem:[%s3826_s4 + $0xc0] sm:$0xff] }
 0x16a   : > { %v2295_v35 = vsel %vm1982_vm3, %v2293_v56, %v2294_v0  ;;  %v2298_v42 = vsel %vm1982_vm3, %v2296_v16, %v2297_v50  ;;  %v2303_v62 = vrot.slane %v2266_v28, 4  ;;  %v2305_v51 = vrot.slane %v2267_v58, 4 }
 0x16b   : > { %v2301_v47 = vsel %vm1982_vm3, %v2299_v20, %v2300_v3  ;;  %v2306_v17 = vrot.slane %v2268_v61, 4  ;;  %v2308_v14 = vrot.slane %v2269_v37, 4  ;;  %v2309_v33 = vrot.slane %v2270_v43, 4 }
 0x16c   : > { %v2304_v7 = vsel %vm1982_vm3, %v2302_v49, %v2303_v62  ;;  %v2319_v32 = vadd.f32 %v2289_v57, %v2243_v5  ;;  %v2320_v1 = vadd.f32 %v2292_v52, %v2244_v59  ;;  %v2321_v9 = vadd.f32 %v2295_v35, %v2245_v21 }
 0x16d   : > { %v2307_v38 = vsel %vm1982_vm3, %v2305_v51, %v2306_v17  ;;  %v2322_v60 = vadd.f32 %v2298_v42, %v2246_v30  ;;  %v2323_v6 = vadd.f32 %v2301_v47, %v2247_v26  ;;  %v2310_v13 = vsel %vm1982_vm3, %v2308_v14, %v2309_v33 }
 0x16e   : > { %v2324_v41 = vadd.f32 %v2304_v7, %v2248_v2  ;;  %v2325_v55 = vadd.f32 %v2307_v38, %v2249_v24  ;;  %v2331_v28 = vmul.f32 %v4896_v53, %v5096_v23  ;;  %v2326_v58 = vadd.f32 %v2310_v13, %v2250_v39 }
 0x16f   : > { %v2332_v61 = vmul.f32 %v5118_v48, %v5096_v23  ;;  %v2333_v5 = vmul.f32 %v4903_v36, %v5096_v23  ;;  %v2334_v59 = vmul.f32 %v5123_v54, %v5096_v23  ;;  %v2335_v21 = vmul.f32 %v4910_v29, %v5096_v23 }
 0x170   : > { %v2336_v30 = vmul.f32 %v5128_v63, %v5096_v23  ;;  %v2337_v26 = vmul.f32 %v4917_v25, %v5096_v23  ;;  %v2338_v2 = vmul.f32 %v5174_v22, %v5096_v23  ;;  %v2339_v24 = vmul.f32 %v4963_v46, %v5096_v23 }
 0x171   : > { %v2340_v39 = vmul.f32 %v5217_v31, %v5096_v23  ;;  %v2341_v37 = vmul.f32 %v5222_v44, %v5096_v23  ;;  %v2342_v43 = vmul.f32 %v4842_v45, %v5096_v23  ;;  %v2343_v40 = vmul.f32 %v5265_v4, %v5096_v23 }
 0x172   : > { %v2344_v15 = vmul.f32 %v4884_v34, %v5096_v23  ;;  %v2345_v56 = vmul.f32 %v5308_v12, %v5096_v23  ;;  %v2346_v0 = vmul.f32 %v4938_v10, %v5096_v23  ;;  %v2363_v16 = vrot.slane %v2331_v28, 4 }
 0x173   : > { %v2364_v50 = vrot.slane %v2332_v61, 4  ;;  %v2366_v57 = vrot.slane %v2333_v5, 4  ;;  %v2367_v52 = vrot.slane %v2334_v59, 4  ;;  %v2369_v20 = vrot.slane %v2335_v21, 4 }
 0x174   : > { %v2370_v3 = vrot.slane %v2336_v30, 4  ;;  %v2372_v35 = vrot.slane %v2337_v26, 4  ;;  %v2373_v42 = vrot.slane %v2338_v2, 4  ;;  %v2375_v47 = vrot.slane %v2339_v24, 4 }
 0x175   : > { %v2365_v49 = vsel %vm1982_vm3, %v2363_v16, %v2364_v50  ;;  %v2368_v62 = vsel %vm1982_vm3, %v2366_v57, %v2367_v52  ;;  %v2376_v51 = vrot.slane %v2340_v39, 4  ;;  %v2378_v7 = vrot.slane %v2341_v37, 4  ;;  %v5351_v52 = vld [vmem:[%s3826_s4 + $0xd0] sm:$0xff] }
 0x176   : > { %v2371_v17 = vsel %vm1982_vm3, %v2369_v20, %v2370_v3  ;;  %v2374_v14 = vsel %vm1982_vm3, %v2372_v35, %v2373_v42  ;;  %v2379_v23 = vrot.slane %v2342_v43, 4  ;;  %v2381_v38 = vrot.slane %v2343_v40, 4  ;;  %6179 = vst [vmem:[#allocation5_spill] sm:$0xff] %v5351_v52  ;;  %v6180_v3 = vld [vmem:[#allocation6_spill] sm:$0xff] }
 0x177   : > { %v2377_v33 = vsel %vm1982_vm3, %v2375_v47, %v2376_v51  ;;  %v2382_v13 = vrot.slane %v2344_v15, 4  ;;  %v2384_v28 = vrot.slane %v2345_v56, 4  ;;  %v2385_v5 = vrot.slane %v2346_v0, 4 }
 0x178   : > { %v2380_v61 = vsel %vm1982_vm3, %v2378_v7, %v2379_v23  ;;  %v2395_v59 = vadd.f32 %v2365_v49, %v2319_v32  ;;  %v2396_v21 = vadd.f32 %v2368_v62, %v2320_v1  ;;  %v2397_v26 = vadd.f32 %v2371_v17, %v2321_v9 }
 0x179   : > { %v2383_v30 = vsel %vm1982_vm3, %v2381_v38, %v2382_v13  ;;  %v2398_v2 = vadd.f32 %v2374_v14, %v2322_v60  ;;  %v2399_v24 = vadd.f32 %v2377_v33, %v2323_v6  ;;  %v2386_v39 = vsel %vm1982_vm3, %v2384_v28, %v2385_v5 }
 0x17a   : > { %v2400_v16 = vadd.f32 %v2380_v61, %v2324_v41  ;;  %v2401_v37 = vadd.f32 %v2383_v30, %v2325_v55  ;;  %v2407_v43 = vmul.f32 %v4903_v36, %v5100_v18  ;;  %v2402_v40 = vadd.f32 %v2386_v39, %v2326_v58 }
 0x17b   : > { %v2408_v15 = vmul.f32 %v5123_v54, %v5100_v18  ;;  %v2409_v32 = vmul.f32 %v4910_v29, %v5100_v18  ;;  %v2410_v1 = vmul.f32 %v5128_v63, %v5100_v18  ;;  %v2411_v9 = vmul.f32 %v4917_v25, %v5100_v18 }
 0x17c   : > { %v2412_v60 = vmul.f32 %v5174_v22, %v5100_v18  ;;  %v2413_v6 = vmul.f32 %v4963_v46, %v5100_v18  ;;  %v2414_v41 = vmul.f32 %v5217_v31, %v5100_v18  ;;  %v2415_v55 = vmul.f32 %v5222_v44, %v5100_v18 }
 0x17d   : > { %v2416_v58 = vmul.f32 %v4842_v45, %v5100_v18  ;;  %v2417_v56 = vmul.f32 %v5265_v4, %v5100_v18  ;;  %v2418_v0 = vmul.f32 %v4884_v34, %v5100_v18  ;;  %v2419_v50 = vmul.f32 %v5308_v12, %v5100_v18 }
 0x17e   : > { %v2420_v57 = vmul.f32 %v4938_v10, %v5100_v18  ;;  %v2421_v20 = vmul.f32 %v5351_v52, %v5100_v18  ;;  %v2422_v45 = vmul.f32 %v6180_v3, %v5100_v18  ;;  %v2439_v35 = vrot.slane %v2407_v43, 4 }
 0x17f   : > { %v2440_v42 = vrot.slane %v2408_v15, 4  ;;  %v2442_v49 = vrot.slane %v2409_v32, 4  ;;  %v2443_v62 = vrot.slane %v2410_v1, 4  ;;  %v2445_v47 = vrot.slane %v2411_v9, 4 }
 0x180   : > { %v2446_v34 = vrot.slane %v2412_v60, 4  ;;  %v2448_v51 = vrot.slane %v2413_v6, 4  ;;  %v2449_v17 = vrot.slane %v2414_v41, 4  ;;  %v2451_v7 = vrot.slane %v2415_v55, 4 }
 0x181   : > { %v2441_v14 = vsel %vm1982_vm3, %v2439_v35, %v2440_v42  ;;  %v2444_v10 = vsel %vm1982_vm3, %v2442_v49, %v2443_v62  ;;  %v2452_v23 = vrot.slane %v2416_v58, 4  ;;  %v2454_v13 = vrot.slane %v2417_v56, 4  ;;  %v5368_v56 = vld [vmem:[%s6063_s1] sm:$0x7f]  ;;  %v5400_v49 = vld [vmem:[%s3826_s4 + $0x28] sm:$0x3f] }
 0x182   : > { %v2447_v33 = vsel %vm1982_vm3, %v2445_v47, %v2446_v34  ;;  %v2450_v38 = vsel %vm1982_vm3, %v2448_v51, %v2449_v17  ;;  %v2455_v18 = vrot.slane %v2418_v0, 4  ;;  %v2457_v61 = vrot.slane %v2419_v50, 4  ;;  %6181 = vst [vmem:[#allocation12_spill] sm:$0xff] %v5368_v56  ;;  %v5405_v34 = vld [vmem:[%s3826_s4 + $0x38] sm:$0x3f] }
 0x183   : > { %v2453_v28 = vsel %vm1982_vm3, %v2451_v7, %v2452_v23  ;;  %v2458_v5 = vrot.slane %v2420_v57, 4  ;;  %v2460_v30 = vrot.slane %v2421_v20, 4  ;;  %v2461_v43 = vrot.slane %v2422_v45, 4  ;;  %v6187_v20 = vld [vmem:[#allocation7_spill] sm:$0xff]  ;;  %v5395_v45 = vld [vmem:[%s3826_s4 + $0x18] sm:$0x3f] }
 0x184   : > { %v2456_v39 = vsel %vm1982_vm3, %v2454_v13, %v2455_v18  ;;  %v2471_v15 = vadd.f32 %v2441_v14, %v2395_v59  ;;  %v2472_v32 = vadd.f32 %v2444_v10, %v2396_v21  ;;  %v2473_v9 = vadd.f32 %v2447_v33, %v2397_v26  ;;  %v6182_v59 = vld [vmem:[#allocation10_spill] sm:$0xff]  ;;  %v5375_v26 = vld [vmem:[%s6063_s1 + $0x8] sm:$0x7f] }
 0x185   : > { %v2459_v1 = vsel %vm1982_vm3, %v2457_v61, %v2458_v5  ;;  %v2474_v60 = vadd.f32 %v2450_v38, %v2398_v2  ;;  %v2475_v6 = vadd.f32 %v2453_v28, %v2399_v24  ;;  %v2462_v41 = vsel %vm1982_vm3, %v2460_v30, %v2461_v43  ;;  %6183 = vst [vmem:[#allocation4_spill] sm:$0xff] %v5375_v26  ;;  %v6184_v24 = vld [vmem:[#allocation8_spill] sm:$0xff] }
 0x186   : > { %v2476_v55 = vadd.f32 %v2456_v39, %v2400_v16  ;;  %v2477_v58 = vadd.f32 %v2459_v1, %v2401_v37  ;;  %v2482_v21 = vrot.slane %v5368_v56, %v6182_v59  ;;  %v2478_v0 = vadd.f32 %v2462_v41, %v2402_v40  ;;  %v5386_v37 = vld [vmem:[%s3826_s4] sm:$0xff]  ;;  %v5390_v40 = vld [vmem:[%s3826_s4 + $0x8] sm:$0x3f] }
 0x187   : > { %v5379_v2 = vrot.slane %v5375_v26, %v6182_v59  ;;  %v5383_v16 = vrot.slane %v6184_v24, %v6182_v59  ;;  %6185 = vst [vmem:[#allocation14_spill] sm:$0xff] %v5386_v37  ;;  %6186 = vst [vmem:[#allocation2_spill] sm:$0xff] %v5390_v40 }
 0x188   : > { %v2483_v50 = vmul.f32 %v5386_v37, %v2482_v21  ;;  %v2484_v57 = vmul.f32 %v5390_v40, %v2482_v21  ;;  %v2485_v3 = vmul.f32 %v6187_v20, %v2482_v21  ;;  %v2486_v35 = vmul.f32 %v5395_v45, %v2482_v21 }
 0x189   : > { %v2487_v42 = vmul.f32 %v5008_v19, %v2482_v21  ;;  %v2488_v62 = vmul.f32 %v5400_v49, %v2482_v21  ;;  %v2489_v47 = vmul.f32 %v5015_v8, %v2482_v21  ;;  %v2490_v51 = vmul.f32 %v5405_v34, %v2482_v21 }
 0x18a   : > { %v2491_v17 = vmul.f32 %v5022_v27, %v2482_v21  ;;  %v2492_v14 = vmul.f32 %v5113_v11, %v2482_v21  ;;  %v2493_v10 = vmul.f32 %v4896_v53, %v2482_v21  ;;  %v2494_v7 = vmul.f32 %v5118_v48, %v2482_v21 }
 0x18b   : > { %v2495_v23 = vmul.f32 %v4903_v36, %v2482_v21  ;;  %v2496_v33 = vmul.f32 %v5123_v54, %v2482_v21  ;;  %v2497_v38 = vmul.f32 %v4910_v29, %v2482_v21  ;;  %v2498_v13 = vmul.f32 %v5128_v63, %v2482_v21 }
 0x18c   : > { %v2516_v18 = vrot.slane %v2483_v50, 5  ;;  %v2517_v28 = vrot.slane %v2484_v57, 5  ;;  %v2519_v61 = vrot.slane %v2485_v3, 5  ;;  %v2520_v5 = vrot.slane %v2486_v35, 5 }
 0x18d   : > { %v2522_v30 = vrot.slane %v2487_v42, 5  ;;  %v2523_v39 = vrot.slane %v2488_v62, 5  ;;  %v2525_v43 = vrot.slane %v2489_v47, 5  ;;  %v2526_v1 = vrot.slane %v2490_v51, 5 }
 0x18e   : > { %v2518_v41 = vsel %vm2515_vm4, %v2516_v18, %v2517_v28  ;;  %v2521_v24 = vsel %vm2515_vm4, %v2519_v61, %v2520_v5  ;;  %v2528_v40 = vrot.slane %v2491_v17, 5  ;;  %v2529_v37 = vrot.slane %v2492_v14, 5 }
 0x18f   : > { %v2524_v26 = vsel %vm2515_vm4, %v2522_v30, %v2523_v39  ;;  %v2527_v56 = vsel %vm2515_vm4, %v2525_v43, %v2526_v1  ;;  %v2531_v52 = vrot.slane %v2493_v10, 5  ;;  %v2532_v21 = vrot.slane %v2494_v7, 5 }
 0x190   : > { %v2530_v50 = vsel %vm2515_vm4, %v2528_v40, %v2529_v37  ;;  %v2534_v57 = vrot.slane %v2495_v23, 5  ;;  %v2535_v3 = vrot.slane %v2496_v33, 5  ;;  %v2537_v35 = vrot.slane %v2497_v38, 5 }
 0x191   : > { %v2533_v42 = vsel %vm2515_vm4, %v2531_v52, %v2532_v21  ;;  %v2538_v62 = vrot.slane %v2498_v13, 5  ;;  %v2548_v47 = vadd.f32 %v2518_v41, %v2471_v15  ;;  %v2549_v51 = vadd.f32 %v2521_v24, %v2472_v32 }
 0x192   : > { %v2536_v18 = vsel %vm2515_vm4, %v2534_v57, %v2535_v3  ;;  %v2550_v17 = vadd.f32 %v2524_v26, %v2473_v9  ;;  %v2551_v14 = vadd.f32 %v2527_v56, %v2474_v60  ;;  %v2552_v28 = vadd.f32 %v2530_v50, %v2475_v6 }
 0x193   : > { %v2539_v61 = vsel %vm2515_vm4, %v2537_v35, %v2538_v62  ;;  %v2553_v5 = vadd.f32 %v2533_v42, %v2476_v55  ;;  %v2554_v10 = vadd.f32 %v2536_v18, %v2477_v58  ;;  %v2560_v37 = vmul.f32 %v6187_v20, %v5379_v2 }
 0x194   : > { %v2555_v40 = vadd.f32 %v2539_v61, %v2478_v0  ;;  %v2561_v7 = vmul.f32 %v5395_v45, %v5379_v2  ;;  %v2562_v52 = vmul.f32 %v5008_v19, %v5379_v2  ;;  %v2563_v15 = vmul.f32 %v5400_v49, %v5379_v2 }
 0x195   : > { %v2564_v32 = vmul.f32 %v5015_v8, %v5379_v2  ;;  %v2565_v9 = vmul.f32 %v5405_v34, %v5379_v2  ;;  %v2566_v60 = vmul.f32 %v5022_v27, %v5379_v2  ;;  %v2567_v6 = vmul.f32 %v5113_v11, %v5379_v2 }
 0x196   : > { %v2568_v55 = vmul.f32 %v4896_v53, %v5379_v2  ;;  %v2569_v58 = vmul.f32 %v5118_v48, %v5379_v2  ;;  %v2570_v56 = vmul.f32 %v4903_v36, %v5379_v2  ;;  %v2571_v0 = vmul.f32 %v5123_v54, %v5379_v2 }
 0x197   : > { %v2572_v26 = vmul.f32 %v4910_v29, %v5379_v2  ;;  %v2573_v20 = vmul.f32 %v5128_v63, %v5379_v2  ;;  %v2574_v23 = vmul.f32 %v4917_v25, %v5379_v2  ;;  %v2575_v53 = vmul.f32 %v5174_v22, %v5379_v2 }
 0x198   : > { %v2592_v33 = vrot.slane %v2560_v37, 5  ;;  %v2593_v38 = vrot.slane %v2561_v7, 5  ;;  %v2595_v13 = vrot.slane %v2562_v52, 5  ;;  %v2596_v30 = vrot.slane %v2563_v15, 5 }
 0x199   : > { %v2598_v36 = vrot.slane %v2564_v32, 5  ;;  %v2599_v39 = vrot.slane %v2565_v9, 5  ;;  %v2601_v43 = vrot.slane %v2566_v60, 5  ;;  %v2602_v1 = vrot.slane %v2567_v6, 5 }
 0x19a   : > { %v2594_v41 = vsel %vm2515_vm4, %v2592_v33, %v2593_v38  ;;  %v2597_v29 = vsel %vm2515_vm4, %v2595_v13, %v2596_v30  ;;  %v2604_v24 = vrot.slane %v2568_v55, 5  ;;  %v2605_v21 = vrot.slane %v2569_v58, 5  ;;  %v5498_v33 = vld [vmem:[%s3826_s4 + $0x80] sm:$0xff] }
 0x19b   : > { %v2600_v50 = vsel %vm2515_vm4, %v2598_v36, %v2599_v39  ;;  %v2603_v25 = vsel %vm2515_vm4, %v2601_v43, %v2602_v1  ;;  %v2607_v57 = vrot.slane %v2570_v56, 5  ;;  %v2608_v2 = vrot.slane %v2571_v0, 5 }
 0x19c   : > { %v2606_v3 = vsel %vm2515_vm4, %v2604_v24, %v2605_v21  ;;  %v2610_v35 = vrot.slane %v2572_v26, 5  ;;  %v2611_v42 = vrot.slane %v2573_v20, 5  ;;  %v2613_v62 = vrot.slane %v2574_v23, 5  ;;  %v5491_v20 = vld [vmem:[%s3826_s4 + $0x70] sm:$0xff] }
 0x19d   : > { %v2609_v18 = vsel %vm2515_vm4, %v2607_v57, %v2608_v2  ;;  %v2614_v61 = vrot.slane %v2575_v53, 5  ;;  %v2624_v37 = vadd.f32 %v2594_v41, %v2548_v47  ;;  %v2625_v7 = vadd.f32 %v2597_v29, %v2549_v51 }
 0x19e   : > { %v2612_v52 = vsel %vm2515_vm4, %v2610_v35, %v2611_v42  ;;  %v2626_v15 = vadd.f32 %v2600_v50, %v2550_v17  ;;  %v2627_v32 = vadd.f32 %v2603_v25, %v2551_v14  ;;  %v2628_v9 = vadd.f32 %v2606_v3, %v2552_v28 }
 0x19f   : > { %v2615_v60 = vsel %vm2515_vm4, %v2613_v62, %v2614_v61  ;;  %v2629_v6 = vadd.f32 %v2609_v18, %v2553_v5  ;;  %v2630_v55 = vadd.f32 %v2612_v52, %v2554_v10  ;;  %v2636_v58 = vmul.f32 %v5008_v19, %v5383_v16  ;;  %v5477_v5 = vld [vmem:[%s3826_s4 + $0x50] sm:$0xff] }
 0x1a0   : > { %v2631_v56 = vadd.f32 %v2615_v60, %v2555_v40  ;;  %v2637_v47 = vmul.f32 %v5400_v49, %v5383_v16  ;;  %v2638_v51 = vmul.f32 %v5015_v8, %v5383_v16  ;;  %v2639_v17 = vmul.f32 %v5405_v34, %v5383_v16  ;;  %v5484_v40 = vld [vmem:[%s3826_s4 + $0x60] sm:$0xff] }
 0x1a1   : > { %v2640_v14 = vmul.f32 %v5022_v27, %v5383_v16  ;;  %v2641_v28 = vmul.f32 %v5113_v11, %v5383_v16  ;;  %v2642_v19 = vmul.f32 %v5477_v5, %v5383_v16  ;;  %v2643_v10 = vmul.f32 %v5118_v48, %v5383_v16 }
 0x1a2   : > { %v2644_v0 = vmul.f32 %v5484_v40, %v5383_v16  ;;  %v2645_v26 = vmul.f32 %v5123_v54, %v5383_v16  ;;  %v2646_v23 = vmul.f32 %v5491_v20, %v5383_v16  ;;  %v2647_v53 = vmul.f32 %v5128_v63, %v5383_v16 }
 0x1a3   : > { %v2648_v38 = vmul.f32 %v5498_v33, %v5383_v16  ;;  %v2649_v13 = vmul.f32 %v5174_v22, %v5383_v16  ;;  %v2650_v30 = vmul.f32 %v4963_v46, %v5383_v16  ;;  %v2651_v36 = vmul.f32 %v5217_v31, %v5383_v16 }
 0x1a4   : > { %v2668_v39 = vrot.slane %v2636_v58, 5  ;;  %v2669_v43 = vrot.slane %v2637_v47, 5  ;;  %v2671_v1 = vrot.slane %v2638_v51, 5  ;;  %v2672_v41 = vrot.slane %v2639_v17, 5 }
 0x1a5   : > { %v2674_v29 = vrot.slane %v2640_v14, 5  ;;  %v2675_v24 = vrot.slane %v2641_v28, 5  ;;  %v2677_v21 = vrot.slane %v2642_v19, 5  ;;  %v2678_v50 = vrot.slane %v2643_v10, 5 }
 0x1a6   : > { %v2670_v25 = vsel %vm2515_vm4, %v2668_v39, %v2669_v43  ;;  %v2673_v57 = vsel %vm2515_vm4, %v2671_v1, %v2672_v41  ;;  %v2680_v2 = vrot.slane %v2644_v0, 5  ;;  %v2681_v3 = vrot.slane %v2645_v26, 5  ;;  %v6188_v26 = vld [vmem:[#allocation9_spill] sm:$0xff] }
 0x1a7   : > { %v2676_v35 = vsel %vm2515_vm4, %v2674_v29, %v2675_v24  ;;  %v2679_v46 = vsel %vm2515_vm4, %v2677_v21, %v2678_v50  ;;  %v2683_v42 = vrot.slane %v2646_v23, 5  ;;  %v2684_v16 = vrot.slane %v2647_v53, 5  ;;  %v5541_v29 = vld [vmem:[%s3826_s4 + $0x90] sm:$0xff]  ;;  %v5547_v50 = vld [vmem:[%s3826_s4 + $0xa8] sm:$0x3f] }
 0x1a8   : > { %v2682_v62 = vsel %vm2515_vm4, %v2680_v2, %v2681_v3  ;;  %v2686_v18 = vrot.slane %v2648_v38, 5  ;;  %v2687_v61 = vrot.slane %v2649_v13, 5  ;;  %v2689_v52 = vrot.slane %v2650_v30, 5  ;;  %v6189_v13 = vld [vmem:[#allocation11_spill] sm:$0xff] }
 0x1a9   : > { %v2685_v60 = vsel %vm2515_vm4, %v2683_v42, %v2684_v16  ;;  %v2690_v58 = vrot.slane %v2651_v36, 5  ;;  %v2700_v47 = vadd.f32 %v2670_v25, %v2624_v37  ;;  %v2701_v17 = vadd.f32 %v2673_v57, %v2625_v7  ;;  %v6190_v37 = vld [vmem:[#allocation13_spill] sm:$0xff] }
 0x1aa   : > { %v2688_v51 = vsel %vm2515_vm4, %v2686_v18, %v2687_v61  ;;  %v2702_v14 = vadd.f32 %v2676_v35, %v2626_v15  ;;  %v2703_v28 = vadd.f32 %v2679_v46, %v2627_v32  ;;  %v2704_v10 = vadd.f32 %v2682_v62, %v2628_v9 }
 0x1ab   : > { %v2691_v19 = vsel %vm2515_vm4, %v2689_v52, %v2690_v58  ;;  %v2705_v0 = vadd.f32 %v2685_v60, %v2629_v6  ;;  %v2711_v23 = vrot.slane %v6188_v26, %v6182_v59  ;;  %v2706_v53 = vadd.f32 %v2688_v51, %v2630_v55 }
 0x1ac   : > { %v5518_v38 = vadd.f32 %v2691_v19, %v2631_v56  ;;  %v5522_v30 = vrot.slane %v6189_v13, %v6182_v59  ;;  %v5526_v7 = vrot.slane %v6190_v37, %v6182_v59 }
 0x1ad   : > { %v2712_v15 = vmul.f32 %v5015_v8, %v2711_v23  ;;  %v2713_v32 = vmul.f32 %v5405_v34, %v2711_v23  ;;  %v2714_v9 = vmul.f32 %v5022_v27, %v2711_v23  ;;  %v2715_v6 = vmul.f32 %v5113_v11, %v2711_v23 }
 0x1ae   : > { %v2716_v55 = vmul.f32 %v5477_v5, %v2711_v23  ;;  %v2717_v56 = vmul.f32 %v5118_v48, %v2711_v23  ;;  %v2718_v36 = vmul.f32 %v5484_v40, %v2711_v23  ;;  %v2719_v39 = vmul.f32 %v5123_v54, %v2711_v23 }
 0x1af   : > { %v2720_v43 = vmul.f32 %v5491_v20, %v2711_v23  ;;  %v2721_v1 = vmul.f32 %v5128_v63, %v2711_v23  ;;  %v2722_v8 = vmul.f32 %v5498_v33, %v2711_v23  ;;  %v2723_v41 = vmul.f32 %v5174_v22, %v2711_v23 }
 0x1b0   : > { %v2724_v27 = vmul.f32 %v5541_v29, %v2711_v23  ;;  %v2725_v24 = vmul.f32 %v5217_v31, %v2711_v23  ;;  %v2726_v21 = vmul.f32 %v5222_v44, %v2711_v23  ;;  %v2727_v25 = vmul.f32 %v5547_v50, %v2711_v23 }
 0x1b1   : > { %v2744_v57 = vrot.slane %v2712_v15, 5  ;;  %v2745_v2 = vrot.slane %v2713_v32, 5  ;;  %v2747_v3 = vrot.slane %v2714_v9, 5  ;;  %v2748_v35 = vrot.slane %v2715_v6, 5 }
 0x1b2   : > { %v2750_v46 = vrot.slane %v2716_v55, 5  ;;  %v2751_v42 = vrot.slane %v2717_v56, 5  ;;  %v2753_v16 = vrot.slane %v2718_v36, 5  ;;  %v2754_v62 = vrot.slane %v2719_v39, 5  ;;  %v5559_v55 = vld [vmem:[%s6063_s1 + $0x30] sm:$0x7f] }
 0x1b3   : > { %v2746_v18 = vsel %vm2515_vm4, %v2744_v57, %v2745_v2  ;;  %v2749_v61 = vsel %vm2515_vm4, %v2747_v3, %v2748_v35  ;;  %v2756_v52 = vrot.slane %v2720_v43, 5  ;;  %v2757_v60 = vrot.slane %v2721_v1, 5  ;;  %v5601_v3 = vld [vmem:[%s3826_s4 + $0xb8] sm:$0x3f] }
 0x1b4   : > { %v2752_v58 = vsel %vm2515_vm4, %v2750_v46, %v2751_v42  ;;  %v2755_v51 = vsel %vm2515_vm4, %v2753_v16, %v2754_v62  ;;  %v2759_v19 = vrot.slane %v2722_v8, 5  ;;  %v2760_v26 = vrot.slane %v2723_v41, 5 }
 0x1b5   : > { %v2758_v23 = vsel %vm2515_vm4, %v2756_v52, %v2757_v60  ;;  %v2762_v13 = vrot.slane %v2724_v27, 5  ;;  %v2763_v37 = vrot.slane %v2725_v24, 5  ;;  %v2765_v15 = vrot.slane %v2726_v21, 5 }
 0x1b6   : > { %v2761_v32 = vsel %vm2515_vm4, %v2759_v19, %v2760_v26  ;;  %v2766_v9 = vrot.slane %v2727_v25, 5  ;;  %v2776_v6 = vadd.f32 %v2746_v18, %v2700_v47  ;;  %v5563_v56 = vrot.slane %v5559_v55, %v6182_v59  ;;  %v5568_v47 = vld [vmem:[%s3826_s4 + $0x40] sm:$0xff] }
 0x1b7   : > { %v2764_v36 = vsel %vm2515_vm4, %v2762_v13, %v2763_v37  ;;  %v2777_v39 = vadd.f32 %v2749_v61, %v2701_v17  ;;  %v2778_v43 = vadd.f32 %v2752_v58, %v2702_v14  ;;  %v2779_v1 = vadd.f32 %v2755_v51, %v2703_v28 }
 0x1b8   : > { %v2767_v8 = vsel %vm2515_vm4, %v2765_v15, %v2766_v9  ;;  %v2780_v41 = vadd.f32 %v2758_v23, %v2704_v10  ;;  %v2781_v27 = vadd.f32 %v2761_v32, %v2705_v0  ;;  %v2782_v24 = vadd.f32 %v2764_v36, %v2706_v53 }
 0x1b9   : > { %v2788_v21 = vmul.f32 %v5568_v47, %v5522_v30  ;;  %v2789_v59 = vmul.f32 %v5113_v11, %v5522_v30  ;;  %v2790_v25 = vmul.f32 %v5477_v5, %v5522_v30  ;;  %v2791_v17 = vmul.f32 %v5118_v48, %v5522_v30 }
 0x1ba   : > { %v2792_v14 = vmul.f32 %v5484_v40, %v5522_v30  ;;  %v2793_v28 = vmul.f32 %v5123_v54, %v5522_v30  ;;  %v2794_v10 = vmul.f32 %v5491_v20, %v5522_v30  ;;  %v2795_v0 = vmul.f32 %v5128_v63, %v5522_v30 }
 0x1bb   : > { %v2796_v11 = vmul.f32 %v5498_v33, %v5522_v30  ;;  %v2797_v53 = vmul.f32 %v5174_v22, %v5522_v30  ;;  %v2798_v48 = vmul.f32 %v5541_v29, %v5522_v30  ;;  %v2799_v57 = vmul.f32 %v5217_v31, %v5522_v30 }
 0x1bc   : > { %v2800_v54 = vmul.f32 %v5222_v44, %v5522_v30  ;;  %v2801_v2 = vmul.f32 %v5547_v50, %v5522_v30  ;;  %v2802_v63 = vmul.f32 %v5265_v4, %v5522_v30  ;;  %v2803_v35 = vmul.f32 %v5601_v3, %v5522_v30 }
 0x1bd   : > { %v2820_v46 = vrot.slane %v2788_v21, 5  ;;  %v2821_v42 = vrot.slane %v2789_v59, 5  ;;  %v2823_v16 = vrot.slane %v2790_v25, 5  ;;  %v2824_v62 = vrot.slane %v2791_v17, 5 }
 0x1be   : > { %v2826_v18 = vrot.slane %v2792_v14, 5  ;;  %v2827_v61 = vrot.slane %v2793_v28, 5  ;;  %v2829_v52 = vrot.slane %v2794_v10, 5  ;;  %v2830_v60 = vrot.slane %v2795_v0, 5 }
 0x1bf   : > { %v2822_v58 = vsel %vm2515_vm4, %v2820_v46, %v2821_v42  ;;  %v2825_v51 = vsel %vm2515_vm4, %v2823_v16, %v2824_v62  ;;  %v2832_v19 = vrot.slane %v2796_v11, 5  ;;  %v2833_v26 = vrot.slane %v2797_v53, 5 }
 0x1c0   : > { %v2828_v23 = vsel %vm2515_vm4, %v2826_v18, %v2827_v61  ;;  %v2831_v13 = vsel %vm2515_vm4, %v2829_v52, %v2830_v60  ;;  %v2835_v37 = vrot.slane %v2798_v48, 5  ;;  %v2836_v30 = vrot.slane %v2799_v57, 5  ;;  %v5654_v18 = vld [vmem:[%s3826_s4 + $0xc8] sm:$0x3f] }
 0x1c1   : > { %v2834_v15 = vsel %vm2515_vm4, %v2832_v19, %v2833_v26  ;;  %v2838_v32 = vrot.slane %v2800_v54, 5  ;;  %v2839_v9 = vrot.slane %v2801_v2, 5  ;;  %v2841_v36 = vrot.slane %v2802_v63, 5  ;;  %6191 = vst [vmem:[#allocation6_spill] sm:$0xff] %v5654_v18 }
 0x1c2   : > { %v2783_v21 = vadd.f32 %v2767_v8, %v5518_v38  ;;  %v2837_v59 = vsel %vm2515_vm4, %v2835_v37, %v2836_v30  ;;  %v2842_v25 = vrot.slane %v2803_v35, 5  ;;  %v2852_v17 = vadd.f32 %v2822_v58, %v2776_v6  ;;  %v5617_v38 = vld [vmem:[%s3826_s4 + $0x58] sm:$0x3f] }
 0x1c3   : > { %v2840_v14 = vsel %vm2515_vm4, %v2838_v32, %v2839_v9  ;;  %v2853_v28 = vadd.f32 %v2825_v51, %v2777_v39  ;;  %v2854_v10 = vadd.f32 %v2828_v23, %v2778_v43  ;;  %v2855_v0 = vadd.f32 %v2831_v13, %v2779_v1  ;;  %v5624_v39 = vld [vmem:[%s3826_s4 + $0x68] sm:$0x3f] }
 0x1c4   : > { %v2843_v11 = vsel %vm2515_vm4, %v2841_v36, %v2842_v25  ;;  %v2856_v53 = vadd.f32 %v2834_v15, %v2780_v41  ;;  %v2857_v48 = vadd.f32 %v2837_v59, %v2781_v27  ;;  %v2858_v57 = vadd.f32 %v2840_v14, %v2782_v24  ;;  %v5631_v41 = vld [vmem:[%s3826_s4 + $0x78] sm:$0x3f] }
 0x1c5   : > { %v2864_v54 = vmul.f32 %v5477_v5, %v5526_v7  ;;  %v2865_v8 = vmul.f32 %v5617_v38, %v5526_v7  ;;  %v2866_v6 = vmul.f32 %v5484_v40, %v5526_v7  ;;  %v2867_v43 = vmul.f32 %v5624_v39, %v5526_v7 }
 0x1c6   : > { %v2868_v1 = vmul.f32 %v5491_v20, %v5526_v7  ;;  %v2869_v27 = vmul.f32 %v5631_v41, %v5526_v7  ;;  %v2870_v24 = vmul.f32 %v5498_v33, %v5526_v7  ;;  %v2871_v2 = vmul.f32 %v5174_v22, %v5526_v7 }
 0x1c7   : > { %v2872_v63 = vmul.f32 %v5541_v29, %v5526_v7  ;;  %v2873_v35 = vmul.f32 %v5217_v31, %v5526_v7  ;;  %v2874_v46 = vmul.f32 %v5222_v44, %v5526_v7  ;;  %v2875_v42 = vmul.f32 %v5547_v50, %v5526_v7 }
 0x1c8   : > { %v2876_v16 = vmul.f32 %v5265_v4, %v5526_v7  ;;  %v2877_v62 = vmul.f32 %v5601_v3, %v5526_v7  ;;  %v2878_v22 = vmul.f32 %v5308_v12, %v5526_v7  ;;  %v2879_v61 = vmul.f32 %v5654_v18, %v5526_v7 }
 0x1c9   : > { %v2896_v52 = vrot.slane %v2864_v54, 5  ;;  %v2897_v60 = vrot.slane %v2865_v8, 5  ;;  %v2899_v58 = vrot.slane %v2866_v6, 5  ;;  %v2900_v51 = vrot.slane %v2867_v43, 5 }
 0x1ca   : > { %v2902_v19 = vrot.slane %v2868_v1, 5  ;;  %v2903_v26 = vrot.slane %v2869_v27, 5  ;;  %v2905_v23 = vrot.slane %v2870_v24, 5  ;;  %v2906_v13 = vrot.slane %v2871_v2, 5 }
 0x1cb   : > { %v2898_v37 = vsel %vm2515_vm4, %v2896_v52, %v2897_v60  ;;  %v2901_v30 = vsel %vm2515_vm4, %v2899_v58, %v2900_v51  ;;  %v2908_v15 = vrot.slane %v2872_v63, 5  ;;  %v2909_v32 = vrot.slane %v2873_v35, 5 }
 0x1cc   : > { %v2904_v9 = vsel %vm2515_vm4, %v2902_v19, %v2903_v26  ;;  %v2907_v36 = vsel %vm2515_vm4, %v2905_v23, %v2906_v13  ;;  %v2911_v59 = vrot.slane %v2874_v46, 5  ;;  %v2912_v7 = vrot.slane %v2875_v42, 5  ;;  %v5700_v26 = vld [vmem:[%s3826_s4 + $0xd8] sm:$0x3f] }
 0x1cd   : > { %v2910_v25 = vsel %vm2515_vm4, %v2908_v15, %v2909_v32  ;;  %v2914_v14 = vrot.slane %v2876_v16, 5  ;;  %v2915_v54 = vrot.slane %v2877_v62, 5  ;;  %v2917_v8 = vrot.slane %v2878_v22, 5  ;;  %6193 = vst [vmem:[#allocation10_spill] sm:$0xff] %v5700_v26 }
 0x1ce   : > { %v2859_v6 = vadd.f32 %v2843_v11, %v2783_v21  ;;  %v2913_v43 = vsel %vm2515_vm4, %v2911_v59, %v2912_v7  ;;  %v2918_v1 = vrot.slane %v2879_v61, 5  ;;  %v2928_v27 = vadd.f32 %v2898_v37, %v2852_v17 }
 0x1cf   : > { %v2916_v24 = vsel %vm2515_vm4, %v2914_v14, %v2915_v54  ;;  %v2929_v2 = vadd.f32 %v2901_v30, %v2853_v28  ;;  %v2930_v63 = vadd.f32 %v2904_v9, %v2854_v10  ;;  %v2931_v35 = vadd.f32 %v2907_v36, %v2855_v0  ;;  %v5677_v0 = vld [vmem:[%s3826_s4 + $0x88] sm:$0x3f] }
 0x1d0   : > { %v2919_v52 = vsel %vm2515_vm4, %v2917_v8, %v2918_v1  ;;  %v2932_v46 = vadd.f32 %v2910_v25, %v2856_v53  ;;  %v2933_v42 = vadd.f32 %v2913_v43, %v2857_v48  ;;  %v2934_v60 = vadd.f32 %v2916_v24, %v2858_v57 }
 0x1d1   : > { %v2940_v16 = vmul.f32 %v5484_v40, %v5563_v56  ;;  %v2941_v21 = vmul.f32 %v5624_v39, %v5563_v56  ;;  %v2942_v17 = vmul.f32 %v5491_v20, %v5563_v56  ;;  %v2943_v28 = vmul.f32 %v5631_v41, %v5563_v56 }
 0x1d2   : > { %v2944_v10 = vmul.f32 %v5498_v33, %v5563_v56  ;;  %v2945_v11 = vmul.f32 %v5677_v0, %v5563_v56  ;;  %v2946_v53 = vmul.f32 %v5541_v29, %v5563_v56  ;;  %v2947_v48 = vmul.f32 %v5217_v31, %v5563_v56  ;;  %v6192_v31 = vld [vmem:[#allocation5_spill] sm:$0xff] }
 0x1d3   : > { %v2948_v57 = vmul.f32 %v5222_v44, %v5563_v56  ;;  %v2949_v62 = vmul.f32 %v5547_v50, %v5563_v56  ;;  %v2950_v22 = vmul.f32 %v5265_v4, %v5563_v56  ;;  %v2951_v61 = vmul.f32 %v5601_v3, %v5563_v56 }
 0x1d4   : > { %v2952_v58 = vmul.f32 %v5308_v12, %v5563_v56  ;;  %v2953_v51 = vmul.f32 %v5654_v18, %v5563_v56  ;;  %v2954_v19 = vmul.f32 %v6192_v31, %v5563_v56  ;;  %v2955_v44 = vmul.f32 %v5700_v26, %v5563_v56  ;;  %v3726_v31 = vld [vmem:[%s6063_s1 + $0x20] sm:$0x7f] }
 0x1d5   : > { %v2972_v23 = vrot.slane %v2940_v16, 5  ;;  %v2973_v13 = vrot.slane %v2941_v21, 5  ;;  %v2975_v4 = vrot.slane %v2942_v17, 5  ;;  %v2976_v37 = vrot.slane %v2943_v28, 5 }
 0x1d6   : > { %v2978_v30 = vrot.slane %v2944_v10, 5  ;;  %v2979_v15 = vrot.slane %v2945_v11, 5  ;;  %v2981_v32 = vrot.slane %v2946_v53, 5  ;;  %v2982_v9 = vrot.slane %v2947_v48, 5  ;;  %v6194_v48 = vld [vmem:[#allocation3_spill] sm:$0xff] }
 0x1d7   : > { %v2935_v12 = vadd.f32 %v2919_v52, %v2859_v6  ;;  %v2974_v36 = vsel %vm2515_vm4, %v2972_v23, %v2973_v13  ;;  %v2984_v59 = vrot.slane %v2948_v57, 5  ;;  %v2985_v7 = vrot.slane %v2949_v62, 5 }
 0x1d8   : > { %v2977_v25 = vsel %vm2515_vm4, %v2975_v4, %v2976_v37  ;;  %v2980_v14 = vsel %vm2515_vm4, %v2978_v30, %v2979_v15  ;;  %v2987_v54 = vrot.slane %v2950_v22, 5  ;;  %v2988_v8 = vrot.slane %v2951_v61, 5  ;;  %v6198_v4 = vld [vmem:[#allocation14_spill] sm:$0xff] }
 0x1d9   : > { %v2983_v56 = vsel %vm2515_vm4, %v2981_v32, %v2982_v9  ;;  %v2990_v43 = vrot.slane %v2952_v58, 5  ;;  %v2991_v1 = vrot.slane %v2953_v51, 5  ;;  %v2993_v24 = vrot.slane %v2954_v19, 5  ;;  %v6196_v51 = vld [vmem:[#allocation4_spill] sm:$0xff]  ;;  %v6199_v30 = vld [vmem:[#allocation2_spill] sm:$0xff] }
 0x1da   : > { %v2986_v16 = vsel %vm2515_vm4, %v2984_v59, %v2985_v7  ;;  %v2989_v21 = vsel %vm2515_vm4, %v2987_v54, %v2988_v8  ;;  %v2994_v6 = vrot.slane %v2955_v44, 5  ;;  %v5711_v17 = vadd.f32 %v2974_v36, %v2928_v27  ;;  %v6195_v27 = vld [vmem:[#allocation12_spill] sm:$0xff]  ;;  %v3727_v44 = vld [vmem:[%s6063_s1 + $0x28] sm:$0x7f]  ;;  %v5761_v36 = vld [vmem:[%s3826_s4 + $0x20] sm:$0xff] }
 0x1db   : > { %v2992_v52 = vsel %vm2515_vm4, %v2990_v43, %v2991_v1  ;;  %v5713_v28 = vadd.f32 %v2977_v25, %v2929_v2  ;;  %v5716_v11 = vadd.f32 %v2980_v14, %v2930_v63  ;;  %v5718_v53 = vadd.f32 %v2983_v56, %v2931_v35  ;;  %v3724_v35 = vld [vmem:[%s6063_s1 + $0x10] sm:$0x7f]  ;;  %v5772_v8 = vld [vmem:[%s3826_s4 + $0x48] sm:$0x3f] }
 0x1dc   : > { %v2995_v10 = vsel %vm2515_vm4, %v2993_v24, %v2994_v6  ;;  %v3014_v57 = vsub.s32 6, %v6194_v48  ;;  %v5721_v62 = vadd.f32 %v2986_v16, %v2932_v46  ;;  %v5723_v22 = vadd.f32 %v2989_v21, %v2933_v42  ;;  %v3725_v42 = vld [vmem:[%s6063_s1 + $0x18] sm:$0x7f]  ;;  %v3728_v32 = vld [vmem:[%s3826_s4 + $0x10] sm:$0xff] }
 0x1dd   : > { %v5725_v61 = vadd.f32 %v2992_v52, %v2934_v60  ;;  %v5727_v58 = vadd.f32 %v2995_v10, %v2935_v12  ;;  %v5766_v25 = vld [vmem:[%s3826_s4 + $0x30] sm:$0xff] }
 0x1de   : > { %v3015_v2 = vrot.slane %v6195_v27, %v3014_v57  ;;  %v5731_v63 = vrot.slane %v6196_v51, %v3014_v57  ;;  %v5736_v46 = vrot.slane %v3724_v35, %v3014_v57  ;;  %v5741_v60 = vrot.slane %v3725_v42, %v3014_v57 }
 0x1df   : > { %v5746_v19 = vrot.slane %v3726_v31, %v3014_v57  ;;  %v5751_v23 = vrot.slane %v3727_v44, %v3014_v57  ;;  %v5754_v13 = vrot.slane %v5559_v55, %v3014_v57 }
 0x1e0   : > { %v3016_v37 = vmul.f32 %v6198_v4, %v3015_v2  ;;  %v3017_v15 = vmul.f32 %v6199_v30, %v3015_v2  ;;  %v3018_v9 = vmul.f32 %v3728_v32, %v3015_v2  ;;  %v3019_v12 = vmul.f32 %v5395_v45, %v3015_v2 }
 0x1e1   : > { %6197 = vst [vmem:[#allocation8_spill] sm:$0xff] %v5754_v13  ;;  %v3020_v59 = vmul.f32 %v5761_v36, %v3015_v2  ;;  %v3021_v7 = vmul.f32 %v5400_v49, %v3015_v2  ;;  %v3022_v14 = vmul.f32 %v5766_v25, %v3015_v2  ;;  %v3023_v55 = vmul.f32 %v5405_v34, %v3015_v2 }
 0x1e2   : > { %v3024_v54 = vmul.f32 %v5568_v47, %v3015_v2  ;;  %v3025_v56 = vmul.f32 %v5772_v8, %v3015_v2  ;;  %v3026_v43 = vmul.f32 %v5477_v5, %v3015_v2  ;;  %v3027_v1 = vmul.f32 %v5617_v38, %v3015_v2 }
 0x1e3   : > { %v3028_v24 = vmul.f32 %v5484_v40, %v3015_v2  ;;  %v3029_v16 = vmul.f32 %v5624_v39, %v3015_v2  ;;  %v3030_v21 = vmul.f32 %v5491_v20, %v3015_v2  ;;  %v3031_v6 = vmul.f32 %v5631_v41, %v3015_v2 }
 0x1e4   : > { %v3049_v52 = vrot.slane %v3016_v37, 6  ;;  %v3050_v10 = vrot.slane %v3017_v15, 6  ;;  %v3052_v48 = vrot.slane %v3018_v9, 6  ;;  %v3053_v57 = vrot.slane %v3019_v12, 6 }
 0x1e5   : > { %v3055_v27 = vrot.slane %v3020_v59, 6  ;;  %v3056_v51 = vrot.slane %v3021_v7, 6  ;;  %v3058_v35 = vrot.slane %v3022_v14, 6  ;;  %v3059_v42 = vrot.slane %v3023_v55, 6 }
 0x1e6   : > { %v3051_v31 = vsel %vm3048_vm5, %v3049_v52, %v3050_v10  ;;  %v3054_v44 = vsel %vm3048_vm5, %v3052_v48, %v3053_v57  ;;  %v3061_v4 = vrot.slane %v3024_v54, 6  ;;  %v3062_v30 = vrot.slane %v3025_v56, 6 }
 0x1e7   : > { %v3057_v26 = vsel %vm3048_vm5, %v3055_v27, %v3056_v51  ;;  %v3060_v13 = vsel %vm3048_vm5, %v3058_v35, %v3059_v42  ;;  %v3064_v18 = vrot.slane %v3026_v43, 6  ;;  %v3065_v2 = vrot.slane %v3027_v1, 6 }
 0x1e8   : > { %v3063_v37 = vsel %vm3048_vm5, %v3061_v4, %v3062_v30  ;;  %v3067_v15 = vrot.slane %v3028_v24, 6  ;;  %v3068_v9 = vrot.slane %v3029_v16, 6  ;;  %v3070_v12 = vrot.slane %v3030_v21, 6 }
 0x1e9   : > { %v3066_v59 = vsel %vm3048_vm5, %v3064_v18, %v3065_v2  ;;  %v3071_v7 = vrot.slane %v3031_v6, 6  ;;  %v3081_v14 = vadd.f32 %v3051_v31, %v5711_v17  ;;  %v3082_v55 = vadd.f32 %v3054_v44, %v5713_v28 }
 0x1ea   : > { %v3069_v54 = vsel %vm3048_vm5, %v3067_v15, %v3068_v9  ;;  %v3083_v56 = vadd.f32 %v3057_v26, %v5716_v11  ;;  %v3084_v52 = vadd.f32 %v3060_v13, %v5718_v53  ;;  %v3085_v43 = vadd.f32 %v3063_v37, %v5721_v62 }
 0x1eb   : > { %v3072_v1 = vsel %vm3048_vm5, %v3070_v12, %v3071_v7  ;;  %v3086_v24 = vadd.f32 %v3066_v59, %v5723_v22  ;;  %v3087_v16 = vadd.f32 %v3069_v54, %v5725_v61  ;;  %v3093_v18 = vmul.f32 %v3728_v32, %v5731_v63 }
 0x1ec   : > { %v3088_v17 = vadd.f32 %v3072_v1, %v5727_v58  ;;  %v3094_v28 = vmul.f32 %v5395_v45, %v5731_v63  ;;  %v3095_v26 = vmul.f32 %v5761_v36, %v5731_v63  ;;  %v3096_v11 = vmul.f32 %v5400_v49, %v5731_v63 }
 0x1ed   : > { %v3097_v53 = vmul.f32 %v5766_v25, %v5731_v63  ;;  %v3098_v62 = vmul.f32 %v5405_v34, %v5731_v63  ;;  %v3099_v22 = vmul.f32 %v5568_v47, %v5731_v63  ;;  %v3100_v61 = vmul.f32 %v5772_v8, %v5731_v63 }
 0x1ee   : > { %v3101_v45 = vmul.f32 %v5477_v5, %v5731_v63  ;;  %v3102_v58 = vmul.f32 %v5617_v38, %v5731_v63  ;;  %v3103_v13 = vmul.f32 %v5484_v40, %v5731_v63  ;;  %v3104_v32 = vmul.f32 %v5624_v39, %v5731_v63 }
 0x1ef   : > { %v3105_v21 = vmul.f32 %v5491_v20, %v5731_v63  ;;  %v3106_v6 = vmul.f32 %v5631_v41, %v5731_v63  ;;  %v3107_v10 = vmul.f32 %v5498_v33, %v5731_v63  ;;  %v3108_v48 = vmul.f32 %v5677_v0, %v5731_v63 }
 0x1f0   : > { %v3125_v57 = vrot.slane %v3093_v18, 6  ;;  %v3126_v27 = vrot.slane %v3094_v28, 6  ;;  %v3128_v51 = vrot.slane %v3095_v26, 6  ;;  %v3129_v35 = vrot.slane %v3096_v11, 6 }
 0x1f1   : > { %v3131_v42 = vrot.slane %v3097_v53, 6  ;;  %v3132_v31 = vrot.slane %v3098_v62, 6  ;;  %v3134_v44 = vrot.slane %v3099_v22, 6  ;;  %v3135_v4 = vrot.slane %v3100_v61, 6 }
 0x1f2   : > { %v3127_v30 = vsel %vm3048_vm5, %v3125_v57, %v3126_v27  ;;  %v3130_v2 = vsel %vm3048_vm5, %v3128_v51, %v3129_v35  ;;  %v3137_v37 = vrot.slane %v3101_v45, 6  ;;  %v3138_v15 = vrot.slane %v3102_v58, 6  ;;  %v5867_v51 = vld [vmem:[%s3826_s4 + $0x98] sm:$0x3f] }
 0x1f3   : > { %v3133_v9 = vsel %vm3048_vm5, %v3131_v42, %v3132_v31  ;;  %v3136_v12 = vsel %vm3048_vm5, %v3134_v44, %v3135_v4  ;;  %v3140_v59 = vrot.slane %v3103_v13, 6  ;;  %v3141_v63 = vrot.slane %v3104_v32, 6 }
 0x1f4   : > { %v3139_v7 = vsel %vm3048_vm5, %v3137_v37, %v3138_v15  ;;  %v3143_v54 = vrot.slane %v3105_v21, 6  ;;  %v3144_v1 = vrot.slane %v3106_v6, 6  ;;  %v3146_v18 = vrot.slane %v3107_v10, 6 }
 0x1f5   : > { %v3142_v28 = vsel %vm3048_vm5, %v3140_v59, %v3141_v63  ;;  %v3147_v26 = vrot.slane %v3108_v48, 6  ;;  %v3157_v11 = vadd.f32 %v3127_v30, %v3081_v14  ;;  %v3158_v53 = vadd.f32 %v3130_v2, %v3082_v55 }
 0x1f6   : > { %v3145_v62 = vsel %vm3048_vm5, %v3143_v54, %v3144_v1  ;;  %v3159_v22 = vadd.f32 %v3133_v9, %v3083_v56  ;;  %v3160_v61 = vadd.f32 %v3136_v12, %v3084_v52  ;;  %v3161_v45 = vadd.f32 %v3139_v7, %v3085_v43 }
 0x1f7   : > { %v3148_v58 = vsel %vm3048_vm5, %v3146_v18, %v3147_v26  ;;  %v3162_v57 = vadd.f32 %v3142_v28, %v3086_v24  ;;  %v3163_v13 = vadd.f32 %v3145_v62, %v3087_v16  ;;  %v3169_v32 = vmul.f32 %v5761_v36, %v5736_v46 }
 0x1f8   : > { %v3164_v21 = vadd.f32 %v3148_v58, %v3088_v17  ;;  %v3170_v6 = vmul.f32 %v5400_v49, %v5736_v46  ;;  %v3171_v14 = vmul.f32 %v5766_v25, %v5736_v46  ;;  %v3172_v55 = vmul.f32 %v5405_v34, %v5736_v46 }
 0x1f9   : > { %v3173_v56 = vmul.f32 %v5568_v47, %v5736_v46  ;;  %v3174_v52 = vmul.f32 %v5772_v8, %v5736_v46  ;;  %v3175_v36 = vmul.f32 %v5477_v5, %v5736_v46  ;;  %v3176_v43 = vmul.f32 %v5617_v38, %v5736_v46 }
 0x1fa   : > { %v3177_v49 = vmul.f32 %v5484_v40, %v5736_v46  ;;  %v3178_v24 = vmul.f32 %v5624_v39, %v5736_v46  ;;  %v3179_v16 = vmul.f32 %v5491_v20, %v5736_v46  ;;  %v3180_v17 = vmul.f32 %v5631_v41, %v5736_v46 }
 0x1fb   : > { %v3181_v10 = vmul.f32 %v5498_v33, %v5736_v46  ;;  %v3182_v48 = vmul.f32 %v5677_v0, %v5736_v46  ;;  %v3183_v27 = vmul.f32 %v5541_v29, %v5736_v46  ;;  %v3184_v35 = vmul.f32 %v5867_v51, %v5736_v46 }
 0x1fc   : > { %v3201_v42 = vrot.slane %v3169_v32, 6  ;;  %v3202_v31 = vrot.slane %v3170_v6, 6  ;;  %v3204_v44 = vrot.slane %v3171_v14, 6  ;;  %v3205_v4 = vrot.slane %v3172_v55, 6 }
 0x1fd   : > { %v3207_v30 = vrot.slane %v3173_v56, 6  ;;  %v3208_v2 = vrot.slane %v3174_v52, 6  ;;  %v3210_v37 = vrot.slane %v3175_v36, 6  ;;  %v3211_v15 = vrot.slane %v3176_v43, 6 }
 0x1fe   : > { %v3203_v9 = vsel %vm3048_vm5, %v3201_v42, %v3202_v31  ;;  %v3206_v12 = vsel %vm3048_vm5, %v3204_v44, %v3205_v4  ;;  %v3213_v59 = vrot.slane %v3177_v49, 6  ;;  %v3214_v63 = vrot.slane %v3178_v24, 6 }
 0x1ff   : > { %v3209_v7 = vsel %vm3048_vm5, %v3207_v30, %v3208_v2  ;;  %v3212_v54 = vsel %vm3048_vm5, %v3210_v37, %v3211_v15  ;;  %v3216_v1 = vrot.slane %v3179_v16, 6  ;;  %v3217_v46 = vrot.slane %v3180_v17, 6 }
 0x200   : > { %v3215_v18 = vsel %vm3048_vm5, %v3213_v59, %v3214_v63  ;;  %v3219_v28 = vrot.slane %v3181_v10, 6  ;;  %v3220_v26 = vrot.slane %v3182_v48, 6  ;;  %v3222_v62 = vrot.slane %v3183_v27, 6 }
 0x201   : > { %v3218_v58 = vsel %vm3048_vm5, %v3216_v1, %v3217_v46  ;;  %v3223_v32 = vrot.slane %v3184_v35, 6  ;;  %v3233_v6 = vadd.f32 %v3203_v9, %v3157_v11  ;;  %v3234_v14 = vadd.f32 %v3206_v12, %v3158_v53  ;;  %v5908_v35 = vld [vmem:[%s3826_s4 + $0xa0] sm:$0xff] }
 0x202   : > { %v3221_v55 = vsel %vm3048_vm5, %v3219_v28, %v3220_v26  ;;  %v3235_v56 = vadd.f32 %v3209_v7, %v3159_v22  ;;  %v3236_v52 = vadd.f32 %v3212_v54, %v3160_v61  ;;  %v3237_v36 = vadd.f32 %v3215_v18, %v3161_v45 }
 0x203   : > { %v3224_v43 = vsel %vm3048_vm5, %v3222_v62, %v3223_v32  ;;  %v3238_v49 = vadd.f32 %v3218_v58, %v3162_v57  ;;  %v3239_v24 = vadd.f32 %v3221_v55, %v3163_v13  ;;  %v3245_v16 = vmul.f32 %v5766_v25, %v5741_v60 }
 0x204   : > { %v3240_v17 = vadd.f32 %v3224_v43, %v3164_v21  ;;  %v3246_v10 = vmul.f32 %v5405_v34, %v5741_v60  ;;  %v3247_v11 = vmul.f32 %v5568_v47, %v5741_v60  ;;  %v3248_v53 = vmul.f32 %v5772_v8, %v5741_v60 }
 0x205   : > { %v3249_v22 = vmul.f32 %v5477_v5, %v5741_v60  ;;  %v3250_v61 = vmul.f32 %v5617_v38, %v5741_v60  ;;  %v3251_v45 = vmul.f32 %v5484_v40, %v5741_v60  ;;  %v3252_v25 = vmul.f32 %v5624_v39, %v5741_v60 }
 0x206   : > { %v3253_v34 = vmul.f32 %v5491_v20, %v5741_v60  ;;  %v3254_v57 = vmul.f32 %v5631_v41, %v5741_v60  ;;  %v3255_v13 = vmul.f32 %v5498_v33, %v5741_v60  ;;  %v3256_v21 = vmul.f32 %v5677_v0, %v5741_v60 }
 0x207   : > { %v3257_v48 = vmul.f32 %v5541_v29, %v5741_v60  ;;  %v3258_v27 = vmul.f32 %v5867_v51, %v5741_v60  ;;  %v3259_v42 = vmul.f32 %v5908_v35, %v5741_v60  ;;  %v3260_v31 = vmul.f32 %v5547_v50, %v5741_v60 }
 0x208   : > { %v3277_v44 = vrot.slane %v3245_v16, 6  ;;  %v3278_v4 = vrot.slane %v3246_v10, 6  ;;  %v3280_v30 = vrot.slane %v3247_v11, 6  ;;  %v3281_v2 = vrot.slane %v3248_v53, 6 }
 0x209   : > { %v3283_v37 = vrot.slane %v3249_v22, 6  ;;  %v3284_v15 = vrot.slane %v3250_v61, 6  ;;  %v3286_v9 = vrot.slane %v3251_v45, 6  ;;  %v3287_v12 = vrot.slane %v3252_v25, 6 }
 0x20a   : > { %v3279_v59 = vsel %vm3048_vm5, %v3277_v44, %v3278_v4  ;;  %v3282_v63 = vsel %vm3048_vm5, %v3280_v30, %v3281_v2  ;;  %v3289_v7 = vrot.slane %v3253_v34, 6  ;;  %v3290_v54 = vrot.slane %v3254_v57, 6 }
 0x20b   : > { %v3285_v1 = vsel %vm3048_vm5, %v3283_v37, %v3284_v15  ;;  %v3288_v46 = vsel %vm3048_vm5, %v3286_v9, %v3287_v12  ;;  %v3292_v18 = vrot.slane %v3255_v13, 6  ;;  %v3293_v60 = vrot.slane %v3256_v21, 6 }
 0x20c   : > { %v3291_v28 = vsel %vm3048_vm5, %v3289_v7, %v3290_v54  ;;  %v3295_v26 = vrot.slane %v3257_v48, 6  ;;  %v3296_v62 = vrot.slane %v3258_v27, 6  ;;  %v3298_v58 = vrot.slane %v3259_v42, 6  ;;  %v5951_v27 = vld [vmem:[%s3826_s4 + $0xb0] sm:$0xff] }
 0x20d   : > { %v3294_v32 = vsel %vm3048_vm5, %v3292_v18, %v3293_v60  ;;  %v3299_v55 = vrot.slane %v3260_v31, 6  ;;  %v3309_v43 = vadd.f32 %v3279_v59, %v3233_v6  ;;  %v3310_v16 = vadd.f32 %v3282_v63, %v3234_v14 }
 0x20e   : > { %v3297_v10 = vsel %vm3048_vm5, %v3295_v26, %v3296_v62  ;;  %v3311_v11 = vadd.f32 %v3285_v1, %v3235_v56  ;;  %v3312_v53 = vadd.f32 %v3288_v46, %v3236_v52  ;;  %v3313_v22 = vadd.f32 %v3291_v28, %v3237_v36 }
 0x20f   : > { %v3300_v61 = vsel %vm3048_vm5, %v3298_v58, %v3299_v55  ;;  %v3314_v45 = vadd.f32 %v3294_v32, %v3238_v49  ;;  %v3315_v25 = vadd.f32 %v3297_v10, %v3239_v24  ;;  %v3321_v34 = vmul.f32 %v5568_v47, %v5746_v19 }
 0x210   : > { %v3316_v57 = vadd.f32 %v3300_v61, %v3240_v17  ;;  %v3322_v13 = vmul.f32 %v5772_v8, %v5746_v19  ;;  %v3323_v6 = vmul.f32 %v5477_v5, %v5746_v19  ;;  %v3324_v14 = vmul.f32 %v5617_v38, %v5746_v19 }
 0x211   : > { %v3325_v56 = vmul.f32 %v5484_v40, %v5746_v19  ;;  %v3326_v52 = vmul.f32 %v5624_v39, %v5746_v19  ;;  %v3327_v36 = vmul.f32 %v5491_v20, %v5746_v19  ;;  %v3328_v47 = vmul.f32 %v5631_v41, %v5746_v19 }
 0x212   : > { %v3329_v8 = vmul.f32 %v5498_v33, %v5746_v19  ;;  %v3330_v49 = vmul.f32 %v5677_v0, %v5746_v19  ;;  %v3331_v24 = vmul.f32 %v5541_v29, %v5746_v19  ;;  %v3332_v17 = vmul.f32 %v5867_v51, %v5746_v19 }
 0x213   : > { %v3333_v21 = vmul.f32 %v5908_v35, %v5746_v19  ;;  %v3334_v48 = vmul.f32 %v5547_v50, %v5746_v19  ;;  %v3335_v42 = vmul.f32 %v5951_v27, %v5746_v19  ;;  %v3336_v31 = vmul.f32 %v5601_v3, %v5746_v19 }
 0x214   : > { %v3353_v44 = vrot.slane %v3321_v34, 6  ;;  %v3354_v4 = vrot.slane %v3322_v13, 6  ;;  %v3356_v30 = vrot.slane %v3323_v6, 6  ;;  %v3357_v2 = vrot.slane %v3324_v14, 6 }
 0x215   : > { %v3359_v37 = vrot.slane %v3325_v56, 6  ;;  %v3360_v15 = vrot.slane %v3326_v52, 6  ;;  %v3362_v9 = vrot.slane %v3327_v36, 6  ;;  %v3363_v12 = vrot.slane %v3328_v47, 6 }
 0x216   : > { %v3355_v59 = vsel %vm3048_vm5, %v3353_v44, %v3354_v4  ;;  %v3358_v63 = vsel %vm3048_vm5, %v3356_v30, %v3357_v2  ;;  %v3365_v7 = vrot.slane %v3329_v8, 6  ;;  %v3366_v54 = vrot.slane %v3330_v49, 6 }
 0x217   : > { %v3361_v1 = vsel %vm3048_vm5, %v3359_v37, %v3360_v15  ;;  %v3364_v46 = vsel %vm3048_vm5, %v3362_v9, %v3363_v12  ;;  %v3368_v18 = vrot.slane %v3331_v24, 6  ;;  %v3369_v19 = vrot.slane %v3332_v17, 6  ;;  %v6200_v24 = vld [vmem:[#allocation6_spill] sm:$0xff] }
 0x218   : > { %v3367_v60 = vsel %vm3048_vm5, %v3365_v7, %v3366_v54  ;;  %v3371_v28 = vrot.slane %v3333_v21, 6  ;;  %v3372_v26 = vrot.slane %v3334_v48, 6  ;;  %v3374_v62 = vrot.slane %v3335_v42, 6 }
 0x219   : > { %v3370_v58 = vsel %vm3048_vm5, %v3368_v18, %v3369_v19  ;;  %v3375_v32 = vrot.slane %v3336_v31, 6  ;;  %v3385_v55 = vadd.f32 %v3355_v59, %v3309_v43  ;;  %v3386_v10 = vadd.f32 %v3358_v63, %v3310_v16 }
 0x21a   : > { %v3373_v61 = vsel %vm3048_vm5, %v3371_v28, %v3372_v26  ;;  %v3387_v34 = vadd.f32 %v3361_v1, %v3311_v11  ;;  %v3388_v13 = vadd.f32 %v3364_v46, %v3312_v53  ;;  %v3389_v6 = vadd.f32 %v3367_v60, %v3313_v22 }
 0x21b   : > { %v3376_v14 = vsel %vm3048_vm5, %v3374_v62, %v3375_v32  ;;  %v3390_v56 = vadd.f32 %v3370_v58, %v3314_v45  ;;  %v3391_v52 = vadd.f32 %v3373_v61, %v3315_v25  ;;  %v3397_v36 = vmul.f32 %v5477_v5, %v5751_v23 }
 0x21c   : > { %v3392_v47 = vadd.f32 %v3376_v14, %v3316_v57  ;;  %v3398_v8 = vmul.f32 %v5617_v38, %v5751_v23  ;;  %v3399_v43 = vmul.f32 %v5484_v40, %v5751_v23  ;;  %v3400_v16 = vmul.f32 %v5624_v39, %v5751_v23  ;;  %v3735_v57 = vld [vmem:[%s3826_s4 + $0xc0] sm:$0xff] }
 0x21d   : > { %v3401_v11 = vmul.f32 %v5491_v20, %v5751_v23  ;;  %v3402_v53 = vmul.f32 %v5631_v41, %v5751_v23  ;;  %v3403_v22 = vmul.f32 %v5498_v33, %v5751_v23  ;;  %v3404_v5 = vmul.f32 %v5677_v0, %v5751_v23 }
 0x21e   : > { %v3405_v38 = vmul.f32 %v5541_v29, %v5751_v23  ;;  %v3406_v40 = vmul.f32 %v5867_v51, %v5751_v23  ;;  %v3407_v45 = vmul.f32 %v5908_v35, %v5751_v23  ;;  %v3408_v20 = vmul.f32 %v5547_v50, %v5751_v23 }
 0x21f   : > { %v3409_v25 = vmul.f32 %v5951_v27, %v5751_v23  ;;  %v3410_v33 = vmul.f32 %v5601_v3, %v5751_v23  ;;  %v3411_v49 = vmul.f32 %v3735_v57, %v5751_v23  ;;  %v3412_v17 = vmul.f32 %v6200_v24, %v5751_v23 }
 0x220   : > { %v3429_v21 = vrot.slane %v3397_v36, 6  ;;  %v3430_v48 = vrot.slane %v3398_v8, 6  ;;  %v3432_v42 = vrot.slane %v3399_v43, 6  ;;  %v3433_v31 = vrot.slane %v3400_v16, 6  ;;  %v3736_v43 = vld [vmem:[%s3826_s4 + $0x60] sm:$0xff]  ;;  %v6201_v16 = vld [vmem:[#allocation8_spill] sm:$0xff] }
 0x221   : > { %v3435_v44 = vrot.slane %v3401_v11, 6  ;;  %v3436_v4 = vrot.slane %v3402_v53, 6  ;;  %v3438_v30 = vrot.slane %v3403_v22, 6  ;;  %v3439_v2 = vrot.slane %v3404_v5, 6 }
 0x222   : > { %v3431_v37 = vsel %vm3048_vm5, %v3429_v21, %v3430_v48  ;;  %v3434_v15 = vsel %vm3048_vm5, %v3432_v42, %v3433_v31  ;;  %v3441_v9 = vrot.slane %v3405_v38, 6  ;;  %v3442_v12 = vrot.slane %v3406_v40, 6 }
 0x223   : > { %v3437_v59 = vsel %vm3048_vm5, %v3435_v44, %v3436_v4  ;;  %v3440_v63 = vsel %vm3048_vm5, %v3438_v30, %v3439_v2  ;;  %v3444_v7 = vrot.slane %v3407_v45, 6  ;;  %v3445_v23 = vrot.slane %v3408_v20, 6  ;;  %v3631_v30 = vld [vmem:[%s6064_s2] ss:$0 sm:$0xff] }
 0x224   : > { %v3443_v54 = vsel %vm3048_vm5, %v3441_v9, %v3442_v12  ;;  %v3447_v1 = vrot.slane %v3409_v25, 6  ;;  %v3448_v46 = vrot.slane %v3410_v33, 6  ;;  %v3450_v18 = vrot.slane %v3411_v49, 6 }
 0x225   : > { %v3446_v19 = vsel %vm3048_vm5, %v3444_v7, %v3445_v23  ;;  %v3451_v60 = vrot.slane %v3412_v17, 6  ;;  %v3461_v28 = vadd.f32 %v3431_v37, %v3385_v55  ;;  %v3462_v26 = vadd.f32 %v3434_v15, %v3386_v10  ;;  %v3737_v55 = vld [vmem:[%s3826_s4 + $0x70] sm:$0xff] }
 0x226   : > { %v3449_v62 = vsel %vm3048_vm5, %v3447_v1, %v3448_v46  ;;  %v3463_v58 = vadd.f32 %v3437_v59, %v3387_v34  ;;  %v3464_v32 = vadd.f32 %v3440_v63, %v3388_v13  ;;  %v3465_v61 = vadd.f32 %v3443_v54, %v3389_v6  ;;  %v3738_v13 = vld [vmem:[%s3826_s4 + $0x80] sm:$0xff] }
 0x227   : > { %v3452_v14 = vsel %vm3048_vm5, %v3450_v18, %v3451_v60  ;;  %v3466_v36 = vadd.f32 %v3446_v19, %v3390_v56  ;;  %v3467_v8 = vadd.f32 %v3449_v62, %v3391_v52  ;;  %v3473_v11 = vmul.f32 %v3736_v43, %v6201_v16 }
 0x228   : > { %v3468_v53 = vadd.f32 %v3452_v14, %v3392_v47  ;;  %v3474_v22 = vmul.f32 %v5624_v39, %v6201_v16  ;;  %v3475_v10 = vmul.f32 %v3737_v55, %v6201_v16  ;;  %v3476_v34 = vmul.f32 %v5631_v41, %v6201_v16 }
 0x229   : > { %v3477_v6 = vmul.f32 %v3738_v13, %v6201_v16  ;;  %v3478_v56 = vmul.f32 %v5677_v0, %v6201_v16  ;;  %v3479_v52 = vmul.f32 %v5541_v29, %v6201_v16  ;;  %v3480_v47 = vmul.f32 %v5867_v51, %v6201_v16  ;;  %v3739_v51 = vld [vmem:[%s3826_s4 + $0xd0] sm:$0xff]  ;;  %s3634_s4 = sshll.u32 %s6204_s13, 6 }
 0x22a   : > { %v3481_v39 = vmul.f32 %v5908_v35, %v6201_v16  ;;  %v3482_v5 = vmul.f32 %v5547_v50, %v6201_v16  ;;  %v3483_v41 = vmul.f32 %v5951_v27, %v6201_v16  ;;  %v3484_v38 = vmul.f32 %v5601_v3, %v6201_v16  ;;  %v6202_v35 = vld [vmem:[#allocation10_spill] sm:$0xff]  ;;  %s170_s22 = scalar_lea.vmem %s6065_s3, %s3634_s4 }
 0x22b   : > { %v3485_v0 = vmul.f32 %v3735_v57, %v6201_v16  ;;  %v3486_v29 = vmul.f32 %v6200_v24, %v6201_v16  ;;  %v3487_v40 = vmul.f32 %v3739_v51, %v6201_v16  ;;  %v3488_v45 = vmul.f32 %v6202_v35, %v6201_v16 }
 0x22c   : > { %v3505_v50 = vrot.slane %v3473_v11, 6  ;;  %v3506_v20 = vrot.slane %v3474_v22, 6  ;;  %v3508_v25 = vrot.slane %v3475_v10, 6  ;;  %v3509_v27 = vrot.slane %v3476_v34, 6 }
 0x22d   : > { %v3511_v33 = vrot.slane %v3477_v6, 6  ;;  %v3512_v49 = vrot.slane %v3478_v56, 6  ;;  %v3514_v3 = vrot.slane %v3479_v52, 6  ;;  %v3515_v17 = vrot.slane %v3480_v47, 6 }
 0x22e   : > { %v3507_v57 = vsel %vm3048_vm5, %v3505_v50, %v3506_v20  ;;  %v3510_v21 = vsel %vm3048_vm5, %v3508_v25, %v3509_v27  ;;  %v3517_v24 = vrot.slane %v3481_v39, 6  ;;  %v3518_v48 = vrot.slane %v3482_v5, 6 }
 0x22f   : > { %v3513_v42 = vsel %vm3048_vm5, %v3511_v33, %v3512_v49  ;;  %v3516_v31 = vsel %vm3048_vm5, %v3514_v3, %v3515_v17  ;;  %v3520_v44 = vrot.slane %v3483_v41, 6  ;;  %v3521_v4 = vrot.slane %v3484_v38, 6 }
 0x230   : > { %v3519_v2 = vsel %vm3048_vm5, %v3517_v24, %v3518_v48  ;;  %v3523_v37 = vrot.slane %v3485_v0, 6  ;;  %v3524_v15 = vrot.slane %v3486_v29, 6  ;;  %v3526_v9 = vrot.slane %v3487_v40, 6 }
 0x231   : > { %v3522_v12 = vsel %vm3048_vm5, %v3520_v44, %v3521_v4  ;;  %v3527_v59 = vrot.slane %v3488_v45, 6  ;;  %v3537_v63 = vadd.f32 %v3507_v57, %v3461_v28  ;;  %v3538_v7 = vadd.f32 %v3510_v21, %v3462_v26 }
 0x232   : > { %v3525_v23 = vsel %vm3048_vm5, %v3523_v37, %v3524_v15  ;;  %v3539_v54 = vadd.f32 %v3513_v42, %v3463_v58  ;;  %v3540_v1 = vadd.f32 %v3516_v31, %v3464_v32  ;;  %v3541_v46 = vadd.f32 %v3519_v2, %v3465_v61 }
 0x233   : > { %v3528_v18 = vsel %vm3048_vm5, %v3526_v9, %v3527_v59  ;;  %v3542_v19 = vadd.f32 %v3522_v12, %v3466_v36  ;;  %v3543_v60 = vadd.f32 %v3525_v23, %v3467_v8  ;;  %v3551_v62 = vadd.f32 %v3631_v30, %v3537_v63 }
 0x234   : > { %v3544_v14 = vadd.f32 %v3528_v18, %v3468_v53  ;;  %v3552_v43 = vadd.f32 %v3631_v30, %v3538_v7  ;;  %v3553_v16 = vadd.f32 %v3631_v30, %v3539_v54  ;;  %v3554_v11 = vadd.f32 %v3631_v30, %v3540_v1 }
 0x235   : > { %v3555_v28 = vadd.f32 %v3631_v30, %v3541_v46  ;;  %v3556_v26 = vadd.f32 %v3631_v30, %v3542_v19  ;;  %v3557_v22 = vadd.f32 %v3631_v30, %v3543_v60  ;;  %3560 = vst.msk [vmem:[%s170_s22] sm:$0xff] %vm3559_vm6, %v3551_v62 }
 0x236   : > { %v3558_v55 = vadd.f32 %v3631_v30, %v3544_v14  ;;  %3561 = vst.msk [vmem:[%s170_s22 + $0x8] sm:$0xff] %vm3559_vm6, %v3552_v43  ;;  %3562 = vst.msk [vmem:[%s170_s22 + $0x10] sm:$0xff] %vm3559_vm6, %v3553_v16 }
 0x237   : > { %3563 = vst.msk [vmem:[%s170_s22 + $0x18] sm:$0xff] %vm3559_vm6, %v3554_v11  ;;  %3564 = vst.msk [vmem:[%s170_s22 + $0x20] sm:$0xff] %vm3559_vm6, %v3555_v28 }
 0x238   : > { %3565 = vst.msk [vmem:[%s170_s22 + $0x28] sm:$0xff] %vm3559_vm6, %v3556_v26  ;;  %3566 = vst.msk [vmem:[%s170_s22 + $0x30] sm:$0xff] %vm3559_vm6, %v3557_v22 }
 0x239   : > { %3567 = vst.msk [vmem:[%s170_s22 + $0x38] sm:$0xff] %vm3559_vm6, %v3558_v55 }
 0x23a PF: > { %s13_s12 = sadd.s32 1, %s3746_s12  }
 0x23b   : > { %p10_p4 = scmp.ge.s32.totalorder %s13_s12, 4  }
 0x23d   :  { %12 = sbr.rel (!%p10_p4) target bundleno = 1 (0x1), region = 62 }

// kernel: grapher_forward.6
= control target key start
LH: loop header
LB: loop body
LE: loop exit
PB: predicated region body
PF: predicated region fallthrough
CT: control target
= control target key end

     0   :  { %s2869_s24 = smov 0   ;;  %s2871_s25 = smov 0   ;;  %s3774_s0 = inlined_call_operand.vmem [shape: f32[2,64,16], index: 0, kind: input, shape index: {}, may-alias: {0,1}]   ;;  %s3775_s1 = inlined_call_operand.vmem [shape: f32[2,64,16], index: 1, kind: input, shape index: {}, may-alias: {0,1}]   ;;  %s3776_s2 = inlined_call_operand.vmem [shape: s32[2,1,64], index: 2, kind: input, shape index: {}]   ;;  %s3777_s3 = inlined_call_operand.vmem [shape: s32[2,64,1], index: 3, kind: input, shape index: {}]   ;;  %s3778_s4 = inlined_call_operand.vmem [shape: bf16[16,32], index: 4, kind: input, shape index: {}]   ;;  %s3779_s5 = inlined_call_operand.vmem [shape: bf16[16,32], index: 5, kind: input, shape index: {}]   ;;  %s3780_s6 = inlined_call_operand.vmem [shape: f32[1,32], index: 6, kind: input, shape index: {}]   ;;  %s3781_s7 = inlined_call_operand.vmem [shape: f32[2,64,32], index: 7, kind: output, shape index: {}]  }
   0x1   :  { %s2873_s26 = smov 0  }
   0x2 LB: > { %s29_s27 = sadd.s32 1, %s2821_s25  ;;  %p2436_p0 = scmp.ge.s32.totalorder %s2825_s26, 1  ;;  %s2825_s26 = sphi %s2873_s26, %s17_s26   ;;  %s2821_s25 = sphi %s2871_s25, %s3834_s25   ;;  %s2817_s24 = sphi %s2869_s24, %s3833_s24  }
   0x3   : > { %p31_p1 = scmp.ge.s32.totalorder %s29_s27, 2  ;;  %p293_p2 = scmp.lt.s32.totalorder %s2825_s26, 3 }
   0x5   : > { %s3836_s27 = smov (%p31_p1, %s29_s27), 0  ;;  %p294_p3 = pnand %p2436_p0, %p293_p2 }
   0x7   : > { %297 = sbr.rel (%p294_p3) target bundleno = 2701 (0xa8d), region = 48 }
   0xe   : > { %p350_p4 = scmp.lt.s32.totalorder %s2817_s24, 1  ;;  %vm413_vm0 = vcmask 130048   ;;  %v3782_v48 = vmov 0   ;;  %vm670_vm2 = vcmask 523264  }
   0xf   : > { %2744 = vset.pattern.permute.xlu1 %v3782_v48  ;;  %2743 = vset.pattern.permute.xlu0 %v3782_v48 }
  0x10   : > { %s3838_s24 = smov (!%p350_p4, %s2817_s24), 1 }
  0x11   : > { %s2890_s28 = sshll.u32 %s3838_s24, 6  ;;  %s367_s17 = scalar_lea.vmem %s3776_s2, %s3838_s24 }
  0x12   : > { %s354_s8 = scalar_lea.vmem %s3774_s0, %s2890_s28  ;;  %s2932_s11 = scalar_lea.vmem %s3775_s1, %s2890_s28 }
  0x13   : > { %v2896_v0 = vld [vmem:[%s354_s8] sm:$0xff]  ;;  %v2898_v1 = vld [vmem:[%s354_s8 + $0x10] sm:$0xff]  ;;  %v2900_v2 = vld [vmem:[%s354_s8 + $0x8] sm:$0xff]  ;;  %s376_s14 = scalar_lea.vmem %s3777_s3, %s2890_s28  ;;  %s3742_s30 = scalar_lea.vmem %s3781_s7, %s2890_s28 }
  0x14   : > { %v405_v3 = vmul.f32 %v2896_v0, %v2896_v0  ;;  %v407_v4 = vmul.f32 %v2898_v1, %v2898_v1  ;;  %v406_v5 = vmul.f32 %v2900_v2, %v2900_v2  ;;  %v2908_v6 = vld [vmem:[%s354_s8 + $0x18] sm:$0xff]  ;;  %v2912_v8 = vld [vmem:[%s354_s8 + $0x28] sm:$0xff]  ;;  %v2914_v9 = vld [vmem:[%s354_s8 + $0x20] sm:$0xff] }
  0x15   : > { %v408_v7 = vmul.f32 %v2908_v6, %v2908_v6  ;;  %v410_v14 = vmul.f32 %v2912_v8, %v2912_v8  ;;  %v409_v15 = vmul.f32 %v2914_v9, %v2914_v9  ;;  %v2924_v16 = vld [vmem:[%s354_s8 + $0x38] sm:$0xff]  ;;  %v2926_v17 = vld [vmem:[%s354_s8 + $0x30] sm:$0xff]  ;;  %v2941_v22 = vld [vmem:[%s2932_s11 + $0x8] sm:$0xff] }
  0x16   : > { %v414_v10 = vsel %vm413_vm0, %v405_v3, 0.0  ;;  %v420_v11 = vsel %vm413_vm0, %v407_v4, 0.0  ;;  %v417_v12 = vsel %vm413_vm0, %v406_v5, 0.0  ;;  %v412_v20 = vmul.f32 %v2924_v16, %v2924_v16  ;;  %v2944_v23 = vld [vmem:[%s2932_s11] sm:$0xff]  ;;  %v2953_v28 = vld [vmem:[%s2932_s11 + $0x18] sm:$0xff]  ;;  %v2956_v29 = vld [vmem:[%s2932_s11 + $0x10] sm:$0xff] }
  0x17   : > { %415 = vadd.xlane.f32.xlu0 %v414_v10  ;;  %421 = vadd.xlane.f32.xlu1 %v420_v11  ;;  %v423_v13 = vsel %vm413_vm0, %v408_v7, 0.0  ;;  %v429_v18 = vsel %vm413_vm0, %v410_v14, 0.0  ;;  %v426_v19 = vsel %vm413_vm0, %v409_v15, 0.0  ;;  %v411_v21 = vmul.f32 %v2926_v17, %v2926_v17  ;;  %v2965_v34 = vld [vmem:[%s2932_s11 + $0x28] sm:$0xff]  ;;  %v2968_v35 = vld [vmem:[%s2932_s11 + $0x20] sm:$0xff]  ;;  %v2977_v40 = vld [vmem:[%s2932_s11 + $0x38] sm:$0xff] }
  0x18   : > { %v435_v24 = vsel %vm413_vm0, %v412_v20, 0.0  ;;  %v467_v26 = vmul.f32 %v2941_v22, %v2941_v22  ;;  %v466_v27 = vmul.f32 %v2944_v23, %v2944_v23  ;;  %v469_v32 = vmul.f32 %v2953_v28, %v2953_v28  ;;  %v2980_v41 = vld [vmem:[%s2932_s11 + $0x30] sm:$0xff]  ;;  %v616_v49 = vld [vmem:[%s376_s14 + $0x8] sm:$0xff]  ;;  %v615_v51 = vld [vmem:[%s376_s14] sm:$0xff] }
  0x19   : > { %v432_v25 = vsel %vm413_vm0, %v411_v21, 0.0  ;;  %v468_v33 = vmul.f32 %v2956_v29, %v2956_v29  ;;  %v471_v38 = vmul.f32 %v2965_v34, %v2965_v34  ;;  %v470_v39 = vmul.f32 %v2968_v35, %v2968_v35  ;;  %v617_v50 = vld [vmem:[%s376_s14 + $0x10] sm:$0xff]  ;;  %v618_v52 = vld [vmem:[%s376_s14 + $0x18] sm:$0xff]  ;;  %v619_v53 = vld [vmem:[%s376_s14 + $0x20] sm:$0xff] }
  0x1a   : > { %v477_v30 = vsel %vm413_vm0, %v467_v26, 0.0  ;;  %v474_v31 = vsel %vm413_vm0, %v466_v27, 0.0  ;;  %v483_v36 = vsel %vm413_vm0, %v469_v32, 0.0  ;;  %v473_v44 = vmul.f32 %v2977_v40, %v2977_v40  ;;  %v620_v54 = vld [vmem:[%s376_s14 + $0x28] sm:$0xff]  ;;  %v621_v55 = vld [vmem:[%s376_s14 + $0x30] sm:$0xff]  ;;  %v622_v56 = vld [vmem:[%s376_s14 + $0x38] sm:$0xff] }
  0x1b   : > { %418 = vadd.xlane.f32.xlu0 %v417_v12  ;;  %424 = vadd.xlane.f32.xlu1 %v423_v13  ;;  %v480_v37 = vsel %vm413_vm0, %v468_v33, 0.0  ;;  %v489_v42 = vsel %vm413_vm0, %v471_v38, 0.0  ;;  %v486_v43 = vsel %vm413_vm0, %v470_v39, 0.0  ;;  %v472_v45 = vmul.f32 %v2980_v41, %v2980_v41 }
  0x1c   : > { %v495_v46 = vsel %vm413_vm0, %v473_v44, 0.0 }
  0x1d   : > { %v492_v47 = vsel %vm413_vm0, %v472_v45, 0.0 }
  0x1f   : > { %430 = vadd.xlane.f32.xlu1 %v429_v18  ;;  %427 = vadd.xlane.f32.xlu0 %v426_v19 }
  0x23   : > { %436 = vadd.xlane.f32.xlu1 %v435_v24  ;;  %433 = vadd.xlane.f32.xlu0 %v432_v25 }
  0x27   : > { %478 = vadd.xlane.f32.xlu1 %v477_v30  ;;  %475 = vadd.xlane.f32.xlu0 %v474_v31 }
  0x2b   : > { %484 = vadd.xlane.f32.xlu1 %v483_v36  ;;  %481 = vadd.xlane.f32.xlu0 %v480_v37 }
  0x2f   : > { %490 = vadd.xlane.f32.xlu1 %v489_v42  ;;  %487 = vadd.xlane.f32.xlu0 %v486_v43 }
  0x33   : > { %496 = vadd.xlane.f32.xlu1 %v495_v46  ;;  %493 = vadd.xlane.f32.xlu0 %v492_v47 }
  0x44   : > { %628 = vperm.xlu1 %2744, %v616_v49  }
  0x48   : > { %631 = vperm.xlu1 %2744, %v617_v50  }
  0x49   : > { %625 = vperm.xlu0 %2743, %v615_v51  }
  0x4c   : > { %634 = vperm.xlu1 %2744, %v618_v52  }
  0x50   : > { %637 = vperm.xlu1 %2744, %v619_v53  }
  0x54   : > { %640 = vperm.xlu1 %2744, %v620_v54  }
  0x58   : > { %643 = vperm.xlu1 %2744, %v621_v55  }
  0x5c   : > { %646 = vperm.xlu1 %2744, %v622_v56  }
  0xa4   : > { %v416_v57 = vpop.xlane.xlu0 %415  ;;  %v422_v58 = vpop.xlane.xlu1 %421 }
  0xa5   : > { %v438_v59 = vmax.f32 %v416_v57, 1e-24  ;;  %v440_v60 = vmax.f32 %v422_v58, 1e-24 }
  0xa7   : > { %2747 = vrsqrt.f32 %v440_v60 }
  0xa8   : > { %v419_v61 = vpop.xlane.xlu0 %418  ;;  %v425_v62 = vpop.xlane.xlu1 %424  ;;  %2749 = vrsqrt.f32 %v438_v59 }
  0xa9   : > { %v439_v63 = vmax.f32 %v419_v61, 1e-24  ;;  %v441_v3 = vmax.f32 %v425_v62, 1e-24 }
  0xab   : > { %2751 = vrsqrt.f32 %v439_v63 }
  0xac   : > { %2753 = vrsqrt.f32 %v441_v3  ;;  %v431_v4 = vpop.xlane.xlu1 %430  ;;  %v428_v5 = vpop.xlane.xlu0 %427 }
  0xad   : > { %v443_v7 = vmax.f32 %v431_v4, 1e-24  ;;  %v442_v10 = vmax.f32 %v428_v5, 1e-24 }
  0xaf   : > { %2755 = vrsqrt.f32 %v443_v7 }
  0xb0   : > { %2757 = vrsqrt.f32 %v442_v10  ;;  %v437_v11 = vpop.xlane.xlu1 %436  ;;  %v434_v12 = vpop.xlane.xlu0 %433 }
  0xb1   : > { %v445_v13 = vmax.f32 %v437_v11, 1e-24  ;;  %v2748_v14 = vpop.eup %2747  ;;  %v444_v15 = vmax.f32 %v434_v12, 1e-24 }
  0xb2   : > { %v2750_v18 = vpop.eup %2749  ;;  %v456_v24 = vmul.f32 %v2748_v14, %v2898_v1 }
  0xb3   : > { %2759 = vrsqrt.f32 %v445_v13  ;;  %v454_v30 = vmul.f32 %v2750_v18, %v2896_v0 }
  0xb4   : > { %v479_v19 = vpop.xlane.xlu1 %478  ;;  %v476_v20 = vpop.xlane.xlu0 %475  ;;  %2761 = vrsqrt.f32 %v444_v15 }
  0xb5   : > { %v2752_v21 = vpop.eup %2751  ;;  %v499_v25 = vmax.f32 %v479_v19, 1e-24  ;;  %v498_v26 = vmax.f32 %v476_v20, 1e-24 }
  0xb6   : > { %v2754_v27 = vpop.eup %2753  ;;  %v455_v31 = vmul.f32 %v2752_v21, %v2900_v2 }
  0xb7   : > { %v457_v32 = vmul.f32 %v2754_v27, %v2908_v6  ;;  %2763 = vrsqrt.f32 %v499_v25 }
  0xb8   : > { %v462_v33 = vpack.c.bf16 %v455_v31, %v454_v30  ;;  %2765 = vrsqrt.f32 %v498_v26  ;;  %v485_v36 = vpop.xlane.xlu1 %484  ;;  %v482_v39 = vpop.xlane.xlu0 %481 }
  0xb9   : > { %v2756_v37 = vpop.eup %2755  ;;  %v463_v38 = vpack.c.bf16 %v457_v32, %v456_v24  ;;  %v501_v49 = vmax.f32 %v485_v36, 1e-24  ;;  %v500_v52 = vmax.f32 %v482_v39, 1e-24  ;;  %v2449_v36 = vld [vmem:[%s367_s17] ss:$0 sm:$0xff] }
  0xba   : > { %v2758_v42 = vpop.eup %2757  ;;  %2713 = vmatprep.subr.msk.bf16.mxu0 %vm413_vm0, %v462_v33  ;;  %v539_v43 = vsel %vm413_vm0, %v462_v33, 0  ;;  %v459_v45 = vmul.f32 %v2756_v37, %v2912_v8 }
  0xbb   : > { %2590 = vmatpush3.bf16.xpose.msra.mxu0 %v539_v43  ;;  %v458_v44 = vmul.f32 %v2758_v42, %v2914_v9  ;;  %v542_v57 = vsel %vm413_vm0, %v463_v38, 0  ;;  %2767 = vrsqrt.f32 %v501_v49 }
  0xbc   : > { %2714 = vmatprep.subr.msk.bf16.mxu0 %vm413_vm0, %v463_v38  ;;  %v491_v46 = vpop.xlane.xlu1 %490  ;;  %v488_v50 = vpop.xlane.xlu0 %487  ;;  %2769 = vrsqrt.f32 %v500_v52 }
  0xbd   : > { %v2760_v47 = vpop.eup %2759  ;;  %v464_v53 = vpack.c.bf16 %v459_v45, %v458_v44  ;;  %v503_v55 = vmax.f32 %v491_v46, 1e-24  ;;  %v502_v58 = vmax.f32 %v488_v50, 1e-24 }
  0xbe   : > { %v2762_v51 = vpop.eup %2761  ;;  %v461_v62 = vmul.f32 %v2760_v47, %v2924_v16 }
  0xbf   : > { %v460_v61 = vmul.f32 %v2762_v51, %v2926_v17  ;;  %2771 = vrsqrt.f32 %v503_v55 }
  0xc0   : > { %v497_v63 = vpop.xlane.xlu1 %496  ;;  %2773 = vrsqrt.f32 %v502_v58  ;;  %v494_v4 = vpop.xlane.xlu0 %493 }
  0xc1   : > { %v2764_v54 = vpop.eup %2763  ;;  %v505_v5 = vmax.f32 %v497_v63, 1e-24  ;;  %v465_v7 = vpack.c.bf16 %v461_v62, %v460_v61  ;;  %v504_v10 = vmax.f32 %v494_v4, 1e-24 }
  0xc2   : > { %v2766_v56 = vpop.eup %2765  ;;  %v515_v59 = vmul.f32 %v2764_v54, %v2941_v22  ;;  %v545_v22 = vsel %vm413_vm0, %v464_v53, 0 }
  0xc3   : > { %2592 = vmatpush3.bf16.xpose.msra.mxu0 %v542_v57  ;;  %v514_v60 = vmul.f32 %v2766_v56, %v2944_v23  ;;  %2775 = vrsqrt.f32 %v505_v5  ;;  %v548_v14 = vsel %vm413_vm0, %v465_v7, 0 }
  0xc4   : > { %2715 = vmatprep.subr.msk.bf16.mxu0 %vm413_vm0, %v464_v53  ;;  %2777 = vrsqrt.f32 %v504_v10 }
  0xc5   : > { %v522_v3 = vpack.c.bf16 %v515_v59, %v514_v60  ;;  %v2768_v23 = vpop.eup %2767 }
  0xc6   : > { %v2770_v11 = vpop.eup %2769  ;;  %v517_v18 = vmul.f32 %v2768_v23, %v2953_v28  ;;  %v629_v28 = vpop.permute.xlu1 %628 }
  0xc7   : > { %2597 = vmatprep.mubr.msk.bf16.mxu0 %vm413_vm0, %v522_v3  ;;  %v516_v15 = vmul.f32 %v2770_v11, %v2956_v29  ;;  %vm653_vm4 = vcmp.eq.s32.totalorder %v629_v28, %v2449_v36  ;;  %v668_v3 = vlaneseq }
  0xc9   : > { %v2772_v12 = vpop.eup %2771  ;;  %v523_v24 = vpack.c.bf16 %v517_v18, %v516_v15  ;;  %v3060_v4 = vand.u32 127, %v668_v3 }
  0xca   : > { %v2774_v13 = vpop.eup %2773  ;;  %v519_v20 = vmul.f32 %v2772_v12, %v2965_v34  ;;  %v626_v34 = vpop.permute.xlu0 %625 }
  0xcb   : > { %2594 = vmatpush3.bf16.xpose.msra.mxu0 %v545_v22  ;;  %v518_v19 = vmul.f32 %v2774_v13, %v2968_v35  ;;  %v632_v35 = vpop.permute.xlu1 %631  ;;  %vm652_vm1 = vcmp.eq.s32.totalorder %v626_v34, %v2449_v36 }
  0xcc   : > { %2716 = vmatprep.subr.msk.bf16.mxu0 %vm413_vm0, %v465_v7  ;;  %vm654_vm5 = vcmp.eq.s32.totalorder %v632_v35, %v2449_v36 }
  0xcd   : > { %v2776_v21 = vpop.eup %2775  ;;  %v524_v26 = vpack.c.bf16 %v519_v20, %v518_v19 }
  0xce   : > { %v2778_v25 = vpop.eup %2777  ;;  %v521_v30 = vmul.f32 %v2776_v21, %v2977_v40 }
  0xcf   : > { %v520_v27 = vmul.f32 %v2778_v25, %v2980_v41  ;;  %v635_v31 = vpop.permute.xlu1 %634 }
  0xd0   : > { %vm655_vm3 = vcmp.eq.s32.totalorder %v635_v31, %v2449_v36 }
  0xd1   : > { %v525_v29 = vpack.c.bf16 %v521_v30, %v520_v27 }
  0xd3   : > { %2596 = vmatpush3.bf16.xpose.msra.mxu0 %v548_v14  ;;  %v638_v32 = vpop.permute.xlu1 %637 }
  0xd4   : > { %vm656_vm6 = vcmp.eq.s32.totalorder %v638_v32, %v2449_v36 }
  0xd7   : > { %v641_v33 = vpop.permute.xlu1 %640 }
  0xd8   : > { %vm657_vm7 = vcmp.eq.s32.totalorder %v641_v33, %v2449_v36 }
  0xda   : > { %2598 = vmatmul.mubr.msk.bf16.vlgmr.msra.gmra.mrb[0].mxu0 %vm413_vm0, %v523_v24 }
  0xdb   : > { %2601 = vmatprep.mubr.msk.bf16.mxu0 %vm413_vm0, %v524_v26  ;;  %v644_v43 = vpop.permute.xlu1 %643 }
  0xdc   : > { %vm658_vm8 = vcmp.eq.s32.totalorder %v644_v43, %v2449_v36 }
  0xdf   : > { %v647_v53 = vpop.permute.xlu1 %646 }
  0xe0   : > { %vm659_vm9 = vcmp.eq.s32.totalorder %v647_v53, %v2449_v36 }
  0xe2   : > { %2602 = vmatmul.mubr.msk.bf16.gmra.mrb[4].mxu0 %vm413_vm0, %v525_v29 }
 0x1ad   : > { %v2599_v41 = vpop.f32.mrb[0].mxu0 }
 0x1ae   : > { %v584_v40 = vpop.f32.mrb[1].mxu0  ;;  %v3038_v47 = vsel %vm654_vm5, %v2599_v41, -1e+30 }
 0x1af   : > { %v3028_v37 = vsel %vm652_vm1, %v584_v40, -1e+30  ;;  %v2600_v38 = vpop.f32.mrb[2].mxu0  ;;  %v677_v52 = vsel %vm670_vm2, %v3038_v47, -inf }
 0x1b0   : > { %v587_v39 = vpop.f32.mrb[3].mxu0  ;;  %v671_v42 = vsel %vm670_vm2, %v3028_v37, -inf  ;;  %v3032_v44 = vsel %vm655_vm3, %v2600_v38, -1e+30 }
 0x1b1   : > { %v3034_v45 = vsel %vm653_vm4, %v587_v39, -1e+30  ;;  %672 = vmax.xlane.f32.xlu1 %v671_v42  ;;  %v680_v49 = vsel %vm670_vm2, %v3032_v44, -inf }
 0x1b2   : > { %v674_v46 = vsel %vm670_vm2, %v3034_v45, -inf }
 0x1b3   : > { %675 = vmax.xlane.f32.xlu0 %v674_v46 }
 0x1b5   : > { %v2603_v50 = vpop.f32.mrb[4].mxu0  ;;  %681 = vmax.xlane.f32.xlu1 %v680_v49 }
 0x1b6   : > { %v600_v51 = vpop.f32.mrb[5].mxu0  ;;  %v3052_v60 = vsel %vm658_vm8, %v2603_v50, -1e+30 }
 0x1b7   : > { %v3044_v54 = vsel %vm656_vm6, %v600_v51, -1e+30  ;;  %678 = vmax.xlane.f32.xlu0 %v677_v52  ;;  %v2604_v55 = vpop.f32.mrb[6].mxu0  ;;  %v689_v62 = vsel %vm670_vm2, %v3052_v60, -inf }
 0x1b8   : > { %v603_v56 = vpop.f32.mrb[7].mxu0  ;;  %v683_v58 = vsel %vm670_vm2, %v3044_v54, -inf  ;;  %v3054_v61 = vsel %vm659_vm9, %v2604_v55, -1e+30 }
 0x1b9   : > { %v3046_v57 = vsel %vm657_vm7, %v603_v56, -1e+30  ;;  %v692_v63 = vsel %vm670_vm2, %v3054_v61, -inf  ;;  %v2689_v56 = vpack.c.bf16 %v2900_v2, %v2896_v0 }
 0x1ba   : > { %v686_v59 = vsel %vm670_vm2, %v3046_v57, -inf }
 0x1bb   : > { %684 = vmax.xlane.f32.xlu0 %v683_v58  ;;  %687 = vmax.xlane.f32.xlu1 %v686_v59  ;;  %v2693_v58 = vpack.c.bf16 %v2908_v6, %v2898_v1 }
 0x1bc   : > { %2690 = vmatprep.subr.bf16.mxu1 %v2689_v56 }
 0x1bd   : > { %2692 = vmatpush3.bf16.msra.mxu1 %v2689_v56 }
 0x1be   : > { %2694 = vmatprep.subr.bf16.mxu1 %v2693_v58 }
 0x1bf   : > { %690 = vmax.xlane.f32.xlu0 %v689_v62  ;;  %693 = vmax.xlane.f32.xlu1 %v692_v63 }
 0x1c1   : > { %2696 = vmatpush3.bf16.msra.mxu1 %v2693_v58 }
 0x23e   : > { %v3062_v22 = vpop.xlane.xlu1 %672 }
 0x23f   : > { %vm695_vm10 = vcmp.ge.f32.partialorder %v3028_v37, %v3062_v22 }
 0x240   : > { %v3066_v5 = vpop.xlane.xlu0 %675  ;;  %v703_v7 = vsel %vm695_vm10, %v3060_v4, 64 }
 0x241   : > { %vm696_vm11 = vcmp.ge.f32.partialorder %v3034_v45, %v3066_v5  ;;  %v711_v10 = vsel %vm670_vm2, %v703_v7, 2147483647 }
 0x242   : > { %v3072_v23 = vpop.xlane.xlu1 %681  ;;  %v713_v11 = vshra.s32 %v711_v10, 16  ;;  %v704_v12 = vsel %vm696_vm11, %v3060_v4, 64  ;;  %v712_v59 = vand.u32 65535, %v711_v10 }
 0x243   : > { %vm698_vm12 = vcmp.ge.f32.partialorder %v3032_v44, %v3072_v23  ;;  %v726_v13 = vsel %vm670_vm2, %v704_v12, 2147483647 }
 0x244   : > { %v3078_v14 = vpop.xlane.xlu0 %678  ;;  %v715_v15 = vcvt.s32.f32 %v713_v11  ;;  %v728_v18 = vshra.s32 %v726_v13, 16  ;;  %v706_v19 = vsel %vm698_vm12, %v3060_v4, 64  ;;  %v727_v62 = vand.u32 65535, %v726_v13 }
 0x245   : > { %vm697_vm13 = vcmp.ge.f32.partialorder %v3038_v47, %v3078_v14  ;;  %v756_v20 = vsel %vm670_vm2, %v706_v19, 2147483647  ;;  %v714_v3 = vcvt.s32.f32 %v712_v59 }
 0x246   : > { %716 = vmin.xlane.f32.xlu0 %v715_v15  ;;  %v730_v21 = vcvt.s32.f32 %v728_v18  ;;  %v758_v24 = vshra.s32 %v756_v20, 16  ;;  %v705_v25 = vsel %vm697_vm13, %v3060_v4, 64  ;;  %v729_v12 = vcvt.s32.f32 %v727_v62 }
 0x247   : > { %v741_v26 = vsel %vm670_vm2, %v705_v25, 2147483647  ;;  %v757_v18 = vand.u32 65535, %v756_v20 }
 0x248   : > { %v3086_v27 = vpop.xlane.xlu1 %687  ;;  %731 = vmin.xlane.f32.xlu1 %v730_v21  ;;  %v3088_v30 = vpop.xlane.xlu0 %684  ;;  %v743_v29 = vshra.s32 %v741_v26, 16  ;;  %v760_v28 = vcvt.s32.f32 %v758_v24  ;;  %v742_v19 = vand.u32 65535, %v741_v26 }
 0x249   : > { %vm700_vm14 = vcmp.ge.f32.partialorder %v3046_v57, %v3086_v27  ;;  %vm699_vm15 = vcmp.ge.f32.partialorder %v3044_v54, %v3088_v30  ;;  %v759_v6 = vcvt.s32.f32 %v757_v18 }
 0x24a   : > { %v745_v35 = vcvt.s32.f32 %v743_v29  ;;  %v708_v31 = vsel %vm700_vm14, %v3060_v4, 64  ;;  %v707_v32 = vsel %vm699_vm15, %v3060_v4, 64  ;;  %v744_v24 = vcvt.s32.f32 %v742_v19 }
 0x24b   : > { %v786_v34 = vsel %vm670_vm2, %v708_v31, 2147483647  ;;  %v771_v33 = vsel %vm670_vm2, %v707_v32, 2147483647 }
 0x24c   : > { %v3098_v36 = vpop.xlane.xlu1 %693  ;;  %761 = vmin.xlane.f32.xlu1 %v760_v28  ;;  %746 = vmin.xlane.f32.xlu0 %v745_v35  ;;  %v3100_v41 = vpop.xlane.xlu0 %690  ;;  %v788_v40 = vshra.s32 %v786_v34, 16  ;;  %v773_v38 = vshra.s32 %v771_v33, 16  ;;  %v787_v25 = vand.u32 65535, %v786_v34  ;;  %v772_v29 = vand.u32 65535, %v771_v33 }
 0x24d   : > { %vm702_vm1 = vcmp.ge.f32.partialorder %v3054_v61, %v3098_v36  ;;  %vm701_vm3 = vcmp.ge.f32.partialorder %v3052_v60, %v3100_v41 }
 0x24e   : > { %v790_v39 = vcvt.s32.f32 %v788_v40  ;;  %v775_v42 = vcvt.s32.f32 %v773_v38  ;;  %v710_v43 = vsel %vm702_vm1, %v3060_v4, 64  ;;  %v709_v46 = vsel %vm701_vm3, %v3060_v4, 64 }
 0x24f   : > { %v816_v49 = vsel %vm670_vm2, %v710_v43, 2147483647  ;;  %v801_v50 = vsel %vm670_vm2, %v709_v46, 2147483647  ;;  %v789_v20 = vcvt.s32.f32 %v787_v25  ;;  %v774_v26 = vcvt.s32.f32 %v772_v29 }
 0x250   : > { %791 = vmin.xlane.f32.xlu1 %v790_v39  ;;  %776 = vmin.xlane.f32.xlu0 %v775_v42  ;;  %v818_v51 = vshra.s32 %v816_v49, 16  ;;  %v803_v52 = vshra.s32 %v801_v50, 16  ;;  %v817_v32 = vand.u32 65535, %v816_v49 }
 0x252   : > { %v820_v53 = vcvt.s32.f32 %v818_v51  ;;  %v805_v55 = vcvt.s32.f32 %v803_v52 }
 0x254   : > { %821 = vmin.xlane.f32.xlu1 %v820_v53  ;;  %806 = vmin.xlane.f32.xlu0 %v805_v55 }
 0x2d3   : > { %v717_v63 = vpop.xlane.xlu0 %716 }
 0x2d4   : > { %vm718_vm4 = vcmp.eq.f32.partialorder %v715_v15, %v717_v63  ;;  %v723_v49 = vcvt.f32.s32 %v717_v63  ;;  %v3784_v63 = vmov 0.0  }
 0x2d5   : > { %v732_v7 = vpop.xlane.xlu1 %731  ;;  %v719_v11 = vsel %vm718_vm4, %v714_v3, inf }
 0x2d6   : > { %720 = vmin.xlane.f32.xlu0 %v719_v11  ;;  %vm733_vm5 = vcmp.eq.f32.partialorder %v730_v21, %v732_v7  ;;  %v802_v21 = vand.u32 65535, %v801_v50  ;;  %v738_v50 = vcvt.f32.s32 %v732_v7  ;;  %v724_v52 = vshll.u32 %v723_v49, 16 }
 0x2d7   : > { %v734_v0 = vsel %vm733_vm5, %v729_v12, inf }
 0x2d8   : > { %735 = vmin.xlane.f32.xlu1 %v734_v0  ;;  %v804_v33 = vcvt.s32.f32 %v802_v21  ;;  %v739_v59 = vshll.u32 %v738_v50, 16 }
 0x2d9   : > { %v762_v2 = vpop.xlane.xlu1 %761  ;;  %v747_v1 = vpop.xlane.xlu0 %746 }
 0x2da   : > { %vm763_vm6 = vcmp.eq.f32.partialorder %v760_v28, %v762_v2  ;;  %vm748_vm7 = vcmp.eq.f32.partialorder %v745_v35, %v747_v1  ;;  %v819_v35 = vcvt.s32.f32 %v817_v32  ;;  %v753_v56 = vcvt.f32.s32 %v747_v1 }
 0x2db   : > { %v764_v10 = vsel %vm763_vm6, %v759_v6, inf  ;;  %v749_v13 = vsel %vm748_vm7, %v744_v24, inf }
 0x2dc   : > { %765 = vmin.xlane.f32.xlu1 %v764_v10  ;;  %750 = vmin.xlane.f32.xlu0 %v749_v13  ;;  %v754_v12 = vshll.u32 %v753_v56, 16 }
 0x2dd   : > { %v792_v15 = vpop.xlane.xlu1 %791  ;;  %v777_v31 = vpop.xlane.xlu0 %776 }
 0x2de   : > { %vm793_vm8 = vcmp.eq.f32.partialorder %v790_v39, %v792_v15  ;;  %vm778_vm9 = vcmp.eq.f32.partialorder %v775_v42, %v777_v31  ;;  %v2697_v39 = vpack.c.bf16 %v2912_v8, %v2914_v9  ;;  %v2701_v42 = vpack.c.bf16 %v2924_v16, %v2926_v17 }
 0x2df   : > { %v794_v40 = vsel %vm793_vm8, %v789_v20, inf  ;;  %v779_v38 = vsel %vm778_vm9, %v774_v26, inf  ;;  %v798_v9 = vcvt.f32.s32 %v792_v15  ;;  %v783_v16 = vcvt.f32.s32 %v777_v31 }
 0x2e0   : > { %795 = vmin.xlane.f32.xlu1 %v794_v40  ;;  %780 = vmin.xlane.f32.xlu0 %v779_v38 }
 0x2e1   : > { %v3114_v34 = vpop.xlane.xlu1 %821  ;;  %v3116_v28 = vpop.xlane.xlu0 %806  ;;  %2698 = vmatprep.subr.bf16.mxu1 %v2697_v39  ;;  %v784_v10 = vshll.u32 %v783_v16, 16 }
 0x2e2   : > { %vm823_vm10 = vcmp.eq.f32.partialorder %v820_v53, %v3114_v34  ;;  %vm808_vm11 = vcmp.eq.f32.partialorder %v805_v55, %v3116_v28  ;;  %2700 = vmatpush3.bf16.msra.mxu1 %v2697_v39  ;;  %v768_v55 = vcvt.f32.s32 %v762_v2  ;;  %v799_v2 = vshll.u32 %v798_v9, 16 }
 0x2e3   : > { %v824_v43 = vsel %vm823_vm10, %v819_v35, inf  ;;  %v809_v46 = vsel %vm808_vm11, %v804_v33, inf  ;;  %2702 = vmatprep.subr.bf16.mxu1 %v2701_v42  ;;  %v828_v13 = vcvt.f32.s32 %v3114_v34  ;;  %v813_v15 = vcvt.f32.s32 %v3116_v28 }
 0x2e4   : > { %825 = vmin.xlane.f32.xlu1 %v824_v43  ;;  %810 = vmin.xlane.f32.xlu0 %v809_v46  ;;  %v769_v11 = vshll.u32 %v768_v55, 16 }
 0x2e5   : > { %v814_v35 = vshll.u32 %v813_v15, 16 }
 0x2e6   : > { %2704 = vmatpush3.bf16.msra.mxu1 %v2701_v42 }
 0x363   : > { %v721_v51 = vpop.xlane.xlu0 %720 }
 0x364   : > { %v722_v53 = vcvt.f32.s32 %v721_v51 }
 0x365   : > { %v736_v58 = vpop.xlane.xlu1 %735 }
 0x366   : > { %v737_v62 = vcvt.f32.s32 %v736_v58  ;;  %v725_v8 = vadd.s32 %v724_v52, %v722_v53 }
 0x368   : > { %v740_v3 = vadd.s32 %v739_v59, %v737_v62  ;;  %vm831_vm12 = vcmp.eq.s32.totalorder %v3060_v4, %v725_v8 }
 0x369   : > { %v766_v17 = vpop.xlane.xlu1 %765  ;;  %v751_v18 = vpop.xlane.xlu0 %750  ;;  %v2450_v7 = vsel %vm831_vm12, 1.0, %v3784_v63 }
 0x36a   : > { %v767_v19 = vcvt.f32.s32 %v766_v17  ;;  %v752_v0 = vcvt.f32.s32 %v751_v18  ;;  %vm855_vm13 = vcmp.gt.f32.partialorder %v2450_v7, 0.0  ;;  %2621 = vmatprep.mubr.msk.f32.mxu1 %vm670_vm2, %v2450_v7  ;;  %vm832_vm14 = vcmp.eq.s32.totalorder %v3060_v4, %v740_v3 }
 0x36b   : > { %v3129_v1 = vsel %vm855_vm13, -1e+30, %v3028_v37  ;;  %v2451_v6 = vsel %vm832_vm14, 1.0, %v3784_v63 }
 0x36c   : > { %v770_v24 = vadd.s32 %v769_v11, %v767_v19  ;;  %v755_v25 = vadd.s32 %v754_v12, %v752_v0  ;;  %2622 = vmatmul.mubr.msk.f32.vlgmr.msra.gmra.mrb[0].mxu1 %vm670_vm2, %v2451_v6  ;;  %v871_v29 = vsel %vm670_vm2, %v3129_v1, -inf  ;;  %vm856_vm15 = vcmp.gt.f32.partialorder %v2451_v6, 0.0 }
 0x36d   : > { %v796_v31 = vpop.xlane.xlu1 %795  ;;  %872 = vmax.xlane.f32.xlu0 %v871_v29  ;;  %v781_v20 = vpop.xlane.xlu0 %780  ;;  %v3138_v37 = vsel %vm856_vm15, -1e+30, %v3034_v45  ;;  %v829_v45 = vshll.u32 %v828_v13, 16 }
 0x36e   : > { %v797_v26 = vcvt.f32.s32 %v796_v31  ;;  %v782_v32 = vcvt.f32.s32 %v781_v20  ;;  %v874_v21 = vsel %vm670_vm2, %v3138_v37, -inf  ;;  %vm833_vm1 = vcmp.eq.s32.totalorder %v3060_v4, %v755_v25 }
 0x36f   : > { %875 = vmax.xlane.f32.xlu1 %v874_v21  ;;  %v2452_v40 = vsel %vm833_vm1, 1.0, %v3784_v63  ;;  %vm834_vm3 = vcmp.eq.s32.totalorder %v3060_v4, %v770_v24 }
 0x370   : > { %v800_v38 = vadd.s32 %v799_v2, %v797_v26  ;;  %v785_v34 = vadd.s32 %v784_v10, %v782_v32  ;;  %2624 = vmatprep.mubr.msk.f32.mxu1 %vm670_vm2, %v2452_v40  ;;  %v2453_v28 = vsel %vm834_vm3, 1.0, %v3784_v63  ;;  %vm857_vm4 = vcmp.gt.f32.partialorder %v2452_v40, 0.0 }
 0x371   : > { %v826_v33 = vpop.xlane.xlu1 %825  ;;  %2625 = vmatmul.mubr.msk.f32.gmra.mrb[2].mxu1 %vm670_vm2, %v2453_v28  ;;  %v811_v43 = vpop.xlane.xlu0 %810  ;;  %vm858_vm5 = vcmp.gt.f32.partialorder %v2453_v28, 0.0  ;;  %v3149_v46 = vsel %vm857_vm4, -1e+30, %v3038_v47 }
 0x372   : > { %v827_v39 = vcvt.f32.s32 %v826_v33  ;;  %v812_v42 = vcvt.f32.s32 %v811_v43  ;;  %v3152_v49 = vsel %vm858_vm5, -1e+30, %v3032_v44  ;;  %v877_v50 = vsel %vm670_vm2, %v3149_v46, -inf }
 0x373   : > { %v880_v51 = vsel %vm670_vm2, %v3152_v49, -inf  ;;  %878 = vmax.xlane.f32.xlu0 %v877_v50  ;;  %vm835_vm6 = vcmp.eq.s32.totalorder %v3060_v4, %v785_v34  ;;  %vm836_vm7 = vcmp.eq.s32.totalorder %v3060_v4, %v800_v38 }
 0x374   : > { %v830_v52 = vadd.s32 %v829_v45, %v827_v39  ;;  %v815_v53 = vadd.s32 %v814_v35, %v812_v42  ;;  %881 = vmax.xlane.f32.xlu1 %v880_v51  ;;  %v2454_v47 = vsel %vm835_vm6, 1.0, %v3784_v63  ;;  %v2455_v55 = vsel %vm836_vm7, 1.0, %v3784_v63 }
 0x375   : > { %2627 = vmatprep.mubr.msk.f32.mxu1 %vm670_vm2, %v2454_v47  ;;  %vm860_vm8 = vcmp.gt.f32.partialorder %v2455_v55, 0.0  ;;  %vm859_vm9 = vcmp.gt.f32.partialorder %v2454_v47, 0.0 }
 0x376   : > { %2628 = vmatmul.mubr.msk.f32.gmra.mrb[4].mxu1 %vm670_vm2, %v2455_v55  ;;  %v3165_v44 = vsel %vm860_vm8, -1e+30, %v3046_v57  ;;  %v3168_v56 = vsel %vm859_vm9, -1e+30, %v3044_v54  ;;  %vm837_vm10 = vcmp.eq.s32.totalorder %v3060_v4, %v815_v53  ;;  %vm838_vm11 = vcmp.eq.s32.totalorder %v3060_v4, %v830_v52 }
 0x377   : > { %v886_v58 = vsel %vm670_vm2, %v3165_v44, -inf  ;;  %v883_v59 = vsel %vm670_vm2, %v3168_v56, -inf  ;;  %v2456_v62 = vsel %vm837_vm10, 1.0, %v3784_v63  ;;  %v2457_v8 = vsel %vm838_vm11, 1.0, %v3784_v63 }
 0x378   : > { %887 = vmax.xlane.f32.xlu1 %v886_v58  ;;  %884 = vmax.xlane.f32.xlu0 %v883_v59  ;;  %vm862_vm12 = vcmp.gt.f32.partialorder %v2457_v8, 0.0  ;;  %vm861_vm13 = vcmp.gt.f32.partialorder %v2456_v62, 0.0 }
 0x379   : > { %2630 = vmatprep.mubr.msk.f32.mxu1 %vm670_vm2, %v2456_v62  ;;  %v3180_v54 = vsel %vm862_vm12, -1e+30, %v3054_v61  ;;  %v3183_v57 = vsel %vm861_vm13, -1e+30, %v3052_v60 }
 0x37a   : > { %2631 = vmatmul.mubr.msk.f32.gmra.mrb[6].mxu1 %vm670_vm2, %v2457_v8  ;;  %v892_v9 = vsel %vm670_vm2, %v3180_v54, -inf  ;;  %v889_v3 = vsel %vm670_vm2, %v3183_v57, -inf }
 0x37c   : > { %893 = vmax.xlane.f32.xlu1 %v892_v9  ;;  %890 = vmax.xlane.f32.xlu0 %v889_v3 }
 0x3fa   : > { %v3190_v11 = vpop.xlane.xlu0 %872 }
 0x3fb   : > { %vm895_vm14 = vcmp.ge.f32.partialorder %v3129_v1, %v3190_v11 }
 0x3fc   : > { %v3194_v61 = vpop.xlane.xlu1 %875  ;;  %v903_v60 = vsel %vm895_vm14, %v3060_v4, 64 }
 0x3fd   : > { %vm896_vm15 = vcmp.ge.f32.partialorder %v3138_v37, %v3194_v61  ;;  %v911_v12 = vsel %vm670_vm2, %v903_v60, 2147483647 }
 0x3fe   : > { %v913_v16 = vshra.s32 %v911_v12, 16  ;;  %v904_v17 = vsel %vm896_vm15, %v3060_v4, 64 }
 0x3ff   : > { %v3202_v18 = vsel %vm670_vm2, %v904_v17, 2147483647 }
 0x400   : > { %v3204_v7 = vpop.xlane.xlu0 %878  ;;  %v915_v19 = vcvt.s32.f32 %v913_v16  ;;  %v928_v0 = vshra.s32 %v3202_v18, 16 }
 0x401   : > { %v3207_v2 = vpop.xlane.xlu1 %881  ;;  %vm897_vm1 = vcmp.ge.f32.partialorder %v3149_v46, %v3204_v7 }
 0x402   : > { %vm898_vm3 = vcmp.ge.f32.partialorder %v3152_v49, %v3207_v2  ;;  %916 = vmin.xlane.f32.xlu0 %v915_v19  ;;  %v930_v6 = vcvt.s32.f32 %v928_v0  ;;  %v905_v24 = vsel %vm897_vm1, %v3060_v4, 64  ;;  %v912_v0 = vand.u32 65535, %v911_v12 }
 0x403   : > { %v906_v25 = vsel %vm898_vm3, %v3060_v4, 64  ;;  %v941_v29 = vsel %vm670_vm2, %v905_v24, 2147483647  ;;  %v927_v24 = vand.u32 65535, %v3202_v18 }
 0x404   : > { %931 = vmin.xlane.f32.xlu1 %v930_v6  ;;  %v956_v10 = vsel %vm670_vm2, %v906_v25, 2147483647  ;;  %v943_v13 = vshra.s32 %v941_v29, 16 }
 0x405   : > { %v3217_v15 = vpop.xlane.xlu1 %887  ;;  %v3219_v31 = vpop.xlane.xlu0 %884  ;;  %v958_v20 = vshra.s32 %v956_v10, 16 }
 0x406   : > { %vm900_vm4 = vcmp.ge.f32.partialorder %v3165_v44, %v3217_v15  ;;  %vm899_vm5 = vcmp.ge.f32.partialorder %v3168_v56, %v3219_v31  ;;  %v945_v32 = vcvt.s32.f32 %v943_v13  ;;  %v914_v13 = vcvt.s32.f32 %v912_v0 }
 0x407   : > { %v960_v26 = vcvt.s32.f32 %v958_v20  ;;  %v908_v21 = vsel %vm900_vm4, %v3060_v4, 64  ;;  %v907_v40 = vsel %vm899_vm5, %v3060_v4, 64 }
 0x408   : > { %v986_v38 = vsel %vm670_vm2, %v908_v21, 2147483647  ;;  %v971_v34 = vsel %vm670_vm2, %v907_v40, 2147483647  ;;  %946 = vmin.xlane.f32.xlu0 %v945_v32  ;;  %v929_v40 = vcvt.s32.f32 %v927_v24 }
 0x409   : > { %961 = vmin.xlane.f32.xlu1 %v960_v26  ;;  %v3229_v28 = vpop.xlane.xlu1 %893  ;;  %v3231_v45 = vpop.xlane.xlu0 %890  ;;  %v988_v35 = vshra.s32 %v986_v38, 16  ;;  %v973_v33 = vshra.s32 %v971_v34, 16  ;;  %v987_v12 = vand.u32 65535, %v986_v38  ;;  %v972_v18 = vand.u32 65535, %v971_v34 }
 0x40a   : > { %vm902_vm6 = vcmp.ge.f32.partialorder %v3180_v54, %v3229_v28  ;;  %vm901_vm7 = vcmp.ge.f32.partialorder %v3183_v57, %v3231_v45 }
 0x40b   : > { %v910_v43 = vsel %vm902_vm6, %v3060_v4, 64  ;;  %v909_v39 = vsel %vm901_vm7, %v3060_v4, 64  ;;  %v990_v42 = vcvt.s32.f32 %v988_v35  ;;  %v975_v50 = vcvt.s32.f32 %v973_v33 }
 0x40c   : > { %v1016_v51 = vsel %vm670_vm2, %v910_v43, 2147483647  ;;  %v1001_v52 = vsel %vm670_vm2, %v909_v39, 2147483647  ;;  %v957_v35 = vand.u32 65535, %v956_v10  ;;  %v942_v33 = vand.u32 65535, %v941_v29 }
 0x40d   : > { %v1018_v53 = vshra.s32 %v1016_v51, 16  ;;  %v1003_v47 = vshra.s32 %v1001_v52, 16  ;;  %991 = vmin.xlane.f32.xlu1 %v990_v42  ;;  %976 = vmin.xlane.f32.xlu0 %v975_v50  ;;  %v1017_v10 = vand.u32 65535, %v1016_v51  ;;  %v1002_v29 = vand.u32 65535, %v1001_v52 }
 0x40e   : > { %v944_v48 = vcvt.s32.f32 %v942_v33 }
 0x40f   : > { %v1020_v55 = vcvt.s32.f32 %v1018_v53  ;;  %v1005_v58 = vcvt.s32.f32 %v1003_v47  ;;  %v959_v47 = vcvt.s32.f32 %v957_v35  ;;  %v1019_v38 = vcvt.s32.f32 %v1017_v10 }
 0x411   : > { %1021 = vmin.xlane.f32.xlu1 %v1020_v55  ;;  %1006 = vmin.xlane.f32.xlu0 %v1005_v58 }
 0x43f   : > { %v3241_v59 = vpop.f32.mrb[0].mxu1 }
 0x440   : > { %3787 = vst [vmem:[#allocation2_spill] sm:$0xff] %v3241_v59  ;;  %v3243_v62 = vpop.f32.mrb[1].mxu1 }
 0x441   : > { %3788 = vst [vmem:[#allocation3_spill] sm:$0xff] %v3243_v62 }
 0x444   : > { %v3245_v8 = vpop.f32.mrb[2].mxu1 }
 0x445   : > { %3789 = vst [vmem:[#allocation4_spill] sm:$0xff] %v3245_v8  ;;  %v3247_v9 = vpop.f32.mrb[3].mxu1 }
 0x446   : > { %3790 = vst [vmem:[#allocation5_spill] sm:$0xff] %v3247_v9 }
 0x449   : > { %v3249_v3 = vpop.f32.mrb[4].mxu1 }
 0x44a   : > { %3791 = vst [vmem:[#allocation6_spill] sm:$0xff] %v3249_v3  ;;  %v3251_v60 = vpop.f32.mrb[5].mxu1 }
 0x44b   : > { %3792 = vst [vmem:[#allocation7_spill] sm:$0xff] %v3251_v60 }
 0x44d   : > { %v3253_v16 = vpop.f32.mrb[6].mxu1 }
 0x44e   : > { %3793 = vst [vmem:[#allocation8_spill] sm:$0xff] %v3253_v16  ;;  %v3255_v17 = vpop.f32.mrb[7].mxu1 }
 0x44f   : > { %3794 = vst [vmem:[#allocation9_spill] sm:$0xff] %v3255_v17 }
 0x48f   : > { %v917_v25 = vpop.xlane.xlu0 %916 }
 0x490   : > { %vm918_vm8 = vcmp.eq.f32.partialorder %v915_v19, %v917_v25 }
 0x491   : > { %v932_v20 = vpop.xlane.xlu1 %931  ;;  %v919_v21 = vsel %vm918_vm8, %v914_v13, inf  ;;  %v989_v13 = vcvt.s32.f32 %v987_v12 }
 0x492   : > { %920 = vmin.xlane.f32.xlu0 %v919_v21  ;;  %vm933_vm9 = vcmp.eq.f32.partialorder %v930_v6, %v932_v20  ;;  %v974_v6 = vcvt.s32.f32 %v972_v18 }
 0x493   : > { %v934_v43 = vsel %vm933_vm9, %v929_v40, inf }
 0x494   : > { %935 = vmin.xlane.f32.xlu1 %v934_v43 }
 0x495   : > { %v947_v53 = vpop.xlane.xlu0 %946 }
 0x496   : > { %v962_v39 = vpop.xlane.xlu1 %961  ;;  %vm948_vm11 = vcmp.eq.f32.partialorder %v945_v32, %v947_v53  ;;  %v953_v43 = vcvt.f32.s32 %v947_v53 }
 0x497   : > { %vm963_vm10 = vcmp.eq.f32.partialorder %v960_v26, %v962_v39  ;;  %v949_v0 = vsel %vm948_vm11, %v944_v48, inf  ;;  %v1004_v48 = vcvt.s32.f32 %v1002_v29  ;;  %v968_v33 = vcvt.f32.s32 %v962_v39 }
 0x498   : > { %v964_v63 = vsel %vm963_vm10, %v959_v47, inf  ;;  %950 = vmin.xlane.f32.xlu0 %v949_v0 }
 0x499   : > { %965 = vmin.xlane.f32.xlu1 %v964_v63 }
 0x49a   : > { %v992_v19 = vpop.xlane.xlu1 %991  ;;  %v977_v24 = vpop.xlane.xlu0 %976 }
 0x49b   : > { %vm993_vm12 = vcmp.eq.f32.partialorder %v990_v42, %v992_v19  ;;  %vm978_vm13 = vcmp.eq.f32.partialorder %v975_v50, %v977_v24  ;;  %v923_v42 = vcvt.f32.s32 %v917_v25  ;;  %v938_v50 = vcvt.f32.s32 %v932_v20 }
 0x49c   : > { %v994_v21 = vsel %vm993_vm12, %v989_v13, inf  ;;  %v979_v40 = vsel %vm978_vm13, %v974_v6, inf  ;;  %v3795_v6 = vmov 0.0   ;;  %v998_v29 = vcvt.f32.s32 %v992_v19 }
 0x49d   : > { %995 = vmin.xlane.f32.xlu1 %v994_v21  ;;  %980 = vmin.xlane.f32.xlu0 %v979_v40  ;;  %v924_v52 = vshll.u32 %v923_v42, 16  ;;  %v939_v12 = vshll.u32 %v938_v50, 16  ;;  %v983_v21 = vcvt.f32.s32 %v977_v24 }
 0x49e   : > { %v3258_v26 = vpop.xlane.xlu1 %1021  ;;  %v3260_v32 = vpop.xlane.xlu0 %1006 }
 0x49f   : > { %vm1023_vm14 = vcmp.eq.f32.partialorder %v1020_v55, %v3258_v26  ;;  %vm1008_vm15 = vcmp.eq.f32.partialorder %v1005_v58, %v3260_v32  ;;  %v969_v55 = vshll.u32 %v968_v33, 16  ;;  %v954_v58 = vshll.u32 %v953_v43, 16 }
 0x4a0   : > { %v1024_v63 = vsel %vm1023_vm14, %v1019_v38, inf  ;;  %v1009_v34 = vsel %vm1008_vm15, %v1004_v48, inf  ;;  %v984_v42 = vshll.u32 %v983_v21, 16 }
 0x4a1   : > { %1025 = vmin.xlane.f32.xlu1 %v1024_v63  ;;  %1010 = vmin.xlane.f32.xlu0 %v1009_v34  ;;  %v999_v34 = vshll.u32 %v998_v29, 16 }
 0x51f   : > { %v921_v51 = vpop.xlane.xlu0 %920 }
 0x520   : > { %v922_v35 = vcvt.f32.s32 %v921_v51  ;;  %v1013_v51 = vcvt.f32.s32 %v3260_v32 }
 0x521   : > { %v936_v47 = vpop.xlane.xlu1 %935 }
 0x522   : > { %v925_v18 = vadd.s32 %v924_v52, %v922_v35  ;;  %v937_v0 = vcvt.f32.s32 %v936_v47 }
 0x524   : > { %v940_v13 = vadd.s32 %v939_v12, %v937_v0  ;;  %vm1031_vm1 = vcmp.eq.s32.totalorder %v3060_v4, %v925_v18 }
 0x525   : > { %v2458_v10 = vsel %vm1031_vm1, 1.0, %v3795_v6  ;;  %v951_v20 = vpop.xlane.xlu0 %950 }
 0x526   : > { %v966_v25 = vpop.xlane.xlu1 %965  ;;  %2633 = vmatprep.mubr.msk.f32.mxu1 %vm670_vm2, %v2458_v10  ;;  %vm1032_vm3 = vcmp.eq.s32.totalorder %v3060_v4, %v940_v13  ;;  %vm1055_vm4 = vcmp.gt.f32.partialorder %v2458_v10, 0.0  ;;  %v952_v53 = vcvt.f32.s32 %v951_v20  ;;  %v1014_v13 = vshll.u32 %v1013_v51, 16 }
 0x527   : > { %v967_v39 = vcvt.f32.s32 %v966_v25  ;;  %v2459_v40 = vsel %vm1032_vm3, 1.0, %v3795_v6  ;;  %v3270_v38 = vsel %vm1055_vm4, -1e+30, %v3129_v1  ;;  %v1028_v1 = vcvt.f32.s32 %v3258_v26 }
 0x528   : > { %2634 = vmatmul.mubr.msk.f32.gmra.mrb[8].mxu1 %vm670_vm2, %v2459_v40  ;;  %v1071_v19 = vsel %vm670_vm2, %v3270_v38, -inf  ;;  %vm1056_vm5 = vcmp.gt.f32.partialorder %v2459_v40, 0.0  ;;  %v955_v48 = vadd.s32 %v954_v58, %v952_v53 }
 0x529   : > { %v970_v24 = vadd.s32 %v969_v55, %v967_v39  ;;  %1072 = vmax.xlane.f32.xlu0 %v1071_v19  ;;  %v3276_v63 = vsel %vm1056_vm5, -1e+30, %v3138_v37  ;;  %v1029_v0 = vshll.u32 %v1028_v1, 16 }
 0x52a   : > { %v1074_v50 = vsel %vm670_vm2, %v3276_v63, -inf  ;;  %v996_v52 = vpop.xlane.xlu1 %995  ;;  %v981_v35 = vpop.xlane.xlu0 %980  ;;  %vm1033_vm6 = vcmp.eq.s32.totalorder %v3060_v4, %v955_v48 }
 0x52b   : > { %1075 = vmax.xlane.f32.xlu1 %v1074_v50  ;;  %vm1034_vm7 = vcmp.eq.s32.totalorder %v3060_v4, %v970_v24  ;;  %v997_v33 = vcvt.f32.s32 %v996_v52  ;;  %v982_v43 = vcvt.f32.s32 %v981_v35  ;;  %v2460_v37 = vsel %vm1033_vm6, 1.0, %v3795_v6 }
 0x52c   : > { %v2461_v47 = vsel %vm1034_vm7, 1.0, %v3795_v6  ;;  %2636 = vmatprep.mubr.msk.f32.mxu1 %vm670_vm2, %v2460_v37  ;;  %vm1057_vm9 = vcmp.gt.f32.partialorder %v2460_v37, 0.0 }
 0x52d   : > { %vm1058_vm8 = vcmp.gt.f32.partialorder %v2461_v47, 0.0  ;;  %v1000_v26 = vadd.s32 %v999_v34, %v997_v33  ;;  %v985_v12 = vadd.s32 %v984_v42, %v982_v43  ;;  %2637 = vmatmul.mubr.msk.f32.gmra.mrb[10].mxu1 %vm670_vm2, %v2461_v47  ;;  %v3292_v18 = vsel %vm1057_vm9, -1e+30, %v3149_v46 }
 0x52e   : > { %v3289_v32 = vsel %vm1058_vm8, -1e+30, %v3152_v49  ;;  %v1026_v55 = vpop.xlane.xlu1 %1025  ;;  %v1011_v58 = vpop.xlane.xlu0 %1010  ;;  %v1077_v29 = vsel %vm670_vm2, %v3292_v18, -inf }
 0x52f   : > { %v1080_v10 = vsel %vm670_vm2, %v3289_v32, -inf  ;;  %v1027_v21 = vcvt.f32.s32 %v1026_v55  ;;  %v1012_v25 = vcvt.f32.s32 %v1011_v58  ;;  %1078 = vmax.xlane.f32.xlu0 %v1077_v29  ;;  %vm1035_vm10 = vcmp.eq.s32.totalorder %v3060_v4, %v985_v12 }
 0x530   : > { %1081 = vmax.xlane.f32.xlu1 %v1080_v10  ;;  %vm1036_vm11 = vcmp.eq.s32.totalorder %v3060_v4, %v1000_v26  ;;  %v2462_v46 = vsel %vm1035_vm10, 1.0, %v3795_v6 }
 0x531   : > { %v2463_v49 = vsel %vm1036_vm11, 1.0, %v3795_v6  ;;  %v1030_v20 = vadd.s32 %v1029_v0, %v1027_v21  ;;  %v1015_v39 = vadd.s32 %v1014_v13, %v1012_v25  ;;  %2639 = vmatprep.mubr.msk.f32.mxu1 %vm670_vm2, %v2462_v46  ;;  %vm1059_vm13 = vcmp.gt.f32.partialorder %v2462_v46, 0.0 }
 0x532   : > { %vm1060_vm12 = vcmp.gt.f32.partialorder %v2463_v49, 0.0  ;;  %2640 = vmatmul.mubr.msk.f32.gmra.mrb[12].mxu1 %vm670_vm2, %v2463_v49  ;;  %v3308_v40 = vsel %vm1059_vm13, -1e+30, %v3168_v56 }
 0x533   : > { %v3305_v53 = vsel %vm1060_vm12, -1e+30, %v3165_v44  ;;  %v1083_v24 = vsel %vm670_vm2, %v3308_v40, -inf  ;;  %vm1037_vm14 = vcmp.eq.s32.totalorder %v3060_v4, %v1015_v39  ;;  %vm1038_vm15 = vcmp.eq.s32.totalorder %v3060_v4, %v1030_v20 }
 0x534   : > { %v1086_v19 = vsel %vm670_vm2, %v3305_v53, -inf  ;;  %1084 = vmax.xlane.f32.xlu0 %v1083_v24  ;;  %v2464_v48 = vsel %vm1037_vm14, 1.0, %v3795_v6  ;;  %v2465_v44 = vsel %vm1038_vm15, 1.0, %v3795_v6 }
 0x535   : > { %1087 = vmax.xlane.f32.xlu1 %v1086_v19  ;;  %2642 = vmatprep.mubr.msk.f32.mxu1 %vm670_vm2, %v2464_v48  ;;  %vm1062_vm1 = vcmp.gt.f32.partialorder %v2465_v44, 0.0  ;;  %vm1061_vm3 = vcmp.gt.f32.partialorder %v2464_v48, 0.0 }
 0x536   : > { %2643 = vmatmul.mubr.msk.f32.gmra.mrb[14].mxu1 %vm670_vm2, %v2465_v44  ;;  %v3321_v56 = vsel %vm1062_vm1, -1e+30, %v3180_v54  ;;  %v3324_v34 = vsel %vm1061_vm3, -1e+30, %v3183_v57 }
 0x537   : > { %v1092_v42 = vsel %vm670_vm2, %v3321_v56, -inf  ;;  %v1089_v50 = vsel %vm670_vm2, %v3324_v34, -inf }
 0x538   : > { %1090 = vmax.xlane.f32.xlu0 %v1089_v50 }
 0x539   : > { %1093 = vmax.xlane.f32.xlu1 %v1092_v42 }
 0x5b6   : > { %v3330_v1 = vpop.xlane.xlu0 %1072 }
 0x5b7   : > { %vm1095_vm4 = vcmp.ge.f32.partialorder %v3270_v38, %v3330_v1 }
 0x5b8   : > { %v1103_v51 = vsel %vm1095_vm4, %v3060_v4, 64  ;;  %v3335_v54 = vpop.xlane.xlu1 %1075 }
 0x5b9   : > { %vm1096_vm5 = vcmp.ge.f32.partialorder %v3276_v63, %v3335_v54  ;;  %v1111_v57 = vsel %vm670_vm2, %v1103_v51, 2147483647 }
 0x5ba   : > { %v1104_v52 = vsel %vm1096_vm5, %v3060_v4, 64  ;;  %v1113_v35 = vshra.s32 %v1111_v57, 16 }
 0x5bb   : > { %v3342_v33 = vsel %vm670_vm2, %v1104_v52, 2147483647 }
 0x5bc   : > { %v1115_v43 = vcvt.s32.f32 %v1113_v35  ;;  %v1128_v37 = vshra.s32 %v3342_v33, 16  ;;  %v3347_v26 = vpop.xlane.xlu0 %1078  ;;  %v1127_v9 = vand.u32 65535, %v3342_v33 }
 0x5bd   : > { %v3345_v47 = vpop.xlane.xlu1 %1081  ;;  %vm1097_vm7 = vcmp.ge.f32.partialorder %v3292_v18, %v3347_v26 }
 0x5be   : > { %vm1098_vm6 = vcmp.ge.f32.partialorder %v3289_v32, %v3345_v47  ;;  %1116 = vmin.xlane.f32.xlu0 %v1115_v43  ;;  %v1105_v0 = vsel %vm1097_vm7, %v3060_v4, 64  ;;  %v1130_v13 = vcvt.s32.f32 %v1128_v37 }
 0x5bf   : > { %v1106_v12 = vsel %vm1098_vm6, %v3060_v4, 64  ;;  %v1141_v58 = vsel %vm670_vm2, %v1105_v0, 2147483647 }
 0x5c0   : > { %v1156_v55 = vsel %vm670_vm2, %v1106_v12, 2147483647  ;;  %v1143_v29 = vshra.s32 %v1141_v58, 16  ;;  %1131 = vmin.xlane.f32.xlu1 %v1130_v13  ;;  %v1142_v62 = vand.u32 65535, %v1141_v58 }
 0x5c1   : > { %v1158_v10 = vshra.s32 %v1156_v55, 16  ;;  %v3359_v25 = vpop.xlane.xlu0 %1084 }
 0x5c2   : > { %v3357_v21 = vpop.xlane.xlu1 %1087  ;;  %vm1099_vm9 = vcmp.ge.f32.partialorder %v3308_v40, %v3359_v25  ;;  %v1145_v39 = vcvt.s32.f32 %v1143_v29 }
 0x5c3   : > { %vm1100_vm8 = vcmp.ge.f32.partialorder %v3305_v53, %v3357_v21  ;;  %v1107_v49 = vsel %vm1099_vm9, %v3060_v4, 64  ;;  %v1160_v20 = vcvt.s32.f32 %v1158_v10 }
 0x5c4   : > { %v1108_v46 = vsel %vm1100_vm8, %v3060_v4, 64  ;;  %v1171_v24 = vsel %vm670_vm2, %v1107_v49, 2147483647  ;;  %1146 = vmin.xlane.f32.xlu0 %v1145_v39 }
 0x5c5   : > { %v1186_v19 = vsel %vm670_vm2, %v1108_v46, 2147483647  ;;  %v3371_v44 = vpop.xlane.xlu0 %1090  ;;  %v1173_v50 = vshra.s32 %v1171_v24, 16  ;;  %1161 = vmin.xlane.f32.xlu1 %v1160_v20 }
 0x5c6   : > { %v3369_v48 = vpop.xlane.xlu1 %1093  ;;  %v1188_v42 = vshra.s32 %v1186_v19, 16  ;;  %vm1101_vm11 = vcmp.ge.f32.partialorder %v3324_v34, %v3371_v44 }
 0x5c7   : > { %3796 = vst [vmem:[#allocation10_spill] sm:$0xff] %v3369_v48  ;;  %vm1102_vm10 = vcmp.ge.f32.partialorder %v3321_v56, %v3369_v48  ;;  %v1109_v52 = vsel %vm1101_vm11, %v3060_v4, 64  ;;  %v1175_v37 = vcvt.s32.f32 %v1173_v50 }
 0x5c8   : > { %v1110_v51 = vsel %vm1102_vm10, %v3060_v4, 64  ;;  %v1190_v35 = vcvt.s32.f32 %v1188_v42  ;;  %v1201_v0 = vsel %vm670_vm2, %v1109_v52, 2147483647 }
 0x5c9   : > { %v1216_v12 = vsel %vm670_vm2, %v1110_v51, 2147483647  ;;  %v1203_v29 = vshra.s32 %v1201_v0, 16  ;;  %1176 = vmin.xlane.f32.xlu0 %v1175_v37 }
 0x5ca   : > { %v1218_v10 = vshra.s32 %v1216_v12, 16  ;;  %1191 = vmin.xlane.f32.xlu1 %v1190_v35 }
 0x5cb   : > { %v1205_v49 = vcvt.s32.f32 %v1203_v29 }
 0x5cc   : > { %v1220_v46 = vcvt.s32.f32 %v1218_v10  ;;  %v1112_v10 = vand.u32 65535, %v1111_v57  ;;  %v1172_v57 = vand.u32 65535, %v1171_v24 }
 0x5cd   : > { %1206 = vmin.xlane.f32.xlu0 %v1205_v49 }
 0x5ce   : > { %1221 = vmin.xlane.f32.xlu1 %v1220_v46  ;;  %v1114_v8 = vcvt.s32.f32 %v1112_v10 }
 0x5fb   : > { %v3381_v16 = vpop.f32.mrb[8].mxu1 }
 0x5fc   : > { %3797 = vst [vmem:[#allocation11_spill] sm:$0xff] %v3381_v16  ;;  %v3383_v17 = vpop.f32.mrb[9].mxu1 }
 0x5fd   : > { %3798 = vst [vmem:[#allocation12_spill] sm:$0xff] %v3383_v17 }
 0x600   : > { %v3385_v3 = vpop.f32.mrb[10].mxu1 }
 0x601   : > { %3799 = vst [vmem:[#allocation13_spill] sm:$0xff] %v3385_v3  ;;  %v3387_v42 = vpop.f32.mrb[11].mxu1  ;;  %v1129_v3 = vcvt.s32.f32 %v1127_v9 }
 0x602   : > { %3800 = vst [vmem:[#allocation14_spill] sm:$0xff] %v3387_v42  ;;  %v1157_v42 = vand.u32 65535, %v1156_v55  ;;  %v1202_v55 = vand.u32 65535, %v1201_v0 }
 0x604   : > { %v1159_v48 = vcvt.s32.f32 %v1157_v42 }
 0x605   : > { %v3389_v50 = vpop.f32.mrb[12].mxu1 }
 0x606   : > { %3801 = vst [vmem:[#allocation15_spill] sm:$0xff] %v3389_v50  ;;  %v3391_v51 = vpop.f32.mrb[13].mxu1 }
 0x607   : > { %3802 = vst [vmem:[#allocation16_spill] sm:$0xff] %v3391_v51  ;;  %v1187_v51 = vand.u32 65535, %v1186_v19 }
 0x609   : > { %v3393_v52 = vpop.f32.mrb[14].mxu1 }
 0x60a   : > { %3803 = vst [vmem:[#allocation17_spill] sm:$0xff] %v3393_v52  ;;  %v3395_v60 = vpop.f32.mrb[15].mxu1 }
 0x60b   : > { %3804 = vst [vmem:[#allocation18_spill] sm:$0xff] %v3395_v60  ;;  %v1144_v60 = vcvt.s32.f32 %v1142_v62 }
 0x64b   : > { %v1117_v29 = vpop.xlane.xlu0 %1116 }
 0x64c   : > { %vm1118_vm12 = vcmp.eq.f32.partialorder %v1115_v43, %v1117_v29  ;;  %v1189_v43 = vcvt.s32.f32 %v1187_v51 }
 0x64d   : > { %v1119_v16 = vsel %vm1118_vm12, %v1114_v8, inf  ;;  %v1132_v59 = vpop.xlane.xlu1 %1131  ;;  %v1217_v8 = vand.u32 65535, %v1216_v12 }
 0x64e   : > { %1120 = vmin.xlane.f32.xlu0 %v1119_v16  ;;  %vm1133_vm13 = vcmp.eq.f32.partialorder %v1130_v13, %v1132_v59  ;;  %v1174_v13 = vcvt.s32.f32 %v1172_v57  ;;  %v1138_v12 = vcvt.f32.s32 %v1132_v59 }
 0x64f   : > { %v1134_v50 = vsel %vm1133_vm13, %v1129_v3, inf }
 0x650   : > { %1135 = vmin.xlane.f32.xlu1 %v1134_v50  ;;  %v1139_v51 = vshll.u32 %v1138_v12, 16 }
 0x651   : > { %v1147_v52 = vpop.xlane.xlu0 %1146 }
 0x652   : > { %v1162_v17 = vpop.xlane.xlu1 %1161  ;;  %vm1148_vm15 = vcmp.eq.f32.partialorder %v1145_v39, %v1147_v52  ;;  %v1219_v39 = vcvt.s32.f32 %v1217_v8 }
 0x653   : > { %vm1163_vm14 = vcmp.eq.f32.partialorder %v1160_v20, %v1162_v17  ;;  %v1149_v33 = vsel %vm1148_vm15, %v1144_v60, inf  ;;  %v1204_v60 = vcvt.s32.f32 %v1202_v55  ;;  %v1168_v57 = vcvt.f32.s32 %v1162_v17 }
 0x654   : > { %v1164_v10 = vsel %vm1163_vm14, %v1159_v48, inf  ;;  %1150 = vmin.xlane.f32.xlu0 %v1149_v33  ;;  %v1123_v48 = vcvt.f32.s32 %v1117_v29  ;;  %v1153_v33 = vcvt.f32.s32 %v1147_v52 }
 0x655   : > { %1165 = vmin.xlane.f32.xlu1 %v1164_v10  ;;  %v1169_v59 = vshll.u32 %v1168_v57, 16 }
 0x656   : > { %v1177_v9 = vpop.xlane.xlu0 %1176  ;;  %v1154_v52 = vshll.u32 %v1153_v33, 16 }
 0x657   : > { %v1192_v16 = vpop.xlane.xlu1 %1191  ;;  %vm1178_vm3 = vcmp.eq.f32.partialorder %v1175_v37, %v1177_v9  ;;  %v1124_v37 = vshll.u32 %v1123_v48, 16 }
 0x658   : > { %vm1193_vm1 = vcmp.eq.f32.partialorder %v1190_v35, %v1192_v16  ;;  %v1179_v58 = vsel %vm1178_vm3, %v1174_v13, inf  ;;  %v1198_v8 = vcvt.f32.s32 %v1192_v16 }
 0x659   : > { %v1194_v3 = vsel %vm1193_vm1, %v1189_v43, inf  ;;  %1180 = vmin.xlane.f32.xlu0 %v1179_v58  ;;  %v1183_v43 = vcvt.f32.s32 %v1177_v9 }
 0x65a   : > { %1195 = vmin.xlane.f32.xlu1 %v1194_v3  ;;  %v3400_v20 = vpop.xlane.xlu0 %1206 }
 0x65b   : > { %v3398_v62 = vpop.xlane.xlu1 %1221  ;;  %vm1208_vm5 = vcmp.eq.f32.partialorder %v1205_v49, %v3400_v20  ;;  %v1213_v48 = vcvt.f32.s32 %v3400_v20 }
 0x65c   : > { %vm1223_vm4 = vcmp.eq.f32.partialorder %v1220_v46, %v3398_v62  ;;  %v1209_v24 = vsel %vm1208_vm5, %v1204_v60, inf }
 0x65d   : > { %v1224_v19 = vsel %vm1223_vm4, %v1219_v39, inf  ;;  %1210 = vmin.xlane.f32.xlu0 %v1209_v24  ;;  %v1228_v24 = vcvt.f32.s32 %v3398_v62  ;;  %v1214_v57 = vshll.u32 %v1213_v48, 16 }
 0x65e   : > { %1225 = vmin.xlane.f32.xlu1 %v1224_v19  ;;  %v1184_v19 = vshll.u32 %v1183_v43, 16 }
 0x65f   : > { %v1229_v20 = vshll.u32 %v1228_v24, 16 }
 0x6db   : > { %v1121_v35 = vpop.xlane.xlu0 %1120 }
 0x6dc   : > { %v1122_v0 = vcvt.f32.s32 %v1121_v35 }
 0x6dd   : > { %v1136_v50 = vpop.xlane.xlu1 %1135 }
 0x6de   : > { %v1125_v42 = vadd.s32 %v1124_v37, %v1122_v0  ;;  %v1137_v10 = vcvt.f32.s32 %v1136_v50 }
 0x6e0   : > { %vm1231_vm6 = vcmp.eq.s32.totalorder %v3060_v4, %v1125_v42  ;;  %v1140_v49 = vadd.s32 %v1139_v51, %v1137_v10 }
 0x6e1   : > { %v2466_v46 = vsel %vm1231_vm6, 1.0, %v3795_v6  ;;  %v1151_v55 = vpop.xlane.xlu0 %1150 }
 0x6e2   : > { %2645 = vmatprep.mubr.msk.f32.mxu1 %vm670_vm2, %v2466_v46  ;;  %vm1255_vm7 = vcmp.gt.f32.partialorder %v2466_v46, 0.0  ;;  %v1166_v13 = vpop.xlane.xlu1 %1165  ;;  %vm1232_vm8 = vcmp.eq.s32.totalorder %v3060_v4, %v1140_v49  ;;  %v1152_v58 = vcvt.f32.s32 %v1151_v55 }
 0x6e3   : > { %v3408_v29 = vsel %vm1255_vm7, -1e+30, %v3270_v38  ;;  %v1167_v3 = vcvt.f32.s32 %v1166_v13  ;;  %v2467_v39 = vsel %vm1232_vm8, 1.0, %v3795_v6  ;;  %v1199_v38 = vshll.u32 %v1198_v8, 16 }
 0x6e4   : > { %v1271_v17 = vsel %vm670_vm2, %v3408_v29, -inf  ;;  %2646 = vmatmul.mubr.msk.f32.gmra.mrb[16].mxu1 %vm670_vm2, %v2467_v39  ;;  %vm1256_vm9 = vcmp.gt.f32.partialorder %v2467_v39, 0.0  ;;  %v1155_v60 = vadd.s32 %v1154_v52, %v1152_v58 }
 0x6e5   : > { %1272 = vmax.xlane.f32.xlu0 %v1271_v17  ;;  %v1170_v16 = vadd.s32 %v1169_v59, %v1167_v3  ;;  %v3416_v9 = vsel %vm1256_vm9, -1e+30, %v3276_v63 }
 0x6e6   : > { %v1181_v37 = vpop.xlane.xlu0 %1180  ;;  %v1274_v12 = vsel %vm670_vm2, %v3416_v9, -inf  ;;  %vm1233_vm10 = vcmp.eq.s32.totalorder %v3060_v4, %v1155_v60 }
 0x6e7   : > { %v1196_v35 = vpop.xlane.xlu1 %1195  ;;  %v1182_v42 = vcvt.f32.s32 %v1181_v37  ;;  %1275 = vmax.xlane.f32.xlu1 %v1274_v12  ;;  %vm1234_vm11 = vcmp.eq.s32.totalorder %v3060_v4, %v1170_v16  ;;  %v2468_v63 = vsel %vm1233_vm10, 1.0, %v3795_v6 }
 0x6e8   : > { %v1197_v0 = vcvt.f32.s32 %v1196_v35  ;;  %v2469_v50 = vsel %vm1234_vm11, 1.0, %v3795_v6  ;;  %2648 = vmatprep.mubr.msk.f32.mxu1 %vm670_vm2, %v2468_v63  ;;  %vm1257_vm13 = vcmp.gt.f32.partialorder %v2468_v63, 0.0 }
 0x6e9   : > { %v1185_v62 = vadd.s32 %v1184_v19, %v1182_v42  ;;  %vm1258_vm12 = vcmp.gt.f32.partialorder %v2469_v50, 0.0  ;;  %2649 = vmatmul.mubr.msk.f32.gmra.mrb[18].mxu1 %vm670_vm2, %v2469_v50  ;;  %v1265_v49 = vsel %vm1257_vm13, -1e+30, %v3292_v18 }
 0x6ea   : > { %v1200_v51 = vadd.s32 %v1199_v38, %v1197_v0  ;;  %v1211_v33 = vpop.xlane.xlu0 %1210  ;;  %v1266_v46 = vsel %vm1258_vm12, -1e+30, %v3289_v32  ;;  %v1277_v13 = vsel %vm670_vm2, %v1265_v49, -inf }
 0x6eb   : > { %v1226_v10 = vpop.xlane.xlu1 %1225  ;;  %v1212_v59 = vcvt.f32.s32 %v1211_v33  ;;  %v1280_v43 = vsel %vm670_vm2, %v1266_v46, -inf  ;;  %1278 = vmax.xlane.f32.xlu0 %v1277_v13  ;;  %vm1235_vm14 = vcmp.eq.s32.totalorder %v3060_v4, %v1185_v62 }
 0x6ec   : > { %v1227_v8 = vcvt.f32.s32 %v1226_v10  ;;  %1281 = vmax.xlane.f32.xlu1 %v1280_v43  ;;  %vm1236_vm15 = vcmp.eq.s32.totalorder %v3060_v4, %v1200_v51  ;;  %v2470_v52 = vsel %vm1235_vm14, 1.0, %v3795_v6 }
 0x6ed   : > { %v1215_v17 = vadd.s32 %v1214_v57, %v1212_v59  ;;  %v2471_v32 = vsel %vm1236_vm15, 1.0, %v3795_v6  ;;  %2651 = vmatprep.mubr.msk.f32.mxu1 %vm670_vm2, %v2470_v52  ;;  %vm1259_vm3 = vcmp.gt.f32.partialorder %v2470_v52, 0.0 }
 0x6ee   : > { %v1230_v55 = vadd.s32 %v1229_v20, %v1227_v8  ;;  %vm1260_vm1 = vcmp.gt.f32.partialorder %v2471_v32, 0.0  ;;  %2652 = vmatmul.mubr.msk.f32.gmra.mrb[20].mxu1 %vm670_vm2, %v2471_v32  ;;  %v1267_v3 = vsel %vm1259_vm3, -1e+30, %v3308_v40 }
 0x6ef   : > { %v1268_v18 = vsel %vm1260_vm1, -1e+30, %v3305_v53  ;;  %vm1237_vm4 = vcmp.eq.s32.totalorder %v3060_v4, %v1215_v17  ;;  %v1283_v39 = vsel %vm670_vm2, %v1267_v3, -inf }
 0x6f0   : > { %vm1238_vm5 = vcmp.eq.s32.totalorder %v3060_v4, %v1230_v55  ;;  %v1286_v58 = vsel %vm670_vm2, %v1268_v18, -inf  ;;  %v2472_v38 = vsel %vm1237_vm4, 1.0, %v3795_v6  ;;  %1284 = vmax.xlane.f32.xlu0 %v1283_v39 }
 0x6f1   : > { %v2473_v16 = vsel %vm1238_vm5, 1.0, %v3795_v6  ;;  %1287 = vmax.xlane.f32.xlu1 %v1286_v58  ;;  %vm1261_vm7 = vcmp.gt.f32.partialorder %v2472_v38, 0.0  ;;  %2654 = vmatprep.mubr.msk.f32.mxu1 %vm670_vm2, %v2472_v38 }
 0x6f2   : > { %vm1262_vm6 = vcmp.gt.f32.partialorder %v2473_v16, 0.0  ;;  %v1269_v40 = vsel %vm1261_vm7, -1e+30, %v3324_v34  ;;  %2655 = vmatmul.mubr.msk.f32.gmra.mrb[22].mxu1 %vm670_vm2, %v2473_v16 }
 0x6f3   : > { %v1270_v53 = vsel %vm1262_vm6, -1e+30, %v3321_v56  ;;  %v1289_v19 = vsel %vm670_vm2, %v1269_v40, -inf }
 0x6f4   : > { %v1292_v60 = vsel %vm670_vm2, %v1270_v53, -inf  ;;  %1290 = vmax.xlane.f32.xlu0 %v1289_v19 }
 0x6f5   : > { %1293 = vmax.xlane.f32.xlu1 %v1292_v60 }
 0x772   : > { %v3452_v24 = vpop.xlane.xlu0 %1272 }
 0x773   : > { %vm1295_vm8 = vcmp.ge.f32.partialorder %v3408_v29, %v3452_v24 }
 0x774   : > { %v1303_v48 = vsel %vm1295_vm8, %v3060_v4, 64  ;;  %v3460_v56 = vpop.xlane.xlu1 %1275 }
 0x775   : > { %v3458_v35 = vsel %vm670_vm2, %v1303_v48, 2147483647  ;;  %vm1296_vm9 = vcmp.ge.f32.partialorder %v3416_v9, %v3460_v56 }
 0x776   : > { %v1313_v34 = vshra.s32 %v3458_v35, 16  ;;  %v1304_v37 = vsel %vm1296_vm9, %v3060_v4, 64 }
 0x777   : > { %v3467_v0 = vsel %vm670_vm2, %v1304_v37, 2147483647 }
 0x778   : > { %v1315_v12 = vcvt.s32.f32 %v1313_v34  ;;  %v1328_v29 = vshra.s32 %v3467_v0, 16  ;;  %v3472_v63 = vpop.xlane.xlu0 %1278 }
 0x779   : > { %v3470_v42 = vpop.xlane.xlu1 %1281  ;;  %vm1297_vm11 = vcmp.ge.f32.partialorder %v1265_v49, %v3472_v63 }
 0x77a   : > { %1316 = vmin.xlane.f32.xlu0 %v1315_v12  ;;  %vm1298_vm10 = vcmp.ge.f32.partialorder %v1266_v46, %v3470_v42  ;;  %v1305_v9 = vsel %vm1297_vm11, %v3060_v4, 64  ;;  %v1330_v20 = vcvt.s32.f32 %v1328_v29  ;;  %vm1784_vm11 = vcmp.gt.f32.partialorder %v3190_v11, -1e+29 }
 0x77b   : > { %v1306_v50 = vsel %vm1298_vm10, %v3060_v4, 64  ;;  %v1341_v62 = vsel %vm670_vm2, %v1305_v9, 2147483647  ;;  %vm1777_vm10 = vcmp.gt.f32.partialorder %v3066_v5, -1e+29 }
 0x77c   : > { %v1356_v51 = vsel %vm670_vm2, %v1306_v50, 2147483647  ;;  %v1343_v10 = vshra.s32 %v1341_v62, 16  ;;  %1331 = vmin.xlane.f32.xlu1 %v1330_v20 }
 0x77d   : > { %v1358_v57 = vshra.s32 %v1356_v51, 16  ;;  %v3482_v8 = vpop.xlane.xlu0 %1284 }
 0x77e   : > { %v3480_v33 = vpop.xlane.xlu1 %1287  ;;  %vm1299_vm13 = vcmp.ge.f32.partialorder %v1267_v3, %v3482_v8  ;;  %v1345_v55 = vcvt.s32.f32 %v1343_v10 }
 0x77f   : > { %vm1300_vm12 = vcmp.ge.f32.partialorder %v1268_v18, %v3480_v33  ;;  %v1307_v49 = vsel %vm1299_vm13, %v3060_v4, 64  ;;  %v1360_v13 = vcvt.s32.f32 %v1358_v57  ;;  %vm1778_vm13 = vcmp.gt.f32.partialorder %v3078_v14, -1e+29 }
 0x780   : > { %v1308_v46 = vsel %vm1300_vm12, %v3060_v4, 64  ;;  %v1371_v43 = vsel %vm670_vm2, %v1307_v49, 2147483647  ;;  %1346 = vmin.xlane.f32.xlu0 %v1345_v55  ;;  %v1312_v49 = vand.u32 65535, %v3458_v35  ;;  %vm1776_vm12 = vcmp.gt.f32.partialorder %v3062_v22, -1e+29 }
 0x781   : > { %v1386_v59 = vsel %vm670_vm2, %v1308_v46, 2147483647  ;;  %v3492_v52 = vpop.xlane.xlu0 %1290  ;;  %v1373_v58 = vshra.s32 %v1371_v43, 16  ;;  %1361 = vmin.xlane.f32.xlu1 %v1360_v13 }
 0x782   : > { %v3490_v17 = vpop.xlane.xlu1 %1293  ;;  %v1388_v32 = vshra.s32 %v1386_v59, 16  ;;  %vm1301_vm15 = vcmp.ge.f32.partialorder %v1269_v40, %v3492_v52 }
 0x783   : > { %vm1302_vm14 = vcmp.ge.f32.partialorder %v1270_v53, %v3490_v17  ;;  %v1309_v3 = vsel %vm1301_vm15, %v3060_v4, 64  ;;  %v1375_v60 = vcvt.s32.f32 %v1373_v58  ;;  %v1314_v58 = vcvt.s32.f32 %v1312_v49 }
 0x784   : > { %v1310_v18 = vsel %vm1302_vm14, %v3060_v4, 64  ;;  %v1401_v38 = vsel %vm670_vm2, %v1309_v3, 2147483647  ;;  %v1390_v16 = vcvt.s32.f32 %v1388_v32  ;;  %v1327_v3 = vand.u32 65535, %v3467_v0 }
 0x785   : > { %v1416_v39 = vsel %vm670_vm2, %v1310_v18, 2147483647  ;;  %v1403_v48 = vshra.s32 %v1401_v38, 16  ;;  %1376 = vmin.xlane.f32.xlu0 %v1375_v60  ;;  %vm1785_vm14 = vcmp.gt.f32.partialorder %v3194_v61, -1e+29 }
 0x786   : > { %v1418_v19 = vshra.s32 %v1416_v39, 16  ;;  %1391 = vmin.xlane.f32.xlu1 %v1390_v16  ;;  %vm1786_vm15 = vcmp.gt.f32.partialorder %v3204_v7, -1e+29 }
 0x787   : > { %v1405_v37 = vcvt.s32.f32 %v1403_v48  ;;  %v1329_v48 = vcvt.s32.f32 %v1327_v3  ;;  %v1417_v3 = vand.u32 65535, %v1416_v39 }
 0x788   : > { %v1420_v34 = vcvt.s32.f32 %v1418_v19 }
 0x789   : > { %1406 = vmin.xlane.f32.xlu0 %v1405_v37 }
 0x78a   : > { %1421 = vmin.xlane.f32.xlu1 %v1420_v34 }
 0x7b7   : > { %v3500_v53 = vpop.f32.mrb[16].mxu1 }
 0x7b8   : > { %v3502_v40 = vpop.f32.mrb[17].mxu1 }
 0x7bc   : > { %v3504_v29 = vpop.f32.mrb[18].mxu1 }
 0x7bd   : > { %3805 = vst [vmem:[#allocation19_spill] sm:$0xff] %v3504_v29  ;;  %v3506_v50 = vpop.f32.mrb[19].mxu1 }
 0x7c1   : > { %v3508_v9 = vpop.f32.mrb[20].mxu1 }
 0x7c2   : > { %3806 = vst [vmem:[#allocation20_spill] sm:$0xff] %v3508_v9  ;;  %v3510_v57 = vpop.f32.mrb[21].mxu1  ;;  %v1357_v9 = vand.u32 65535, %v1356_v51 }
 0x7c3   : > { %3807 = vst [vmem:[#allocation21_spill] sm:$0xff] %v3510_v57 }
 0x7c4   : > { %v1359_v49 = vcvt.s32.f32 %v1357_v9 }
 0x7c5   : > { %v3512_v10 = vpop.f32.mrb[22].mxu1 }
 0x7c6   : > { %3808 = vst [vmem:[#allocation22_spill] sm:$0xff] %v3512_v10  ;;  %v3514_v46 = vpop.f32.mrb[23].mxu1  ;;  %v1342_v10 = vand.u32 65535, %v1341_v62 }
 0x7c7   : > { %3809 = vst [vmem:[#allocation23_spill] sm:$0xff] %v3514_v46 }
 0x7c8   : > { %v1344_v29 = vcvt.s32.f32 %v1342_v10 }
 0x807   : > { %v3517_v32 = vpop.xlane.xlu0 %1316 }
 0x808   : > { %vm1318_vm1 = vcmp.eq.f32.partialorder %v1315_v12, %v3517_v32  ;;  %v1387_v12 = vand.u32 65535, %v1386_v59 }
 0x809   : > { %v1319_v18 = vsel %vm1318_vm1, %v1314_v58, inf  ;;  %v3521_v19 = vpop.xlane.xlu1 %1331  ;;  %v1372_v58 = vand.u32 65535, %v1371_v43  ;;  %vm1779_vm1 = vcmp.gt.f32.partialorder %v3072_v23, -1e+29 }
 0x80a   : > { %1320 = vmin.xlane.f32.xlu0 %v1319_v18  ;;  %vm1333_vm3 = vcmp.eq.f32.partialorder %v1330_v20, %v3521_v19  ;;  %v1389_v20 = vcvt.s32.f32 %v1387_v12  ;;  %v2745_v12 = vld [vmem:[%s3779_s5] sm:$0xff]  }
 0x80b   : > { %v1334_v57 = vsel %vm1333_vm3, %v1329_v48, inf  ;;  %v1402_v48 = vand.u32 65535, %v1401_v38  ;;  %vm1792_vm3 = vcmp.gt.f32.partialorder %v3330_v1, -1e+29  ;;  %2669 = vmatprep.subr.bf16.mxu0 %v2745_v12 }
 0x80c   : > { %1335 = vmin.xlane.f32.xlu1 %v1334_v57  ;;  %v1374_v57 = vcvt.s32.f32 %v1372_v58  ;;  %2670 = vmatpush3.bf16.msra.mxu0 %v2745_v12 }
 0x80d   : > { %v3526_v35 = vpop.xlane.xlu0 %1346  ;;  %v1404_v9 = vcvt.s32.f32 %v1402_v48 }
 0x80e   : > { %v3524_v46 = vpop.xlane.xlu1 %1361  ;;  %vm1348_vm5 = vcmp.eq.f32.partialorder %v1345_v55, %v3526_v35 }
 0x80f   : > { %vm1363_vm4 = vcmp.eq.f32.partialorder %v1360_v13, %v3524_v46  ;;  %v1349_v18 = vsel %vm1348_vm5, %v1344_v29, inf  ;;  %v1419_v29 = vcvt.s32.f32 %v1417_v3  ;;  %vm1794_vm5 = vcmp.gt.f32.partialorder %v3347_v26, -1e+29 }
 0x810   : > { %v1364_v0 = vsel %vm1363_vm4, %v1359_v49, inf  ;;  %1350 = vmin.xlane.f32.xlu0 %v1349_v18  ;;  %vm1787_vm4 = vcmp.gt.f32.partialorder %v3207_v2, -1e+29  ;;  %v1338_v18 = vcvt.f32.s32 %v3521_v19  ;;  %v1368_v48 = vcvt.f32.s32 %v3524_v46 }
 0x811   : > { %1365 = vmin.xlane.f32.xlu1 %v1364_v0 }
 0x812   : > { %v3532_v62 = vpop.xlane.xlu0 %1376  ;;  %v1339_v3 = vshll.u32 %v1338_v18, 16  ;;  %v3816_v18 = vld [vmem:[#allocation5_spill] sm:$0xff] }
 0x813   : > { %v3530_v51 = vpop.xlane.xlu1 %1391  ;;  %vm1378_vm7 = vcmp.eq.f32.partialorder %v1375_v60, %v3532_v62  ;;  %v1383_v19 = vcvt.f32.s32 %v3532_v62 }
 0x814   : > { %vm1393_vm6 = vcmp.eq.f32.partialorder %v1390_v16, %v3530_v51  ;;  %v1379_v43 = vsel %vm1378_vm7, %v1374_v57, inf  ;;  %v3810_v16 = vmov 0   ;;  %vm1800_vm7 = vcmp.gt.f32.partialorder %v3452_v24, -1e+29 }
 0x815   : > { %v1394_v59 = vsel %vm1393_vm6, %v1389_v20, inf  ;;  %1380 = vmin.xlane.f32.xlu0 %v1379_v43  ;;  %v1809_v60 = vsel %vm1777_vm10, 1, %v3810_v16  ;;  %v1816_v10 = vsel %vm1784_vm11, 1, %v3810_v16  ;;  %v1817_v5 = vsel %vm1785_vm14, 1, %v3810_v16 }
 0x816   : > { %1395 = vmin.xlane.f32.xlu1 %v1394_v59  ;;  %v3538_v55 = vpop.xlane.xlu0 %1406  ;;  %v1818_v22 = vsel %vm1786_vm15, 1, %v3810_v16  ;;  %v1811_v14 = vsel %vm1779_vm1, 1, %v3810_v16  ;;  %v1824_v11 = vsel %vm1792_vm3, 1, %v3810_v16  ;;  %v1819_v61 = vsel %vm1787_vm4, 1, %v3810_v16 }
 0x817   : > { %v3536_v13 = vpop.xlane.xlu1 %1421  ;;  %vm1408_vm9 = vcmp.eq.f32.partialorder %v1405_v37, %v3538_v55  ;;  %v1810_v37 = vsel %vm1778_vm13, 1, %v3810_v16  ;;  %vm1793_vm6 = vcmp.gt.f32.partialorder %v3335_v54, -1e+29  ;;  %v1826_v23 = vsel %vm1794_vm5, 1, %v3810_v16 }
 0x818   : > { %vm1423_vm8 = vcmp.eq.f32.partialorder %v1420_v34, %v3536_v13  ;;  %v1409_v38 = vsel %vm1408_vm9, %v1404_v9, inf  ;;  %v1808_v34 = vsel %vm1776_vm12, 1, %v3810_v16  ;;  %v1825_v7 = vsel %vm1793_vm6, 1, %v3810_v16 }
 0x819   : > { %v1424_v39 = vsel %vm1423_vm8, %v1419_v29, inf  ;;  %1410 = vmin.xlane.f32.xlu0 %v1409_v38  ;;  %vm1795_vm8 = vcmp.gt.f32.partialorder %v3345_v47, -1e+29  ;;  %v1832_v2 = vsel %vm1800_vm7, 1, %v3810_v16  ;;  %vm1802_vm9 = vcmp.gt.f32.partialorder %v3472_v63, -1e+29 }
 0x81a   : > { %1425 = vmin.xlane.f32.xlu1 %v1424_v39  ;;  %v1827_v1 = vsel %vm1795_vm8, 1, %v3810_v16  ;;  %vm1801_vm10 = vcmp.gt.f32.partialorder %v3460_v56, -1e+29  ;;  %v1834_v54 = vsel %vm1802_vm9, 1, %v3810_v16  ;;  %vm1780_vm11 = vcmp.gt.f32.partialorder %v3088_v30, -1e+29 }
 0x81b   : > { %v1833_v26 = vsel %vm1801_vm10, 1, %v3810_v16  ;;  %vm1803_vm12 = vcmp.gt.f32.partialorder %v3470_v42, -1e+29  ;;  %v1812_v47 = vsel %vm1780_vm11, 1, %v3810_v16  ;;  %vm1788_vm13 = vcmp.gt.f32.partialorder %v3219_v31, -1e+29 }
 0x81c   : > { %v1835_v24 = vsel %vm1803_vm12, 1, %v3810_v16  ;;  %vm1781_vm14 = vcmp.gt.f32.partialorder %v3086_v27, -1e+29  ;;  %v1820_v56 = vsel %vm1788_vm13, 1, %v3810_v16  ;;  %vm1782_vm15 = vcmp.gt.f32.partialorder %v3100_v41, -1e+29 }
 0x81d   : > { %v1813_v30 = vsel %vm1781_vm14, 1, %v3810_v16  ;;  %vm1789_vm1 = vcmp.gt.f32.partialorder %v3217_v15, -1e+29  ;;  %v1814_v42 = vsel %vm1782_vm15, 1, %v3810_v16  ;;  %vm1790_vm3 = vcmp.gt.f32.partialorder %v3231_v45, -1e+29 }
 0x81e   : > { %v1821_v31 = vsel %vm1789_vm1, 1, %v3810_v16  ;;  %vm1783_vm4 = vcmp.gt.f32.partialorder %v3098_v36, -1e+29  ;;  %v1822_v27 = vsel %vm1790_vm3, 1, %v3810_v16  ;;  %vm1796_vm5 = vcmp.gt.f32.partialorder %v3359_v25, -1e+29 }
 0x81f   : > { %v1815_v41 = vsel %vm1783_vm4, 1, %v3810_v16  ;;  %vm1791_vm6 = vcmp.gt.f32.partialorder %v3229_v28, -1e+29  ;;  %v1828_v15 = vsel %vm1796_vm5, 1, %v3810_v16  ;;  %vm1798_vm7 = vcmp.gt.f32.partialorder %v3371_v44, -1e+29 }
 0x820   : > { %v1823_v45 = vsel %vm1791_vm6, 1, %v3810_v16  ;;  %vm1797_vm8 = vcmp.gt.f32.partialorder %v3357_v21, -1e+29  ;;  %v1830_v36 = vsel %vm1798_vm7, 1, %v3810_v16  ;;  %vm1804_vm9 = vcmp.gt.f32.partialorder %v3482_v8, -1e+29 }
 0x821   : > { %v1829_v25 = vsel %vm1797_vm8, 1, %v3810_v16  ;;  %v3811_v63 = vld [vmem:[#allocation10_spill] sm:$0xff]  ;;  %v1836_v28 = vsel %vm1804_vm9, 1, %v3810_v16  ;;  %vm1806_vm11 = vcmp.gt.f32.partialorder %v3492_v52, -1e+29  ;;  %v1353_v43 = vcvt.f32.s32 %v3526_v35 }
 0x822   : > { %vm1799_vm10 = vcmp.gt.f32.partialorder %v3811_v63, -1e+29  ;;  %vm1805_vm12 = vcmp.gt.f32.partialorder %v3480_v33, -1e+29  ;;  %v1838_v21 = vsel %vm1806_vm11, 1, %v3810_v16  ;;  %v1323_v33 = vcvt.f32.s32 %v3517_v32 }
 0x823   : > { %v1831_v49 = vsel %vm1799_vm10, 1, %v3810_v16  ;;  %v1837_v44 = vsel %vm1805_vm12, 1, %v3810_v16  ;;  %vm1807_vm13 = vcmp.gt.f32.partialorder %v3490_v17, -1e+29  ;;  %v1369_v29 = vshll.u32 %v1368_v48, 16 }
 0x824   : > { %v1839_v8 = vsel %vm1807_vm13, 1, %v3810_v16  ;;  %v1324_v58 = vshll.u32 %v1323_v33, 16  ;;  %v1398_v9 = vcvt.f32.s32 %v3530_v51  ;;  %v1354_v16 = vshll.u32 %v1353_v43, 16  ;;  %v3818_v43 = vld [vmem:[#allocation4_spill] sm:$0xff] }
 0x825   : > { %v1413_v51 = vcvt.f32.s32 %v3538_v55 }
 0x826   : > { %v1399_v35 = vshll.u32 %v1398_v9, 16  ;;  %v3819_v9 = vld [vmem:[#allocation13_spill] sm:$0xff] }
 0x82b   : > { %1844 = vperm.xlu1 %2744, %v1809_v60  }
 0x82f   : > { %1865 = vperm.xlu1 %2744, %v1816_v10   ;;  %1841 = vperm.xlu0 %2743, %v1808_v34  }
 0x833   : > { %1847 = vperm.xlu1 %2744, %v1810_v37   ;;  %1868 = vperm.xlu0 %2743, %v1817_v5   ;;  %v1384_v5 = vshll.u32 %v1383_v19, 16 }
 0x837   : > { %1871 = vperm.xlu1 %2744, %v1818_v22   ;;  %1850 = vperm.xlu0 %2743, %v1811_v14   ;;  %v1428_v22 = vcvt.f32.s32 %v3536_v13  ;;  %v1414_v13 = vshll.u32 %v1413_v51, 16 }
 0x83b   : > { %1889 = vperm.xlu1 %2744, %v1824_v11   ;;  %1874 = vperm.xlu0 %2743, %v1819_v61  }
 0x83f   : > { %1895 = vperm.xlu1 %2744, %v1826_v23   ;;  %1892 = vperm.xlu0 %2743, %v1825_v7  }
 0x843   : > { %1913 = vperm.xlu1 %2744, %v1832_v2   ;;  %1898 = vperm.xlu0 %2743, %v1827_v1  }
 0x847   : > { %1919 = vperm.xlu1 %2744, %v1834_v54   ;;  %1916 = vperm.xlu0 %2743, %v1833_v26   ;;  %v1429_v54 = vshll.u32 %v1428_v22, 16 }
 0x84b   : > { %1853 = vperm.xlu1 %2744, %v1812_v47   ;;  %1922 = vperm.xlu0 %2743, %v1835_v24  }
 0x84f   : > { %1877 = vperm.xlu1 %2744, %v1820_v56   ;;  %1856 = vperm.xlu0 %2743, %v1813_v30  }
 0x853   : > { %1859 = vperm.xlu1 %2744, %v1814_v42   ;;  %1880 = vperm.xlu0 %2743, %v1821_v31  }
 0x857   : > { %1883 = vperm.xlu1 %2744, %v1822_v27   ;;  %1862 = vperm.xlu0 %2743, %v1815_v41  }
 0x85b   : > { %1901 = vperm.xlu1 %2744, %v1828_v15   ;;  %1886 = vperm.xlu0 %2743, %v1823_v45  }
 0x85f   : > { %1907 = vperm.xlu1 %2744, %v1830_v36   ;;  %1904 = vperm.xlu0 %2743, %v1829_v25   ;;  %v3812_v25 = vld [vmem:[#allocation12_spill] sm:$0xff] }
 0x863   : > { %1925 = vperm.xlu1 %2744, %v1836_v28   ;;  %1910 = vperm.xlu0 %2743, %v1831_v49   ;;  %v3813_v28 = vld [vmem:[#allocation3_spill] sm:$0xff] }
 0x867   : > { %1931 = vperm.xlu1 %2744, %v1838_v21   ;;  %1928 = vperm.xlu0 %2743, %v1837_v44  }
 0x86b   : > { %1934 = vperm.xlu0 %2743, %v1839_v8   ;;  %v3814_v8 = vld [vmem:[#allocation2_spill] sm:$0xff] }
 0x897   : > { %v1321_v52 = vpop.xlane.xlu0 %1320 }
 0x898   : > { %v1322_v0 = vcvt.f32.s32 %v1321_v52 }
 0x899   : > { %v1336_v17 = vpop.xlane.xlu1 %1335 }
 0x89a   : > { %v1325_v20 = vadd.s32 %v1324_v58, %v1322_v0  ;;  %v1337_v59 = vcvt.f32.s32 %v1336_v17  ;;  %v3817_v17 = vld [vmem:[#allocation14_spill] sm:$0xff] }
 0x89c   : > { %vm1431_vm14 = vcmp.eq.s32.totalorder %v3060_v4, %v1325_v20  ;;  %v1340_v32 = vadd.s32 %v1339_v3, %v1337_v59 }
 0x89d   : > { %v2474_v57 = vsel %vm1431_vm14, 1.0, %v3795_v6  ;;  %v1351_v38 = vpop.xlane.xlu0 %1350 }
 0x89e   : > { %2657 = vmatprep.mubr.msk.f32.mxu1 %vm670_vm2, %v2474_v57  ;;  %v1366_v39 = vpop.xlane.xlu1 %1365  ;;  %vm1432_vm15 = vcmp.eq.s32.totalorder %v3060_v4, %v1340_v32  ;;  %v1352_v10 = vcvt.f32.s32 %v1351_v38 }
 0x89f   : > { %v1367_v60 = vcvt.f32.s32 %v1366_v39  ;;  %v2475_v46 = vsel %vm1432_vm15, 1.0, %v3795_v6 }
 0x8a0   : > { %2658 = vmatmul.mubr.msk.f32.gmra.mrb[24].mxu1 %vm670_vm2, %v2475_v46  ;;  %v1355_v37 = vadd.s32 %v1354_v16, %v1352_v10 }
 0x8a1   : > { %v1370_v34 = vadd.s32 %v1369_v29, %v1367_v60 }
 0x8a2   : > { %v1381_v14 = vpop.xlane.xlu0 %1380  ;;  %vm1433_vm1 = vcmp.eq.s32.totalorder %v3060_v4, %v1355_v37 }
 0x8a3   : > { %v1396_v62 = vpop.xlane.xlu1 %1395  ;;  %v1382_v61 = vcvt.f32.s32 %v1381_v14  ;;  %vm1434_vm3 = vcmp.eq.s32.totalorder %v3060_v4, %v1370_v34  ;;  %v2476_v23 = vsel %vm1433_vm1, 1.0, %v3795_v6 }
 0x8a4   : > { %v1397_v11 = vcvt.f32.s32 %v1396_v62  ;;  %v2477_v7 = vsel %vm1434_vm3, 1.0, %v3795_v6  ;;  %2660 = vmatprep.mubr.msk.f32.mxu1 %vm670_vm2, %v2476_v23  ;;  %v3821_v23 = vld [vmem:[#allocation7_spill] sm:$0xff] }
 0x8a5   : > { %v1385_v1 = vadd.s32 %v1384_v5, %v1382_v61  ;;  %2661 = vmatmul.mubr.msk.f32.gmra.mrb[26].mxu1 %vm670_vm2, %v2477_v7 }
 0x8a6   : > { %v1400_v2 = vadd.s32 %v1399_v35, %v1397_v11  ;;  %v1411_v55 = vpop.xlane.xlu0 %1410 }
 0x8a7   : > { %v1426_v26 = vpop.xlane.xlu1 %1425  ;;  %v1412_v24 = vcvt.f32.s32 %v1411_v55  ;;  %vm1435_vm4 = vcmp.eq.s32.totalorder %v3060_v4, %v1385_v1  ;;  %v3823_v55 = vld [vmem:[#allocation6_spill] sm:$0xff] }
 0x8a8   : > { %v1427_v47 = vcvt.f32.s32 %v1426_v26  ;;  %vm1436_vm5 = vcmp.eq.s32.totalorder %v3060_v4, %v1400_v2  ;;  %v2478_v56 = vsel %vm1435_vm4, 1.0, %v3795_v6  ;;  %v3822_v2 = vld [vmem:[#allocation16_spill] sm:$0xff] }
 0x8a9   : > { %v2479_v30 = vsel %vm1436_vm5, 1.0, %v3795_v6  ;;  %v1415_v31 = vadd.s32 %v1414_v13, %v1412_v24  ;;  %2663 = vmatprep.mubr.msk.f32.mxu1 %vm670_vm2, %v2478_v56  ;;  %v3824_v24 = vld [vmem:[#allocation15_spill] sm:$0xff] }
 0x8aa   : > { %v1430_v42 = vadd.s32 %v1429_v54, %v1427_v47  ;;  %2664 = vmatmul.mubr.msk.f32.gmra.mrb[28].mxu1 %vm670_vm2, %v2479_v30 }
 0x8ab   : > { %v1845_v27 = vpop.permute.xlu1 %1844  ;;  %vm1437_vm6 = vcmp.eq.s32.totalorder %v3060_v4, %v1415_v31 }
 0x8ac   : > { %vm1438_vm7 = vcmp.eq.s32.totalorder %v3060_v4, %v1430_v42  ;;  %v2480_v41 = vsel %vm1437_vm6, 1.0, %v3795_v6  ;;  %vm1937_vm10 = vcmp.eq.s32.totalorder %v1845_v27, 1  ;;  %v3825_v27 = vld [vmem:[#allocation9_spill] sm:$0xff] }
 0x8ad   : > { %v2481_v15 = vsel %vm1438_vm7, 1.0, %v3795_v6  ;;  %2666 = vmatprep.mubr.msk.f32.mxu1 %vm670_vm2, %v2480_v41  ;;  %v1969_v12 = vsel %vm1937_vm10, %v3814_v8, -1e+30  ;;  %v3815_v6 = vld [vmem:[#allocation11_spill] sm:$0xff] }
 0x8ae   : > { %2667 = vmatmul.mubr.msk.f32.gmra.mrb[30].mxu1 %vm670_vm2, %v2481_v15  ;;  %v1842_v36 = vpop.permute.xlu0 %1841  ;;  %v3826_v15 = vld [vmem:[#allocation18_spill] sm:$0xff] }
 0x8af   : > { %v1866_v45 = vpop.permute.xlu1 %1865  ;;  %vm1936_vm9 = vcmp.eq.s32.totalorder %v1842_v36, 1 }
 0x8b0   : > { %vm1944_vm8 = vcmp.eq.s32.totalorder %v1866_v45, 1  ;;  %v1968_v49 = vsel %vm1936_vm9, %v3813_v28, -1e+30  ;;  %v3827_v28 = vld [vmem:[#allocation8_spill] sm:$0xff] }
 0x8b1   : > { %v1976_v63 = vsel %vm1944_vm8, %v3812_v25, -1e+30 }
 0x8b2   : > { %v2000_v21 = vmax.f32 %v1968_v49, %v1976_v63  ;;  %v1869_v4 = vpop.permute.xlu0 %1868 }
 0x8b3   : > { %v1848_v44 = vpop.permute.xlu1 %1847  ;;  %vm1945_vm11 = vcmp.eq.s32.totalorder %v1869_v4, 1  ;;  %v3829_v4 = vld [vmem:[#allocation17_spill] sm:$0xff] }
 0x8b4   : > { %v1977_v33 = vsel %vm1945_vm11, %v3815_v6, -1e+30  ;;  %vm1938_vm12 = vcmp.eq.s32.totalorder %v1848_v44, 1 }
 0x8b5   : > { %v2001_v52 = vmax.f32 %v1969_v12, %v1977_v33  ;;  %v1970_v20 = vsel %vm1938_vm12, %v3816_v18, -1e+30  ;;  %v3831_v18 = vld [vmem:[#allocation20_spill] sm:$0xff] }
 0x8b6   : > { %v1851_v0 = vpop.permute.xlu0 %1850 }
 0x8b7   : > { %v1872_v58 = vpop.permute.xlu1 %1871  ;;  %vm1939_vm13 = vcmp.eq.s32.totalorder %v1851_v0, 1 }
 0x8b8   : > { %vm1946_vm2 = vcmp.eq.s32.totalorder %v1872_v58, 1  ;;  %v1971_v32 = vsel %vm1939_vm13, %v3818_v43, -1e+30  ;;  %v3830_v58 = vld [vmem:[#allocation23_spill] sm:$0xff] }
 0x8b9   : > { %v1978_v57 = vsel %vm1946_vm2, %v3817_v17, -1e+30 }
 0x8ba   : > { %v2002_v3 = vmax.f32 %v1970_v20, %v1978_v57  ;;  %v1875_v59 = vpop.permute.xlu0 %1874 }
 0x8bb   : > { %v1890_v48 = vpop.permute.xlu1 %1889  ;;  %vm1947_vm15 = vcmp.eq.s32.totalorder %v1875_v59, 1 }
 0x8bc   : > { %vm1952_vm14 = vcmp.eq.s32.totalorder %v1890_v48, 1  ;;  %v1979_v19 = vsel %vm1947_vm15, %v3819_v9, -1e+30  ;;  %v3832_v48 = vld [vmem:[#allocation22_spill] sm:$0xff] }
 0x8bd   : > { %v1984_v29 = vsel %vm1952_vm14, %v3502_v40, -1e+30  ;;  %v2003_v38 = vmax.f32 %v1971_v32, %v1979_v19  ;;  %v3820_v40 = vld [vmem:[#allocation19_spill] sm:$0xff]  ;;  %v2746_v32 = vld [vmem:[%s3778_s4] sm:$0xff]  }
 0x8be   : > { %v3650_v39 = vmax.f32 %v2000_v21, %v1984_v29  ;;  %v1893_v60 = vpop.permute.xlu0 %1892  ;;  %v3828_v21 = vld [vmem:[#allocation21_spill] sm:$0xff]  ;;  %2679 = vmatprep.subr.bf16.mxu0 %v2746_v32 }
 0x8bf   : > { %v1896_v16 = vpop.permute.xlu1 %1895  ;;  %vm1953_vm3 = vcmp.eq.s32.totalorder %v1893_v60, 1 }
 0x8c0   : > { %vm1954_vm1 = vcmp.eq.s32.totalorder %v1896_v16, 1  ;;  %v1985_v46 = vsel %vm1953_vm3, %v3500_v53, -1e+30 }
 0x8c1   : > { %v1986_v10 = vsel %vm1954_vm1, %v3506_v50, -1e+30  ;;  %v3656_v37 = vmax.f32 %v2001_v52, %v1985_v46 }
 0x8c2   : > { %v3654_v34 = vmax.f32 %v2002_v3, %v1986_v10  ;;  %v1899_v5 = vpop.permute.xlu0 %1898  ;;  %v2795_v10 = vld [vmem:[%s2932_s11 + $0x8] sm:$0xff] }
 0x8c3   : > { %v1914_v35 = vpop.permute.xlu1 %1913  ;;  %vm1955_vm4 = vcmp.eq.s32.totalorder %v1899_v5, 1 }
 0x8c4   : > { %v1987_v22 = vsel %vm1955_vm4, %v3820_v40, -1e+30  ;;  %vm1960_vm3 = vcmp.eq.s32.totalorder %v1914_v35, 1  ;;  %v2796_v40 = vld [vmem:[%s2932_s11] sm:$0xff] }
 0x8c5   : > { %v3659_v51 = vmax.f32 %v2003_v38, %v1987_v22 }
 0x8c6   : > { %v1917_v14 = vpop.permute.xlu0 %1916 }
 0x8c7   : > { %v3661_v62 = vpop.permute.xlu1 %1919  ;;  %vm1961_vm1 = vcmp.eq.s32.totalorder %v1917_v14, 1 }
 0x8ca   : > { %v3663_v61 = vpop.permute.xlu0 %1922 }
 0x8cb   : > { %v1854_v11 = vpop.permute.xlu1 %1853  ;;  %vm1963_vm4 = vcmp.eq.s32.totalorder %v3663_v61, 1 }
 0x8cc   : > { %vm1940_vm5 = vcmp.eq.s32.totalorder %v1854_v11, 1 }
 0x8cd   : > { %v1972_v7 = vsel %vm1940_vm5, %v3821_v23, -1e+30  ;;  %vm1962_vm5 = vcmp.eq.s32.totalorder %v3661_v62, 1 }
 0x8ce   : > { %v1857_v53 = vpop.permute.xlu0 %1856 }
 0x8cf   : > { %v1878_v50 = vpop.permute.xlu1 %1877  ;;  %vm1941_vm7 = vcmp.eq.s32.totalorder %v1857_v53, 1 }
 0x8d0   : > { %vm1948_vm6 = vcmp.eq.s32.totalorder %v1878_v50, 1  ;;  %v1973_v47 = vsel %vm1941_vm7, %v3823_v55, -1e+30 }
 0x8d1   : > { %v1980_v1 = vsel %vm1948_vm6, %v3822_v2, -1e+30 }
 0x8d2   : > { %v2004_v54 = vmax.f32 %v1972_v7, %v1980_v1  ;;  %v1881_v26 = vpop.permute.xlu0 %1880  ;;  %v2797_v7 = vld [vmem:[%s2932_s11 + $0x18] sm:$0xff] }
 0x8d3   : > { %v1860_v13 = vpop.permute.xlu1 %1859  ;;  %vm1949_vm8 = vcmp.eq.s32.totalorder %v1881_v26, 1 }
 0x8d4   : > { %v1981_v56 = vsel %vm1949_vm8, %v3824_v24, -1e+30  ;;  %vm1942_vm9 = vcmp.eq.s32.totalorder %v1860_v13, 1 }
 0x8d5   : > { %v2005_v30 = vmax.f32 %v1973_v47, %v1981_v56  ;;  %v1974_v41 = vsel %vm1942_vm9, %v3825_v27, -1e+30 }
 0x8d6   : > { %v1863_v31 = vpop.permute.xlu0 %1862 }
 0x8d7   : > { %v1884_v42 = vpop.permute.xlu1 %1883  ;;  %vm1943_vm11 = vcmp.eq.s32.totalorder %v1863_v31, 1  ;;  %v2800_v31 = vld [vmem:[%s2932_s11 + $0x20] sm:$0xff] }
 0x8d8   : > { %vm1950_vm10 = vcmp.eq.s32.totalorder %v1884_v42, 1  ;;  %v1975_v49 = vsel %vm1943_vm11, %v3827_v28, -1e+30  ;;  %v2801_v28 = vld [vmem:[%s2932_s11 + $0x38] sm:$0xff] }
 0x8d9   : > { %v1982_v45 = vsel %vm1950_vm10, %v3826_v15, -1e+30 }
 0x8da   : > { %v2006_v36 = vmax.f32 %v1974_v41, %v1982_v45  ;;  %v1887_v63 = vpop.permute.xlu0 %1886 }
 0x8db   : > { %v1902_v25 = vpop.permute.xlu1 %1901  ;;  %vm1951_vm2 = vcmp.eq.s32.totalorder %v1887_v63, 1 }
 0x8dc   : > { %vm1956_vm12 = vcmp.eq.s32.totalorder %v1902_v25, 1  ;;  %v1983_v8 = vsel %vm1951_vm2, %v3829_v4, -1e+30  ;;  %v2036_v4 = vpack.c.bf16 %v2795_v10, %v2796_v40 }
 0x8dd   : > { %v1988_v44 = vsel %vm1956_vm12, %v3828_v21, -1e+30  ;;  %v2007_v6 = vmax.f32 %v1975_v49, %v1983_v8  ;;  %v2802_v21 = vld [vmem:[%s2932_s11 + $0x30] sm:$0xff] }
 0x8de   : > { %v2012_v12 = vmax.f32 %v2004_v54, %v1988_v44  ;;  %v1905_v52 = vpop.permute.xlu0 %1904  ;;  %v2798_v54 = vld [vmem:[%s2932_s11 + $0x10] sm:$0xff] }
 0x8df   : > { %v1908_v33 = vpop.permute.xlu1 %1907  ;;  %vm1957_vm14 = vcmp.eq.s32.totalorder %v1905_v52, 1  ;;  %v2524_v52 = vld [vmem:[%s3780_s6] ss:$0 sm:$0xff] }
 0x8e0   : > { %vm1958_vm13 = vcmp.eq.s32.totalorder %v1908_v33, 1  ;;  %v1989_v20 = vsel %vm1957_vm14, %v3831_v18, -1e+30  ;;  %v2039_v33 = vpack.c.bf16 %v2801_v28, %v2802_v21 }
 0x8e1   : > { %v1990_v0 = vsel %vm1958_vm13, %v3830_v58, -1e+30  ;;  %v2013_v57 = vmax.f32 %v2005_v30, %v1989_v20 }
 0x8e2   : > { %v3676_v17 = vmax.f32 %v2006_v36, %v1990_v0  ;;  %v1911_v3 = vpop.permute.xlu0 %1910 }
 0x8e3   : > { %vm1959_vm15 = vcmp.eq.s32.totalorder %v1911_v3, 1  ;;  %v1926_v11 = vpop.permute.xlu1 %1925 }
 0x8e4   : > { %v1991_v59 = vsel %vm1959_vm15, %v3832_v48, -1e+30  ;;  %vm1964_vm7 = vcmp.eq.s32.totalorder %v1926_v11, 1 }
 0x8e5   : > { %v2015_v43 = vmax.f32 %v2007_v6, %v1991_v59 }
 0x8e6   : > { %v1929_v5 = vpop.permute.xlu0 %1928 }
 0x8e7   : > { %vm1965_vm6 = vcmp.eq.s32.totalorder %v1929_v5, 1  ;;  %v1932_v55 = vpop.permute.xlu1 %1931 }
 0x8e8   : > { %vm1966_vm9 = vcmp.eq.s32.totalorder %v1932_v55, 1 }
 0x8ea   : > { %v1935_v1 = vpop.permute.xlu0 %1934 }
 0x8eb   : > { %vm1967_vm8 = vcmp.eq.s32.totalorder %v1935_v1, 1 }
 0x973   : > { %v2659_v29 = vpop.f32.mrb[24].mxu1 }
 0x974   : > { %v1993_v9 = vsel %vm1961_vm1, %v2659_v29, -1e+30  ;;  %v1737_v19 = vpop.f32.mrb[25].mxu1 }
 0x975   : > { %v2017_v38 = vmax.f32 %v3656_v37, %v1993_v9  ;;  %v1992_v16 = vsel %vm1960_vm3, %v1737_v19, -1e+30 }
 0x976   : > { %v2016_v60 = vmax.f32 %v3650_v39, %v1992_v16 }
 0x977   : > { %v2025_v46 = vsub.f32 %v2017_v38, %v2795_v10 }
 0x978   : > { %v2024_v22 = vsub.f32 %v2016_v60, %v2796_v40  ;;  %v2662_v14 = vpop.f32.mrb[26].mxu1 }
 0x979   : > { %v1995_v50 = vsel %vm1963_vm4, %v2662_v14, -1e+30  ;;  %v1747_v53 = vpop.f32.mrb[27].mxu1 }
 0x97a   : > { %v2032_v35 = vpack.c.bf16 %v2025_v46, %v2024_v22  ;;  %v2019_v37 = vmax.f32 %v3659_v51, %v1995_v50  ;;  %v1994_v23 = vsel %vm1962_vm5, %v1747_v53, -1e+30 }
 0x97b   : > { %v2018_v39 = vmax.f32 %v3654_v34, %v1994_v23  ;;  %v2799_v34 = vld [vmem:[%s2932_s11 + $0x28] sm:$0xff] }
 0x97c   : > { %2671 = vmatprep.mubr.msk.bf16.mxu0 %vm413_vm0, %v2032_v35  ;;  %v2027_v2 = vsub.f32 %v2019_v37, %v2797_v7  ;;  %v2038_v6 = vpack.c.bf16 %v2799_v34, %v2800_v31 }
 0x97d   : > { %v2665_v61 = vpop.f32.mrb[28].mxu1  ;;  %v2026_v62 = vsub.f32 %v2018_v39, %v2798_v54 }
 0x97e   : > { %v1997_v13 = vsel %vm1965_vm6, %v2665_v61, -1e+30  ;;  %v1757_v26 = vpop.f32.mrb[29].mxu1 }
 0x97f   : > { %v2021_v47 = vmax.f32 %v2013_v57, %v1997_v13  ;;  %v1996_v51 = vsel %vm1964_vm7, %v1757_v26, -1e+30  ;;  %v2033_v24 = vpack.c.bf16 %v2027_v2, %v2026_v62 }
 0x980   : > { %v2020_v56 = vmax.f32 %v2012_v12, %v1996_v51  ;;  %v2037_v12 = vpack.c.bf16 %v2797_v7, %v2798_v54 }
 0x981   : > { %v2029_v30 = vsub.f32 %v2021_v47, %v2799_v34  ;;  %v2668_v42 = vpop.f32.mrb[30].mxu1  ;;  %2672 = vmatmul.mubr.msk.bf16.vlgmr.msra.gmra.mrb[8].mxu0 %vm413_vm0, %v2033_v24 }
 0x982   : > { %v2028_v27 = vsub.f32 %v2020_v56, %v2800_v31  ;;  %v1999_v41 = vsel %vm1967_vm8, %v2668_v42, -1e+30  ;;  %v1767_v15 = vpop.f32.mrb[31].mxu1  ;;  %2680 = vmatpush3.bf16.msra.mxu0 %v2746_v32 }
 0x983   : > { %v2023_v45 = vmax.f32 %v2015_v43, %v1999_v41  ;;  %v1998_v36 = vsel %vm1966_vm9, %v1767_v15, -1e+30 }
 0x984   : > { %v2034_v25 = vpack.c.bf16 %v2029_v30, %v2028_v27  ;;  %v2022_v63 = vmax.f32 %v3676_v17, %v1998_v36 }
 0x985   : > { %v2031_v49 = vsub.f32 %v2023_v45, %v2801_v28 }
 0x986   : > { %v2030_v44 = vsub.f32 %v2022_v63, %v2802_v21  ;;  %2675 = vmatprep.mubr.msk.bf16.mxu0 %vm413_vm0, %v2034_v25 }
 0x988   : > { %v2035_v8 = vpack.c.bf16 %v2031_v49, %v2030_v44 }
 0x98a   : > { %2676 = vmatmul.mubr.msk.bf16.gmra.mrb[12].mxu0 %vm413_vm0, %v2035_v8 }
 0x98b   : > { %2681 = vmatprep.mubr.msk.bf16.mxu0 %vm413_vm0, %v2036_v4 }
 0x992   : > { %2682 = vmatmul.mubr.msk.bf16.vlgmr.msra.gmra.mrb[8].mxu0 %vm413_vm0, %v2037_v12 }
 0x993   : > { %2685 = vmatprep.mubr.msk.bf16.mxu0 %vm413_vm0, %v2038_v6 }
 0x99a   : > { %2686 = vmatmul.mubr.msk.bf16.gmra.mrb[12].mxu0 %vm413_vm0, %v2039_v33  ;;  %vm2297_vm0 = vcmask 261120  }
 0xa65   : > { %v2683_v58 = vpop.f32.mrb[8].mxu0 }
 0xa66   : > { %v2219_v0 = vadd.f32 %v2683_v58, %v2524_v52  ;;  %v2179_v18 = vpop.f32.mrb[9].mxu0 }
 0xa67   : > { %v3708_v20 = vadd.f32 %v2524_v52, %v2179_v18  ;;  %v2684_v17 = vpop.f32.mrb[10].mxu0 }
 0xa68   : > { %v2235_v57 = vmul.f32 0.044715, %v2219_v0  ;;  %v3710_v3 = vadd.f32 %v2684_v17, %v2524_v52  ;;  %v2182_v48 = vpop.f32.mrb[11].mxu0  ;;  %v2227_v44 = vmul.f32 0.5, %v2219_v0 }
 0xa69   : > { %v2233_v59 = vmul.f32 0.044715, %v3708_v20  ;;  %v3713_v43 = vadd.f32 %v2524_v52, %v2182_v48  ;;  %v2225_v6 = vmul.f32 0.5, %v3708_v20 }
 0xa6a   : > { %v2243_v32 = vmul.f32 %v2235_v57, %v2219_v0  ;;  %v2236_v29 = vmul.f32 0.044715, %v3710_v3 }
 0xa6b   : > { %v2241_v9 = vmul.f32 %v2233_v59, %v3708_v20  ;;  %v2234_v19 = vmul.f32 0.044715, %v3713_v43  ;;  %v2226_v57 = vmul.f32 0.5, %v3713_v43 }
 0xa6c   : > { %v2251_v38 = vmul.f32 %v2243_v32, %v2219_v0  ;;  %v2244_v16 = vmul.f32 %v2236_v29, %v3710_v3 }
 0xa6d   : > { %v2249_v60 = vmul.f32 %v2241_v9, %v3708_v20  ;;  %v2242_v10 = vmul.f32 %v2234_v19, %v3713_v43  ;;  %v2687_v46 = vpop.f32.mrb[12].mxu0 }
 0xa6e   : > { %v2259_v5 = vadd.f32 %v2251_v38, %v2219_v0  ;;  %v2252_v40 = vmul.f32 %v2244_v16, %v3710_v3  ;;  %v3722_v22 = vadd.f32 %v2687_v46, %v2524_v52  ;;  %v2195_v11 = vpop.f32.mrb[13].mxu0  ;;  %v2228_v0 = vmul.f32 0.5, %v3710_v3 }
 0xa6f   : > { %v2257_v14 = vadd.f32 %v2249_v60, %v3708_v20  ;;  %v2250_v35 = vmul.f32 %v2242_v10, %v3713_v43  ;;  %v3726_v50 = vadd.f32 %v2524_v52, %v2195_v11  ;;  %v2688_v53 = vpop.f32.mrb[14].mxu0 }
 0xa70   : > { %v2267_v37 = vmul.f32 0.7978846, %v2259_v5  ;;  %v2260_v23 = vadd.f32 %v2252_v40, %v3710_v3  ;;  %v2239_v39 = vmul.f32 0.044715, %v3722_v22  ;;  %v2198_v7 = vpop.f32.mrb[15].mxu0  ;;  %v2224_v13 = vadd.f32 %v2688_v53, %v2524_v52 }
 0xa71   : > { %v2265_v2 = vmul.f32 0.7978846, %v2257_v14  ;;  %v2258_v61 = vadd.f32 %v2250_v35, %v3713_v43  ;;  %v2237_v1 = vmul.f32 0.044715, %v3726_v50  ;;  %v2222_v47 = vadd.f32 %v2524_v52, %v2198_v7 }
 0xa72   : > { %2779 = vtanh.f32 %v2267_v37  ;;  %v2268_v54 = vmul.f32 0.7978846, %v2260_v23  ;;  %v2247_v62 = vmul.f32 %v2239_v39, %v3722_v22  ;;  %v2240_v24 = vmul.f32 0.044715, %v2224_v13 }
 0xa73   : > { %2781 = vtanh.f32 %v2265_v2  ;;  %v2266_v26 = vmul.f32 0.7978846, %v2258_v61  ;;  %v2245_v55 = vmul.f32 %v2237_v1, %v3726_v50  ;;  %v2238_v34 = vmul.f32 0.044715, %v2222_v47 }
 0xa74   : > { %2783 = vtanh.f32 %v2268_v54  ;;  %v2255_v51 = vmul.f32 %v2247_v62, %v3722_v22  ;;  %v2248_v42 = vmul.f32 %v2240_v24, %v2224_v13  ;;  %v2231_v29 = vmul.f32 0.5, %v3722_v22 }
 0xa75   : > { %2785 = vtanh.f32 %v2266_v26  ;;  %v2253_v56 = vmul.f32 %v2245_v55, %v3726_v50  ;;  %v2246_v27 = vmul.f32 %v2238_v34, %v2222_v47  ;;  %v2229_v43 = vmul.f32 0.5, %v3726_v50 }
 0xa76   : > { %v2263_v30 = vadd.f32 %v2255_v51, %v3722_v22  ;;  %v2256_v15 = vmul.f32 %v2248_v42, %v2224_v13  ;;  %v2232_v46 = vmul.f32 0.5, %v2224_v13  ;;  %v2230_v40 = vmul.f32 0.5, %v2222_v47 }
 0xa77   : > { %v2261_v31 = vadd.f32 %v2253_v56, %v3726_v50  ;;  %v2254_v36 = vmul.f32 %v2246_v27, %v2222_v47 }
 0xa78   : > { %v2271_v41 = vmul.f32 0.7978846, %v2263_v30  ;;  %v2264_v25 = vadd.f32 %v2256_v15, %v2224_v13 }
 0xa79   : > { %v2269_v45 = vmul.f32 0.7978846, %v2261_v31  ;;  %v2262_v63 = vadd.f32 %v2254_v36, %v2222_v47 }
 0xa7a   : > { %2787 = vtanh.f32 %v2271_v41  ;;  %v2272_v49 = vmul.f32 0.7978846, %v2264_v25 }
 0xa7b   : > { %2789 = vtanh.f32 %v2269_v45  ;;  %v2270_v8 = vmul.f32 0.7978846, %v2262_v63 }
 0xa7c   : > { %v2780_v28 = vpop.eup %2779  ;;  %2791 = vtanh.f32 %v2272_v49 }
 0xa7d   : > { %v2782_v21 = vpop.eup %2781  ;;  %v2283_v4 = vadd.f32 1.0, %v2780_v28  ;;  %2793 = vtanh.f32 %v2270_v8 }
 0xa7e   : > { %v2784_v12 = vpop.eup %2783  ;;  %v2281_v33 = vadd.f32 1.0, %v2782_v21 }
 0xa7f   : > { %v2786_v52 = vpop.eup %2785  ;;  %v2291_v58 = vmul.f32 %v2283_v4, %v2227_v44  ;;  %v2284_v18 = vadd.f32 1.0, %v2784_v12 }
 0xa80   : > { %v2289_v17 = vmul.f32 %v2281_v33, %v2225_v6  ;;  %v2282_v48 = vadd.f32 1.0, %v2786_v52 }
 0xa81   : > { %2300 = vst.msk [vmem:[%s3742_s30 + $0x10] sm:$0xff] %vm2297_vm0, %v2291_v58  ;;  %v2292_v59 = vmul.f32 %v2284_v18, %v2228_v0 }
 0xa82   : > { %2298 = vst.msk [vmem:[%s3742_s30] sm:$0xff] %vm2297_vm0, %v2289_v17  ;;  %v2290_v20 = vmul.f32 %v2282_v48, %v2226_v57 }
 0xa83   : > { %2301 = vst.msk [vmem:[%s3742_s30 + $0x18] sm:$0xff] %vm2297_vm0, %v2292_v59 }
 0xa84   : > { %v2788_v32 = vpop.eup %2787  ;;  %2299 = vst.msk [vmem:[%s3742_s30 + $0x8] sm:$0xff] %vm2297_vm0, %v2290_v20 }
 0xa85   : > { %v2790_v3 = vpop.eup %2789  ;;  %v2287_v9 = vadd.f32 1.0, %v2788_v32 }
 0xa86   : > { %v2285_v19 = vadd.f32 1.0, %v2790_v3  ;;  %v2792_v16 = vpop.eup %2791 }
 0xa87   : > { %v2295_v38 = vmul.f32 %v2287_v9, %v2231_v29  ;;  %v2794_v10 = vpop.eup %2793  ;;  %v2288_v5 = vadd.f32 1.0, %v2792_v16 }
 0xa88   : > { %v2293_v60 = vmul.f32 %v2285_v19, %v2229_v43  ;;  %v2286_v11 = vadd.f32 1.0, %v2794_v10 }
 0xa89   : > { %2304 = vst.msk [vmem:[%s3742_s30 + $0x30] sm:$0xff] %vm2297_vm0, %v2295_v38  ;;  %v2296_v14 = vmul.f32 %v2288_v5, %v2232_v46 }
 0xa8a   : > { %2302 = vst.msk [vmem:[%s3742_s30 + $0x20] sm:$0xff] %vm2297_vm0, %v2293_v60  ;;  %v2294_v22 = vmul.f32 %v2286_v11, %v2230_v40 }
 0xa8b   : > { %2305 = vst.msk [vmem:[%s3742_s30 + $0x38] sm:$0xff] %vm2297_vm0, %v2296_v14 }
 0xa8c   : > { %2303 = vst.msk [vmem:[%s3742_s30 + $0x28] sm:$0xff] %vm2297_vm0, %v2294_v22 }
 0xa8d PF: > { %s17_s26 = sadd.s32 1, %s2825_s26   ;;  %s3833_s24 = smov %s2821_s25 }
 0xa8e   : > { %p14_p5 = scmp.ge.s32.totalorder %s17_s26, 4   ;;  %s3834_s25 = smov %s3836_s27 }
 0xa90   :  { %16 = sbr.rel (!%p14_p5) target bundleno = 2 (0x2), region = 87 }

</bundles_post_ra>
